<compile_context>
chip_gen: v7x
topology: tpu7x:2x2x1
jax: 0.10.0
libtpu: 0.0.40
codegen_flags: <defaults>
</compile_context>

<pallas_src>
import functools

import jax
import jax.numpy as jnp
from jax.experimental import pallas as pl
from jax.experimental.pallas import tpu as pltpu

CIN_PAD = 16      # initial conv Cin padded 10 -> 16 (bf16-friendly K per tap)
C = 64            # trunk channels
COUT_PAD = 128    # final conv Cout padded 3 -> 128 (lane-dense stores)
N_BLOCKS = 4


def _margin(d):
    """Zero rows above/below the flat raster image: >= d+1 (vertical halo of
    the 3x3 conv in raster space) and a multiple of 8 so the interior
    activation store is sublane-aligned."""
    return ((d + 1 + 7) // 8) * 8


# ------------------------------ fused kernel ------------------------------- #

def _make_fused_kernel(d):
    Wd = d
    HW = d * d
    MARGIN = _margin(d)
    # slice start for tap (dy, dx) in the zero-margined raster buffer
    ROW_OFF = MARGIN - Wd - 1

    def kernel(x_ref, iw_ref, ib_ref, bw_ref, bb_ref, fw_ref, fb_ref,
               o_ref, buf_ref):
        # Column-wrap masks: taps reading the x-1 / x+1 neighbour must not
        # pick up the previous/next raster row's edge pixel.
        col = jax.lax.broadcasted_iota(jnp.int32, (HW, 1), 0) % Wd
        not_left = col != 0
        not_right = col != (Wd - 1)

        def masked(slab, dx):
            if dx == 0:
                return jnp.where(not_left, slab, jnp.zeros_like(slab))
            if dx == 2:
                return jnp.where(not_right, slab, jnp.zeros_like(slab))
            return slab

        def conv3x3(read_tap, get_w, bias):
            # 9 accumulating MXU matmuls (bf16 in, f32 accumulate) + bias.
            acc = None
            for dy in range(3):
                for dx in range(3):
                    s = masked(read_tap(dy, dx), dx)
                    p = jnp.dot(s, get_w(dy * 3 + dx),
                                preferred_element_type=jnp.float32)
                    acc = p if acc is None else acc + p
            return acc + bias

        def x_tap(dy, dx):          # initial-conv taps straight from the input
            start = ROW_OFF + dy * Wd + dx
            return x_ref[0, start:start + HW, :]

        def buf_tap(dy, dx):        # trunk taps from the VMEM activation buffer
            start = ROW_OFF + dy * Wd + dx
            return buf_ref[start:start + HW, :]

        def write_act(a):           # store activation into the padded buffer
            buf_ref[MARGIN:MARGIN + HW, :] = a.astype(jnp.bfloat16)

        # Zero the buffer once per grid step; only the interior rows are ever
        # overwritten below, so the margins supply the vertical zero padding.
        buf_ref[...] = jnp.zeros(buf_ref.shape, buf_ref.dtype)

        # ---- initial conv + folded BN + ReLU ----
        h = conv3x3(x_tap,
                    lambda t: iw_ref[t * CIN_PAD:(t + 1) * CIN_PAD, :],
                    ib_ref[...])
        h = jnp.maximum(h, 0.0)
        write_act(h)

        # ---- 4 residual blocks: conv-BN-ReLU, conv-BN, +residual, ReLU ----
        for blk in range(N_BLOCKS):
            i1, i2 = 2 * blk, 2 * blk + 1
            a1 = conv3x3(buf_tap,
                         lambda t, i=i1: bw_ref[i, t * C:(t + 1) * C, :],
                         bb_ref[i1])
            write_act(jnp.maximum(a1, 0.0))
            a2 = conv3x3(buf_tap,
                         lambda t, i=i2: bw_ref[i, t * C:(t + 1) * C, :],
                         bb_ref[i2])
            h = jnp.maximum(a2 + h, 0.0)       # residual add + ReLU in f32
            write_act(h)

        # ---- final conv (bias, no BN/ReLU); Cout padded to 128 lanes ----
        out = conv3x3(buf_tap,
                      lambda t: fw_ref[t * C:(t + 1) * C, :],
                      fb_ref[...])
        o_ref[0] = out

    return kernel


def cnn_fused_call(xpad, params, *, d):
    """xpad: (B, HW + 2*MARGIN, CIN_PAD) bf16 (zero row margins, zero-padded
    channels).  Returns (B, HW, COUT_PAD) f32."""
    B, rows, _ = xpad.shape
    HW = d * d
    grid_spec = pltpu.PrefetchScalarGridSpec(
        num_scalar_prefetch=0,
        grid=(B,),
        in_specs=[
            pl.BlockSpec((1, rows, CIN_PAD), lambda b: (b, 0, 0)),
            pl.BlockSpec((9 * CIN_PAD, C), lambda b: (0, 0)),       # init W
            pl.BlockSpec((1, C), lambda b: (0, 0)),                 # init shift
            pl.BlockSpec((2 * N_BLOCKS, 9 * C, C), lambda b: (0, 0, 0)),
            pl.BlockSpec((2 * N_BLOCKS, 1, C), lambda b: (0, 0, 0)),
            pl.BlockSpec((9 * C, COUT_PAD), lambda b: (0, 0)),      # final W
            pl.BlockSpec((1, COUT_PAD), lambda b: (0, 0)),          # final bias
        ],
        out_specs=pl.BlockSpec((1, HW, COUT_PAD), lambda b: (b, 0, 0)),
        scratch_shapes=[pltpu.VMEM((rows, C), jnp.bfloat16)],
    )
    return pl.pallas_call(
        _make_fused_kernel(d),
        out_shape=jax.ShapeDtypeStruct((B, HW, COUT_PAD), jnp.float32),
        grid_spec=grid_spec,
        compiler_params=pltpu.CompilerParams(
            dimension_semantics=("parallel",),     # shards batch over 2 TCs on v7x
            vmem_limit_bytes=32 * 1024 * 1024,
        ),
    )(xpad, params["init_w"], params["init_b"],
      params["blk_w"], params["blk_b"],
      params["fin_w"], params["fin_b"])


# --------------------------- parameters (synthetic) ------------------------ #

def init_params(key, d):
    """Deterministic synthetic parameters matching CNNNet.__init__, with the
    eval-mode BatchNorm scale folded into the (bf16) conv weights.

    NOTE: weights are stored tap-major (ky, kx, Cin, Cout) -> (9*Cin, Cout);
    importing real PyTorch weights requires permuting (Cout,Cin,ky,kx) first.
    """
    del d  # parameter shapes don't depend on spatial size

    def folded_conv_bn(kw, kbn, cin, cout, cin_pad=None):
        cin_pad = cin if cin_pad is None else cin_pad
        w = jax.random.normal(kw, (3, 3, cin, cout), jnp.float32)
        w = w / jnp.sqrt(9.0 * cin)
        k1, k2, k3, k4 = jax.random.split(kbn, 4)
        gamma = 1.0 + 0.1 * jax.random.normal(k1, (cout,), jnp.float32)
        beta = 0.1 * jax.random.normal(k2, (cout,), jnp.float32)
        mean = 0.1 * jax.random.normal(k3, (cout,), jnp.float32)
        var = 0.5 + jnp.abs(jax.random.normal(k4, (cout,), jnp.float32))
        scale = gamma * jax.lax.rsqrt(var + 1e-5)
        shift = beta - mean * scale
        w = w * scale                                   # fold BN scale (eval mode)
        if cin_pad != cin:
            w = jnp.pad(w, ((0, 0), (0, 0), (0, cin_pad - cin), (0, 0)))
        w2d = w.reshape(9 * cin_pad, cout).astype(jnp.bfloat16)
        return w2d, shift.reshape(1, cout).astype(jnp.float32)

    keys = iter(jax.random.split(key, 32))
    params = {}
    params["init_w"], params["init_b"] = folded_conv_bn(
        next(keys), next(keys), 10, C, cin_pad=CIN_PAD)           # (144, 64)

    blk_w, blk_b = [], []
    for _ in range(N_BLOCKS):
        w1, b1 = folded_conv_bn(next(keys), next(keys), C, C)
        w2, b2 = folded_conv_bn(next(keys), next(keys), C, C)
        blk_w += [w1, w2]
        blk_b += [b1, b2]
    params["blk_w"] = jnp.stack(blk_w)                            # (8, 576, 64) bf16
    params["blk_b"] = jnp.stack(blk_b)                            # (8, 1, 64) f32

    wf = jax.random.normal(next(keys), (3, 3, C, 3), jnp.float32)
    wf = wf / jnp.sqrt(9.0 * C)
    wf = jnp.pad(wf, ((0, 0), (0, 0), (0, 0), (0, COUT_PAD - 3)))
    params["fin_w"] = wf.reshape(9 * C, COUT_PAD).astype(jnp.bfloat16)  # (576, 128)
    bias3 = 0.1 * jax.random.normal(next(keys), (3,), jnp.float32)
    params["fin_b"] = jnp.pad(bias3, (0, COUT_PAD - 3)).reshape(1, COUT_PAD)
    return params


# ------------------------------ forward pass ------------------------------- #

def cnn_net_forward(params, x, t, *, d):
    """Matches CNNNet.forward: x (B, 9*d*d), t (B,) -> (B, 3*d*d)."""
    B = x.shape[0]
    HW = d * d
    m = x[:, 6 * HW:]                                       # (B, 3*d*d) mask
    xin = x[:, :9 * HW].reshape(B, 9, d, d)                 # NCHW
    t_exp = jnp.broadcast_to(t.reshape(B, 1, 1, 1), (B, 1, d, d))
    xin = jnp.concatenate([xin, t_exp], axis=1)             # (B, 10, d, d)
    h = jnp.transpose(xin, (0, 2, 3, 1)).reshape(B, HW, 10)  # raster rows, C last
    margin = _margin(d)
    # zero row margins (vertical conv padding) + channel pad 10 -> 16
    h = jnp.pad(h, ((0, 0), (margin, margin), (0, CIN_PAD - 10)))
    h = h.astype(jnp.bfloat16)

    out = cnn_fused_call(h, params, d=d)                    # (B, HW, 128) f32
    out = out[..., :3].reshape(B, d, d, 3)                  # drop padded lanes
    out = jnp.transpose(out, (0, 3, 1, 2)).reshape(B, -1)   # NCHW flatten
    return (1.0 - m) * out


# ---------------------------------- main ----------------------------------- #

if __name__ == "__main__":
    d = 8          # spatial size -> dimvec = 3*d*d = 192
    B = 2

    key = jax.random.PRNGKey(0)
    kx, kt, kp = jax.random.split(key, 3)
    x = jax.random.normal(kx, (B, 9 * d * d), jnp.float32)
    t = jax.random.uniform(kt, (B,), jnp.float32)
    params = init_params(kp, d)

    fwd = jax.jit(functools.partial(cnn_net_forward, d=d))
    y = fwd(params, x, t)
    jax.block_until_ready(y)
    assert y.shape == (B, 3 * d * d) and y.dtype == jnp.float32
    print("KERNEL_OK")
</pallas_src>

<mosaic_0001>
module attributes {stable_mosaic.version = 11 : i64} {
  func.func @kernel(%arg0: i32, %arg1: memref<1x96x16xbf16, #tpu.memory_space<vmem>>, %arg2: memref<144x64xbf16, #tpu.memory_space<vmem>>, %arg3: memref<1x64xf32, #tpu.memory_space<vmem>>, %arg4: memref<8x576x64xbf16, #tpu.memory_space<vmem>>, %arg5: memref<8x1x64xf32, #tpu.memory_space<vmem>>, %arg6: memref<576x128xbf16, #tpu.memory_space<vmem>>, %arg7: memref<1x128xf32, #tpu.memory_space<vmem>>, %arg8: memref<1x64x128xf32, #tpu.memory_space<vmem>>, %arg9: memref<96x64xbf16, #tpu.memory_space<vmem>>) attributes {dimension_semantics = [#tpu.dimension_semantics<parallel>], iteration_bounds = array<i64: 2>, scalar_prefetch = 0 : i64, scratch_operands = 1 : i64, tpu.core_type = #tpu.core_type<tc>, window_params = [{transform_indices = @transform_0, window_bounds = array<i64: 1, 96, 16>}, {pipeline_mode = #tpu.pipeline_mode<synchronous>, transform_indices = @transform_1, window_bounds = array<i64: 144, 64>}, {pipeline_mode = #tpu.pipeline_mode<synchronous>, transform_indices = @transform_2, window_bounds = array<i64: 1, 64>}, {pipeline_mode = #tpu.pipeline_mode<synchronous>, transform_indices = @transform_3, window_bounds = array<i64: 8, 576, 64>}, {pipeline_mode = #tpu.pipeline_mode<synchronous>, transform_indices = @transform_4, window_bounds = array<i64: 8, 1, 64>}, {pipeline_mode = #tpu.pipeline_mode<synchronous>, transform_indices = @transform_5, window_bounds = array<i64: 576, 128>}, {pipeline_mode = #tpu.pipeline_mode<synchronous>, transform_indices = @transform_6, window_bounds = array<i64: 1, 128>}, {transform_indices = @transform_7, window_bounds = array<i64: 1, 64, 128>}]} {
    %0 = tpu.iota {dimensions = array<i32: 0>} : vector<64x1xi32>
    %c8_i32 = arith.constant 8 : i32
    %c0_i32 = arith.constant 0 : i32
    %1 = arith.cmpi eq, %c8_i32, %c0_i32 : i32
    %c1_i32 = arith.constant 1 : i32
    %2 = arith.select %1, %c1_i32, %c8_i32 : i32
    %3 = vector.broadcast %2 : i32 to vector<64x1xi32>
    %4 = arith.remsi %0, %3 : vector<64x1xi32>
    %c0_i32_0 = arith.constant 0 : i32
    %5 = vector.broadcast %c0_i32_0 : i32 to vector<64x1xi32>
    %6 = arith.cmpi ne, %4, %5 : vector<64x1xi32>
    %c0_i32_1 = arith.constant 0 : i32
    %7 = vector.broadcast %c0_i32_1 : i32 to vector<64x1xi32>
    %8 = arith.cmpi slt, %4, %7 : vector<64x1xi32>
    %c0_i32_2 = arith.constant 0 : i32
    %9 = arith.cmpi slt, %2, %c0_i32_2 : i32
    %10 = vector.broadcast %9 : i1 to vector<64x1xi1>
    %11 = vector.broadcast %10 : vector<64x1xi1> to vector<64x1xi1>
    %12 = arith.xori %8, %11 : vector<64x1xi1>
    %13 = arith.andi %12, %6 : vector<64x1xi1>
    %14 = vector.broadcast %2 : i32 to vector<64x1xi32>
    %15 = arith.addi %4, %14 : vector<64x1xi32>
    %16 = arith.select %13, %15, %4 : vector<64x1xi1>, vector<64x1xi32>
    %c0_i32_3 = arith.constant 0 : i32
    %17 = vector.broadcast %c0_i32_3 : i32 to vector<64x1xi32>
    %18 = arith.cmpi ne, %16, %17 : vector<64x1xi32>
    %c7_i32 = arith.constant 7 : i32
    %19 = vector.broadcast %c7_i32 : i32 to vector<64x1xi32>
    %20 = arith.cmpi ne, %16, %19 : vector<64x1xi32>
    %cst = arith.constant 0.000000e+00 : bf16
    %21 = vector.broadcast %cst : bf16 to vector<96x64xbf16>
    %c0 = arith.constant 0 : index
    %c0_4 = arith.constant 0 : index
    %22 = vector.load %arg9[%c0, %c0_4] : memref<96x64xbf16, #tpu.memory_space<vmem>>, vector<96x64xbf16>
    tpu.vector_store %arg9[%c0, %c0_4], %21 {strides = array<i32>} : memref<96x64xbf16, #tpu.memory_space<vmem>>, vector<96x64xbf16>,
    %c0_5 = arith.constant 0 : index
    %c0_6 = arith.constant 0 : index
    %23 = vector.load %arg3[%c0_5, %c0_6] : memref<1x64xf32, #tpu.memory_space<vmem>>, vector<1x64xf32>
    %c0_7 = arith.constant 0 : index
    %c7 = arith.constant 7 : index
    %c0_8 = arith.constant 0 : index
    %24 = vector.load %arg1[%c0_7, %c7, %c0_8] : memref<1x96x16xbf16, #tpu.memory_space<vmem>>, vector<1x64x16xbf16>
    %25 = vector.shape_cast %24 : vector<1x64x16xbf16> to vector<64x16xbf16>
    %cst_9 = arith.constant 0.000000e+00 : bf16
    %26 = vector.broadcast %cst_9 : bf16 to vector<64x16xbf16>
    %27 = vector.shape_cast %18 : vector<64x1xi1> to vector<64x1xi1>
    %28 = vector.broadcast %27 : vector<64x1xi1> to vector<64x16xi1>
    %29 = arith.select %28, %25, %26 : vector<64x16xi1>, vector<64x16xbf16>
    %c0_10 = arith.constant 0 : index
    %c0_11 = arith.constant 0 : index
    %30 = vector.load %arg2[%c0_10, %c0_11] : memref<144x64xbf16, #tpu.memory_space<vmem>>, vector<16x64xbf16>
    %cst_12 = arith.constant dense<0.000000e+00> : vector<64x64xf32>
    %31 = tpu.matmul %29, %30, %cst_12 {dimension_numbers = #tpu.dot_dimension_numbers<[1], [0], [0], [1], [0, 0, 1, 1], [], []>} : vector<64x16xbf16>, vector<16x64xbf16>, vector<64x64xf32> -> vector<64x64xf32>
    %c0_13 = arith.constant 0 : index
    %c8 = arith.constant 8 : index
    %c0_14 = arith.constant 0 : index
    %32 = vector.load %arg1[%c0_13, %c8, %c0_14] : memref<1x96x16xbf16, #tpu.memory_space<vmem>>, vector<1x64x16xbf16>
    %33 = vector.shape_cast %32 : vector<1x64x16xbf16> to vector<64x16xbf16>
    %c16 = arith.constant 16 : index
    %c0_15 = arith.constant 0 : index
    %34 = vector.load %arg2[%c16, %c0_15] : memref<144x64xbf16, #tpu.memory_space<vmem>>, vector<16x64xbf16>
    %cst_16 = arith.constant dense<0.000000e+00> : vector<64x64xf32>
    %35 = tpu.matmul %33, %34, %cst_16 {dimension_numbers = #tpu.dot_dimension_numbers<[1], [0], [0], [1], [0, 0, 1, 1], [], []>} : vector<64x16xbf16>, vector<16x64xbf16>, vector<64x64xf32> -> vector<64x64xf32>
    %36 = arith.addf %31, %35 : vector<64x64xf32>
    %c0_17 = arith.constant 0 : index
    %c9 = arith.constant 9 : index
    %c0_18 = arith.constant 0 : index
    %37 = vector.load %arg1[%c0_17, %c9, %c0_18] : memref<1x96x16xbf16, #tpu.memory_space<vmem>>, vector<1x64x16xbf16>
    %38 = vector.shape_cast %37 : vector<1x64x16xbf16> to vector<64x16xbf16>
    %cst_19 = arith.constant 0.000000e+00 : bf16
    %39 = vector.broadcast %cst_19 : bf16 to vector<64x16xbf16>
    %40 = vector.shape_cast %20 : vector<64x1xi1> to vector<64x1xi1>
    %41 = vector.broadcast %40 : vector<64x1xi1> to vector<64x16xi1>
    %42 = arith.select %41, %38, %39 : vector<64x16xi1>, vector<64x16xbf16>
    %c32 = arith.constant 32 : index
    %c0_20 = arith.constant 0 : index
    %43 = vector.load %arg2[%c32, %c0_20] : memref<144x64xbf16, #tpu.memory_space<vmem>>, vector<16x64xbf16>
    %cst_21 = arith.constant dense<0.000000e+00> : vector<64x64xf32>
    %44 = tpu.matmul %42, %43, %cst_21 {dimension_numbers = #tpu.dot_dimension_numbers<[1], [0], [0], [1], [0, 0, 1, 1], [], []>} : vector<64x16xbf16>, vector<16x64xbf16>, vector<64x64xf32> -> vector<64x64xf32>
    %45 = arith.addf %36, %44 : vector<64x64xf32>
    %c0_22 = arith.constant 0 : index
    %c15 = arith.constant 15 : index
    %c0_23 = arith.constant 0 : index
    %46 = vector.load %arg1[%c0_22, %c15, %c0_23] : memref<1x96x16xbf16, #tpu.memory_space<vmem>>, vector<1x64x16xbf16>
    %47 = vector.shape_cast %46 : vector<1x64x16xbf16> to vector<64x16xbf16>
    %cst_24 = arith.constant 0.000000e+00 : bf16
    %48 = vector.broadcast %cst_24 : bf16 to vector<64x16xbf16>
    %49 = vector.shape_cast %18 : vector<64x1xi1> to vector<64x1xi1>
    %50 = vector.broadcast %49 : vector<64x1xi1> to vector<64x16xi1>
    %51 = arith.select %50, %47, %48 : vector<64x16xi1>, vector<64x16xbf16>
    %c48 = arith.constant 48 : index
    %c0_25 = arith.constant 0 : index
    %52 = vector.load %arg2[%c48, %c0_25] : memref<144x64xbf16, #tpu.memory_space<vmem>>, vector<16x64xbf16>
    %cst_26 = arith.constant dense<0.000000e+00> : vector<64x64xf32>
    %53 = tpu.matmul %51, %52, %cst_26 {dimension_numbers = #tpu.dot_dimension_numbers<[1], [0], [0], [1], [0, 0, 1, 1], [], []>} : vector<64x16xbf16>, vector<16x64xbf16>, vector<64x64xf32> -> vector<64x64xf32>
    %54 = arith.addf %45, %53 : vector<64x64xf32>
    %c0_27 = arith.constant 0 : index
    %c16_28 = arith.constant 16 : index
    %c0_29 = arith.constant 0 : index
    %55 = vector.load %arg1[%c0_27, %c16_28, %c0_29] : memref<1x96x16xbf16, #tpu.memory_space<vmem>>, vector<1x64x16xbf16>
    %56 = vector.shape_cast %55 : vector<1x64x16xbf16> to vector<64x16xbf16>
    %c64 = arith.constant 64 : index
    %c0_30 = arith.constant 0 : index
    %57 = vector.load %arg2[%c64, %c0_30] : memref<144x64xbf16, #tpu.memory_space<vmem>>, vector<16x64xbf16>
    %cst_31 = arith.constant dense<0.000000e+00> : vector<64x64xf32>
    %58 = tpu.matmul %56, %57, %cst_31 {dimension_numbers = #tpu.dot_dimension_numbers<[1], [0], [0], [1], [0, 0, 1, 1], [], []>} : vector<64x16xbf16>, vector<16x64xbf16>, vector<64x64xf32> -> vector<64x64xf32>
    %59 = arith.addf %54, %58 : vector<64x64xf32>
    %c0_32 = arith.constant 0 : index
    %c17 = arith.constant 17 : index
    %c0_33 = arith.constant 0 : index
    %60 = vector.load %arg1[%c0_32, %c17, %c0_33] : memref<1x96x16xbf16, #tpu.memory_space<vmem>>, vector<1x64x16xbf16>
    %61 = vector.shape_cast %60 : vector<1x64x16xbf16> to vector<64x16xbf16>
    %cst_34 = arith.constant 0.000000e+00 : bf16
    %62 = vector.broadcast %cst_34 : bf16 to vector<64x16xbf16>
    %63 = vector.shape_cast %20 : vector<64x1xi1> to vector<64x1xi1>
    %64 = vector.broadcast %63 : vector<64x1xi1> to vector<64x16xi1>
    %65 = arith.select %64, %61, %62 : vector<64x16xi1>, vector<64x16xbf16>
    %c80 = arith.constant 80 : index
    %c0_35 = arith.constant 0 : index
    %66 = vector.load %arg2[%c80, %c0_35] : memref<144x64xbf16, #tpu.memory_space<vmem>>, vector<16x64xbf16>
    %cst_36 = arith.constant dense<0.000000e+00> : vector<64x64xf32>
    %67 = tpu.matmul %65, %66, %cst_36 {dimension_numbers = #tpu.dot_dimension_numbers<[1], [0], [0], [1], [0, 0, 1, 1], [], []>} : vector<64x16xbf16>, vector<16x64xbf16>, vector<64x64xf32> -> vector<64x64xf32>
    %68 = arith.addf %59, %67 : vector<64x64xf32>
    %c0_37 = arith.constant 0 : index
    %c23 = arith.constant 23 : index
    %c0_38 = arith.constant 0 : index
    %69 = vector.load %arg1[%c0_37, %c23, %c0_38] : memref<1x96x16xbf16, #tpu.memory_space<vmem>>, vector<1x64x16xbf16>
    %70 = vector.shape_cast %69 : vector<1x64x16xbf16> to vector<64x16xbf16>
    %cst_39 = arith.constant 0.000000e+00 : bf16
    %71 = vector.broadcast %cst_39 : bf16 to vector<64x16xbf16>
    %72 = vector.shape_cast %18 : vector<64x1xi1> to vector<64x1xi1>
    %73 = vector.broadcast %72 : vector<64x1xi1> to vector<64x16xi1>
    %74 = arith.select %73, %70, %71 : vector<64x16xi1>, vector<64x16xbf16>
    %c96 = arith.constant 96 : index
    %c0_40 = arith.constant 0 : index
    %75 = vector.load %arg2[%c96, %c0_40] : memref<144x64xbf16, #tpu.memory_space<vmem>>, vector<16x64xbf16>
    %cst_41 = arith.constant dense<0.000000e+00> : vector<64x64xf32>
    %76 = tpu.matmul %74, %75, %cst_41 {dimension_numbers = #tpu.dot_dimension_numbers<[1], [0], [0], [1], [0, 0, 1, 1], [], []>} : vector<64x16xbf16>, vector<16x64xbf16>, vector<64x64xf32> -> vector<64x64xf32>
    %77 = arith.addf %68, %76 : vector<64x64xf32>
    %c0_42 = arith.constant 0 : index
    %c24 = arith.constant 24 : index
    %c0_43 = arith.constant 0 : index
    %78 = vector.load %arg1[%c0_42, %c24, %c0_43] : memref<1x96x16xbf16, #tpu.memory_space<vmem>>, vector<1x64x16xbf16>
    %79 = vector.shape_cast %78 : vector<1x64x16xbf16> to vector<64x16xbf16>
    %c112 = arith.constant 112 : index
    %c0_44 = arith.constant 0 : index
    %80 = vector.load %arg2[%c112, %c0_44] : memref<144x64xbf16, #tpu.memory_space<vmem>>, vector<16x64xbf16>
    %cst_45 = arith.constant dense<0.000000e+00> : vector<64x64xf32>
    %81 = tpu.matmul %79, %80, %cst_45 {dimension_numbers = #tpu.dot_dimension_numbers<[1], [0], [0], [1], [0, 0, 1, 1], [], []>} : vector<64x16xbf16>, vector<16x64xbf16>, vector<64x64xf32> -> vector<64x64xf32>
    %82 = arith.addf %77, %81 : vector<64x64xf32>
    %c0_46 = arith.constant 0 : index
    %c25 = arith.constant 25 : index
    %c0_47 = arith.constant 0 : index
    %83 = vector.load %arg1[%c0_46, %c25, %c0_47] : memref<1x96x16xbf16, #tpu.memory_space<vmem>>, vector<1x64x16xbf16>
    %84 = vector.shape_cast %83 : vector<1x64x16xbf16> to vector<64x16xbf16>
    %cst_48 = arith.constant 0.000000e+00 : bf16
    %85 = vector.broadcast %cst_48 : bf16 to vector<64x16xbf16>
    %86 = vector.shape_cast %20 : vector<64x1xi1> to vector<64x1xi1>
    %87 = vector.broadcast %86 : vector<64x1xi1> to vector<64x16xi1>
    %88 = arith.select %87, %84, %85 : vector<64x16xi1>, vector<64x16xbf16>
    %c128 = arith.constant 128 : index
    %c0_49 = arith.constant 0 : index
    %89 = vector.load %arg2[%c128, %c0_49] : memref<144x64xbf16, #tpu.memory_space<vmem>>, vector<16x64xbf16>
    %cst_50 = arith.constant dense<0.000000e+00> : vector<64x64xf32>
    %90 = tpu.matmul %88, %89, %cst_50 {dimension_numbers = #tpu.dot_dimension_numbers<[1], [0], [0], [1], [0, 0, 1, 1], [], []>} : vector<64x16xbf16>, vector<16x64xbf16>, vector<64x64xf32> -> vector<64x64xf32>
    %91 = arith.addf %82, %90 : vector<64x64xf32>
    %92 = vector.broadcast %23 : vector<1x64xf32> to vector<64x64xf32>
    %93 = arith.addf %91, %92 : vector<64x64xf32>
    %cst_51 = arith.constant 0.000000e+00 : f32
    %94 = vector.broadcast %cst_51 : f32 to vector<64x64xf32>
    %95 = arith.maximumf %93, %94 : vector<64x64xf32>
    %96 = arith.truncf %95 : vector<64x64xf32> to vector<64x64xbf16>
    %c16_52 = arith.constant 16 : index
    %c0_53 = arith.constant 0 : index
    %97 = vector.load %arg9[%c16_52, %c0_53] : memref<96x64xbf16, #tpu.memory_space<vmem>>, vector<64x64xbf16>
    tpu.vector_store %arg9[%c16_52, %c0_53], %96 {strides = array<i32>} : memref<96x64xbf16, #tpu.memory_space<vmem>>, vector<64x64xbf16>,
    %c0_54 = arith.constant 0 : index
    %c0_55 = arith.constant 0 : index
    %c0_56 = arith.constant 0 : index
    %98 = vector.load %arg5[%c0_54, %c0_55, %c0_56] : memref<8x1x64xf32, #tpu.memory_space<vmem>>, vector<1x1x64xf32>
    %99 = vector.shape_cast %98 : vector<1x1x64xf32> to vector<1x64xf32>
    %c7_57 = arith.constant 7 : index
    %c0_58 = arith.constant 0 : index
    %100 = vector.load %arg9[%c7_57, %c0_58] : memref<96x64xbf16, #tpu.memory_space<vmem>>, vector<64x64xbf16>
    %cst_59 = arith.constant 0.000000e+00 : bf16
    %101 = vector.broadcast %cst_59 : bf16 to vector<64x64xbf16>
    %102 = vector.shape_cast %18 : vector<64x1xi1> to vector<64x1xi1>
    %103 = vector.broadcast %102 : vector<64x1xi1> to vector<64x64xi1>
    %104 = arith.select %103, %100, %101 : vector<64x64xi1>, vector<64x64xbf16>
    %c0_60 = arith.constant 0 : index
    %c0_61 = arith.constant 0 : index
    %c0_62 = arith.constant 0 : index
    %105 = vector.load %arg4[%c0_60, %c0_61, %c0_62] : memref<8x576x64xbf16, #tpu.memory_space<vmem>>, vector<1x64x64xbf16>
    %106 = vector.shape_cast %105 : vector<1x64x64xbf16> to vector<64x64xbf16>
    %cst_63 = arith.constant dense<0.000000e+00> : vector<64x64xf32>
    %107 = tpu.matmul %104, %106, %cst_63 {dimension_numbers = #tpu.dot_dimension_numbers<[1], [0], [0], [1], [0, 0, 1, 1], [], []>} : vector<64x64xbf16>, vector<64x64xbf16>, vector<64x64xf32> -> vector<64x64xf32>
    %c8_64 = arith.constant 8 : index
    %c0_65 = arith.constant 0 : index
    %108 = vector.load %arg9[%c8_64, %c0_65] : memref<96x64xbf16, #tpu.memory_space<vmem>>, vector<64x64xbf16>
    %c0_66 = arith.constant 0 : index
    %c64_67 = arith.constant 64 : index
    %c0_68 = arith.constant 0 : index
    %109 = vector.load %arg4[%c0_66, %c64_67, %c0_68] : memref<8x576x64xbf16, #tpu.memory_space<vmem>>, vector<1x64x64xbf16>
    %110 = vector.shape_cast %109 : vector<1x64x64xbf16> to vector<64x64xbf16>
    %cst_69 = arith.constant dense<0.000000e+00> : vector<64x64xf32>
    %111 = tpu.matmul %108, %110, %cst_69 {dimension_numbers = #tpu.dot_dimension_numbers<[1], [0], [0], [1], [0, 0, 1, 1], [], []>} : vector<64x64xbf16>, vector<64x64xbf16>, vector<64x64xf32> -> vector<64x64xf32>
    %112 = arith.addf %107, %111 : vector<64x64xf32>
    %c9_70 = arith.constant 9 : index
    %c0_71 = arith.constant 0 : index
    %113 = vector.load %arg9[%c9_70, %c0_71] : memref<96x64xbf16, #tpu.memory_space<vmem>>, vector<64x64xbf16>
    %cst_72 = arith.constant 0.000000e+00 : bf16
    %114 = vector.broadcast %cst_72 : bf16 to vector<64x64xbf16>
    %115 = vector.shape_cast %20 : vector<64x1xi1> to vector<64x1xi1>
    %116 = vector.broadcast %115 : vector<64x1xi1> to vector<64x64xi1>
    %117 = arith.select %116, %113, %114 : vector<64x64xi1>, vector<64x64xbf16>
    %c0_73 = arith.constant 0 : index
    %c128_74 = arith.constant 128 : index
    %c0_75 = arith.constant 0 : index
    %118 = vector.load %arg4[%c0_73, %c128_74, %c0_75] : memref<8x576x64xbf16, #tpu.memory_space<vmem>>, vector<1x64x64xbf16>
    %119 = vector.shape_cast %118 : vector<1x64x64xbf16> to vector<64x64xbf16>
    %cst_76 = arith.constant dense<0.000000e+00> : vector<64x64xf32>
    %120 = tpu.matmul %117, %119, %cst_76 {dimension_numbers = #tpu.dot_dimension_numbers<[1], [0], [0], [1], [0, 0, 1, 1], [], []>} : vector<64x64xbf16>, vector<64x64xbf16>, vector<64x64xf32> -> vector<64x64xf32>
    %121 = arith.addf %112, %120 : vector<64x64xf32>
    %c15_77 = arith.constant 15 : index
    %c0_78 = arith.constant 0 : index
    %122 = vector.load %arg9[%c15_77, %c0_78] : memref<96x64xbf16, #tpu.memory_space<vmem>>, vector<64x64xbf16>
    %cst_79 = arith.constant 0.000000e+00 : bf16
    %123 = vector.broadcast %cst_79 : bf16 to vector<64x64xbf16>
    %124 = vector.shape_cast %18 : vector<64x1xi1> to vector<64x1xi1>
    %125 = vector.broadcast %124 : vector<64x1xi1> to vector<64x64xi1>
    %126 = arith.select %125, %122, %123 : vector<64x64xi1>, vector<64x64xbf16>
    %c0_80 = arith.constant 0 : index
    %c192 = arith.constant 192 : index
    %c0_81 = arith.constant 0 : index
    %127 = vector.load %arg4[%c0_80, %c192, %c0_81] : memref<8x576x64xbf16, #tpu.memory_space<vmem>>, vector<1x64x64xbf16>
    %128 = vector.shape_cast %127 : vector<1x64x64xbf16> to vector<64x64xbf16>
    %cst_82 = arith.constant dense<0.000000e+00> : vector<64x64xf32>
    %129 = tpu.matmul %126, %128, %cst_82 {dimension_numbers = #tpu.dot_dimension_numbers<[1], [0], [0], [1], [0, 0, 1, 1], [], []>} : vector<64x64xbf16>, vector<64x64xbf16>, vector<64x64xf32> -> vector<64x64xf32>
    %130 = arith.addf %121, %129 : vector<64x64xf32>
    %c16_83 = arith.constant 16 : index
    %c0_84 = arith.constant 0 : index
    %131 = vector.load %arg9[%c16_83, %c0_84] : memref<96x64xbf16, #tpu.memory_space<vmem>>, vector<64x64xbf16>
    %c0_85 = arith.constant 0 : index
    %c256 = arith.constant 256 : index
    %c0_86 = arith.constant 0 : index
    %132 = vector.load %arg4[%c0_85, %c256, %c0_86] : memref<8x576x64xbf16, #tpu.memory_space<vmem>>, vector<1x64x64xbf16>
    %133 = vector.shape_cast %132 : vector<1x64x64xbf16> to vector<64x64xbf16>
    %cst_87 = arith.constant dense<0.000000e+00> : vector<64x64xf32>
    %134 = tpu.matmul %131, %133, %cst_87 {dimension_numbers = #tpu.dot_dimension_numbers<[1], [0], [0], [1], [0, 0, 1, 1], [], []>} : vector<64x64xbf16>, vector<64x64xbf16>, vector<64x64xf32> -> vector<64x64xf32>
    %135 = arith.addf %130, %134 : vector<64x64xf32>
    %c17_88 = arith.constant 17 : index
    %c0_89 = arith.constant 0 : index
    %136 = vector.load %arg9[%c17_88, %c0_89] : memref<96x64xbf16, #tpu.memory_space<vmem>>, vector<64x64xbf16>
    %cst_90 = arith.constant 0.000000e+00 : bf16
    %137 = vector.broadcast %cst_90 : bf16 to vector<64x64xbf16>
    %138 = vector.shape_cast %20 : vector<64x1xi1> to vector<64x1xi1>
    %139 = vector.broadcast %138 : vector<64x1xi1> to vector<64x64xi1>
    %140 = arith.select %139, %136, %137 : vector<64x64xi1>, vector<64x64xbf16>
    %c0_91 = arith.constant 0 : index
    %c320 = arith.constant 320 : index
    %c0_92 = arith.constant 0 : index
    %141 = vector.load %arg4[%c0_91, %c320, %c0_92] : memref<8x576x64xbf16, #tpu.memory_space<vmem>>, vector<1x64x64xbf16>
    %142 = vector.shape_cast %141 : vector<1x64x64xbf16> to vector<64x64xbf16>
    %cst_93 = arith.constant dense<0.000000e+00> : vector<64x64xf32>
    %143 = tpu.matmul %140, %142, %cst_93 {dimension_numbers = #tpu.dot_dimension_numbers<[1], [0], [0], [1], [0, 0, 1, 1], [], []>} : vector<64x64xbf16>, vector<64x64xbf16>, vector<64x64xf32> -> vector<64x64xf32>
    %144 = arith.addf %135, %143 : vector<64x64xf32>
    %c23_94 = arith.constant 23 : index
    %c0_95 = arith.constant 0 : index
    %145 = vector.load %arg9[%c23_94, %c0_95] : memref<96x64xbf16, #tpu.memory_space<vmem>>, vector<64x64xbf16>
    %cst_96 = arith.constant 0.000000e+00 : bf16
    %146 = vector.broadcast %cst_96 : bf16 to vector<64x64xbf16>
    %147 = vector.shape_cast %18 : vector<64x1xi1> to vector<64x1xi1>
    %148 = vector.broadcast %147 : vector<64x1xi1> to vector<64x64xi1>
    %149 = arith.select %148, %145, %146 : vector<64x64xi1>, vector<64x64xbf16>
    %c0_97 = arith.constant 0 : index
    %c384 = arith.constant 384 : index
    %c0_98 = arith.constant 0 : index
    %150 = vector.load %arg4[%c0_97, %c384, %c0_98] : memref<8x576x64xbf16, #tpu.memory_space<vmem>>, vector<1x64x64xbf16>
    %151 = vector.shape_cast %150 : vector<1x64x64xbf16> to vector<64x64xbf16>
    %cst_99 = arith.constant dense<0.000000e+00> : vector<64x64xf32>
    %152 = tpu.matmul %149, %151, %cst_99 {dimension_numbers = #tpu.dot_dimension_numbers<[1], [0], [0], [1], [0, 0, 1, 1], [], []>} : vector<64x64xbf16>, vector<64x64xbf16>, vector<64x64xf32> -> vector<64x64xf32>
    %153 = arith.addf %144, %152 : vector<64x64xf32>
    %c24_100 = arith.constant 24 : index
    %c0_101 = arith.constant 0 : index
    %154 = vector.load %arg9[%c24_100, %c0_101] : memref<96x64xbf16, #tpu.memory_space<vmem>>, vector<64x64xbf16>
    %c0_102 = arith.constant 0 : index
    %c448 = arith.constant 448 : index
    %c0_103 = arith.constant 0 : index
    %155 = vector.load %arg4[%c0_102, %c448, %c0_103] : memref<8x576x64xbf16, #tpu.memory_space<vmem>>, vector<1x64x64xbf16>
    %156 = vector.shape_cast %155 : vector<1x64x64xbf16> to vector<64x64xbf16>
    %cst_104 = arith.constant dense<0.000000e+00> : vector<64x64xf32>
    %157 = tpu.matmul %154, %156, %cst_104 {dimension_numbers = #tpu.dot_dimension_numbers<[1], [0], [0], [1], [0, 0, 1, 1], [], []>} : vector<64x64xbf16>, vector<64x64xbf16>, vector<64x64xf32> -> vector<64x64xf32>
    %158 = arith.addf %153, %157 : vector<64x64xf32>
    %c25_105 = arith.constant 25 : index
    %c0_106 = arith.constant 0 : index
    %159 = vector.load %arg9[%c25_105, %c0_106] : memref<96x64xbf16, #tpu.memory_space<vmem>>, vector<64x64xbf16>
    %cst_107 = arith.constant 0.000000e+00 : bf16
    %160 = vector.broadcast %cst_107 : bf16 to vector<64x64xbf16>
    %161 = vector.shape_cast %20 : vector<64x1xi1> to vector<64x1xi1>
    %162 = vector.broadcast %161 : vector<64x1xi1> to vector<64x64xi1>
    %163 = arith.select %162, %159, %160 : vector<64x64xi1>, vector<64x64xbf16>
    %c0_108 = arith.constant 0 : index
    %c512 = arith.constant 512 : index
    %c0_109 = arith.constant 0 : index
    %164 = vector.load %arg4[%c0_108, %c512, %c0_109] : memref<8x576x64xbf16, #tpu.memory_space<vmem>>, vector<1x64x64xbf16>
    %165 = vector.shape_cast %164 : vector<1x64x64xbf16> to vector<64x64xbf16>
    %cst_110 = arith.constant dense<0.000000e+00> : vector<64x64xf32>
    %166 = tpu.matmul %163, %165, %cst_110 {dimension_numbers = #tpu.dot_dimension_numbers<[1], [0], [0], [1], [0, 0, 1, 1], [], []>} : vector<64x64xbf16>, vector<64x64xbf16>, vector<64x64xf32> -> vector<64x64xf32>
    %167 = arith.addf %158, %166 : vector<64x64xf32>
    %168 = vector.broadcast %99 : vector<1x64xf32> to vector<64x64xf32>
    %169 = arith.addf %167, %168 : vector<64x64xf32>
    %cst_111 = arith.constant 0.000000e+00 : f32
    %170 = vector.broadcast %cst_111 : f32 to vector<64x64xf32>
    %171 = arith.maximumf %169, %170 : vector<64x64xf32>
    %172 = arith.truncf %171 : vector<64x64xf32> to vector<64x64xbf16>
    %c16_112 = arith.constant 16 : index
    %c0_113 = arith.constant 0 : index
    %173 = vector.load %arg9[%c16_112, %c0_113] : memref<96x64xbf16, #tpu.memory_space<vmem>>, vector<64x64xbf16>
    tpu.vector_store %arg9[%c16_112, %c0_113], %172 {strides = array<i32>} : memref<96x64xbf16, #tpu.memory_space<vmem>>, vector<64x64xbf16>,
    %c1 = arith.constant 1 : index
    %c0_114 = arith.constant 0 : index
    %c0_115 = arith.constant 0 : index
    %174 = vector.load %arg5[%c1, %c0_114, %c0_115] : memref<8x1x64xf32, #tpu.memory_space<vmem>>, vector<1x1x64xf32>
    %175 = vector.shape_cast %174 : vector<1x1x64xf32> to vector<1x64xf32>
    %c7_116 = arith.constant 7 : index
    %c0_117 = arith.constant 0 : index
    %176 = vector.load %arg9[%c7_116, %c0_117] : memref<96x64xbf16, #tpu.memory_space<vmem>>, vector<64x64xbf16>
    %cst_118 = arith.constant 0.000000e+00 : bf16
    %177 = vector.broadcast %cst_118 : bf16 to vector<64x64xbf16>
    %178 = vector.shape_cast %18 : vector<64x1xi1> to vector<64x1xi1>
    %179 = vector.broadcast %178 : vector<64x1xi1> to vector<64x64xi1>
    %180 = arith.select %179, %176, %177 : vector<64x64xi1>, vector<64x64xbf16>
    %c1_119 = arith.constant 1 : index
    %c0_120 = arith.constant 0 : index
    %c0_121 = arith.constant 0 : index
    %181 = vector.load %arg4[%c1_119, %c0_120, %c0_121] : memref<8x576x64xbf16, #tpu.memory_space<vmem>>, vector<1x64x64xbf16>
    %182 = vector.shape_cast %181 : vector<1x64x64xbf16> to vector<64x64xbf16>
    %cst_122 = arith.constant dense<0.000000e+00> : vector<64x64xf32>
    %183 = tpu.matmul %180, %182, %cst_122 {dimension_numbers = #tpu.dot_dimension_numbers<[1], [0], [0], [1], [0, 0, 1, 1], [], []>} : vector<64x64xbf16>, vector<64x64xbf16>, vector<64x64xf32> -> vector<64x64xf32>
    %c8_123 = arith.constant 8 : index
    %c0_124 = arith.constant 0 : index
    %184 = vector.load %arg9[%c8_123, %c0_124] : memref<96x64xbf16, #tpu.memory_space<vmem>>, vector<64x64xbf16>
    %c1_125 = arith.constant 1 : index
    %c64_126 = arith.constant 64 : index
    %c0_127 = arith.constant 0 : index
    %185 = vector.load %arg4[%c1_125, %c64_126, %c0_127] : memref<8x576x64xbf16, #tpu.memory_space<vmem>>, vector<1x64x64xbf16>
    %186 = vector.shape_cast %185 : vector<1x64x64xbf16> to vector<64x64xbf16>
    %cst_128 = arith.constant dense<0.000000e+00> : vector<64x64xf32>
    %187 = tpu.matmul %184, %186, %cst_128 {dimension_numbers = #tpu.dot_dimension_numbers<[1], [0], [0], [1], [0, 0, 1, 1], [], []>} : vector<64x64xbf16>, vector<64x64xbf16>, vector<64x64xf32> -> vector<64x64xf32>
    %188 = arith.addf %183, %187 : vector<64x64xf32>
    %c9_129 = arith.constant 9 : index
    %c0_130 = arith.constant 0 : index
    %189 = vector.load %arg9[%c9_129, %c0_130] : memref<96x64xbf16, #tpu.memory_space<vmem>>, vector<64x64xbf16>
    %cst_131 = arith.constant 0.000000e+00 : bf16
    %190 = vector.broadcast %cst_131 : bf16 to vector<64x64xbf16>
    %191 = vector.shape_cast %20 : vector<64x1xi1> to vector<64x1xi1>
    %192 = vector.broadcast %191 : vector<64x1xi1> to vector<64x64xi1>
    %193 = arith.select %192, %189, %190 : vector<64x64xi1>, vector<64x64xbf16>
    %c1_132 = arith.constant 1 : index
    %c128_133 = arith.constant 128 : index
    %c0_134 = arith.constant 0 : index
    %194 = vector.load %arg4[%c1_132, %c128_133, %c0_134] : memref<8x576x64xbf16, #tpu.memory_space<vmem>>, vector<1x64x64xbf16>
    %195 = vector.shape_cast %194 : vector<1x64x64xbf16> to vector<64x64xbf16>
    %cst_135 = arith.constant dense<0.000000e+00> : vector<64x64xf32>
    %196 = tpu.matmul %193, %195, %cst_135 {dimension_numbers = #tpu.dot_dimension_numbers<[1], [0], [0], [1], [0, 0, 1, 1], [], []>} : vector<64x64xbf16>, vector<64x64xbf16>, vector<64x64xf32> -> vector<64x64xf32>
    %197 = arith.addf %188, %196 : vector<64x64xf32>
    %c15_136 = arith.constant 15 : index
    %c0_137 = arith.constant 0 : index
    %198 = vector.load %arg9[%c15_136, %c0_137] : memref<96x64xbf16, #tpu.memory_space<vmem>>, vector<64x64xbf16>
    %cst_138 = arith.constant 0.000000e+00 : bf16
    %199 = vector.broadcast %cst_138 : bf16 to vector<64x64xbf16>
    %200 = vector.shape_cast %18 : vector<64x1xi1> to vector<64x1xi1>
    %201 = vector.broadcast %200 : vector<64x1xi1> to vector<64x64xi1>
    %202 = arith.select %201, %198, %199 : vector<64x64xi1>, vector<64x64xbf16>
    %c1_139 = arith.constant 1 : index
    %c192_140 = arith.constant 192 : index
    %c0_141 = arith.constant 0 : index
    %203 = vector.load %arg4[%c1_139, %c192_140, %c0_141] : memref<8x576x64xbf16, #tpu.memory_space<vmem>>, vector<1x64x64xbf16>
    %204 = vector.shape_cast %203 : vector<1x64x64xbf16> to vector<64x64xbf16>
    %cst_142 = arith.constant dense<0.000000e+00> : vector<64x64xf32>
    %205 = tpu.matmul %202, %204, %cst_142 {dimension_numbers = #tpu.dot_dimension_numbers<[1], [0], [0], [1], [0, 0, 1, 1], [], []>} : vector<64x64xbf16>, vector<64x64xbf16>, vector<64x64xf32> -> vector<64x64xf32>
    %206 = arith.addf %197, %205 : vector<64x64xf32>
    %c16_143 = arith.constant 16 : index
    %c0_144 = arith.constant 0 : index
    %207 = vector.load %arg9[%c16_143, %c0_144] : memref<96x64xbf16, #tpu.memory_space<vmem>>, vector<64x64xbf16>
    %c1_145 = arith.constant 1 : index
    %c256_146 = arith.constant 256 : index
    %c0_147 = arith.constant 0 : index
    %208 = vector.load %arg4[%c1_145, %c256_146, %c0_147] : memref<8x576x64xbf16, #tpu.memory_space<vmem>>, vector<1x64x64xbf16>
    %209 = vector.shape_cast %208 : vector<1x64x64xbf16> to vector<64x64xbf16>
    %cst_148 = arith.constant dense<0.000000e+00> : vector<64x64xf32>
    %210 = tpu.matmul %207, %209, %cst_148 {dimension_numbers = #tpu.dot_dimension_numbers<[1], [0], [0], [1], [0, 0, 1, 1], [], []>} : vector<64x64xbf16>, vector<64x64xbf16>, vector<64x64xf32> -> vector<64x64xf32>
    %211 = arith.addf %206, %210 : vector<64x64xf32>
    %c17_149 = arith.constant 17 : index
    %c0_150 = arith.constant 0 : index
    %212 = vector.load %arg9[%c17_149, %c0_150] : memref<96x64xbf16, #tpu.memory_space<vmem>>, vector<64x64xbf16>
    %cst_151 = arith.constant 0.000000e+00 : bf16
    %213 = vector.broadcast %cst_151 : bf16 to vector<64x64xbf16>
    %214 = vector.shape_cast %20 : vector<64x1xi1> to vector<64x1xi1>
    %215 = vector.broadcast %214 : vector<64x1xi1> to vector<64x64xi1>
    %216 = arith.select %215, %212, %213 : vector<64x64xi1>, vector<64x64xbf16>
    %c1_152 = arith.constant 1 : index
    %c320_153 = arith.constant 320 : index
    %c0_154 = arith.constant 0 : index
    %217 = vector.load %arg4[%c1_152, %c320_153, %c0_154] : memref<8x576x64xbf16, #tpu.memory_space<vmem>>, vector<1x64x64xbf16>
    %218 = vector.shape_cast %217 : vector<1x64x64xbf16> to vector<64x64xbf16>
    %cst_155 = arith.constant dense<0.000000e+00> : vector<64x64xf32>
    %219 = tpu.matmul %216, %218, %cst_155 {dimension_numbers = #tpu.dot_dimension_numbers<[1], [0], [0], [1], [0, 0, 1, 1], [], []>} : vector<64x64xbf16>, vector<64x64xbf16>, vector<64x64xf32> -> vector<64x64xf32>
    %220 = arith.addf %211, %219 : vector<64x64xf32>
    %c23_156 = arith.constant 23 : index
    %c0_157 = arith.constant 0 : index
    %221 = vector.load %arg9[%c23_156, %c0_157] : memref<96x64xbf16, #tpu.memory_space<vmem>>, vector<64x64xbf16>
    %cst_158 = arith.constant 0.000000e+00 : bf16
    %222 = vector.broadcast %cst_158 : bf16 to vector<64x64xbf16>
    %223 = vector.shape_cast %18 : vector<64x1xi1> to vector<64x1xi1>
    %224 = vector.broadcast %223 : vector<64x1xi1> to vector<64x64xi1>
    %225 = arith.select %224, %221, %222 : vector<64x64xi1>, vector<64x64xbf16>
    %c1_159 = arith.constant 1 : index
    %c384_160 = arith.constant 384 : index
    %c0_161 = arith.constant 0 : index
    %226 = vector.load %arg4[%c1_159, %c384_160, %c0_161] : memref<8x576x64xbf16, #tpu.memory_space<vmem>>, vector<1x64x64xbf16>
    %227 = vector.shape_cast %226 : vector<1x64x64xbf16> to vector<64x64xbf16>
    %cst_162 = arith.constant dense<0.000000e+00> : vector<64x64xf32>
    %228 = tpu.matmul %225, %227, %cst_162 {dimension_numbers = #tpu.dot_dimension_numbers<[1], [0], [0], [1], [0, 0, 1, 1], [], []>} : vector<64x64xbf16>, vector<64x64xbf16>, vector<64x64xf32> -> vector<64x64xf32>
    %229 = arith.addf %220, %228 : vector<64x64xf32>
    %c24_163 = arith.constant 24 : index
    %c0_164 = arith.constant 0 : index
    %230 = vector.load %arg9[%c24_163, %c0_164] : memref<96x64xbf16, #tpu.memory_space<vmem>>, vector<64x64xbf16>
    %c1_165 = arith.constant 1 : index
    %c448_166 = arith.constant 448 : index
    %c0_167 = arith.constant 0 : index
    %231 = vector.load %arg4[%c1_165, %c448_166, %c0_167] : memref<8x576x64xbf16, #tpu.memory_space<vmem>>, vector<1x64x64xbf16>
    %232 = vector.shape_cast %231 : vector<1x64x64xbf16> to vector<64x64xbf16>
    %cst_168 = arith.constant dense<0.000000e+00> : vector<64x64xf32>
    %233 = tpu.matmul %230, %232, %cst_168 {dimension_numbers = #tpu.dot_dimension_numbers<[1], [0], [0], [1], [0, 0, 1, 1], [], []>} : vector<64x64xbf16>, vector<64x64xbf16>, vector<64x64xf32> -> vector<64x64xf32>
    %234 = arith.addf %229, %233 : vector<64x64xf32>
    %c25_169 = arith.constant 25 : index
    %c0_170 = arith.constant 0 : index
    %235 = vector.load %arg9[%c25_169, %c0_170] : memref<96x64xbf16, #tpu.memory_space<vmem>>, vector<64x64xbf16>
    %cst_171 = arith.constant 0.000000e+00 : bf16
    %236 = vector.broadcast %cst_171 : bf16 to vector<64x64xbf16>
    %237 = vector.shape_cast %20 : vector<64x1xi1> to vector<64x1xi1>
    %238 = vector.broadcast %237 : vector<64x1xi1> to vector<64x64xi1>
    %239 = arith.select %238, %235, %236 : vector<64x64xi1>, vector<64x64xbf16>
    %c1_172 = arith.constant 1 : index
    %c512_173 = arith.constant 512 : index
    %c0_174 = arith.constant 0 : index
    %240 = vector.load %arg4[%c1_172, %c512_173, %c0_174] : memref<8x576x64xbf16, #tpu.memory_space<vmem>>, vector<1x64x64xbf16>
    %241 = vector.shape_cast %240 : vector<1x64x64xbf16> to vector<64x64xbf16>
    %cst_175 = arith.constant dense<0.000000e+00> : vector<64x64xf32>
    %242 = tpu.matmul %239, %241, %cst_175 {dimension_numbers = #tpu.dot_dimension_numbers<[1], [0], [0], [1], [0, 0, 1, 1], [], []>} : vector<64x64xbf16>, vector<64x64xbf16>, vector<64x64xf32> -> vector<64x64xf32>
    %243 = arith.addf %234, %242 : vector<64x64xf32>
    %244 = vector.broadcast %175 : vector<1x64xf32> to vector<64x64xf32>
    %245 = arith.addf %243, %244 : vector<64x64xf32>
    %246 = arith.addf %245, %95 : vector<64x64xf32>
    %cst_176 = arith.constant 0.000000e+00 : f32
    %247 = vector.broadcast %cst_176 : f32 to vector<64x64xf32>
    %248 = arith.maximumf %246, %247 : vector<64x64xf32>
    %249 = arith.truncf %248 : vector<64x64xf32> to vector<64x64xbf16>
    %c16_177 = arith.constant 16 : index
    %c0_178 = arith.constant 0 : index
    %250 = vector.load %arg9[%c16_177, %c0_178] : memref<96x64xbf16, #tpu.memory_space<vmem>>, vector<64x64xbf16>
    tpu.vector_store %arg9[%c16_177, %c0_178], %249 {strides = array<i32>} : memref<96x64xbf16, #tpu.memory_space<vmem>>, vector<64x64xbf16>,
    %c2 = arith.constant 2 : index
    %c0_179 = arith.constant 0 : index
    %c0_180 = arith.constant 0 : index
    %251 = vector.load %arg5[%c2, %c0_179, %c0_180] : memref<8x1x64xf32, #tpu.memory_space<vmem>>, vector<1x1x64xf32>
    %252 = vector.shape_cast %251 : vector<1x1x64xf32> to vector<1x64xf32>
    %c7_181 = arith.constant 7 : index
    %c0_182 = arith.constant 0 : index
    %253 = vector.load %arg9[%c7_181, %c0_182] : memref<96x64xbf16, #tpu.memory_space<vmem>>, vector<64x64xbf16>
    %cst_183 = arith.constant 0.000000e+00 : bf16
    %254 = vector.broadcast %cst_183 : bf16 to vector<64x64xbf16>
    %255 = vector.shape_cast %18 : vector<64x1xi1> to vector<64x1xi1>
    %256 = vector.broadcast %255 : vector<64x1xi1> to vector<64x64xi1>
    %257 = arith.select %256, %253, %254 : vector<64x64xi1>, vector<64x64xbf16>
    %c2_184 = arith.constant 2 : index
    %c0_185 = arith.constant 0 : index
    %c0_186 = arith.constant 0 : index
    %258 = vector.load %arg4[%c2_184, %c0_185, %c0_186] : memref<8x576x64xbf16, #tpu.memory_space<vmem>>, vector<1x64x64xbf16>
    %259 = vector.shape_cast %258 : vector<1x64x64xbf16> to vector<64x64xbf16>
    %cst_187 = arith.constant dense<0.000000e+00> : vector<64x64xf32>
    %260 = tpu.matmul %257, %259, %cst_187 {dimension_numbers = #tpu.dot_dimension_numbers<[1], [0], [0], [1], [0, 0, 1, 1], [], []>} : vector<64x64xbf16>, vector<64x64xbf16>, vector<64x64xf32> -> vector<64x64xf32>
    %c8_188 = arith.constant 8 : index
    %c0_189 = arith.constant 0 : index
    %261 = vector.load %arg9[%c8_188, %c0_189] : memref<96x64xbf16, #tpu.memory_space<vmem>>, vector<64x64xbf16>
    %c2_190 = arith.constant 2 : index
    %c64_191 = arith.constant 64 : index
    %c0_192 = arith.constant 0 : index
    %262 = vector.load %arg4[%c2_190, %c64_191, %c0_192] : memref<8x576x64xbf16, #tpu.memory_space<vmem>>, vector<1x64x64xbf16>
    %263 = vector.shape_cast %262 : vector<1x64x64xbf16> to vector<64x64xbf16>
    %cst_193 = arith.constant dense<0.000000e+00> : vector<64x64xf32>
    %264 = tpu.matmul %261, %263, %cst_193 {dimension_numbers = #tpu.dot_dimension_numbers<[1], [0], [0], [1], [0, 0, 1, 1], [], []>} : vector<64x64xbf16>, vector<64x64xbf16>, vector<64x64xf32> -> vector<64x64xf32>
    %265 = arith.addf %260, %264 : vector<64x64xf32>
    %c9_194 = arith.constant 9 : index
    %c0_195 = arith.constant 0 : index
    %266 = vector.load %arg9[%c9_194, %c0_195] : memref<96x64xbf16, #tpu.memory_space<vmem>>, vector<64x64xbf16>
    %cst_196 = arith.constant 0.000000e+00 : bf16
    %267 = vector.broadcast %cst_196 : bf16 to vector<64x64xbf16>
    %268 = vector.shape_cast %20 : vector<64x1xi1> to vector<64x1xi1>
    %269 = vector.broadcast %268 : vector<64x1xi1> to vector<64x64xi1>
    %270 = arith.select %269, %266, %267 : vector<64x64xi1>, vector<64x64xbf16>
    %c2_197 = arith.constant 2 : index
    %c128_198 = arith.constant 128 : index
    %c0_199 = arith.constant 0 : index
    %271 = vector.load %arg4[%c2_197, %c128_198, %c0_199] : memref<8x576x64xbf16, #tpu.memory_space<vmem>>, vector<1x64x64xbf16>
    %272 = vector.shape_cast %271 : vector<1x64x64xbf16> to vector<64x64xbf16>
    %cst_200 = arith.constant dense<0.000000e+00> : vector<64x64xf32>
    %273 = tpu.matmul %270, %272, %cst_200 {dimension_numbers = #tpu.dot_dimension_numbers<[1], [0], [0], [1], [0, 0, 1, 1], [], []>} : vector<64x64xbf16>, vector<64x64xbf16>, vector<64x64xf32> -> vector<64x64xf32>
    %274 = arith.addf %265, %273 : vector<64x64xf32>
    %c15_201 = arith.constant 15 : index
    %c0_202 = arith.constant 0 : index
    %275 = vector.load %arg9[%c15_201, %c0_202] : memref<96x64xbf16, #tpu.memory_space<vmem>>, vector<64x64xbf16>
    %cst_203 = arith.constant 0.000000e+00 : bf16
    %276 = vector.broadcast %cst_203 : bf16 to vector<64x64xbf16>
    %277 = vector.shape_cast %18 : vector<64x1xi1> to vector<64x1xi1>
    %278 = vector.broadcast %277 : vector<64x1xi1> to vector<64x64xi1>
    %279 = arith.select %278, %275, %276 : vector<64x64xi1>, vector<64x64xbf16>
    %c2_204 = arith.constant 2 : index
    %c192_205 = arith.constant 192 : index
    %c0_206 = arith.constant 0 : index
    %280 = vector.load %arg4[%c2_204, %c192_205, %c0_206] : memref<8x576x64xbf16, #tpu.memory_space<vmem>>, vector<1x64x64xbf16>
    %281 = vector.shape_cast %280 : vector<1x64x64xbf16> to vector<64x64xbf16>
    %cst_207 = arith.constant dense<0.000000e+00> : vector<64x64xf32>
    %282 = tpu.matmul %279, %281, %cst_207 {dimension_numbers = #tpu.dot_dimension_numbers<[1], [0], [0], [1], [0, 0, 1, 1], [], []>} : vector<64x64xbf16>, vector<64x64xbf16>, vector<64x64xf32> -> vector<64x64xf32>
    %283 = arith.addf %274, %282 : vector<64x64xf32>
    %c16_208 = arith.constant 16 : index
    %c0_209 = arith.constant 0 : index
    %284 = vector.load %arg9[%c16_208, %c0_209] : memref<96x64xbf16, #tpu.memory_space<vmem>>, vector<64x64xbf16>
    %c2_210 = arith.constant 2 : index
    %c256_211 = arith.constant 256 : index
    %c0_212 = arith.constant 0 : index
    %285 = vector.load %arg4[%c2_210, %c256_211, %c0_212] : memref<8x576x64xbf16, #tpu.memory_space<vmem>>, vector<1x64x64xbf16>
    %286 = vector.shape_cast %285 : vector<1x64x64xbf16> to vector<64x64xbf16>
    %cst_213 = arith.constant dense<0.000000e+00> : vector<64x64xf32>
    %287 = tpu.matmul %284, %286, %cst_213 {dimension_numbers = #tpu.dot_dimension_numbers<[1], [0], [0], [1], [0, 0, 1, 1], [], []>} : vector<64x64xbf16>, vector<64x64xbf16>, vector<64x64xf32> -> vector<64x64xf32>
    %288 = arith.addf %283, %287 : vector<64x64xf32>
    %c17_214 = arith.constant 17 : index
    %c0_215 = arith.constant 0 : index
    %289 = vector.load %arg9[%c17_214, %c0_215] : memref<96x64xbf16, #tpu.memory_space<vmem>>, vector<64x64xbf16>
    %cst_216 = arith.constant 0.000000e+00 : bf16
    %290 = vector.broadcast %cst_216 : bf16 to vector<64x64xbf16>
    %291 = vector.shape_cast %20 : vector<64x1xi1> to vector<64x1xi1>
    %292 = vector.broadcast %291 : vector<64x1xi1> to vector<64x64xi1>
    %293 = arith.select %292, %289, %290 : vector<64x64xi1>, vector<64x64xbf16>
    %c2_217 = arith.constant 2 : index
    %c320_218 = arith.constant 320 : index
    %c0_219 = arith.constant 0 : index
    %294 = vector.load %arg4[%c2_217, %c320_218, %c0_219] : memref<8x576x64xbf16, #tpu.memory_space<vmem>>, vector<1x64x64xbf16>
    %295 = vector.shape_cast %294 : vector<1x64x64xbf16> to vector<64x64xbf16>
    %cst_220 = arith.constant dense<0.000000e+00> : vector<64x64xf32>
    %296 = tpu.matmul %293, %295, %cst_220 {dimension_numbers = #tpu.dot_dimension_numbers<[1], [0], [0], [1], [0, 0, 1, 1], [], []>} : vector<64x64xbf16>, vector<64x64xbf16>, vector<64x64xf32> -> vector<64x64xf32>
    %297 = arith.addf %288, %296 : vector<64x64xf32>
    %c23_221 = arith.constant 23 : index
    %c0_222 = arith.constant 0 : index
    %298 = vector.load %arg9[%c23_221, %c0_222] : memref<96x64xbf16, #tpu.memory_space<vmem>>, vector<64x64xbf16>
    %cst_223 = arith.constant 0.000000e+00 : bf16
    %299 = vector.broadcast %cst_223 : bf16 to vector<64x64xbf16>
    %300 = vector.shape_cast %18 : vector<64x1xi1> to vector<64x1xi1>
    %301 = vector.broadcast %300 : vector<64x1xi1> to vector<64x64xi1>
    %302 = arith.select %301, %298, %299 : vector<64x64xi1>, vector<64x64xbf16>
    %c2_224 = arith.constant 2 : index
    %c384_225 = arith.constant 384 : index
    %c0_226 = arith.constant 0 : index
    %303 = vector.load %arg4[%c2_224, %c384_225, %c0_226] : memref<8x576x64xbf16, #tpu.memory_space<vmem>>, vector<1x64x64xbf16>
    %304 = vector.shape_cast %303 : vector<1x64x64xbf16> to vector<64x64xbf16>
    %cst_227 = arith.constant dense<0.000000e+00> : vector<64x64xf32>
    %305 = tpu.matmul %302, %304, %cst_227 {dimension_numbers = #tpu.dot_dimension_numbers<[1], [0], [0], [1], [0, 0, 1, 1], [], []>} : vector<64x64xbf16>, vector<64x64xbf16>, vector<64x64xf32> -> vector<64x64xf32>
    %306 = arith.addf %297, %305 : vector<64x64xf32>
    %c24_228 = arith.constant 24 : index
    %c0_229 = arith.constant 0 : index
    %307 = vector.load %arg9[%c24_228, %c0_229] : memref<96x64xbf16, #tpu.memory_space<vmem>>, vector<64x64xbf16>
    %c2_230 = arith.constant 2 : index
    %c448_231 = arith.constant 448 : index
    %c0_232 = arith.constant 0 : index
    %308 = vector.load %arg4[%c2_230, %c448_231, %c0_232] : memref<8x576x64xbf16, #tpu.memory_space<vmem>>, vector<1x64x64xbf16>
    %309 = vector.shape_cast %308 : vector<1x64x64xbf16> to vector<64x64xbf16>
    %cst_233 = arith.constant dense<0.000000e+00> : vector<64x64xf32>
    %310 = tpu.matmul %307, %309, %cst_233 {dimension_numbers = #tpu.dot_dimension_numbers<[1], [0], [0], [1], [0, 0, 1, 1], [], []>} : vector<64x64xbf16>, vector<64x64xbf16>, vector<64x64xf32> -> vector<64x64xf32>
    %311 = arith.addf %306, %310 : vector<64x64xf32>
    %c25_234 = arith.constant 25 : index
    %c0_235 = arith.constant 0 : index
    %312 = vector.load %arg9[%c25_234, %c0_235] : memref<96x64xbf16, #tpu.memory_space<vmem>>, vector<64x64xbf16>
    %cst_236 = arith.constant 0.000000e+00 : bf16
    %313 = vector.broadcast %cst_236 : bf16 to vector<64x64xbf16>
    %314 = vector.shape_cast %20 : vector<64x1xi1> to vector<64x1xi1>
    %315 = vector.broadcast %314 : vector<64x1xi1> to vector<64x64xi1>
    %316 = arith.select %315, %312, %313 : vector<64x64xi1>, vector<64x64xbf16>
    %c2_237 = arith.constant 2 : index
    %c512_238 = arith.constant 512 : index
    %c0_239 = arith.constant 0 : index
    %317 = vector.load %arg4[%c2_237, %c512_238, %c0_239] : memref<8x576x64xbf16, #tpu.memory_space<vmem>>, vector<1x64x64xbf16>
    %318 = vector.shape_cast %317 : vector<1x64x64xbf16> to vector<64x64xbf16>
    %cst_240 = arith.constant dense<0.000000e+00> : vector<64x64xf32>
    %319 = tpu.matmul %316, %318, %cst_240 {dimension_numbers = #tpu.dot_dimension_numbers<[1], [0], [0], [1], [0, 0, 1, 1], [], []>} : vector<64x64xbf16>, vector<64x64xbf16>, vector<64x64xf32> -> vector<64x64xf32>
    %320 = arith.addf %311, %319 : vector<64x64xf32>
    %321 = vector.broadcast %252 : vector<1x64xf32> to vector<64x64xf32>
    %322 = arith.addf %320, %321 : vector<64x64xf32>
    %cst_241 = arith.constant 0.000000e+00 : f32
    %323 = vector.broadcast %cst_241 : f32 to vector<64x64xf32>
    %324 = arith.maximumf %322, %323 : vector<64x64xf32>
    %325 = arith.truncf %324 : vector<64x64xf32> to vector<64x64xbf16>
    %c16_242 = arith.constant 16 : index
    %c0_243 = arith.constant 0 : index
    %326 = vector.load %arg9[%c16_242, %c0_243] : memref<96x64xbf16, #tpu.memory_space<vmem>>, vector<64x64xbf16>
    tpu.vector_store %arg9[%c16_242, %c0_243], %325 {strides = array<i32>} : memref<96x64xbf16, #tpu.memory_space<vmem>>, vector<64x64xbf16>,
    %c3 = arith.constant 3 : index
    %c0_244 = arith.constant 0 : index
    %c0_245 = arith.constant 0 : index
    %327 = vector.load %arg5[%c3, %c0_244, %c0_245] : memref<8x1x64xf32, #tpu.memory_space<vmem>>, vector<1x1x64xf32>
    %328 = vector.shape_cast %327 : vector<1x1x64xf32> to vector<1x64xf32>
    %c7_246 = arith.constant 7 : index
    %c0_247 = arith.constant 0 : index
    %329 = vector.load %arg9[%c7_246, %c0_247] : memref<96x64xbf16, #tpu.memory_space<vmem>>, vector<64x64xbf16>
    %cst_248 = arith.constant 0.000000e+00 : bf16
    %330 = vector.broadcast %cst_248 : bf16 to vector<64x64xbf16>
    %331 = vector.shape_cast %18 : vector<64x1xi1> to vector<64x1xi1>
    %332 = vector.broadcast %331 : vector<64x1xi1> to vector<64x64xi1>
    %333 = arith.select %332, %329, %330 : vector<64x64xi1>, vector<64x64xbf16>
    %c3_249 = arith.constant 3 : index
    %c0_250 = arith.constant 0 : index
    %c0_251 = arith.constant 0 : index
    %334 = vector.load %arg4[%c3_249, %c0_250, %c0_251] : memref<8x576x64xbf16, #tpu.memory_space<vmem>>, vector<1x64x64xbf16>
    %335 = vector.shape_cast %334 : vector<1x64x64xbf16> to vector<64x64xbf16>
    %cst_252 = arith.constant dense<0.000000e+00> : vector<64x64xf32>
    %336 = tpu.matmul %333, %335, %cst_252 {dimension_numbers = #tpu.dot_dimension_numbers<[1], [0], [0], [1], [0, 0, 1, 1], [], []>} : vector<64x64xbf16>, vector<64x64xbf16>, vector<64x64xf32> -> vector<64x64xf32>
    %c8_253 = arith.constant 8 : index
    %c0_254 = arith.constant 0 : index
    %337 = vector.load %arg9[%c8_253, %c0_254] : memref<96x64xbf16, #tpu.memory_space<vmem>>, vector<64x64xbf16>
    %c3_255 = arith.constant 3 : index
    %c64_256 = arith.constant 64 : index
    %c0_257 = arith.constant 0 : index
    %338 = vector.load %arg4[%c3_255, %c64_256, %c0_257] : memref<8x576x64xbf16, #tpu.memory_space<vmem>>, vector<1x64x64xbf16>
    %339 = vector.shape_cast %338 : vector<1x64x64xbf16> to vector<64x64xbf16>
    %cst_258 = arith.constant dense<0.000000e+00> : vector<64x64xf32>
    %340 = tpu.matmul %337, %339, %cst_258 {dimension_numbers = #tpu.dot_dimension_numbers<[1], [0], [0], [1], [0, 0, 1, 1], [], []>} : vector<64x64xbf16>, vector<64x64xbf16>, vector<64x64xf32> -> vector<64x64xf32>
    %341 = arith.addf %336, %340 : vector<64x64xf32>
    %c9_259 = arith.constant 9 : index
    %c0_260 = arith.constant 0 : index
    %342 = vector.load %arg9[%c9_259, %c0_260] : memref<96x64xbf16, #tpu.memory_space<vmem>>, vector<64x64xbf16>
    %cst_261 = arith.constant 0.000000e+00 : bf16
    %343 = vector.broadcast %cst_261 : bf16 to vector<64x64xbf16>
    %344 = vector.shape_cast %20 : vector<64x1xi1> to vector<64x1xi1>
    %345 = vector.broadcast %344 : vector<64x1xi1> to vector<64x64xi1>
    %346 = arith.select %345, %342, %343 : vector<64x64xi1>, vector<64x64xbf16>
    %c3_262 = arith.constant 3 : index
    %c128_263 = arith.constant 128 : index
    %c0_264 = arith.constant 0 : index
    %347 = vector.load %arg4[%c3_262, %c128_263, %c0_264] : memref<8x576x64xbf16, #tpu.memory_space<vmem>>, vector<1x64x64xbf16>
    %348 = vector.shape_cast %347 : vector<1x64x64xbf16> to vector<64x64xbf16>
    %cst_265 = arith.constant dense<0.000000e+00> : vector<64x64xf32>
    %349 = tpu.matmul %346, %348, %cst_265 {dimension_numbers = #tpu.dot_dimension_numbers<[1], [0], [0], [1], [0, 0, 1, 1], [], []>} : vector<64x64xbf16>, vector<64x64xbf16>, vector<64x64xf32> -> vector<64x64xf32>
    %350 = arith.addf %341, %349 : vector<64x64xf32>
    %c15_266 = arith.constant 15 : index
    %c0_267 = arith.constant 0 : index
    %351 = vector.load %arg9[%c15_266, %c0_267] : memref<96x64xbf16, #tpu.memory_space<vmem>>, vector<64x64xbf16>
    %cst_268 = arith.constant 0.000000e+00 : bf16
    %352 = vector.broadcast %cst_268 : bf16 to vector<64x64xbf16>
    %353 = vector.shape_cast %18 : vector<64x1xi1> to vector<64x1xi1>
    %354 = vector.broadcast %353 : vector<64x1xi1> to vector<64x64xi1>
    %355 = arith.select %354, %351, %352 : vector<64x64xi1>, vector<64x64xbf16>
    %c3_269 = arith.constant 3 : index
    %c192_270 = arith.constant 192 : index
    %c0_271 = arith.constant 0 : index
    %356 = vector.load %arg4[%c3_269, %c192_270, %c0_271] : memref<8x576x64xbf16, #tpu.memory_space<vmem>>, vector<1x64x64xbf16>
    %357 = vector.shape_cast %356 : vector<1x64x64xbf16> to vector<64x64xbf16>
    %cst_272 = arith.constant dense<0.000000e+00> : vector<64x64xf32>
    %358 = tpu.matmul %355, %357, %cst_272 {dimension_numbers = #tpu.dot_dimension_numbers<[1], [0], [0], [1], [0, 0, 1, 1], [], []>} : vector<64x64xbf16>, vector<64x64xbf16>, vector<64x64xf32> -> vector<64x64xf32>
    %359 = arith.addf %350, %358 : vector<64x64xf32>
    %c16_273 = arith.constant 16 : index
    %c0_274 = arith.constant 0 : index
    %360 = vector.load %arg9[%c16_273, %c0_274] : memref<96x64xbf16, #tpu.memory_space<vmem>>, vector<64x64xbf16>
    %c3_275 = arith.constant 3 : index
    %c256_276 = arith.constant 256 : index
    %c0_277 = arith.constant 0 : index
    %361 = vector.load %arg4[%c3_275, %c256_276, %c0_277] : memref<8x576x64xbf16, #tpu.memory_space<vmem>>, vector<1x64x64xbf16>
    %362 = vector.shape_cast %361 : vector<1x64x64xbf16> to vector<64x64xbf16>
    %cst_278 = arith.constant dense<0.000000e+00> : vector<64x64xf32>
    %363 = tpu.matmul %360, %362, %cst_278 {dimension_numbers = #tpu.dot_dimension_numbers<[1], [0], [0], [1], [0, 0, 1, 1], [], []>} : vector<64x64xbf16>, vector<64x64xbf16>, vector<64x64xf32> -> vector<64x64xf32>
    %364 = arith.addf %359, %363 : vector<64x64xf32>
    %c17_279 = arith.constant 17 : index
    %c0_280 = arith.constant 0 : index
    %365 = vector.load %arg9[%c17_279, %c0_280] : memref<96x64xbf16, #tpu.memory_space<vmem>>, vector<64x64xbf16>
    %cst_281 = arith.constant 0.000000e+00 : bf16
    %366 = vector.broadcast %cst_281 : bf16 to vector<64x64xbf16>
    %367 = vector.shape_cast %20 : vector<64x1xi1> to vector<64x1xi1>
    %368 = vector.broadcast %367 : vector<64x1xi1> to vector<64x64xi1>
    %369 = arith.select %368, %365, %366 : vector<64x64xi1>, vector<64x64xbf16>
    %c3_282 = arith.constant 3 : index
    %c320_283 = arith.constant 320 : index
    %c0_284 = arith.constant 0 : index
    %370 = vector.load %arg4[%c3_282, %c320_283, %c0_284] : memref<8x576x64xbf16, #tpu.memory_space<vmem>>, vector<1x64x64xbf16>
    %371 = vector.shape_cast %370 : vector<1x64x64xbf16> to vector<64x64xbf16>
    %cst_285 = arith.constant dense<0.000000e+00> : vector<64x64xf32>
    %372 = tpu.matmul %369, %371, %cst_285 {dimension_numbers = #tpu.dot_dimension_numbers<[1], [0], [0], [1], [0, 0, 1, 1], [], []>} : vector<64x64xbf16>, vector<64x64xbf16>, vector<64x64xf32> -> vector<64x64xf32>
    %373 = arith.addf %364, %372 : vector<64x64xf32>
    %c23_286 = arith.constant 23 : index
    %c0_287 = arith.constant 0 : index
    %374 = vector.load %arg9[%c23_286, %c0_287] : memref<96x64xbf16, #tpu.memory_space<vmem>>, vector<64x64xbf16>
    %cst_288 = arith.constant 0.000000e+00 : bf16
    %375 = vector.broadcast %cst_288 : bf16 to vector<64x64xbf16>
    %376 = vector.shape_cast %18 : vector<64x1xi1> to vector<64x1xi1>
    %377 = vector.broadcast %376 : vector<64x1xi1> to vector<64x64xi1>
    %378 = arith.select %377, %374, %375 : vector<64x64xi1>, vector<64x64xbf16>
    %c3_289 = arith.constant 3 : index
    %c384_290 = arith.constant 384 : index
    %c0_291 = arith.constant 0 : index
    %379 = vector.load %arg4[%c3_289, %c384_290, %c0_291] : memref<8x576x64xbf16, #tpu.memory_space<vmem>>, vector<1x64x64xbf16>
    %380 = vector.shape_cast %379 : vector<1x64x64xbf16> to vector<64x64xbf16>
    %cst_292 = arith.constant dense<0.000000e+00> : vector<64x64xf32>
    %381 = tpu.matmul %378, %380, %cst_292 {dimension_numbers = #tpu.dot_dimension_numbers<[1], [0], [0], [1], [0, 0, 1, 1], [], []>} : vector<64x64xbf16>, vector<64x64xbf16>, vector<64x64xf32> -> vector<64x64xf32>
    %382 = arith.addf %373, %381 : vector<64x64xf32>
    %c24_293 = arith.constant 24 : index
    %c0_294 = arith.constant 0 : index
    %383 = vector.load %arg9[%c24_293, %c0_294] : memref<96x64xbf16, #tpu.memory_space<vmem>>, vector<64x64xbf16>
    %c3_295 = arith.constant 3 : index
    %c448_296 = arith.constant 448 : index
    %c0_297 = arith.constant 0 : index
    %384 = vector.load %arg4[%c3_295, %c448_296, %c0_297] : memref<8x576x64xbf16, #tpu.memory_space<vmem>>, vector<1x64x64xbf16>
    %385 = vector.shape_cast %384 : vector<1x64x64xbf16> to vector<64x64xbf16>
    %cst_298 = arith.constant dense<0.000000e+00> : vector<64x64xf32>
    %386 = tpu.matmul %383, %385, %cst_298 {dimension_numbers = #tpu.dot_dimension_numbers<[1], [0], [0], [1], [0, 0, 1, 1], [], []>} : vector<64x64xbf16>, vector<64x64xbf16>, vector<64x64xf32> -> vector<64x64xf32>
    %387 = arith.addf %382, %386 : vector<64x64xf32>
    %c25_299 = arith.constant 25 : index
    %c0_300 = arith.constant 0 : index
    %388 = vector.load %arg9[%c25_299, %c0_300] : memref<96x64xbf16, #tpu.memory_space<vmem>>, vector<64x64xbf16>
    %cst_301 = arith.constant 0.000000e+00 : bf16
    %389 = vector.broadcast %cst_301 : bf16 to vector<64x64xbf16>
    %390 = vector.shape_cast %20 : vector<64x1xi1> to vector<64x1xi1>
    %391 = vector.broadcast %390 : vector<64x1xi1> to vector<64x64xi1>
    %392 = arith.select %391, %388, %389 : vector<64x64xi1>, vector<64x64xbf16>
    %c3_302 = arith.constant 3 : index
    %c512_303 = arith.constant 512 : index
    %c0_304 = arith.constant 0 : index
    %393 = vector.load %arg4[%c3_302, %c512_303, %c0_304] : memref<8x576x64xbf16, #tpu.memory_space<vmem>>, vector<1x64x64xbf16>
    %394 = vector.shape_cast %393 : vector<1x64x64xbf16> to vector<64x64xbf16>
    %cst_305 = arith.constant dense<0.000000e+00> : vector<64x64xf32>
    %395 = tpu.matmul %392, %394, %cst_305 {dimension_numbers = #tpu.dot_dimension_numbers<[1], [0], [0], [1], [0, 0, 1, 1], [], []>} : vector<64x64xbf16>, vector<64x64xbf16>, vector<64x64xf32> -> vector<64x64xf32>
    %396 = arith.addf %387, %395 : vector<64x64xf32>
    %397 = vector.broadcast %328 : vector<1x64xf32> to vector<64x64xf32>
    %398 = arith.addf %396, %397 : vector<64x64xf32>
    %399 = arith.addf %398, %248 : vector<64x64xf32>
    %cst_306 = arith.constant 0.000000e+00 : f32
    %400 = vector.broadcast %cst_306 : f32 to vector<64x64xf32>
    %401 = arith.maximumf %399, %400 : vector<64x64xf32>
    %402 = arith.truncf %401 : vector<64x64xf32> to vector<64x64xbf16>
    %c16_307 = arith.constant 16 : index
    %c0_308 = arith.constant 0 : index
    %403 = vector.load %arg9[%c16_307, %c0_308] : memref<96x64xbf16, #tpu.memory_space<vmem>>, vector<64x64xbf16>
    tpu.vector_store %arg9[%c16_307, %c0_308], %402 {strides = array<i32>} : memref<96x64xbf16, #tpu.memory_space<vmem>>, vector<64x64xbf16>,
    %c4 = arith.constant 4 : index
    %c0_309 = arith.constant 0 : index
    %c0_310 = arith.constant 0 : index
    %404 = vector.load %arg5[%c4, %c0_309, %c0_310] : memref<8x1x64xf32, #tpu.memory_space<vmem>>, vector<1x1x64xf32>
    %405 = vector.shape_cast %404 : vector<1x1x64xf32> to vector<1x64xf32>
    %c7_311 = arith.constant 7 : index
    %c0_312 = arith.constant 0 : index
    %406 = vector.load %arg9[%c7_311, %c0_312] : memref<96x64xbf16, #tpu.memory_space<vmem>>, vector<64x64xbf16>
    %cst_313 = arith.constant 0.000000e+00 : bf16
    %407 = vector.broadcast %cst_313 : bf16 to vector<64x64xbf16>
    %408 = vector.shape_cast %18 : vector<64x1xi1> to vector<64x1xi1>
    %409 = vector.broadcast %408 : vector<64x1xi1> to vector<64x64xi1>
    %410 = arith.select %409, %406, %407 : vector<64x64xi1>, vector<64x64xbf16>
    %c4_314 = arith.constant 4 : index
    %c0_315 = arith.constant 0 : index
    %c0_316 = arith.constant 0 : index
    %411 = vector.load %arg4[%c4_314, %c0_315, %c0_316] : memref<8x576x64xbf16, #tpu.memory_space<vmem>>, vector<1x64x64xbf16>
    %412 = vector.shape_cast %411 : vector<1x64x64xbf16> to vector<64x64xbf16>
    %cst_317 = arith.constant dense<0.000000e+00> : vector<64x64xf32>
    %413 = tpu.matmul %410, %412, %cst_317 {dimension_numbers = #tpu.dot_dimension_numbers<[1], [0], [0], [1], [0, 0, 1, 1], [], []>} : vector<64x64xbf16>, vector<64x64xbf16>, vector<64x64xf32> -> vector<64x64xf32>
    %c8_318 = arith.constant 8 : index
    %c0_319 = arith.constant 0 : index
    %414 = vector.load %arg9[%c8_318, %c0_319] : memref<96x64xbf16, #tpu.memory_space<vmem>>, vector<64x64xbf16>
    %c4_320 = arith.constant 4 : index
    %c64_321 = arith.constant 64 : index
    %c0_322 = arith.constant 0 : index
    %415 = vector.load %arg4[%c4_320, %c64_321, %c0_322] : memref<8x576x64xbf16, #tpu.memory_space<vmem>>, vector<1x64x64xbf16>
    %416 = vector.shape_cast %415 : vector<1x64x64xbf16> to vector<64x64xbf16>
    %cst_323 = arith.constant dense<0.000000e+00> : vector<64x64xf32>
    %417 = tpu.matmul %414, %416, %cst_323 {dimension_numbers = #tpu.dot_dimension_numbers<[1], [0], [0], [1], [0, 0, 1, 1], [], []>} : vector<64x64xbf16>, vector<64x64xbf16>, vector<64x64xf32> -> vector<64x64xf32>
    %418 = arith.addf %413, %417 : vector<64x64xf32>
    %c9_324 = arith.constant 9 : index
    %c0_325 = arith.constant 0 : index
    %419 = vector.load %arg9[%c9_324, %c0_325] : memref<96x64xbf16, #tpu.memory_space<vmem>>, vector<64x64xbf16>
    %cst_326 = arith.constant 0.000000e+00 : bf16
    %420 = vector.broadcast %cst_326 : bf16 to vector<64x64xbf16>
    %421 = vector.shape_cast %20 : vector<64x1xi1> to vector<64x1xi1>
    %422 = vector.broadcast %421 : vector<64x1xi1> to vector<64x64xi1>
    %423 = arith.select %422, %419, %420 : vector<64x64xi1>, vector<64x64xbf16>
    %c4_327 = arith.constant 4 : index
    %c128_328 = arith.constant 128 : index
    %c0_329 = arith.constant 0 : index
    %424 = vector.load %arg4[%c4_327, %c128_328, %c0_329] : memref<8x576x64xbf16, #tpu.memory_space<vmem>>, vector<1x64x64xbf16>
    %425 = vector.shape_cast %424 : vector<1x64x64xbf16> to vector<64x64xbf16>
    %cst_330 = arith.constant dense<0.000000e+00> : vector<64x64xf32>
    %426 = tpu.matmul %423, %425, %cst_330 {dimension_numbers = #tpu.dot_dimension_numbers<[1], [0], [0], [1], [0, 0, 1, 1], [], []>} : vector<64x64xbf16>, vector<64x64xbf16>, vector<64x64xf32> -> vector<64x64xf32>
    %427 = arith.addf %418, %426 : vector<64x64xf32>
    %c15_331 = arith.constant 15 : index
    %c0_332 = arith.constant 0 : index
    %428 = vector.load %arg9[%c15_331, %c0_332] : memref<96x64xbf16, #tpu.memory_space<vmem>>, vector<64x64xbf16>
    %cst_333 = arith.constant 0.000000e+00 : bf16
    %429 = vector.broadcast %cst_333 : bf16 to vector<64x64xbf16>
    %430 = vector.shape_cast %18 : vector<64x1xi1> to vector<64x1xi1>
    %431 = vector.broadcast %430 : vector<64x1xi1> to vector<64x64xi1>
    %432 = arith.select %431, %428, %429 : vector<64x64xi1>, vector<64x64xbf16>
    %c4_334 = arith.constant 4 : index
    %c192_335 = arith.constant 192 : index
    %c0_336 = arith.constant 0 : index
    %433 = vector.load %arg4[%c4_334, %c192_335, %c0_336] : memref<8x576x64xbf16, #tpu.memory_space<vmem>>, vector<1x64x64xbf16>
    %434 = vector.shape_cast %433 : vector<1x64x64xbf16> to vector<64x64xbf16>
    %cst_337 = arith.constant dense<0.000000e+00> : vector<64x64xf32>
    %435 = tpu.matmul %432, %434, %cst_337 {dimension_numbers = #tpu.dot_dimension_numbers<[1], [0], [0], [1], [0, 0, 1, 1], [], []>} : vector<64x64xbf16>, vector<64x64xbf16>, vector<64x64xf32> -> vector<64x64xf32>
    %436 = arith.addf %427, %435 : vector<64x64xf32>
    %c16_338 = arith.constant 16 : index
    %c0_339 = arith.constant 0 : index
    %437 = vector.load %arg9[%c16_338, %c0_339] : memref<96x64xbf16, #tpu.memory_space<vmem>>, vector<64x64xbf16>
    %c4_340 = arith.constant 4 : index
    %c256_341 = arith.constant 256 : index
    %c0_342 = arith.constant 0 : index
    %438 = vector.load %arg4[%c4_340, %c256_341, %c0_342] : memref<8x576x64xbf16, #tpu.memory_space<vmem>>, vector<1x64x64xbf16>
    %439 = vector.shape_cast %438 : vector<1x64x64xbf16> to vector<64x64xbf16>
    %cst_343 = arith.constant dense<0.000000e+00> : vector<64x64xf32>
    %440 = tpu.matmul %437, %439, %cst_343 {dimension_numbers = #tpu.dot_dimension_numbers<[1], [0], [0], [1], [0, 0, 1, 1], [], []>} : vector<64x64xbf16>, vector<64x64xbf16>, vector<64x64xf32> -> vector<64x64xf32>
    %441 = arith.addf %436, %440 : vector<64x64xf32>
    %c17_344 = arith.constant 17 : index
    %c0_345 = arith.constant 0 : index
    %442 = vector.load %arg9[%c17_344, %c0_345] : memref<96x64xbf16, #tpu.memory_space<vmem>>, vector<64x64xbf16>
    %cst_346 = arith.constant 0.000000e+00 : bf16
    %443 = vector.broadcast %cst_346 : bf16 to vector<64x64xbf16>
    %444 = vector.shape_cast %20 : vector<64x1xi1> to vector<64x1xi1>
    %445 = vector.broadcast %444 : vector<64x1xi1> to vector<64x64xi1>
    %446 = arith.select %445, %442, %443 : vector<64x64xi1>, vector<64x64xbf16>
    %c4_347 = arith.constant 4 : index
    %c320_348 = arith.constant 320 : index
    %c0_349 = arith.constant 0 : index
    %447 = vector.load %arg4[%c4_347, %c320_348, %c0_349] : memref<8x576x64xbf16, #tpu.memory_space<vmem>>, vector<1x64x64xbf16>
    %448 = vector.shape_cast %447 : vector<1x64x64xbf16> to vector<64x64xbf16>
    %cst_350 = arith.constant dense<0.000000e+00> : vector<64x64xf32>
    %449 = tpu.matmul %446, %448, %cst_350 {dimension_numbers = #tpu.dot_dimension_numbers<[1], [0], [0], [1], [0, 0, 1, 1], [], []>} : vector<64x64xbf16>, vector<64x64xbf16>, vector<64x64xf32> -> vector<64x64xf32>
    %450 = arith.addf %441, %449 : vector<64x64xf32>
    %c23_351 = arith.constant 23 : index
    %c0_352 = arith.constant 0 : index
    %451 = vector.load %arg9[%c23_351, %c0_352] : memref<96x64xbf16, #tpu.memory_space<vmem>>, vector<64x64xbf16>
    %cst_353 = arith.constant 0.000000e+00 : bf16
    %452 = vector.broadcast %cst_353 : bf16 to vector<64x64xbf16>
    %453 = vector.shape_cast %18 : vector<64x1xi1> to vector<64x1xi1>
    %454 = vector.broadcast %453 : vector<64x1xi1> to vector<64x64xi1>
    %455 = arith.select %454, %451, %452 : vector<64x64xi1>, vector<64x64xbf16>
    %c4_354 = arith.constant 4 : index
    %c384_355 = arith.constant 384 : index
    %c0_356 = arith.constant 0 : index
    %456 = vector.load %arg4[%c4_354, %c384_355, %c0_356] : memref<8x576x64xbf16, #tpu.memory_space<vmem>>, vector<1x64x64xbf16>
    %457 = vector.shape_cast %456 : vector<1x64x64xbf16> to vector<64x64xbf16>
    %cst_357 = arith.constant dense<0.000000e+00> : vector<64x64xf32>
    %458 = tpu.matmul %455, %457, %cst_357 {dimension_numbers = #tpu.dot_dimension_numbers<[1], [0], [0], [1], [0, 0, 1, 1], [], []>} : vector<64x64xbf16>, vector<64x64xbf16>, vector<64x64xf32> -> vector<64x64xf32>
    %459 = arith.addf %450, %458 : vector<64x64xf32>
    %c24_358 = arith.constant 24 : index
    %c0_359 = arith.constant 0 : index
    %460 = vector.load %arg9[%c24_358, %c0_359] : memref<96x64xbf16, #tpu.memory_space<vmem>>, vector<64x64xbf16>
    %c4_360 = arith.constant 4 : index
    %c448_361 = arith.constant 448 : index
    %c0_362 = arith.constant 0 : index
    %461 = vector.load %arg4[%c4_360, %c448_361, %c0_362] : memref<8x576x64xbf16, #tpu.memory_space<vmem>>, vector<1x64x64xbf16>
    %462 = vector.shape_cast %461 : vector<1x64x64xbf16> to vector<64x64xbf16>
    %cst_363 = arith.constant dense<0.000000e+00> : vector<64x64xf32>
    %463 = tpu.matmul %460, %462, %cst_363 {dimension_numbers = #tpu.dot_dimension_numbers<[1], [0], [0], [1], [0, 0, 1, 1], [], []>} : vector<64x64xbf16>, vector<64x64xbf16>, vector<64x64xf32> -> vector<64x64xf32>
    %464 = arith.addf %459, %463 : vector<64x64xf32>
    %c25_364 = arith.constant 25 : index
    %c0_365 = arith.constant 0 : index
    %465 = vector.load %arg9[%c25_364, %c0_365] : memref<96x64xbf16, #tpu.memory_space<vmem>>, vector<64x64xbf16>
    %cst_366 = arith.constant 0.000000e+00 : bf16
    %466 = vector.broadcast %cst_366 : bf16 to vector<64x64xbf16>
    %467 = vector.shape_cast %20 : vector<64x1xi1> to vector<64x1xi1>
    %468 = vector.broadcast %467 : vector<64x1xi1> to vector<64x64xi1>
    %469 = arith.select %468, %465, %466 : vector<64x64xi1>, vector<64x64xbf16>
    %c4_367 = arith.constant 4 : index
    %c512_368 = arith.constant 512 : index
    %c0_369 = arith.constant 0 : index
    %470 = vector.load %arg4[%c4_367, %c512_368, %c0_369] : memref<8x576x64xbf16, #tpu.memory_space<vmem>>, vector<1x64x64xbf16>
    %471 = vector.shape_cast %470 : vector<1x64x64xbf16> to vector<64x64xbf16>
    %cst_370 = arith.constant dense<0.000000e+00> : vector<64x64xf32>
    %472 = tpu.matmul %469, %471, %cst_370 {dimension_numbers = #tpu.dot_dimension_numbers<[1], [0], [0], [1], [0, 0, 1, 1], [], []>} : vector<64x64xbf16>, vector<64x64xbf16>, vector<64x64xf32> -> vector<64x64xf32>
    %473 = arith.addf %464, %472 : vector<64x64xf32>
    %474 = vector.broadcast %405 : vector<1x64xf32> to vector<64x64xf32>
    %475 = arith.addf %473, %474 : vector<64x64xf32>
    %cst_371 = arith.constant 0.000000e+00 : f32
    %476 = vector.broadcast %cst_371 : f32 to vector<64x64xf32>
    %477 = arith.maximumf %475, %476 : vector<64x64xf32>
    %478 = arith.truncf %477 : vector<64x64xf32> to vector<64x64xbf16>
    %c16_372 = arith.constant 16 : index
    %c0_373 = arith.constant 0 : index
    %479 = vector.load %arg9[%c16_372, %c0_373] : memref<96x64xbf16, #tpu.memory_space<vmem>>, vector<64x64xbf16>
    tpu.vector_store %arg9[%c16_372, %c0_373], %478 {strides = array<i32>} : memref<96x64xbf16, #tpu.memory_space<vmem>>, vector<64x64xbf16>,
    %c5 = arith.constant 5 : index
    %c0_374 = arith.constant 0 : index
    %c0_375 = arith.constant 0 : index
    %480 = vector.load %arg5[%c5, %c0_374, %c0_375] : memref<8x1x64xf32, #tpu.memory_space<vmem>>, vector<1x1x64xf32>
    %481 = vector.shape_cast %480 : vector<1x1x64xf32> to vector<1x64xf32>
    %c7_376 = arith.constant 7 : index
    %c0_377 = arith.constant 0 : index
    %482 = vector.load %arg9[%c7_376, %c0_377] : memref<96x64xbf16, #tpu.memory_space<vmem>>, vector<64x64xbf16>
    %cst_378 = arith.constant 0.000000e+00 : bf16
    %483 = vector.broadcast %cst_378 : bf16 to vector<64x64xbf16>
    %484 = vector.shape_cast %18 : vector<64x1xi1> to vector<64x1xi1>
    %485 = vector.broadcast %484 : vector<64x1xi1> to vector<64x64xi1>
    %486 = arith.select %485, %482, %483 : vector<64x64xi1>, vector<64x64xbf16>
    %c5_379 = arith.constant 5 : index
    %c0_380 = arith.constant 0 : index
    %c0_381 = arith.constant 0 : index
    %487 = vector.load %arg4[%c5_379, %c0_380, %c0_381] : memref<8x576x64xbf16, #tpu.memory_space<vmem>>, vector<1x64x64xbf16>
    %488 = vector.shape_cast %487 : vector<1x64x64xbf16> to vector<64x64xbf16>
    %cst_382 = arith.constant dense<0.000000e+00> : vector<64x64xf32>
    %489 = tpu.matmul %486, %488, %cst_382 {dimension_numbers = #tpu.dot_dimension_numbers<[1], [0], [0], [1], [0, 0, 1, 1], [], []>} : vector<64x64xbf16>, vector<64x64xbf16>, vector<64x64xf32> -> vector<64x64xf32>
    %c8_383 = arith.constant 8 : index
    %c0_384 = arith.constant 0 : index
    %490 = vector.load %arg9[%c8_383, %c0_384] : memref<96x64xbf16, #tpu.memory_space<vmem>>, vector<64x64xbf16>
    %c5_385 = arith.constant 5 : index
    %c64_386 = arith.constant 64 : index
    %c0_387 = arith.constant 0 : index
    %491 = vector.load %arg4[%c5_385, %c64_386, %c0_387] : memref<8x576x64xbf16, #tpu.memory_space<vmem>>, vector<1x64x64xbf16>
    %492 = vector.shape_cast %491 : vector<1x64x64xbf16> to vector<64x64xbf16>
    %cst_388 = arith.constant dense<0.000000e+00> : vector<64x64xf32>
    %493 = tpu.matmul %490, %492, %cst_388 {dimension_numbers = #tpu.dot_dimension_numbers<[1], [0], [0], [1], [0, 0, 1, 1], [], []>} : vector<64x64xbf16>, vector<64x64xbf16>, vector<64x64xf32> -> vector<64x64xf32>
    %494 = arith.addf %489, %493 : vector<64x64xf32>
    %c9_389 = arith.constant 9 : index
    %c0_390 = arith.constant 0 : index
    %495 = vector.load %arg9[%c9_389, %c0_390] : memref<96x64xbf16, #tpu.memory_space<vmem>>, vector<64x64xbf16>
    %cst_391 = arith.constant 0.000000e+00 : bf16
    %496 = vector.broadcast %cst_391 : bf16 to vector<64x64xbf16>
    %497 = vector.shape_cast %20 : vector<64x1xi1> to vector<64x1xi1>
    %498 = vector.broadcast %497 : vector<64x1xi1> to vector<64x64xi1>
    %499 = arith.select %498, %495, %496 : vector<64x64xi1>, vector<64x64xbf16>
    %c5_392 = arith.constant 5 : index
    %c128_393 = arith.constant 128 : index
    %c0_394 = arith.constant 0 : index
    %500 = vector.load %arg4[%c5_392, %c128_393, %c0_394] : memref<8x576x64xbf16, #tpu.memory_space<vmem>>, vector<1x64x64xbf16>
    %501 = vector.shape_cast %500 : vector<1x64x64xbf16> to vector<64x64xbf16>
    %cst_395 = arith.constant dense<0.000000e+00> : vector<64x64xf32>
    %502 = tpu.matmul %499, %501, %cst_395 {dimension_numbers = #tpu.dot_dimension_numbers<[1], [0], [0], [1], [0, 0, 1, 1], [], []>} : vector<64x64xbf16>, vector<64x64xbf16>, vector<64x64xf32> -> vector<64x64xf32>
    %503 = arith.addf %494, %502 : vector<64x64xf32>
    %c15_396 = arith.constant 15 : index
    %c0_397 = arith.constant 0 : index
    %504 = vector.load %arg9[%c15_396, %c0_397] : memref<96x64xbf16, #tpu.memory_space<vmem>>, vector<64x64xbf16>
    %cst_398 = arith.constant 0.000000e+00 : bf16
    %505 = vector.broadcast %cst_398 : bf16 to vector<64x64xbf16>
    %506 = vector.shape_cast %18 : vector<64x1xi1> to vector<64x1xi1>
    %507 = vector.broadcast %506 : vector<64x1xi1> to vector<64x64xi1>
    %508 = arith.select %507, %504, %505 : vector<64x64xi1>, vector<64x64xbf16>
    %c5_399 = arith.constant 5 : index
    %c192_400 = arith.constant 192 : index
    %c0_401 = arith.constant 0 : index
    %509 = vector.load %arg4[%c5_399, %c192_400, %c0_401] : memref<8x576x64xbf16, #tpu.memory_space<vmem>>, vector<1x64x64xbf16>
    %510 = vector.shape_cast %509 : vector<1x64x64xbf16> to vector<64x64xbf16>
    %cst_402 = arith.constant dense<0.000000e+00> : vector<64x64xf32>
    %511 = tpu.matmul %508, %510, %cst_402 {dimension_numbers = #tpu.dot_dimension_numbers<[1], [0], [0], [1], [0, 0, 1, 1], [], []>} : vector<64x64xbf16>, vector<64x64xbf16>, vector<64x64xf32> -> vector<64x64xf32>
    %512 = arith.addf %503, %511 : vector<64x64xf32>
    %c16_403 = arith.constant 16 : index
    %c0_404 = arith.constant 0 : index
    %513 = vector.load %arg9[%c16_403, %c0_404] : memref<96x64xbf16, #tpu.memory_space<vmem>>, vector<64x64xbf16>
    %c5_405 = arith.constant 5 : index
    %c256_406 = arith.constant 256 : index
    %c0_407 = arith.constant 0 : index
    %514 = vector.load %arg4[%c5_405, %c256_406, %c0_407] : memref<8x576x64xbf16, #tpu.memory_space<vmem>>, vector<1x64x64xbf16>
    %515 = vector.shape_cast %514 : vector<1x64x64xbf16> to vector<64x64xbf16>
    %cst_408 = arith.constant dense<0.000000e+00> : vector<64x64xf32>
    %516 = tpu.matmul %513, %515, %cst_408 {dimension_numbers = #tpu.dot_dimension_numbers<[1], [0], [0], [1], [0, 0, 1, 1], [], []>} : vector<64x64xbf16>, vector<64x64xbf16>, vector<64x64xf32> -> vector<64x64xf32>
    %517 = arith.addf %512, %516 : vector<64x64xf32>
    %c17_409 = arith.constant 17 : index
    %c0_410 = arith.constant 0 : index
    %518 = vector.load %arg9[%c17_409, %c0_410] : memref<96x64xbf16, #tpu.memory_space<vmem>>, vector<64x64xbf16>
    %cst_411 = arith.constant 0.000000e+00 : bf16
    %519 = vector.broadcast %cst_411 : bf16 to vector<64x64xbf16>
    %520 = vector.shape_cast %20 : vector<64x1xi1> to vector<64x1xi1>
    %521 = vector.broadcast %520 : vector<64x1xi1> to vector<64x64xi1>
    %522 = arith.select %521, %518, %519 : vector<64x64xi1>, vector<64x64xbf16>
    %c5_412 = arith.constant 5 : index
    %c320_413 = arith.constant 320 : index
    %c0_414 = arith.constant 0 : index
    %523 = vector.load %arg4[%c5_412, %c320_413, %c0_414] : memref<8x576x64xbf16, #tpu.memory_space<vmem>>, vector<1x64x64xbf16>
    %524 = vector.shape_cast %523 : vector<1x64x64xbf16> to vector<64x64xbf16>
    %cst_415 = arith.constant dense<0.000000e+00> : vector<64x64xf32>
    %525 = tpu.matmul %522, %524, %cst_415 {dimension_numbers = #tpu.dot_dimension_numbers<[1], [0], [0], [1], [0, 0, 1, 1], [], []>} : vector<64x64xbf16>, vector<64x64xbf16>, vector<64x64xf32> -> vector<64x64xf32>
    %526 = arith.addf %517, %525 : vector<64x64xf32>
    %c23_416 = arith.constant 23 : index
    %c0_417 = arith.constant 0 : index
    %527 = vector.load %arg9[%c23_416, %c0_417] : memref<96x64xbf16, #tpu.memory_space<vmem>>, vector<64x64xbf16>
    %cst_418 = arith.constant 0.000000e+00 : bf16
    %528 = vector.broadcast %cst_418 : bf16 to vector<64x64xbf16>
    %529 = vector.shape_cast %18 : vector<64x1xi1> to vector<64x1xi1>
    %530 = vector.broadcast %529 : vector<64x1xi1> to vector<64x64xi1>
    %531 = arith.select %530, %527, %528 : vector<64x64xi1>, vector<64x64xbf16>
    %c5_419 = arith.constant 5 : index
    %c384_420 = arith.constant 384 : index
    %c0_421 = arith.constant 0 : index
    %532 = vector.load %arg4[%c5_419, %c384_420, %c0_421] : memref<8x576x64xbf16, #tpu.memory_space<vmem>>, vector<1x64x64xbf16>
    %533 = vector.shape_cast %532 : vector<1x64x64xbf16> to vector<64x64xbf16>
    %cst_422 = arith.constant dense<0.000000e+00> : vector<64x64xf32>
    %534 = tpu.matmul %531, %533, %cst_422 {dimension_numbers = #tpu.dot_dimension_numbers<[1], [0], [0], [1], [0, 0, 1, 1], [], []>} : vector<64x64xbf16>, vector<64x64xbf16>, vector<64x64xf32> -> vector<64x64xf32>
    %535 = arith.addf %526, %534 : vector<64x64xf32>
    %c24_423 = arith.constant 24 : index
    %c0_424 = arith.constant 0 : index
    %536 = vector.load %arg9[%c24_423, %c0_424] : memref<96x64xbf16, #tpu.memory_space<vmem>>, vector<64x64xbf16>
    %c5_425 = arith.constant 5 : index
    %c448_426 = arith.constant 448 : index
    %c0_427 = arith.constant 0 : index
    %537 = vector.load %arg4[%c5_425, %c448_426, %c0_427] : memref<8x576x64xbf16, #tpu.memory_space<vmem>>, vector<1x64x64xbf16>
    %538 = vector.shape_cast %537 : vector<1x64x64xbf16> to vector<64x64xbf16>
    %cst_428 = arith.constant dense<0.000000e+00> : vector<64x64xf32>
    %539 = tpu.matmul %536, %538, %cst_428 {dimension_numbers = #tpu.dot_dimension_numbers<[1], [0], [0], [1], [0, 0, 1, 1], [], []>} : vector<64x64xbf16>, vector<64x64xbf16>, vector<64x64xf32> -> vector<64x64xf32>
    %540 = arith.addf %535, %539 : vector<64x64xf32>
    %c25_429 = arith.constant 25 : index
    %c0_430 = arith.constant 0 : index
    %541 = vector.load %arg9[%c25_429, %c0_430] : memref<96x64xbf16, #tpu.memory_space<vmem>>, vector<64x64xbf16>
    %cst_431 = arith.constant 0.000000e+00 : bf16
    %542 = vector.broadcast %cst_431 : bf16 to vector<64x64xbf16>
    %543 = vector.shape_cast %20 : vector<64x1xi1> to vector<64x1xi1>
    %544 = vector.broadcast %543 : vector<64x1xi1> to vector<64x64xi1>
    %545 = arith.select %544, %541, %542 : vector<64x64xi1>, vector<64x64xbf16>
    %c5_432 = arith.constant 5 : index
    %c512_433 = arith.constant 512 : index
    %c0_434 = arith.constant 0 : index
    %546 = vector.load %arg4[%c5_432, %c512_433, %c0_434] : memref<8x576x64xbf16, #tpu.memory_space<vmem>>, vector<1x64x64xbf16>
    %547 = vector.shape_cast %546 : vector<1x64x64xbf16> to vector<64x64xbf16>
    %cst_435 = arith.constant dense<0.000000e+00> : vector<64x64xf32>
    %548 = tpu.matmul %545, %547, %cst_435 {dimension_numbers = #tpu.dot_dimension_numbers<[1], [0], [0], [1], [0, 0, 1, 1], [], []>} : vector<64x64xbf16>, vector<64x64xbf16>, vector<64x64xf32> -> vector<64x64xf32>
    %549 = arith.addf %540, %548 : vector<64x64xf32>
    %550 = vector.broadcast %481 : vector<1x64xf32> to vector<64x64xf32>
    %551 = arith.addf %549, %550 : vector<64x64xf32>
    %552 = arith.addf %551, %401 : vector<64x64xf32>
    %cst_436 = arith.constant 0.000000e+00 : f32
    %553 = vector.broadcast %cst_436 : f32 to vector<64x64xf32>
    %554 = arith.maximumf %552, %553 : vector<64x64xf32>
    %555 = arith.truncf %554 : vector<64x64xf32> to vector<64x64xbf16>
    %c16_437 = arith.constant 16 : index
    %c0_438 = arith.constant 0 : index
    %556 = vector.load %arg9[%c16_437, %c0_438] : memref<96x64xbf16, #tpu.memory_space<vmem>>, vector<64x64xbf16>
    tpu.vector_store %arg9[%c16_437, %c0_438], %555 {strides = array<i32>} : memref<96x64xbf16, #tpu.memory_space<vmem>>, vector<64x64xbf16>,
    %c6 = arith.constant 6 : index
    %c0_439 = arith.constant 0 : index
    %c0_440 = arith.constant 0 : index
    %557 = vector.load %arg5[%c6, %c0_439, %c0_440] : memref<8x1x64xf32, #tpu.memory_space<vmem>>, vector<1x1x64xf32>
    %558 = vector.shape_cast %557 : vector<1x1x64xf32> to vector<1x64xf32>
    %c7_441 = arith.constant 7 : index
    %c0_442 = arith.constant 0 : index
    %559 = vector.load %arg9[%c7_441, %c0_442] : memref<96x64xbf16, #tpu.memory_space<vmem>>, vector<64x64xbf16>
    %cst_443 = arith.constant 0.000000e+00 : bf16
    %560 = vector.broadcast %cst_443 : bf16 to vector<64x64xbf16>
    %561 = vector.shape_cast %18 : vector<64x1xi1> to vector<64x1xi1>
    %562 = vector.broadcast %561 : vector<64x1xi1> to vector<64x64xi1>
    %563 = arith.select %562, %559, %560 : vector<64x64xi1>, vector<64x64xbf16>
    %c6_444 = arith.constant 6 : index
    %c0_445 = arith.constant 0 : index
    %c0_446 = arith.constant 0 : index
    %564 = vector.load %arg4[%c6_444, %c0_445, %c0_446] : memref<8x576x64xbf16, #tpu.memory_space<vmem>>, vector<1x64x64xbf16>
    %565 = vector.shape_cast %564 : vector<1x64x64xbf16> to vector<64x64xbf16>
    %cst_447 = arith.constant dense<0.000000e+00> : vector<64x64xf32>
    %566 = tpu.matmul %563, %565, %cst_447 {dimension_numbers = #tpu.dot_dimension_numbers<[1], [0], [0], [1], [0, 0, 1, 1], [], []>} : vector<64x64xbf16>, vector<64x64xbf16>, vector<64x64xf32> -> vector<64x64xf32>
    %c8_448 = arith.constant 8 : index
    %c0_449 = arith.constant 0 : index
    %567 = vector.load %arg9[%c8_448, %c0_449] : memref<96x64xbf16, #tpu.memory_space<vmem>>, vector<64x64xbf16>
    %c6_450 = arith.constant 6 : index
    %c64_451 = arith.constant 64 : index
    %c0_452 = arith.constant 0 : index
    %568 = vector.load %arg4[%c6_450, %c64_451, %c0_452] : memref<8x576x64xbf16, #tpu.memory_space<vmem>>, vector<1x64x64xbf16>
    %569 = vector.shape_cast %568 : vector<1x64x64xbf16> to vector<64x64xbf16>
    %cst_453 = arith.constant dense<0.000000e+00> : vector<64x64xf32>
    %570 = tpu.matmul %567, %569, %cst_453 {dimension_numbers = #tpu.dot_dimension_numbers<[1], [0], [0], [1], [0, 0, 1, 1], [], []>} : vector<64x64xbf16>, vector<64x64xbf16>, vector<64x64xf32> -> vector<64x64xf32>
    %571 = arith.addf %566, %570 : vector<64x64xf32>
    %c9_454 = arith.constant 9 : index
    %c0_455 = arith.constant 0 : index
    %572 = vector.load %arg9[%c9_454, %c0_455] : memref<96x64xbf16, #tpu.memory_space<vmem>>, vector<64x64xbf16>
    %cst_456 = arith.constant 0.000000e+00 : bf16
    %573 = vector.broadcast %cst_456 : bf16 to vector<64x64xbf16>
    %574 = vector.shape_cast %20 : vector<64x1xi1> to vector<64x1xi1>
    %575 = vector.broadcast %574 : vector<64x1xi1> to vector<64x64xi1>
    %576 = arith.select %575, %572, %573 : vector<64x64xi1>, vector<64x64xbf16>
    %c6_457 = arith.constant 6 : index
    %c128_458 = arith.constant 128 : index
    %c0_459 = arith.constant 0 : index
    %577 = vector.load %arg4[%c6_457, %c128_458, %c0_459] : memref<8x576x64xbf16, #tpu.memory_space<vmem>>, vector<1x64x64xbf16>
    %578 = vector.shape_cast %577 : vector<1x64x64xbf16> to vector<64x64xbf16>
    %cst_460 = arith.constant dense<0.000000e+00> : vector<64x64xf32>
    %579 = tpu.matmul %576, %578, %cst_460 {dimension_numbers = #tpu.dot_dimension_numbers<[1], [0], [0], [1], [0, 0, 1, 1], [], []>} : vector<64x64xbf16>, vector<64x64xbf16>, vector<64x64xf32> -> vector<64x64xf32>
    %580 = arith.addf %571, %579 : vector<64x64xf32>
    %c15_461 = arith.constant 15 : index
    %c0_462 = arith.constant 0 : index
    %581 = vector.load %arg9[%c15_461, %c0_462] : memref<96x64xbf16, #tpu.memory_space<vmem>>, vector<64x64xbf16>
    %cst_463 = arith.constant 0.000000e+00 : bf16
    %582 = vector.broadcast %cst_463 : bf16 to vector<64x64xbf16>
    %583 = vector.shape_cast %18 : vector<64x1xi1> to vector<64x1xi1>
    %584 = vector.broadcast %583 : vector<64x1xi1> to vector<64x64xi1>
    %585 = arith.select %584, %581, %582 : vector<64x64xi1>, vector<64x64xbf16>
    %c6_464 = arith.constant 6 : index
    %c192_465 = arith.constant 192 : index
    %c0_466 = arith.constant 0 : index
    %586 = vector.load %arg4[%c6_464, %c192_465, %c0_466] : memref<8x576x64xbf16, #tpu.memory_space<vmem>>, vector<1x64x64xbf16>
    %587 = vector.shape_cast %586 : vector<1x64x64xbf16> to vector<64x64xbf16>
    %cst_467 = arith.constant dense<0.000000e+00> : vector<64x64xf32>
    %588 = tpu.matmul %585, %587, %cst_467 {dimension_numbers = #tpu.dot_dimension_numbers<[1], [0], [0], [1], [0, 0, 1, 1], [], []>} : vector<64x64xbf16>, vector<64x64xbf16>, vector<64x64xf32> -> vector<64x64xf32>
    %589 = arith.addf %580, %588 : vector<64x64xf32>
    %c16_468 = arith.constant 16 : index
    %c0_469 = arith.constant 0 : index
    %590 = vector.load %arg9[%c16_468, %c0_469] : memref<96x64xbf16, #tpu.memory_space<vmem>>, vector<64x64xbf16>
    %c6_470 = arith.constant 6 : index
    %c256_471 = arith.constant 256 : index
    %c0_472 = arith.constant 0 : index
    %591 = vector.load %arg4[%c6_470, %c256_471, %c0_472] : memref<8x576x64xbf16, #tpu.memory_space<vmem>>, vector<1x64x64xbf16>
    %592 = vector.shape_cast %591 : vector<1x64x64xbf16> to vector<64x64xbf16>
    %cst_473 = arith.constant dense<0.000000e+00> : vector<64x64xf32>
    %593 = tpu.matmul %590, %592, %cst_473 {dimension_numbers = #tpu.dot_dimension_numbers<[1], [0], [0], [1], [0, 0, 1, 1], [], []>} : vector<64x64xbf16>, vector<64x64xbf16>, vector<64x64xf32> -> vector<64x64xf32>
    %594 = arith.addf %589, %593 : vector<64x64xf32>
    %c17_474 = arith.constant 17 : index
    %c0_475 = arith.constant 0 : index
    %595 = vector.load %arg9[%c17_474, %c0_475] : memref<96x64xbf16, #tpu.memory_space<vmem>>, vector<64x64xbf16>
    %cst_476 = arith.constant 0.000000e+00 : bf16
    %596 = vector.broadcast %cst_476 : bf16 to vector<64x64xbf16>
    %597 = vector.shape_cast %20 : vector<64x1xi1> to vector<64x1xi1>
    %598 = vector.broadcast %597 : vector<64x1xi1> to vector<64x64xi1>
    %599 = arith.select %598, %595, %596 : vector<64x64xi1>, vector<64x64xbf16>
    %c6_477 = arith.constant 6 : index
    %c320_478 = arith.constant 320 : index
    %c0_479 = arith.constant 0 : index
    %600 = vector.load %arg4[%c6_477, %c320_478, %c0_479] : memref<8x576x64xbf16, #tpu.memory_space<vmem>>, vector<1x64x64xbf16>
    %601 = vector.shape_cast %600 : vector<1x64x64xbf16> to vector<64x64xbf16>
    %cst_480 = arith.constant dense<0.000000e+00> : vector<64x64xf32>
    %602 = tpu.matmul %599, %601, %cst_480 {dimension_numbers = #tpu.dot_dimension_numbers<[1], [0], [0], [1], [0, 0, 1, 1], [], []>} : vector<64x64xbf16>, vector<64x64xbf16>, vector<64x64xf32> -> vector<64x64xf32>
    %603 = arith.addf %594, %602 : vector<64x64xf32>
    %c23_481 = arith.constant 23 : index
    %c0_482 = arith.constant 0 : index
    %604 = vector.load %arg9[%c23_481, %c0_482] : memref<96x64xbf16, #tpu.memory_space<vmem>>, vector<64x64xbf16>
    %cst_483 = arith.constant 0.000000e+00 : bf16
    %605 = vector.broadcast %cst_483 : bf16 to vector<64x64xbf16>
    %606 = vector.shape_cast %18 : vector<64x1xi1> to vector<64x1xi1>
    %607 = vector.broadcast %606 : vector<64x1xi1> to vector<64x64xi1>
    %608 = arith.select %607, %604, %605 : vector<64x64xi1>, vector<64x64xbf16>
    %c6_484 = arith.constant 6 : index
    %c384_485 = arith.constant 384 : index
    %c0_486 = arith.constant 0 : index
    %609 = vector.load %arg4[%c6_484, %c384_485, %c0_486] : memref<8x576x64xbf16, #tpu.memory_space<vmem>>, vector<1x64x64xbf16>
    %610 = vector.shape_cast %609 : vector<1x64x64xbf16> to vector<64x64xbf16>
    %cst_487 = arith.constant dense<0.000000e+00> : vector<64x64xf32>
    %611 = tpu.matmul %608, %610, %cst_487 {dimension_numbers = #tpu.dot_dimension_numbers<[1], [0], [0], [1], [0, 0, 1, 1], [], []>} : vector<64x64xbf16>, vector<64x64xbf16>, vector<64x64xf32> -> vector<64x64xf32>
    %612 = arith.addf %603, %611 : vector<64x64xf32>
    %c24_488 = arith.constant 24 : index
    %c0_489 = arith.constant 0 : index
    %613 = vector.load %arg9[%c24_488, %c0_489] : memref<96x64xbf16, #tpu.memory_space<vmem>>, vector<64x64xbf16>
    %c6_490 = arith.constant 6 : index
    %c448_491 = arith.constant 448 : index
    %c0_492 = arith.constant 0 : index
    %614 = vector.load %arg4[%c6_490, %c448_491, %c0_492] : memref<8x576x64xbf16, #tpu.memory_space<vmem>>, vector<1x64x64xbf16>
    %615 = vector.shape_cast %614 : vector<1x64x64xbf16> to vector<64x64xbf16>
    %cst_493 = arith.constant dense<0.000000e+00> : vector<64x64xf32>
    %616 = tpu.matmul %613, %615, %cst_493 {dimension_numbers = #tpu.dot_dimension_numbers<[1], [0], [0], [1], [0, 0, 1, 1], [], []>} : vector<64x64xbf16>, vector<64x64xbf16>, vector<64x64xf32> -> vector<64x64xf32>
    %617 = arith.addf %612, %616 : vector<64x64xf32>
    %c25_494 = arith.constant 25 : index
    %c0_495 = arith.constant 0 : index
    %618 = vector.load %arg9[%c25_494, %c0_495] : memref<96x64xbf16, #tpu.memory_space<vmem>>, vector<64x64xbf16>
    %cst_496 = arith.constant 0.000000e+00 : bf16
    %619 = vector.broadcast %cst_496 : bf16 to vector<64x64xbf16>
    %620 = vector.shape_cast %20 : vector<64x1xi1> to vector<64x1xi1>
    %621 = vector.broadcast %620 : vector<64x1xi1> to vector<64x64xi1>
    %622 = arith.select %621, %618, %619 : vector<64x64xi1>, vector<64x64xbf16>
    %c6_497 = arith.constant 6 : index
    %c512_498 = arith.constant 512 : index
    %c0_499 = arith.constant 0 : index
    %623 = vector.load %arg4[%c6_497, %c512_498, %c0_499] : memref<8x576x64xbf16, #tpu.memory_space<vmem>>, vector<1x64x64xbf16>
    %624 = vector.shape_cast %623 : vector<1x64x64xbf16> to vector<64x64xbf16>
    %cst_500 = arith.constant dense<0.000000e+00> : vector<64x64xf32>
    %625 = tpu.matmul %622, %624, %cst_500 {dimension_numbers = #tpu.dot_dimension_numbers<[1], [0], [0], [1], [0, 0, 1, 1], [], []>} : vector<64x64xbf16>, vector<64x64xbf16>, vector<64x64xf32> -> vector<64x64xf32>
    %626 = arith.addf %617, %625 : vector<64x64xf32>
    %627 = vector.broadcast %558 : vector<1x64xf32> to vector<64x64xf32>
    %628 = arith.addf %626, %627 : vector<64x64xf32>
    %cst_501 = arith.constant 0.000000e+00 : f32
    %629 = vector.broadcast %cst_501 : f32 to vector<64x64xf32>
    %630 = arith.maximumf %628, %629 : vector<64x64xf32>
    %631 = arith.truncf %630 : vector<64x64xf32> to vector<64x64xbf16>
    %c16_502 = arith.constant 16 : index
    %c0_503 = arith.constant 0 : index
    %632 = vector.load %arg9[%c16_502, %c0_503] : memref<96x64xbf16, #tpu.memory_space<vmem>>, vector<64x64xbf16>
    tpu.vector_store %arg9[%c16_502, %c0_503], %631 {strides = array<i32>} : memref<96x64xbf16, #tpu.memory_space<vmem>>, vector<64x64xbf16>,
    %c7_504 = arith.constant 7 : index
    %c0_505 = arith.constant 0 : index
    %c0_506 = arith.constant 0 : index
    %633 = vector.load %arg5[%c7_504, %c0_505, %c0_506] : memref<8x1x64xf32, #tpu.memory_space<vmem>>, vector<1x1x64xf32>
    %634 = vector.shape_cast %633 : vector<1x1x64xf32> to vector<1x64xf32>
    %c7_507 = arith.constant 7 : index
    %c0_508 = arith.constant 0 : index
    %635 = vector.load %arg9[%c7_507, %c0_508] : memref<96x64xbf16, #tpu.memory_space<vmem>>, vector<64x64xbf16>
    %cst_509 = arith.constant 0.000000e+00 : bf16
    %636 = vector.broadcast %cst_509 : bf16 to vector<64x64xbf16>
    %637 = vector.shape_cast %18 : vector<64x1xi1> to vector<64x1xi1>
    %638 = vector.broadcast %637 : vector<64x1xi1> to vector<64x64xi1>
    %639 = arith.select %638, %635, %636 : vector<64x64xi1>, vector<64x64xbf16>
    %c7_510 = arith.constant 7 : index
    %c0_511 = arith.constant 0 : index
    %c0_512 = arith.constant 0 : index
    %640 = vector.load %arg4[%c7_510, %c0_511, %c0_512] : memref<8x576x64xbf16, #tpu.memory_space<vmem>>, vector<1x64x64xbf16>
    %641 = vector.shape_cast %640 : vector<1x64x64xbf16> to vector<64x64xbf16>
    %cst_513 = arith.constant dense<0.000000e+00> : vector<64x64xf32>
    %642 = tpu.matmul %639, %641, %cst_513 {dimension_numbers = #tpu.dot_dimension_numbers<[1], [0], [0], [1], [0, 0, 1, 1], [], []>} : vector<64x64xbf16>, vector<64x64xbf16>, vector<64x64xf32> -> vector<64x64xf32>
    %c8_514 = arith.constant 8 : index
    %c0_515 = arith.constant 0 : index
    %643 = vector.load %arg9[%c8_514, %c0_515] : memref<96x64xbf16, #tpu.memory_space<vmem>>, vector<64x64xbf16>
    %c7_516 = arith.constant 7 : index
    %c64_517 = arith.constant 64 : index
    %c0_518 = arith.constant 0 : index
    %644 = vector.load %arg4[%c7_516, %c64_517, %c0_518] : memref<8x576x64xbf16, #tpu.memory_space<vmem>>, vector<1x64x64xbf16>
    %645 = vector.shape_cast %644 : vector<1x64x64xbf16> to vector<64x64xbf16>
    %cst_519 = arith.constant dense<0.000000e+00> : vector<64x64xf32>
    %646 = tpu.matmul %643, %645, %cst_519 {dimension_numbers = #tpu.dot_dimension_numbers<[1], [0], [0], [1], [0, 0, 1, 1], [], []>} : vector<64x64xbf16>, vector<64x64xbf16>, vector<64x64xf32> -> vector<64x64xf32>
    %647 = arith.addf %642, %646 : vector<64x64xf32>
    %c9_520 = arith.constant 9 : index
    %c0_521 = arith.constant 0 : index
    %648 = vector.load %arg9[%c9_520, %c0_521] : memref<96x64xbf16, #tpu.memory_space<vmem>>, vector<64x64xbf16>
    %cst_522 = arith.constant 0.000000e+00 : bf16
    %649 = vector.broadcast %cst_522 : bf16 to vector<64x64xbf16>
    %650 = vector.shape_cast %20 : vector<64x1xi1> to vector<64x1xi1>
    %651 = vector.broadcast %650 : vector<64x1xi1> to vector<64x64xi1>
    %652 = arith.select %651, %648, %649 : vector<64x64xi1>, vector<64x64xbf16>
    %c7_523 = arith.constant 7 : index
    %c128_524 = arith.constant 128 : index
    %c0_525 = arith.constant 0 : index
    %653 = vector.load %arg4[%c7_523, %c128_524, %c0_525] : memref<8x576x64xbf16, #tpu.memory_space<vmem>>, vector<1x64x64xbf16>
    %654 = vector.shape_cast %653 : vector<1x64x64xbf16> to vector<64x64xbf16>
    %cst_526 = arith.constant dense<0.000000e+00> : vector<64x64xf32>
    %655 = tpu.matmul %652, %654, %cst_526 {dimension_numbers = #tpu.dot_dimension_numbers<[1], [0], [0], [1], [0, 0, 1, 1], [], []>} : vector<64x64xbf16>, vector<64x64xbf16>, vector<64x64xf32> -> vector<64x64xf32>
    %656 = arith.addf %647, %655 : vector<64x64xf32>
    %c15_527 = arith.constant 15 : index
    %c0_528 = arith.constant 0 : index
    %657 = vector.load %arg9[%c15_527, %c0_528] : memref<96x64xbf16, #tpu.memory_space<vmem>>, vector<64x64xbf16>
    %cst_529 = arith.constant 0.000000e+00 : bf16
    %658 = vector.broadcast %cst_529 : bf16 to vector<64x64xbf16>
    %659 = vector.shape_cast %18 : vector<64x1xi1> to vector<64x1xi1>
    %660 = vector.broadcast %659 : vector<64x1xi1> to vector<64x64xi1>
    %661 = arith.select %660, %657, %658 : vector<64x64xi1>, vector<64x64xbf16>
    %c7_530 = arith.constant 7 : index
    %c192_531 = arith.constant 192 : index
    %c0_532 = arith.constant 0 : index
    %662 = vector.load %arg4[%c7_530, %c192_531, %c0_532] : memref<8x576x64xbf16, #tpu.memory_space<vmem>>, vector<1x64x64xbf16>
    %663 = vector.shape_cast %662 : vector<1x64x64xbf16> to vector<64x64xbf16>
    %cst_533 = arith.constant dense<0.000000e+00> : vector<64x64xf32>
    %664 = tpu.matmul %661, %663, %cst_533 {dimension_numbers = #tpu.dot_dimension_numbers<[1], [0], [0], [1], [0, 0, 1, 1], [], []>} : vector<64x64xbf16>, vector<64x64xbf16>, vector<64x64xf32> -> vector<64x64xf32>
    %665 = arith.addf %656, %664 : vector<64x64xf32>
    %c16_534 = arith.constant 16 : index
    %c0_535 = arith.constant 0 : index
    %666 = vector.load %arg9[%c16_534, %c0_535] : memref<96x64xbf16, #tpu.memory_space<vmem>>, vector<64x64xbf16>
    %c7_536 = arith.constant 7 : index
    %c256_537 = arith.constant 256 : index
    %c0_538 = arith.constant 0 : index
    %667 = vector.load %arg4[%c7_536, %c256_537, %c0_538] : memref<8x576x64xbf16, #tpu.memory_space<vmem>>, vector<1x64x64xbf16>
    %668 = vector.shape_cast %667 : vector<1x64x64xbf16> to vector<64x64xbf16>
    %cst_539 = arith.constant dense<0.000000e+00> : vector<64x64xf32>
    %669 = tpu.matmul %666, %668, %cst_539 {dimension_numbers = #tpu.dot_dimension_numbers<[1], [0], [0], [1], [0, 0, 1, 1], [], []>} : vector<64x64xbf16>, vector<64x64xbf16>, vector<64x64xf32> -> vector<64x64xf32>
    %670 = arith.addf %665, %669 : vector<64x64xf32>
    %c17_540 = arith.constant 17 : index
    %c0_541 = arith.constant 0 : index
    %671 = vector.load %arg9[%c17_540, %c0_541] : memref<96x64xbf16, #tpu.memory_space<vmem>>, vector<64x64xbf16>
    %cst_542 = arith.constant 0.000000e+00 : bf16
    %672 = vector.broadcast %cst_542 : bf16 to vector<64x64xbf16>
    %673 = vector.shape_cast %20 : vector<64x1xi1> to vector<64x1xi1>
    %674 = vector.broadcast %673 : vector<64x1xi1> to vector<64x64xi1>
    %675 = arith.select %674, %671, %672 : vector<64x64xi1>, vector<64x64xbf16>
    %c7_543 = arith.constant 7 : index
    %c320_544 = arith.constant 320 : index
    %c0_545 = arith.constant 0 : index
    %676 = vector.load %arg4[%c7_543, %c320_544, %c0_545] : memref<8x576x64xbf16, #tpu.memory_space<vmem>>, vector<1x64x64xbf16>
    %677 = vector.shape_cast %676 : vector<1x64x64xbf16> to vector<64x64xbf16>
    %cst_546 = arith.constant dense<0.000000e+00> : vector<64x64xf32>
    %678 = tpu.matmul %675, %677, %cst_546 {dimension_numbers = #tpu.dot_dimension_numbers<[1], [0], [0], [1], [0, 0, 1, 1], [], []>} : vector<64x64xbf16>, vector<64x64xbf16>, vector<64x64xf32> -> vector<64x64xf32>
    %679 = arith.addf %670, %678 : vector<64x64xf32>
    %c23_547 = arith.constant 23 : index
    %c0_548 = arith.constant 0 : index
    %680 = vector.load %arg9[%c23_547, %c0_548] : memref<96x64xbf16, #tpu.memory_space<vmem>>, vector<64x64xbf16>
    %cst_549 = arith.constant 0.000000e+00 : bf16
    %681 = vector.broadcast %cst_549 : bf16 to vector<64x64xbf16>
    %682 = vector.shape_cast %18 : vector<64x1xi1> to vector<64x1xi1>
    %683 = vector.broadcast %682 : vector<64x1xi1> to vector<64x64xi1>
    %684 = arith.select %683, %680, %681 : vector<64x64xi1>, vector<64x64xbf16>
    %c7_550 = arith.constant 7 : index
    %c384_551 = arith.constant 384 : index
    %c0_552 = arith.constant 0 : index
    %685 = vector.load %arg4[%c7_550, %c384_551, %c0_552] : memref<8x576x64xbf16, #tpu.memory_space<vmem>>, vector<1x64x64xbf16>
    %686 = vector.shape_cast %685 : vector<1x64x64xbf16> to vector<64x64xbf16>
    %cst_553 = arith.constant dense<0.000000e+00> : vector<64x64xf32>
    %687 = tpu.matmul %684, %686, %cst_553 {dimension_numbers = #tpu.dot_dimension_numbers<[1], [0], [0], [1], [0, 0, 1, 1], [], []>} : vector<64x64xbf16>, vector<64x64xbf16>, vector<64x64xf32> -> vector<64x64xf32>
    %688 = arith.addf %679, %687 : vector<64x64xf32>
    %c24_554 = arith.constant 24 : index
    %c0_555 = arith.constant 0 : index
    %689 = vector.load %arg9[%c24_554, %c0_555] : memref<96x64xbf16, #tpu.memory_space<vmem>>, vector<64x64xbf16>
    %c7_556 = arith.constant 7 : index
    %c448_557 = arith.constant 448 : index
    %c0_558 = arith.constant 0 : index
    %690 = vector.load %arg4[%c7_556, %c448_557, %c0_558] : memref<8x576x64xbf16, #tpu.memory_space<vmem>>, vector<1x64x64xbf16>
    %691 = vector.shape_cast %690 : vector<1x64x64xbf16> to vector<64x64xbf16>
    %cst_559 = arith.constant dense<0.000000e+00> : vector<64x64xf32>
    %692 = tpu.matmul %689, %691, %cst_559 {dimension_numbers = #tpu.dot_dimension_numbers<[1], [0], [0], [1], [0, 0, 1, 1], [], []>} : vector<64x64xbf16>, vector<64x64xbf16>, vector<64x64xf32> -> vector<64x64xf32>
    %693 = arith.addf %688, %692 : vector<64x64xf32>
    %c25_560 = arith.constant 25 : index
    %c0_561 = arith.constant 0 : index
    %694 = vector.load %arg9[%c25_560, %c0_561] : memref<96x64xbf16, #tpu.memory_space<vmem>>, vector<64x64xbf16>
    %cst_562 = arith.constant 0.000000e+00 : bf16
    %695 = vector.broadcast %cst_562 : bf16 to vector<64x64xbf16>
    %696 = vector.shape_cast %20 : vector<64x1xi1> to vector<64x1xi1>
    %697 = vector.broadcast %696 : vector<64x1xi1> to vector<64x64xi1>
    %698 = arith.select %697, %694, %695 : vector<64x64xi1>, vector<64x64xbf16>
    %c7_563 = arith.constant 7 : index
    %c512_564 = arith.constant 512 : index
    %c0_565 = arith.constant 0 : index
    %699 = vector.load %arg4[%c7_563, %c512_564, %c0_565] : memref<8x576x64xbf16, #tpu.memory_space<vmem>>, vector<1x64x64xbf16>
    %700 = vector.shape_cast %699 : vector<1x64x64xbf16> to vector<64x64xbf16>
    %cst_566 = arith.constant dense<0.000000e+00> : vector<64x64xf32>
    %701 = tpu.matmul %698, %700, %cst_566 {dimension_numbers = #tpu.dot_dimension_numbers<[1], [0], [0], [1], [0, 0, 1, 1], [], []>} : vector<64x64xbf16>, vector<64x64xbf16>, vector<64x64xf32> -> vector<64x64xf32>
    %702 = arith.addf %693, %701 : vector<64x64xf32>
    %703 = vector.broadcast %634 : vector<1x64xf32> to vector<64x64xf32>
    %704 = arith.addf %702, %703 : vector<64x64xf32>
    %705 = arith.addf %704, %554 : vector<64x64xf32>
    %cst_567 = arith.constant 0.000000e+00 : f32
    %706 = vector.broadcast %cst_567 : f32 to vector<64x64xf32>
    %707 = arith.maximumf %705, %706 : vector<64x64xf32>
    %708 = arith.truncf %707 : vector<64x64xf32> to vector<64x64xbf16>
    %c16_568 = arith.constant 16 : index
    %c0_569 = arith.constant 0 : index
    %709 = vector.load %arg9[%c16_568, %c0_569] : memref<96x64xbf16, #tpu.memory_space<vmem>>, vector<64x64xbf16>
    tpu.vector_store %arg9[%c16_568, %c0_569], %708 {strides = array<i32>} : memref<96x64xbf16, #tpu.memory_space<vmem>>, vector<64x64xbf16>,
    %c0_570 = arith.constant 0 : index
    %c0_571 = arith.constant 0 : index
    %710 = vector.load %arg7[%c0_570, %c0_571] : memref<1x128xf32, #tpu.memory_space<vmem>>, vector<1x128xf32>
    %c7_572 = arith.constant 7 : index
    %c0_573 = arith.constant 0 : index
    %711 = vector.load %arg9[%c7_572, %c0_573] : memref<96x64xbf16, #tpu.memory_space<vmem>>, vector<64x64xbf16>
    %cst_574 = arith.constant 0.000000e+00 : bf16
    %712 = vector.broadcast %cst_574 : bf16 to vector<64x64xbf16>
    %713 = vector.shape_cast %18 : vector<64x1xi1> to vector<64x1xi1>
    %714 = vector.broadcast %713 : vector<64x1xi1> to vector<64x64xi1>
    %715 = arith.select %714, %711, %712 : vector<64x64xi1>, vector<64x64xbf16>
    %c0_575 = arith.constant 0 : index
    %c0_576 = arith.constant 0 : index
    %716 = vector.load %arg6[%c0_575, %c0_576] : memref<576x128xbf16, #tpu.memory_space<vmem>>, vector<64x128xbf16>
    %cst_577 = arith.constant dense<0.000000e+00> : vector<64x128xf32>
    %717 = tpu.matmul %715, %716, %cst_577 {dimension_numbers = #tpu.dot_dimension_numbers<[1], [0], [0], [1], [0, 0, 1, 1], [], []>} : vector<64x64xbf16>, vector<64x128xbf16>, vector<64x128xf32> -> vector<64x128xf32>
    %c8_578 = arith.constant 8 : index
    %c0_579 = arith.constant 0 : index
    %718 = vector.load %arg9[%c8_578, %c0_579] : memref<96x64xbf16, #tpu.memory_space<vmem>>, vector<64x64xbf16>
    %c64_580 = arith.constant 64 : index
    %c0_581 = arith.constant 0 : index
    %719 = vector.load %arg6[%c64_580, %c0_581] : memref<576x128xbf16, #tpu.memory_space<vmem>>, vector<64x128xbf16>
    %cst_582 = arith.constant dense<0.000000e+00> : vector<64x128xf32>
    %720 = tpu.matmul %718, %719, %cst_582 {dimension_numbers = #tpu.dot_dimension_numbers<[1], [0], [0], [1], [0, 0, 1, 1], [], []>} : vector<64x64xbf16>, vector<64x128xbf16>, vector<64x128xf32> -> vector<64x128xf32>
    %721 = arith.addf %717, %720 : vector<64x128xf32>
    %c9_583 = arith.constant 9 : index
    %c0_584 = arith.constant 0 : index
    %722 = vector.load %arg9[%c9_583, %c0_584] : memref<96x64xbf16, #tpu.memory_space<vmem>>, vector<64x64xbf16>
    %cst_585 = arith.constant 0.000000e+00 : bf16
    %723 = vector.broadcast %cst_585 : bf16 to vector<64x64xbf16>
    %724 = vector.shape_cast %20 : vector<64x1xi1> to vector<64x1xi1>
    %725 = vector.broadcast %724 : vector<64x1xi1> to vector<64x64xi1>
    %726 = arith.select %725, %722, %723 : vector<64x64xi1>, vector<64x64xbf16>
    %c128_586 = arith.constant 128 : index
    %c0_587 = arith.constant 0 : index
    %727 = vector.load %arg6[%c128_586, %c0_587] : memref<576x128xbf16, #tpu.memory_space<vmem>>, vector<64x128xbf16>
    %cst_588 = arith.constant dense<0.000000e+00> : vector<64x128xf32>
    %728 = tpu.matmul %726, %727, %cst_588 {dimension_numbers = #tpu.dot_dimension_numbers<[1], [0], [0], [1], [0, 0, 1, 1], [], []>} : vector<64x64xbf16>, vector<64x128xbf16>, vector<64x128xf32> -> vector<64x128xf32>
    %729 = arith.addf %721, %728 : vector<64x128xf32>
    %c15_589 = arith.constant 15 : index
    %c0_590 = arith.constant 0 : index
    %730 = vector.load %arg9[%c15_589, %c0_590] : memref<96x64xbf16, #tpu.memory_space<vmem>>, vector<64x64xbf16>
    %cst_591 = arith.constant 0.000000e+00 : bf16
    %731 = vector.broadcast %cst_591 : bf16 to vector<64x64xbf16>
    %732 = vector.shape_cast %18 : vector<64x1xi1> to vector<64x1xi1>
    %733 = vector.broadcast %732 : vector<64x1xi1> to vector<64x64xi1>
    %734 = arith.select %733, %730, %731 : vector<64x64xi1>, vector<64x64xbf16>
    %c192_592 = arith.constant 192 : index
    %c0_593 = arith.constant 0 : index
    %735 = vector.load %arg6[%c192_592, %c0_593] : memref<576x128xbf16, #tpu.memory_space<vmem>>, vector<64x128xbf16>
    %cst_594 = arith.constant dense<0.000000e+00> : vector<64x128xf32>
    %736 = tpu.matmul %734, %735, %cst_594 {dimension_numbers = #tpu.dot_dimension_numbers<[1], [0], [0], [1], [0, 0, 1, 1], [], []>} : vector<64x64xbf16>, vector<64x128xbf16>, vector<64x128xf32> -> vector<64x128xf32>
    %737 = arith.addf %729, %736 : vector<64x128xf32>
    %c16_595 = arith.constant 16 : index
    %c0_596 = arith.constant 0 : index
    %738 = vector.load %arg9[%c16_595, %c0_596] : memref<96x64xbf16, #tpu.memory_space<vmem>>, vector<64x64xbf16>
    %c256_597 = arith.constant 256 : index
    %c0_598 = arith.constant 0 : index
    %739 = vector.load %arg6[%c256_597, %c0_598] : memref<576x128xbf16, #tpu.memory_space<vmem>>, vector<64x128xbf16>
    %cst_599 = arith.constant dense<0.000000e+00> : vector<64x128xf32>
    %740 = tpu.matmul %738, %739, %cst_599 {dimension_numbers = #tpu.dot_dimension_numbers<[1], [0], [0], [1], [0, 0, 1, 1], [], []>} : vector<64x64xbf16>, vector<64x128xbf16>, vector<64x128xf32> -> vector<64x128xf32>
    %741 = arith.addf %737, %740 : vector<64x128xf32>
    %c17_600 = arith.constant 17 : index
    %c0_601 = arith.constant 0 : index
    %742 = vector.load %arg9[%c17_600, %c0_601] : memref<96x64xbf16, #tpu.memory_space<vmem>>, vector<64x64xbf16>
    %cst_602 = arith.constant 0.000000e+00 : bf16
    %743 = vector.broadcast %cst_602 : bf16 to vector<64x64xbf16>
    %744 = vector.shape_cast %20 : vector<64x1xi1> to vector<64x1xi1>
    %745 = vector.broadcast %744 : vector<64x1xi1> to vector<64x64xi1>
    %746 = arith.select %745, %742, %743 : vector<64x64xi1>, vector<64x64xbf16>
    %c320_603 = arith.constant 320 : index
    %c0_604 = arith.constant 0 : index
    %747 = vector.load %arg6[%c320_603, %c0_604] : memref<576x128xbf16, #tpu.memory_space<vmem>>, vector<64x128xbf16>
    %cst_605 = arith.constant dense<0.000000e+00> : vector<64x128xf32>
    %748 = tpu.matmul %746, %747, %cst_605 {dimension_numbers = #tpu.dot_dimension_numbers<[1], [0], [0], [1], [0, 0, 1, 1], [], []>} : vector<64x64xbf16>, vector<64x128xbf16>, vector<64x128xf32> -> vector<64x128xf32>
    %749 = arith.addf %741, %748 : vector<64x128xf32>
    %c23_606 = arith.constant 23 : index
    %c0_607 = arith.constant 0 : index
    %750 = vector.load %arg9[%c23_606, %c0_607] : memref<96x64xbf16, #tpu.memory_space<vmem>>, vector<64x64xbf16>
    %cst_608 = arith.constant 0.000000e+00 : bf16
    %751 = vector.broadcast %cst_608 : bf16 to vector<64x64xbf16>
    %752 = vector.shape_cast %18 : vector<64x1xi1> to vector<64x1xi1>
    %753 = vector.broadcast %752 : vector<64x1xi1> to vector<64x64xi1>
    %754 = arith.select %753, %750, %751 : vector<64x64xi1>, vector<64x64xbf16>
    %c384_609 = arith.constant 384 : index
    %c0_610 = arith.constant 0 : index
    %755 = vector.load %arg6[%c384_609, %c0_610] : memref<576x128xbf16, #tpu.memory_space<vmem>>, vector<64x128xbf16>
    %cst_611 = arith.constant dense<0.000000e+00> : vector<64x128xf32>
    %756 = tpu.matmul %754, %755, %cst_611 {dimension_numbers = #tpu.dot_dimension_numbers<[1], [0], [0], [1], [0, 0, 1, 1], [], []>} : vector<64x64xbf16>, vector<64x128xbf16>, vector<64x128xf32> -> vector<64x128xf32>
    %757 = arith.addf %749, %756 : vector<64x128xf32>
    %c24_612 = arith.constant 24 : index
    %c0_613 = arith.constant 0 : index
    %758 = vector.load %arg9[%c24_612, %c0_613] : memref<96x64xbf16, #tpu.memory_space<vmem>>, vector<64x64xbf16>
    %c448_614 = arith.constant 448 : index
    %c0_615 = arith.constant 0 : index
    %759 = vector.load %arg6[%c448_614, %c0_615] : memref<576x128xbf16, #tpu.memory_space<vmem>>, vector<64x128xbf16>
    %cst_616 = arith.constant dense<0.000000e+00> : vector<64x128xf32>
    %760 = tpu.matmul %758, %759, %cst_616 {dimension_numbers = #tpu.dot_dimension_numbers<[1], [0], [0], [1], [0, 0, 1, 1], [], []>} : vector<64x64xbf16>, vector<64x128xbf16>, vector<64x128xf32> -> vector<64x128xf32>
    %761 = arith.addf %757, %760 : vector<64x128xf32>
    %c25_617 = arith.constant 25 : index
    %c0_618 = arith.constant 0 : index
    %762 = vector.load %arg9[%c25_617, %c0_618] : memref<96x64xbf16, #tpu.memory_space<vmem>>, vector<64x64xbf16>
    %cst_619 = arith.constant 0.000000e+00 : bf16
    %763 = vector.broadcast %cst_619 : bf16 to vector<64x64xbf16>
    %764 = vector.shape_cast %20 : vector<64x1xi1> to vector<64x1xi1>
    %765 = vector.broadcast %764 : vector<64x1xi1> to vector<64x64xi1>
    %766 = arith.select %765, %762, %763 : vector<64x64xi1>, vector<64x64xbf16>
    %c512_620 = arith.constant 512 : index
    %c0_621 = arith.constant 0 : index
    %767 = vector.load %arg6[%c512_620, %c0_621] : memref<576x128xbf16, #tpu.memory_space<vmem>>, vector<64x128xbf16>
    %cst_622 = arith.constant dense<0.000000e+00> : vector<64x128xf32>
    %768 = tpu.matmul %766, %767, %cst_622 {dimension_numbers = #tpu.dot_dimension_numbers<[1], [0], [0], [1], [0, 0, 1, 1], [], []>} : vector<64x64xbf16>, vector<64x128xbf16>, vector<64x128xf32> -> vector<64x128xf32>
    %769 = arith.addf %761, %768 : vector<64x128xf32>
    %770 = vector.broadcast %710 : vector<1x128xf32> to vector<64x128xf32>
    %771 = arith.addf %769, %770 : vector<64x128xf32>
    %c0_623 = arith.constant 0 : index
    %c0_624 = arith.constant 0 : index
    %c0_625 = arith.constant 0 : index
    %772 = vector.load %arg8[%c0_623, %c0_624, %c0_625] : memref<1x64x128xf32, #tpu.memory_space<vmem>>, vector<1x64x128xf32>
    %773 = vector.shape_cast %772 : vector<1x64x128xf32> to vector<64x128xf32>
    %774 = vector.shape_cast %771 : vector<64x128xf32> to vector<1x64x128xf32>
    tpu.vector_store %arg8[%c0_623, %c0_624, %c0_625], %774 {strides = array<i32>} : memref<1x64x128xf32, #tpu.memory_space<vmem>>, vector<1x64x128xf32>,
    return
  }
  func.func @transform_0(%arg0: i32) -> (i32, i32, i32) {
    %c0_i32 = arith.constant 0 : i32
    %c0_i32_0 = arith.constant 0 : i32
    %c0_i32_1 = arith.constant 0 : i32
    return %arg0, %c0_i32, %c0_i32_0 : i32, i32, i32
  }
  func.func @transform_1(%arg0: i32) -> (i32, i32) {
    %c0_i32 = arith.constant 0 : i32
    %c0_i32_0 = arith.constant 0 : i32
    %c0_i32_1 = arith.constant 0 : i32
    return %c0_i32, %c0_i32_0 : i32, i32
  }
  func.func @transform_2(%arg0: i32) -> (i32, i32) {
    %c0_i32 = arith.constant 0 : i32
    %c0_i32_0 = arith.constant 0 : i32
    %c0_i32_1 = arith.constant 0 : i32
    return %c0_i32, %c0_i32_0 : i32, i32
  }
  func.func @transform_3(%arg0: i32) -> (i32, i32, i32) {
    %c0_i32 = arith.constant 0 : i32
    %c0_i32_0 = arith.constant 0 : i32
    %c0_i32_1 = arith.constant 0 : i32
    %c0_i32_2 = arith.constant 0 : i32
    return %c0_i32, %c0_i32_0, %c0_i32_1 : i32, i32, i32
  }
  func.func @transform_4(%arg0: i32) -> (i32, i32, i32) {
    %c0_i32 = arith.constant 0 : i32
    %c0_i32_0 = arith.constant 0 : i32
    %c0_i32_1 = arith.constant 0 : i32
    %c0_i32_2 = arith.constant 0 : i32
    return %c0_i32, %c0_i32_0, %c0_i32_1 : i32, i32, i32
  }
  func.func @transform_5(%arg0: i32) -> (i32, i32) {
    %c0_i32 = arith.constant 0 : i32
    %c0_i32_0 = arith.constant 0 : i32
    %c0_i32_1 = arith.constant 0 : i32
    return %c0_i32, %c0_i32_0 : i32, i32
  }
  func.func @transform_6(%arg0: i32) -> (i32, i32) {
    %c0_i32 = arith.constant 0 : i32
    %c0_i32_0 = arith.constant 0 : i32
    %c0_i32_1 = arith.constant 0 : i32
    return %c0_i32, %c0_i32_0 : i32, i32
  }
  func.func @transform_7(%arg0: i32) -> (i32, i32, i32) {
    %c0_i32 = arith.constant 0 : i32
    %c0_i32_0 = arith.constant 0 : i32
    %c0_i32_1 = arith.constant 0 : i32
    return %arg0, %c0_i32, %c0_i32_0 : i32, i32, i32
  }
}

</mosaic_0001>

<bundles_post_ra>
// kernel: cnn_net_forward.1
= control target key start
LH: loop header
LB: loop body
LE: loop exit
PB: predicated region body
PF: predicated region fallthrough
CT: control target
= control target key end

     0   :  { %s19204_s24 = smov 0   ;;  %s23122_s0 = inlined_call_operand.vmem [shape: bf16[2,96,16], index: 0, kind: input, shape index: {}]   ;;  %s23123_s1 = inlined_call_operand.vmem [shape: bf16[144,64], index: 1, kind: input, shape index: {}]   ;;  %s23124_s2 = inlined_call_operand.vmem [shape: f32[1,64], index: 2, kind: input, shape index: {}]   ;;  %s23125_s3 = inlined_call_operand.vmem [shape: bf16[8,576,64], index: 3, kind: input, shape index: {}]   ;;  %s23126_s4 = inlined_call_operand.vmem [shape: f32[8,1,64], index: 4, kind: input, shape index: {}]   ;;  %s23127_s5 = inlined_call_operand.vmem [shape: bf16[576,128], index: 5, kind: input, shape index: {}]   ;;  %s23128_s6 = inlined_call_operand.vmem [shape: f32[1,128], index: 6, kind: input, shape index: {}]   ;;  %s23129_s7 = inlined_call_operand.vmem [shape: f32[2,64,128], index: 7, kind: output, shape index: {}]  }
   0x1 LB: > { %s14793_s25 = sadd.s32 4294967295, %s19161_s24   ;;  %p14797_p0 = scmp.ge.s32.totalorder %s19161_s24, 1  ;;  %s19161_s24 = sphi %s19204_s24, %s17_s24  }
   0x2   : > { %p237_p1 = scmp.lt.s32.totalorder %s19161_s24, 3 }
   0x4   : > { %p238_p2 = pnand %p14797_p0, %p237_p1 }
   0x6   : > { %241 = sbr.rel (%p238_p2) target bundleno = 3677 (0xe5d), region = 48 }
   0xd   : > { %v18805_v0 = vld [vmem:[%s23123_s1 + $0x8] sm:$0xff]   ;;  %p269_p3 = scmp.lt.s32.totalorder %s14793_s25, 1  ;;  %v282_v1 = vlaneseq  ;;  %v19227_v7 = vld [vmem:[%s23123_s1] sm:$0xff]   ;;  %vm582_vm6 = vcmask 130048   ;;  %v23133_v16 = vmov 0   ;;  %v19449_v41 = vld [vmem:[%s23123_s1 + $0x10] sm:$0xff]  }
   0xe   : > { %16761 = vmatprep.subr.bf16.mxu0 %v18805_v0  ;;  %vm23151_vm9 = vsmask.f32 3328  ;;  %vm453_vm10 = vsmask.f32 7440 }
   0xf   : > { %s23504_s25 = smov (!%p269_p3, %s14793_s25), 1  ;;  %v19217_v2 = vshrl.u32 %v282_v1, 7  ;;  %16762 = vmatpush3.bf16.msra.mxu0 %v18805_v0  ;;  %vm19302_vm14 = vmor %vm23151_vm9, %vm453_vm10  ;;  %vm683_vm10 = vsmask.f32 4352 }
  0x10   : > { %s18795_s28 = smul.u32 48, %s23504_s25  ;;  %16771 = vmatprep.subr.bf16.mxu0 %v19227_v7  ;;  %s16067_s19 = sshll.u32 %s23504_s25, 6 }
  0x11   : > { %v284_v3 = vadd.s32 8, %v19217_v2  ;;  %v285_v4 = vadd.s32 16, %v19217_v2  ;;  %v286_v5 = vadd.s32 24, %v19217_v2  ;;  %v295_v6 = vand.u32 7, %v19217_v2  ;;  %s278_s26 = scalar_lea.vmem %s23129_s7, %s16067_s19 }
  0x12   : > { %s19232_s10 = scalar_lea.vmem %s23122_s0, %s18795_s28  ;;  %v19317_v49 = vadd.s32 32, %v19217_v2  ;;  %v19340_v58 = vadd.s32 40, %v19217_v2  ;;  %v19343_v59 = vadd.s32 48, %v19217_v2  ;;  %v19353_v63 = vadd.s32 56, %v19217_v2 }
  0x13   : > { %v302_v8 = vand.u32 7, %v284_v3  ;;  %v309_v9 = vand.u32 7, %v285_v4  ;;  %v316_v10 = vand.u32 7, %v286_v5  ;;  %vm387_vm0 = vcmp.ne.s32.totalorder %v295_v6, 0  ;;  %v19240_v12 = vld [vmem:[%s19232_s10 + $0x4] sm:$0xf] }
  0x14   : > { %vm19235_vm1 = vcmp.ne.s32.totalorder %v295_v6, 7  ;;  %vm436_vm2 = vmpackc.low %vm387_vm0, %vm387_vm0  ;;  %v19251_v15 = vld [vmem:[%s19232_s10 + $0x8] sm:$0xf]  ;;  %v411_v51 = vld [vmem:[%s19232_s10] sm:$0x8]  ;;  %v323_v62 = vand.u32 7, %v19317_v49 }
  0x15   : > { %vm388_vm3 = vcmp.ne.s32.totalorder %v302_v8, 0  ;;  %vm19242_vm4 = vcmp.ne.s32.totalorder %v309_v9, 0  ;;  %vm19246_vm5 = vcmp.ne.s32.totalorder %v316_v10, 0  ;;  %vm836_vm7 = vmpackc.low %vm19235_vm1, %vm19235_vm1  ;;  %v19257_v17 = vsel %vm436_vm2, 65537, %v23133_v16  ;;  %v1097_v5 = vld [vmem:[%s19232_s10 + $0x4] sm:$0x8] }
  0x16   : > { %vm437_vm8 = vmpackc.low %vm388_vm3, %vm388_vm3  ;;  %v14801_v18 = vcombine.low %v19240_v12, %v19251_v15  ;;  %vm19261_vm11 = vcmp.ne.s32.totalorder %v302_v8, 7  ;;  %v456_v21 = vshll.u32 %v19257_v17, 16  ;;  %v459_v22 = vshrl.u32 %v19257_v17, 16  ;;  %v19369_v6 = vld [vmem:[%s19232_s10 + $0xc] sm:$0xf] }
  0x17   : > { %vm438_vm12 = vmpackc.low %vm19242_vm4, %vm19242_vm4  ;;  %v19269_v20 = vsel %vm437_vm8, 65537, %v23133_v16  ;;  %v19288_v26 = vsel %vm836_vm7, 65537, %v23133_v16  ;;  %vm19306_vm15 = vcmp.ne.s32.totalorder %v309_v9, 7  ;;  %vm19319_vm1 = vcmp.ne.s32.totalorder %v316_v10, 7  ;;  %v19372_v8 = vld [vmem:[%s19232_s10 + $0x10] sm:$0xf] }
  0x18   : > { %vm439_vm13 = vmpackc.low %vm19246_vm5, %vm19246_vm5  ;;  %v19277_v23 = vsel %vm438_vm12, 65537, %v23133_v16  ;;  %v465_v24 = vshll.u32 %v19269_v20, 16  ;;  %v469_v25 = vshrl.u32 %v19269_v20, 16  ;;  %16763 = vmatprep.mubr.msk.bf16.mxu0 %vm582_vm6, %v14801_v18  ;;  %v19293_v28 = vrot.slane %v456_v21, 5  ;;  %v19375_v2 = vld [vmem:[%s19232_s10 + $0x14] sm:$0xf] }
  0x19   : > { %v19291_v27 = vsel %vm439_vm13, 65537, %v23133_v16  ;;  %v461_v29 = vrot.slane %v459_v22, 4  ;;  %v475_v30 = vshll.u32 %v19277_v23, 16  ;;  %v479_v33 = vshrl.u32 %v19277_v23, 16  ;;  %vm837_vm0 = vmpackc.low %vm19261_vm11, %vm19261_vm11  ;;  %v1551_v9 = vld [vmem:[%s19232_s10 + $0x8] sm:$0x8] }
  0x1a   : > { %v467_v31 = vrot.slane %v465_v24, 5  ;;  %v471_v32 = vrot.slane %v469_v25, 4  ;;  %v485_v34 = vshll.u32 %v19291_v27, 16  ;;  %v489_v37 = vshrl.u32 %v19291_v27, 16  ;;  %vm838_vm4 = vmpackc.low %vm19306_vm15, %vm19306_vm15  ;;  %v414_v10 = vld [vmem:[%s19232_s10 + $0xc] sm:$0xf] }
  0x1b   : > { %v462_v35 = vor.u32 %v461_v29, %v19293_v28  ;;  %v477_v36 = vrot.slane %v475_v30, 5  ;;  %v481_v40 = vrot.slane %v479_v33, 4  ;;  %v856_v43 = vshrl.u32 %v19288_v26, 16  ;;  %vm839_vm5 = vmpackc.low %vm19319_vm1, %vm19319_vm1  ;;  %v19382_v13 = vld [vmem:[%s19232_s10 + $0x8] sm:$0xf] }
  0x1c   : > { %v472_v39 = vor.u32 %v471_v32, %v467_v31  ;;  %v487_v46 = vrot.slane %v485_v34, 5  ;;  %v491_v47 = vrot.slane %v489_v37, 4  ;;  %vm534_vm2 = vcmp.ne.s16.totalorder %v19293_v28, 0  ;;  %v19420_v32 = vld [vmem:[%s19232_s10 + $0xc] sm:$0xf] }
  0x1d   : > { %v463_v42 = vrot.slane %v462_v35, 4  ;;  %v482_v45 = vor.u32 %v481_v40, %v477_v36  ;;  %v19326_v53 = vsel %vm837_vm0, 65537, %v23133_v16  ;;  %v19337_v57 = vrot.slane %v856_v43, 7 }
  0x1e   : > { %v473_v44 = vrot.slane %v472_v39, 4  ;;  %v492_v56 = vor.u32 %v491_v47, %v487_v46  ;;  %v543_v60 = vsel %vm534_vm2, %v411_v51, 0  ;;  %v864_v61 = vshrl.u32 %v19326_v53, 16 }
  0x1f   : > { %v468_v48 = vsel %vm19302_vm14, %v463_v42, %v467_v31  ;;  %v483_v52 = vrot.slane %v482_v45, 4  ;;  %v19365_v4 = vsel %vm838_vm4, 65537, %v23133_v16  ;;  %v862_v14 = vrot.slane %v19337_v57, 4 }
  0x20   : > { %v478_v54 = vsel %vm19302_vm14, %v473_v44, %v477_v36  ;;  %vm19330_vm3 = vcmp.ne.s16.totalorder %v468_v48, 0  ;;  %v19379_v11 = vrot.slane %v492_v56, 4  ;;  %v867_v18 = vshll.u32 %v19326_v53, 16 }
  0x21   : > { %v488_v0 = vsel %vm19302_vm14, %v483_v52, %v487_v46  ;;  %vm19357_vm7 = vcmp.ne.s16.totalorder %v478_v54, 0  ;;  %v544_v3 = vsel %vm19330_vm3, %v19240_v12, 0  ;;  %v19390_v12 = vsel %vm839_vm5, 65537, %v23133_v16 }
  0x22   : > { %vm19394_vm8 = vcmp.ne.s16.totalorder %v488_v0, 0  ;;  %v545_v21 = vsel %vm19357_vm7, %v19251_v15, 0  ;;  %v19401_v22 = vcombine.low %v543_v60, %v544_v3  ;;  %v19403_v24 = vrot.slane %v864_v61, 7  ;;  %v19417_v15 = vld [vmem:[%s19232_s10 + $0x10] sm:$0xf] }
  0x23   : > { %v1553_v25 = vsel %vm534_vm2, %v1551_v9, 0  ;;  %v1554_v29 = vsel %vm19330_vm3, %v19369_v6, 0  ;;  %v1555_v30 = vsel %vm19357_vm7, %v19372_v8, 0  ;;  %v1556_v31 = vsel %vm19394_vm8, %v19375_v2, 0  ;;  %v19475_v9 = vld [vmem:[%s19232_s10 + $0x10] sm:$0xf] }
  0x24   : > { %v19424_v33 = vsel %vm534_vm2, %v1097_v5, 0  ;;  %v19429_v35 = vcombine.low %v1553_v25, %v1554_v29  ;;  %v19431_v36 = vcombine.low %v1555_v30, %v1556_v31  ;;  %v14889_v39 = vcombine.low %v19257_v17, %v19269_v20 }
  0x25   : > { %v19440_v28 = vcombine.low %v19277_v23, %v19291_v27  ;;  %v19444_v40 = vcombine.low %v19288_v26, %v19326_v53  ;;  %v546_v42 = vsel %vm19394_vm8, %v414_v10, 0  ;;  %vm23135_vm11 = vsmask.f32 256 }
  0x26   : > { %vm853_vm12 = vsmask.f32 4368  ;;  %vm23172_vm13 = vsmask.f32 7424  ;;  %v14910_v17 = vcombine.low %v19365_v4, %v19390_v12  ;;  %vm19457_vm15 = vcmp.ne.s32.totalorder %v323_v62, 0 }
  0x27   : > { %23200 = vst [vmem:[#allocation3_spill] sm:$0xff] %v19444_v40  ;;  %v14802_v23 = vcombine.low %v414_v10, %v19417_v15  ;;  %v2054_v27 = vshrl.u32 %v14889_v39, 16  ;;  %v2057_v43 = vshll.u32 %v14889_v39, 16  ;;  %v23132_v44 = vshrl.u32 %v19440_v28, 16  ;;  %vm440_vm0 = vmpackc.low %vm19457_vm15, %vm19457_vm15 }
  0x28   : > { %v2065_v45 = vshll.u32 %v19440_v28, 16  ;;  %v2390_v46 = vshrl.u32 %v19444_v40, 16  ;;  %v23130_v47 = vshll.u32 %v19444_v40, 16  ;;  %v2398_v48 = vshrl.u32 %v14910_v17, 16  ;;  %vm19537_vm1 = vmor %vm23135_vm11, %vm853_vm12 }
  0x29   : > { %v2401_v50 = vshll.u32 %v14910_v17, 16  ;;  %16764 = vmatmul.mubr.msk.bf16.vlgmr.msra.gmra.mrb[0].mxu0 %vm582_vm6, %v14802_v23  ;;  %v2056_v51 = vrot.slane %v2054_v27, 4  ;;  %v2059_v52 = vrot.slane %v2057_v43, 5  ;;  %v2064_v54 = vrot.slane %v23132_v44, 4 }
  0x2a   : > { %v2067_v56 = vrot.slane %v2065_v45, 5  ;;  %16772 = vmatpush3.bf16.msra.mxu0 %v19227_v7  ;;  %v2392_v60 = vrot.slane %v2390_v46, 3  ;;  %v2395_v61 = vrot.slane %v23130_v47, 4  ;;  %v2400_v0 = vrot.slane %v2398_v48, 3 }
  0x2b   : > { %v2403_v3 = vrot.slane %v2401_v50, 4  ;;  %16781 = vmatprep.subr.bf16.mxu0 %v19449_v41  ;;  %v685_v5 = vshrl.u32 %v19401_v22, 16  ;;  %v19477_v10 = vor.u32 %v2059_v52, %v2056_v51  ;;  %v19481_v7 = vrot.slane %v2057_v43, 1 }
  0x2c   : > { %v19479_v25 = vor.u32 %v2067_v56, %v2064_v54  ;;  %v14811_v29 = vcombine.low %v545_v21, %v546_v42  ;;  %v19483_v30 = vor.u32 %v2395_v61, %v2392_v60  ;;  %v19487_v39 = vrot.slane %v2398_v48, 7  ;;  %v19503_v21 = vld [vmem:[%s19232_s10 + $0x14] sm:$0xf]  ;;  %v19506_v42 = vld [vmem:[%s19232_s10 + $0x18] sm:$0xf] }
  0x2d   : > { %23203 = vst [vmem:[#allocation4_spill] sm:$0xff] %v19477_v10  ;;  %23204 = vst [vmem:[#allocation5_spill] sm:$0xff] %v19481_v7  ;;  %v19485_v31 = vor.u32 %v2403_v3, %v2400_v0  ;;  %v2598_v23 = vor.u32 %v19481_v7, %v2054_v27  ;;  %v19495_v51 = vrot.slane %v2065_v45, 1  ;;  %v19497_v52 = vrot.slane %v2390_v46, 7  ;;  %v19518_v45 = vld [vmem:[%s19232_s10 + $0x1c] sm:$0xf] }
  0x2e   : > { %23205 = vst [vmem:[#allocation6_spill] sm:$0xff] %v19483_v30  ;;  %23206 = vst [vmem:[#allocation7_spill] sm:$0xff] %v19487_v39  ;;  %v19492_v17 = vsel %vm23151_vm9, %v19477_v10, %v19479_v25  ;;  %v688_v43 = vshll.u32 %v19401_v22, 16  ;;  %v869_v20 = vor.u32 %v867_v18, %v19403_v24  ;;  %v2896_v22 = vor.u32 %v19487_v39, %v2401_v50  ;;  %v19529_v54 = vld [vmem:[%s19232_s10 + $0x20] sm:$0xf] }
  0x2f   : > { %23207 = vst [vmem:[#allocation8_spill] sm:$0xff] %v19492_v17  ;;  %23208 = vst [vmem:[#allocation9_spill] sm:$0xff] %v19497_v52  ;;  %v19515_v27 = vsel %vm683_vm10, %v19483_v30, %v19485_v31  ;;  %v19525_v46 = vsel %vm23172_vm13, %v2598_v23, %v19495_v51  ;;  %v19531_v56 = vrot.slane %v685_v5, 3  ;;  %v693_v60 = vshrl.u32 %v14811_v29, 16  ;;  %v19573_v48 = vld [vmem:[%s19232_s10 + $0x18] sm:$0xf] }
  0x30   : > { %23209 = vst [vmem:[#allocation10_spill] sm:$0xff] %v19515_v27  ;;  %23210 = vst [vmem:[#allocation11_spill] sm:$0xff] %v19525_v46  ;;  %v448_v61 = vsel %vm440_vm0, 65537, %v23133_v16  ;;  %v330_v0 = vand.u32 7, %v19340_v58  ;;  %v19543_v18 = vsel %vm23135_vm11, %v19497_v52, %v2896_v22  ;;  %vm19547_vm2 = vcmp.ne.s32.totalorder %v323_v62, 7 }
  0x31   : > { %23213 = vst [vmem:[#allocation12_spill] sm:$0xff] %v19543_v18  ;;  %v495_v3 = vshll.u32 %v448_v61, 16  ;;  %v23131_v58 = vand.u32 7, %v19343_v59  ;;  %v499_v23 = vshrl.u32 %v448_v61, 16  ;;  %v14803_v47 = vcombine.low %v19503_v21, %v19506_v42  ;;  %vm840_vm0 = vmpackc.low %vm19547_vm2, %vm19547_vm2  ;;  %v19636_v7 = vld [vmem:[%s19232_s10 + $0x1c] sm:$0xf] }
  0x32   : > { %vm392_vm4 = vcmp.ne.s32.totalorder %v330_v0, 0  ;;  %vm19552_vm5 = vcmp.ne.s32.totalorder %v330_v0, 7  ;;  %v696_v22 = vshll.u32 %v14811_v29, 16  ;;  %v14804_v62 = vcombine.low %v19518_v45, %v19529_v54  ;;  %v19664_v39 = vld [vmem:[%s19232_s10 + $0x14] sm:$0xf] }
  0x33   : > { %v497_v37 = vrot.slane %v495_v3, 5  ;;  %vm19560_vm12 = vcmp.ne.s32.totalorder %v23131_v58, 0  ;;  %vm441_vm15 = vmpackc.low %vm392_vm4, %vm392_vm4  ;;  %v19570_v0 = vsel %vm19537_vm1, %v862_v14, %v869_v20  ;;  %v501_v3 = vrot.slane %v499_v23, 4  ;;  %16767 = vmatprep.mubr.msk.bf16.mxu0 %vm582_vm6, %v14803_v47 }
  0x34   : > { %v449_v29 = vsel %vm441_vm15, 65537, %v23133_v16  ;;  %vm841_vm4 = vmpackc.low %vm19552_vm5, %vm19552_vm5  ;;  %16768 = vmatmul.mubr.msk.bf16.gmra.mrb[4].mxu0 %vm582_vm6, %v14804_v62  ;;  %v19588_v20 = vrot.slane %v688_v43, 4  ;;  %v695_v16 = vrot.slane %v693_v60, 3  ;;  %v698_v47 = vrot.slane %v696_v22, 4 }
  0x35   : > { %v498_v58 = vsel %vm19302_vm14, %v19379_v11, %v497_v37  ;;  %v505_v34 = vshll.u32 %v449_v29, 16  ;;  %v509_v44 = vshrl.u32 %v449_v29, 16  ;;  %vm442_vm11 = vmpackc.low %vm19560_vm12, %vm19560_vm12  ;;  %v502_v11 = vor.u32 %v501_v3, %v497_v37 }
  0x36   : > { %vm19590_vm15 = vcmp.ne.s16.totalorder %v498_v58, 0  ;;  %v23222_v5 = vmov 0   ;;  %vm927_vm5 = vcmp.ne.s16.totalorder %v19570_v0, 0  ;;  %v14891_v22 = vcombine.low %v448_v61, %v449_v29  ;;  %v1842_v0 = vld [vmem:[%s19232_s10 + $0x28] sm:$0xf] }
  0x37   : > { %v19603_v62 = vsel %vm840_vm0, 65537, %v23222_v5  ;;  %v1557_v43 = vsel %vm19590_vm15, %v19573_v48, 0  ;;  %v507_v60 = vrot.slane %v505_v34, 5  ;;  %v503_v58 = vrot.slane %v502_v11, 4 }
  0x38   : > { %v511_v49 = vrot.slane %v509_v44, 4  ;;  %v19610_v37 = vsel %vm841_vm4, 65537, %v23222_v5  ;;  %v547_v50 = vsel %vm19590_vm15, %v19417_v15, 0  ;;  %v450_v3 = vsel %vm442_vm11, 65537, %v23222_v5 }
  0x39   : > { %v19618_v14 = vcombine.low %v19603_v62, %v19610_v37  ;;  %v23223_v34 = vand.u32 7, %v19353_v63  ;;  %v508_v44 = vsel %vm19302_vm14, %v503_v58, %v507_v60  ;;  %v2071_v29 = vshrl.u32 %v14891_v22, 16 }
  0x3a   : > { %v512_v61 = vor.u32 %v511_v49, %v507_v60  ;;  %v2074_v11 = vshll.u32 %v14891_v22, 16  ;;  %v23226_v15 = vshrl.u32 %v19440_v28, 16  ;;  %vm19631_vm11 = vcmp.ne.s16.totalorder %v508_v44, 0 }
  0x3b   : > { %vm19622_vm2 = vcmp.ne.s32.totalorder %v23223_v34, 0  ;;  %v23150_v34 = vshrl.u32 %v19618_v14, 16  ;;  %v515_v27 = vshll.u32 %v450_v3, 16  ;;  %v548_v60 = vsel %vm19631_vm11, %v19503_v21, 0 }
  0x3c   : > { %v2601_v52 = vor.u32 %v19495_v51, %v23226_v15  ;;  %v1558_v28 = vsel %vm19631_vm11, %v19636_v7, 0  ;;  %v691_v51 = vor.u32 %v19588_v20, %v19531_v56  ;;  %v14812_v58 = vcombine.low %v547_v50, %v548_v60  ;;  %vm443_vm12 = vmpackc.low %vm19622_vm2, %vm19622_vm2 }
  0x3d   : > { %v19648_v49 = vcombine.low %v1557_v43, %v1558_v28  ;;  %v2073_v22 = vrot.slane %v2071_v29, 4  ;;  %v699_v44 = vor.u32 %v698_v47, %v695_v16  ;;  %v513_v15 = vrot.slane %v512_v61, 4 }
  0x3e   : > { %v2076_v46 = vrot.slane %v2074_v11, 5  ;;  %v2409_v21 = vrot.slane %v23150_v34, 3  ;;  %v23229_v30 = vshll.u32 %v19618_v14, 16  ;;  %v702_v10 = vshrl.u32 %v14812_v58, 16 }
  0x3f   : > { %v705_v56 = vshll.u32 %v14812_v58, 16  ;;  %v2602_v20 = vrot.slane %v2074_v11, 1  ;;  %v519_v43 = vshrl.u32 %v450_v3, 16  ;;  %v517_v50 = vrot.slane %v515_v27, 5 }
  0x40   : > { %v2412_v17 = vrot.slane %v23229_v30, 4  ;;  %v2077_v60 = vor.u32 %v2076_v46, %v2073_v22  ;;  %v451_v18 = vsel %vm443_vm12, 65537, %v23222_v5  ;;  %v704_v16 = vrot.slane %v702_v10, 3 }
  0x41   : > { %v707_v47 = vrot.slane %v705_v56, 4  ;;  %v19661_v61 = vsel %vm23172_vm13, %v2601_v52, %v2602_v20  ;;  %v23230_v30 = vsel %vm19330_vm3, %v19382_v13, 0  ;;  %v19687_v55 = vsel %vm927_vm5, %v19382_v13, 0 }
  0x42   : > { %v19657_v28 = vor.u32 %v2412_v17, %v2409_v21  ;;  %v19671_v11 = vcombine.low %v19424_v33, %v23230_v30  ;;  %v518_v17 = vsel %vm19302_vm14, %v513_v15, %v517_v50  ;;  %v19677_v27 = vsel %vm23151_vm9, %v19479_v25, %v2077_v60 }
  0x43   : > { %v521_v52 = vrot.slane %v519_v43, 4  ;;  %v525_v46 = vshll.u32 %v451_v18, 16  ;;  %v529_v58 = vshrl.u32 %v451_v18, 16  ;;  %v19692_v22 = vcombine.low %v450_v3, %v451_v18  ;;  %v19705_v43 = vld [vmem:[%s23123_s1 + $0x18] sm:$0xff]  }
  0x44   : > { %v19682_v10 = vsel %vm683_vm10, %v19485_v31, %v19657_v28  ;;  %v700_v25 = vsel %vm683_vm10, %v691_v51, %v699_v44  ;;  %v19695_v15 = vor.u32 %v707_v47, %v704_v16  ;;  %vm19697_vm3 = vcmp.ne.s16.totalorder %v518_v17, 0 }
  0x45   : > { %23231 = vst [vmem:[#allocation13_spill] sm:$0xff] %v19692_v22  ;;  %v2604_v21 = vor.u32 %v2602_v20, %v2071_v29  ;;  %v522_v56 = vor.u32 %v521_v52, %v517_v50  ;;  %v527_v30 = vrot.slane %v525_v46, 5  ;;  %16773 = vmatprep.mubr.msk.bf16.mxu0 %vm582_vm6, %v700_v25  ;;  %v531_v3 = vrot.slane %v529_v58, 4 }
  0x46   : > { %v23149_v18 = vshrl.u32 %v19692_v22, 16  ;;  %v2083_v51 = vshll.u32 %v19692_v22, 16  ;;  %v709_v16 = vsel %vm683_vm10, %v699_v44, %v19695_v15  ;;  %v859_v29 = vshll.u32 %v19288_v26, 16 }
  0x47   : > { %v523_v47 = vrot.slane %v522_v56, 4  ;;  %16774 = vmatmul.mubr.msk.bf16.vlgmr.msra.gmra.mrb[0].mxu0 %vm582_vm6, %v709_v16  ;;  %v873_v20 = vshrl.u32 %v19365_v4, 16  ;;  %v876_v50 = vshll.u32 %v19365_v4, 16  ;;  %v532_v17 = vor.u32 %v531_v3, %v527_v30  ;;  %v19728_v4 = vld [vmem:[%s19232_s10 + $0x18] sm:$0xf] }
  0x48   : > { %v2082_v52 = vrot.slane %v23149_v18, 4  ;;  %v2085_v46 = vrot.slane %v2083_v51, 5  ;;  %v19717_v58 = vrot.slane %v2083_v51, 1  ;;  %16782 = vmatpush3.bf16.msra.mxu0 %v19449_v41  ;;  %v549_v44 = vsel %vm19697_vm3, %v19506_v42, 0 }
  0x49   : > { %v528_v26 = vsel %vm19302_vm14, %v523_v47, %v527_v30  ;;  %v871_v25 = vrot.slane %v19403_v24, 4  ;;  %v875_v56 = vrot.slane %v873_v20, 7  ;;  %16791 = vmatprep.subr.bf16.mxu0 %v19705_v43  ;;  %v19730_v3 = vrot.slane %v532_v17, 4 }
  0x4a   : > { %23234 = vst [vmem:[#allocation14_spill] sm:$0xff] %v19717_v58  ;;  %vm19732_vm0 = vcmp.ne.s16.totalorder %v528_v26, 0  ;;  %v19736_v41 = vor.u32 %v2085_v46, %v2082_v52  ;;  %v19740_v38 = vsel %vm23172_vm13, %v2604_v21, %v19717_v58  ;;  %v19746_v42 = vor.u32 %v859_v29, %v19337_v57 }
  0x4b   : > { %23237 = vst [vmem:[#allocation15_spill] sm:$0xff] %v19740_v38  ;;  %v550_v24 = vsel %vm19732_vm0, %v19518_v45, 0  ;;  %v878_v30 = vor.u32 %v876_v50, %v875_v56  ;;  %v882_v16 = vshrl.u32 %v19390_v12, 16  ;;  %v23238_v47 = vand.u32 7, %v19353_v63  ;;  %v811_v63 = vld [vmem:[%s19232_s10 + $0x4] sm:$0xf] }
  0x4c   : > { %vm23155_vm4 = vcmp.ne.s16.totalorder %v19730_v3, 0  ;;  %v14813_v21 = vcombine.low %v549_v44, %v550_v24  ;;  %v19758_v17 = vsel %vm23151_vm9, %v2077_v60, %v19736_v41  ;;  %v1104_v57 = vsel %vm19631_vm11, %v19728_v4, 0 }
  0x4d   : > { %vm19751_vm14 = vcmp.ne.s32.totalorder %v23238_v47, 7  ;;  %v551_v45 = vsel %vm23155_vm4, %v19529_v54, 0  ;;  %v19769_v29 = vsel %vm19537_vm1, %v871_v25, %v878_v30  ;;  %v885_v50 = vshll.u32 %v19390_v12, 16 }
  0x4e   : > { %v14814_v52 = vcombine.low %v551_v45, %v551_v45  ;;  %v711_v46 = vshrl.u32 %v14813_v21, 16  ;;  %v714_v44 = vshll.u32 %v14813_v21, 16  ;;  %v880_v60 = vrot.slane %v875_v56, 4  ;;  %vm843_vm9 = vmpackc.low %vm19751_vm14, %vm19751_vm14 }
  0x4f   : > { %v884_v26 = vrot.slane %v882_v16, 7  ;;  %vm23153_vm2 = vcmp.ne.s16.totalorder %v19746_v42, 0  ;;  %vm23152_vm12 = vcmp.ne.s16.totalorder %v19769_v29, 0  ;;  %v891_v24 = vshrl.u32 %v19603_v62, 16 }
  0x50   : > { %v713_v47 = vrot.slane %v711_v46, 3  ;;  %v716_v54 = vrot.slane %v714_v44, 4  ;;  %v720_v18 = vshrl.u32 %v14814_v52, 16  ;;  %v723_v34 = vshll.u32 %v14814_v52, 16 }
  0x51   : > { %v887_v33 = vor.u32 %v885_v50, %v884_v26  ;;  %v889_v25 = vrot.slane %v884_v26, 4  ;;  %v935_v12 = vsel %vm23153_vm2, %v811_v63, 0  ;;  %v937_v56 = vsel %vm23152_vm12, %v19420_v32, 0 }
  0x52   : > { %v717_v30 = vor.u32 %v716_v54, %v713_v47  ;;  %v722_v16 = vrot.slane %v720_v18, 3  ;;  %v725_v21 = vrot.slane %v723_v34, 4  ;;  %v14820_v45 = vcombine.low %v935_v12, %v19687_v55 }
  0x53   : > { %v19783_v46 = vsel %vm19537_vm1, %v880_v60, %v887_v33  ;;  %v893_v44 = vrot.slane %v891_v24, 7  ;;  %v894_v50 = vshll.u32 %v19603_v62, 16  ;;  %v900_v52 = vshrl.u32 %v19610_v37, 16 }
  0x54   : > { %v718_v63 = vsel %vm683_vm10, %v19695_v15, %v717_v30  ;;  %v726_v18 = vor.u32 %v725_v21, %v722_v16  ;;  %vm23154_vm12 = vcmp.ne.s16.totalorder %v19783_v46, 0  ;;  %v971_v34 = vshrl.u32 %v14820_v45, 16 }
  0x55   : > { %16777 = vmatprep.mubr.msk.bf16.mxu0 %vm582_vm6, %v718_v63  ;;  %v938_v55 = vsel %vm23154_vm12, %v19475_v9, 0  ;;  %v973_v62 = vshll.u32 %v14820_v45, 16  ;;  %v896_v33 = vor.u32 %v894_v50, %v893_v44  ;;  %v898_v60 = vrot.slane %v893_v44, 4 }
  0x56   : > { %v727_v26 = vsel %vm683_vm10, %v717_v30, %v726_v18  ;;  %v14821_v24 = vcombine.low %v937_v56, %v938_v55  ;;  %v902_v47 = vrot.slane %v900_v52, 7  ;;  %v903_v54 = vshll.u32 %v19610_v37, 16 }
  0x57   : > { %16778 = vmatmul.mubr.msk.bf16.gmra.mrb[4].mxu0 %vm582_vm6, %v727_v26  ;;  %v975_v15 = vrot.slane %v973_v62, 1  ;;  %v19802_v12 = vsel %vm19537_vm1, %v889_v25, %v896_v33  ;;  %v23241_v16 = vand.u32 7, %v19343_v59  ;;  %v851_v56 = vsel %vm843_vm9, 65537, %v23222_v5 }
  0x58   : > { %v978_v30 = vshll.u32 %v14821_v24, 16  ;;  %v982_v21 = vshrl.u32 %v14821_v24, 16  ;;  %v905_v37 = vor.u32 %v903_v54, %v902_v47  ;;  %vm930_vm12 = vcmp.ne.s16.totalorder %v19802_v12, 0 }
  0x59   : > { %vm401_vm2 = vcmp.ne.s32.totalorder %v23241_v16, 7  ;;  %v976_v45 = vor.u32 %v975_v15, %v971_v34  ;;  %v939_v25 = vsel %vm930_vm12, %v19664_v39, 0  ;;  %v907_v44 = vrot.slane %v902_v47, 4  ;;  %v19838_v15 = vld [vmem:[%s19232_s10 + $0x1c] sm:$0xf] }
  0x5a   : > { %vm842_vm4 = vmpackc.low %vm401_vm2, %vm401_vm2  ;;  %v980_v50 = vrot.slane %v978_v30, 1  ;;  %v19819_v20 = vsel %vm19537_vm1, %v898_v60, %v905_v37  ;;  %v918_v18 = vshrl.u32 %v851_v56, 16  ;;  %v921_v34 = vshll.u32 %v851_v56, 16  ;;  %v19843_v30 = vld [vmem:[%s19232_s10 + $0x20] sm:$0xf] }
  0x5b   : > { %v850_v59 = vsel %vm842_vm4, 65537, %v23222_v5  ;;  %vm931_vm9 = vcmp.ne.s16.totalorder %v19819_v20, 0  ;;  %v23242_v62 = vsel %vm19394_vm8, %v19475_v9, 0  ;;  %v23243_v33 = vsel %vm19357_vm7, %v19420_v32, 0 }
  0x5c   : > { %v909_v52 = vshrl.u32 %v850_v59, 16  ;;  %v912_v63 = vshll.u32 %v850_v59, 16  ;;  %v19822_v55 = vcombine.low %v850_v59, %v851_v56  ;;  %v14831_v26 = vcombine.low %v23243_v33, %v23242_v62 }
  0x5d   : > { %v981_v60 = vsel %vm23172_vm13, %v976_v45, %v980_v50  ;;  %v940_v24 = vsel %vm931_vm9, %v19728_v4, 0  ;;  %v920_v19 = vrot.slane %v918_v18, 7  ;;  %v984_v56 = vor.u32 %v982_v21, %v980_v50 }
  0x5e   : > { %v911_v47 = vrot.slane %v909_v52, 7  ;;  %16783 = vmatprep.mubr.msk.bf16.mxu0 %vm582_vm6, %v981_v60  ;;  %v14822_v54 = vcombine.low %v939_v25, %v940_v24  ;;  %v23157_v16 = vshrl.u32 %v19822_v55, 16  ;;  %v23156_v1 = vshll.u32 %v19822_v55, 16  ;;  %v819_v25 = vld [vmem:[%s19232_s10 + $0x24] sm:$0x1] }
  0x5f   : > { %v1134_v59 = vshrl.u32 %v19671_v11, 16  ;;  %v923_v33 = vor.u32 %v921_v34, %v920_v19  ;;  %v1137_v60 = vshll.u32 %v19671_v11, 16  ;;  %v925_v50 = vrot.slane %v920_v19, 4  ;;  %v19864_v11 = vld [vmem:[%s23123_s1 + $0x20] sm:$0xff]  }
  0x60   : > { %v914_v37 = vor.u32 %v912_v63, %v911_v47  ;;  %v916_v45 = vrot.slane %v911_v47, 4  ;;  %v986_v62 = vshll.u32 %v14822_v54, 16  ;;  %v2418_v52 = vrot.slane %v23157_v16, 3 }
  0x61   : > { %v990_v24 = vshrl.u32 %v14822_v54, 16  ;;  %v2421_v21 = vrot.slane %v23156_v1, 4  ;;  %v1136_v34 = vrot.slane %v1134_v59, 3  ;;  %vm23248_vm11 = vcmp.ne.s16.totalorder %v19746_v42, 0 }
  0x62   : > { %v19852_v18 = vsel %vm19537_vm1, %v907_v44, %v914_v37  ;;  %v988_v63 = vrot.slane %v986_v62, 1  ;;  %v19858_v47 = vsel %vm19537_vm1, %v916_v45, %v923_v33  ;;  %v23244_v44 = vsel %vm19590_vm15, %v19664_v39, 0 }
  0x63   : > { %vm932_vm7 = vcmp.ne.s16.totalorder %v19852_v18, 0  ;;  %v14832_v54 = vcombine.low %v23244_v44, %v1104_v57  ;;  %vm933_vm8 = vcmp.ne.s16.totalorder %v19858_v47, 0  ;;  %v19878_v19 = vor.u32 %v2421_v21, %v2418_v52 }
  0x64   : > { %v941_v53 = vsel %vm932_vm7, %v19838_v15, 0  ;;  %v989_v37 = vsel %vm23172_vm13, %v984_v56, %v988_v63  ;;  %v942_v40 = vsel %vm933_vm8, %v19843_v30, 0  ;;  %vm19884_vm1 = vcmp.ne.s16.totalorder %v925_v50, 0  ;;  %v19901_v50 = vld [vmem:[%s19232_s10 + $0x24] sm:$0xf] }
  0x65   : > { %v1391_v57 = vsel %vm927_vm5, %v19369_v6, 0  ;;  %16784 = vmatmul.mubr.msk.bf16.vlgmr.msra.gmra.mrb[0].mxu0 %vm582_vm6, %v989_v37  ;;  %v14823_v45 = vcombine.low %v941_v53, %v942_v40  ;;  %v19895_v59 = vsel %vm683_vm10, %v19657_v28, %v19878_v19  ;;  %v943_v56 = vsel %vm19884_vm1, %v819_v25, 0 }
  0x66   : > { %16792 = vmatpush3.bf16.msra.mxu0 %v19705_v43  ;;  %v992_v62 = vor.u32 %v990_v24, %v988_v63  ;;  %v14824_v33 = vcombine.low %v943_v56, %v943_v56  ;;  %v1139_v52 = vrot.slane %v1137_v60, 4  ;;  %v1142_v21 = vshrl.u32 %v14831_v26, 16 }
  0x67   : > { %v994_v6 = vshll.u32 %v14823_v45, 16  ;;  %v998_v44 = vshrl.u32 %v14823_v45, 16  ;;  %v1145_v53 = vshll.u32 %v14831_v26, 16  ;;  %16801 = vmatprep.subr.bf16.mxu0 %v19864_v11  ;;  %v1151_v37 = vshrl.u32 %v14832_v54, 16 }
  0x68   : > { %v1002_v28 = vshll.u32 %v14824_v33, 16  ;;  %v1140_v40 = vor.u32 %v1139_v52, %v1136_v34  ;;  %v1144_v1 = vrot.slane %v1142_v21, 3  ;;  %v1154_v16 = vshll.u32 %v14832_v54, 16  ;;  %v1381_v34 = vld [vmem:[%s19232_s10 + $0x8] sm:$0xf] }
  0x69   : > { %v996_v25 = vrot.slane %v994_v6, 1  ;;  %v1147_v58 = vrot.slane %v1145_v53, 4  ;;  %v1153_v43 = vrot.slane %v1151_v37, 3  ;;  %v1105_v60 = vsel %vm19697_vm3, %v19838_v15, 0 }
  0x6a   : > { %v1004_v24 = vrot.slane %v1002_v28, 1  ;;  %v1156_v63 = vrot.slane %v1154_v16, 4  ;;  %v1106_v26 = vsel %vm19732_vm0, %v19843_v30, 0  ;;  %vm23247_vm15 = vcmp.ne.s16.totalorder %v19730_v3, 0 }
  0x6b   : > { %v1107_v45 = vsel %vm23247_vm15, %v19901_v50, 0  ;;  %v997_v54 = vsel %vm23172_vm13, %v992_v62, %v996_v25  ;;  %v1000_v56 = vor.u32 %v998_v44, %v996_v25  ;;  %v1148_v33 = vor.u32 %v1147_v58, %v1144_v1  ;;  %v19920_v62 = vld [vmem:[%s19232_s10 + $0x20] sm:$0xf]  ;;  %v19929_v25 = vld [vmem:[%s19232_s10 + $0x24] sm:$0xf]  ;;  %vm23251_vm2 = vmmov %vm23247_vm15 }
  0x6c   : > { %v14833_v52 = vcombine.low %v1105_v60, %v1106_v26  ;;  %16787 = vmatprep.mubr.msk.bf16.mxu0 %vm582_vm6, %v997_v54  ;;  %v14834_v21 = vcombine.low %v1107_v45, %v1107_v45  ;;  %v1157_v28 = vor.u32 %v1156_v63, %v1153_v43  ;;  %v1390_v44 = vsel %vm23248_vm11, %v1381_v34, 0 }
  0x6d   : > { %v1005_v16 = vsel %vm23172_vm13, %v1000_v56, %v1004_v24  ;;  %v1149_v6 = vsel %vm683_vm10, %v1140_v40, %v1148_v33  ;;  %vm23249_vm14 = vcmp.ne.s16.totalorder %v19769_v29, 0  ;;  %vm23250_vm4 = vcmp.ne.s16.totalorder %v19783_v46, 0  ;;  %v1389_v24 = vld [vmem:[%s19232_s10 + $0x28] sm:$0x1]  ;;  %v18820_v29 = vld [vmem:[%s23123_s1 + $0x30] sm:$0xff]  }
  0x6e   : > { %v1160_v53 = vshrl.u32 %v14833_v52, 16  ;;  %v1163_v37 = vshll.u32 %v14833_v52, 16  ;;  %16788 = vmatmul.mubr.msk.bf16.gmra.mrb[4].mxu0 %vm582_vm6, %v1005_v16  ;;  %v1169_v22 = vshrl.u32 %v14834_v21, 16  ;;  %v1172_v38 = vshll.u32 %v14834_v21, 16  ;;  %vm23254_vm15 = vmmov %vm23250_vm4 }
  0x6f   : > { %16793 = vmatprep.mubr.msk.bf16.mxu0 %vm582_vm6, %v1149_v6  ;;  %v1392_v40 = vsel %vm23249_vm14, %v19372_v8, 0  ;;  %v1393_v43 = vsel %vm23250_vm4, %v19375_v2, 0  ;;  %v19934_v60 = vcombine.low %v1390_v44, %v1391_v57  ;;  %v1394_v45 = vsel %vm930_vm12, %v19573_v48, 0 }
  0x70   : > { %v1162_v58 = vrot.slane %v1160_v53, 3  ;;  %v1165_v1 = vrot.slane %v1163_v37, 4  ;;  %v19937_v26 = vcombine.low %v1392_v40, %v1393_v43  ;;  %v1395_v8 = vsel %vm931_vm9, %v19636_v7, 0  ;;  %v19957_v7 = vld [vmem:[%s23123_s1 + $0x28] sm:$0xff]  }
  0x71   : > { %v1171_v34 = vrot.slane %v1169_v22, 3  ;;  %v1174_v54 = vrot.slane %v1172_v38, 4  ;;  %v19945_v56 = vcombine.low %v1394_v45, %v1395_v8  ;;  %v1158_v2 = vsel %vm683_vm10, %v1148_v33, %v1157_v28  ;;  %v19981_v45 = vld [vmem:[%s19232_s10 + $0x28] sm:$0xf] }
  0x72   : > { %v1166_v63 = vor.u32 %v1165_v1, %v1162_v58  ;;  %v1427_v57 = vshll.u32 %v19934_v60, 16  ;;  %v1432_v52 = vshll.u32 %v19937_v26, 16  ;;  %v1396_v21 = vsel %vm932_vm7, %v19920_v62, 0 }
  0x73   : > { %v1397_v22 = vsel %vm933_vm8, %v19929_v25, 0  ;;  %v1425_v38 = vshrl.u32 %v19934_v60, 16  ;;  %v1440_v33 = vshll.u32 %v19945_v56, 16  ;;  %v1398_v6 = vsel %vm19884_vm1, %v1389_v24, 0  ;;  %v1838_v60 = vld [vmem:[%s19232_s10 + $0x18] sm:$0xf] }
  0x74   : > { %v1167_v48 = vsel %vm683_vm10, %v1157_v28, %v1166_v63  ;;  %v19964_v16 = vcombine.low %v1396_v21, %v1397_v22  ;;  %v1175_v53 = vor.u32 %v1174_v54, %v1171_v34  ;;  %v1436_v37 = vshrl.u32 %v19937_v26, 16 }
  0x75   : > { %v1588_v28 = vshrl.u32 %v19429_v35, 16  ;;  %v1429_v58 = vrot.slane %v1427_v57, 1  ;;  %v19973_v1 = vrot.slane %v1432_v52, 1  ;;  %v14853_v44 = vcombine.low %v1398_v6, %v1398_v6  ;;  %v1835_v57 = vld [vmem:[%s19232_s10 + $0xc] sm:$0xf] }
  0x76   : > { %16794 = vmatmul.mubr.msk.bf16.vlgmr.msra.gmra.mrb[0].mxu0 %vm582_vm6, %v1158_v2  ;;  %v1591_v40 = vshll.u32 %v19429_v35, 16  ;;  %v14840_v43 = vcombine.low %v19382_v13, %v19420_v32  ;;  %v1448_v8 = vshll.u32 %v19964_v16, 16  ;;  %v1596_v54 = vshrl.u32 %v19431_v36, 16  ;;  %v1836_v52 = vld [vmem:[%s19232_s10 + $0x10] sm:$0xf] }
  0x77   : > { %16802 = vmatpush3.bf16.msra.mxu0 %v19864_v11  ;;  %16797 = vmatprep.mubr.msk.bf16.mxu0 %vm582_vm6, %v1167_v48  ;;  %v1590_v24 = vrot.slane %v1588_v28, 3  ;;  %v19983_v11 = vrot.slane %v1440_v33, 1  ;;  %v1599_v13 = vshll.u32 %v19431_v36, 16  ;;  %v1605_v32 = vshrl.u32 %v19648_v49, 16  ;;  %v1837_v35 = vld [vmem:[%s19232_s10 + $0x14] sm:$0xf] }
  0x78   : > { %16811 = vmatprep.subr.bf16.mxu0 %v19957_v7  ;;  %v1593_v34 = vrot.slane %v1591_v40, 4  ;;  %v1608_v2 = vshll.u32 %v19648_v49, 16  ;;  %v1176_v21 = vsel %vm683_vm10, %v1166_v63, %v1175_v53  ;;  %v19994_v48 = vshll.u32 %v14853_v44, 16 }
  0x79   : > { %v1598_v33 = vrot.slane %v1596_v54, 3  ;;  %v1601_v6 = vrot.slane %v1599_v13, 4  ;;  %v1607_v28 = vrot.slane %v1605_v32, 3  ;;  %v1559_v36 = vsel %vm19697_vm3, %v19920_v62, 0  ;;  %v1839_v54 = vld [vmem:[%s19232_s10 + $0x1c] sm:$0xf]  ;;  %vm23252_vm3 = vmmov %vm23248_vm11 }
  0x7a   : > { %v1594_v22 = vor.u32 %v1593_v34, %v1590_v24  ;;  %v1610_v40 = vrot.slane %v1608_v2, 4  ;;  %v14841_v49 = vcombine.low %v19475_v9, %v19664_v39  ;;  %v1560_v63 = vsel %vm19732_vm0, %v19929_v25, 0  ;;  %v1840_v13 = vld [vmem:[%s19232_s10 + $0x20] sm:$0xf]  ;;  %vm23253_vm0 = vmmov %vm23249_vm14 }
  0x7b   : > { %v1561_v53 = vsel %vm23251_vm2, %v19981_v45, 0  ;;  %v1602_v44 = vor.u32 %v1601_v6, %v1598_v33  ;;  %v14862_v31 = vcombine.low %v1559_v36, %v1560_v63  ;;  %v14842_v9 = vcombine.low %v19728_v4, %v19838_v15  ;;  %v1843_v63 = vld [vmem:[%s19232_s10 + $0x2c] sm:$0x1] }
  0x7c   : > { %v1611_v24 = vor.u32 %v1610_v40, %v1607_v28  ;;  %v14863_v34 = vcombine.low %v1561_v53, %v1561_v53  ;;  %v1430_v39 = vor.u32 %v1429_v58, %v1425_v38  ;;  %v1844_v3 = vsel %vm23252_vm3, %v1835_v57, 0 }
  0x7d   : > { %v1845_v51 = vsel %vm927_vm5, %v1836_v52, 0  ;;  %v20020_v32 = vsel %vm683_vm10, %v1594_v22, %v1602_v44  ;;  %v1617_v33 = vshll.u32 %v14862_v31, 16  ;;  %v1846_v4 = vsel %vm23253_vm0, %v1837_v35, 0 }
  0x7e   : > { %16798 = vmatmul.mubr.msk.bf16.gmra.mrb[4].mxu0 %vm582_vm6, %v1176_v21  ;;  %v20023_v2 = vsel %vm683_vm10, %v1602_v44, %v1611_v24  ;;  %v1614_v21 = vshrl.u32 %v14862_v31, 16  ;;  %v1623_v6 = vshrl.u32 %v14863_v34, 16  ;;  %v1626_v28 = vshll.u32 %v14863_v34, 16 }
  0x7f   : > { %16803 = vmatprep.mubr.msk.bf16.mxu0 %vm582_vm6, %v14840_v43  ;;  %v1841_v43 = vld [vmem:[%s19232_s10 + $0x24] sm:$0xf]  ;;  %v1847_v42 = vsel %vm23254_vm15, %v1838_v60, 0  ;;  %v1619_v38 = vrot.slane %v1617_v33, 4  ;;  %v14878_v58 = vcombine.low %v1844_v3, %v1845_v51  ;;  %v1848_v40 = vsel %vm930_vm12, %v1839_v54, 0 }
  0x80   : > { %v1616_v15 = vrot.slane %v1614_v21, 3  ;;  %v14879_v57 = vcombine.low %v1846_v4, %v1847_v42  ;;  %v1625_v52 = vrot.slane %v1623_v6, 3  ;;  %v1628_v22 = vrot.slane %v1626_v28, 4 }
  0x81   : > { %v1849_v36 = vsel %vm931_vm9, %v1840_v13, 0  ;;  %v1879_v60 = vshrl.u32 %v14878_v58, 16  ;;  %v1881_v35 = vshll.u32 %v14878_v58, 16  ;;  %v1850_v3 = vsel %vm932_vm7, %v1841_v43, 0 }
  0x82   : > { %v1620_v46 = vor.u32 %v1619_v38, %v1616_v15  ;;  %v1886_v53 = vshll.u32 %v14879_v57, 16  ;;  %v1629_v44 = vor.u32 %v1628_v22, %v1625_v52  ;;  %v1890_v31 = vshrl.u32 %v14879_v57, 16 }
  0x83   : > { %v14880_v34 = vcombine.low %v1848_v40, %v1849_v36  ;;  %v1883_v20 = vrot.slane %v1881_v35, 1  ;;  %v1851_v13 = vsel %vm933_vm8, %v1842_v0, 0  ;;  %v1450_v18 = vrot.slane %v1448_v8, 1  ;;  %v19154_v35 = vld [vmem:[%s19232_s10 + $0x1c] sm:$0xf] }
  0x84   : > { %v1621_v12 = vsel %vm683_vm10, %v1611_v24, %v1620_v46  ;;  %v1888_v54 = vrot.slane %v1886_v53, 1  ;;  %v1630_v51 = vsel %vm683_vm10, %v1620_v46, %v1629_v44  ;;  %v14881_v33 = vcombine.low %v1850_v3, %v1851_v13  ;;  %v19152_v46 = vld [vmem:[%s19232_s10 + $0x14] sm:$0xf]  ;;  %v18829_v44 = vld [vmem:[%s23125_s3 + $0x38] sm:$0xff]  }
  0x85   : > { %v1894_v21 = vshll.u32 %v14880_v34, 16  ;;  %v1898_v6 = vshrl.u32 %v14880_v34, 16  ;;  %v1852_v43 = vsel %vm19884_vm1, %v1843_v63, 0  ;;  %v1435_v8 = vsel %vm23172_vm13, %v1430_v39, %v19973_v1  ;;  %v19151_v63 = vld [vmem:[%s19232_s10 + $0x10] sm:$0xf] }
  0x86   : > { %16804 = vmatmul.mubr.msk.bf16.vlgmr.msra.gmra.mrb[0].mxu0 %vm582_vm6, %v14841_v49  ;;  %v1884_v49 = vor.u32 %v1883_v20, %v1879_v60  ;;  %v1892_v24 = vor.u32 %v1890_v31, %v1888_v54  ;;  %v1902_v28 = vshll.u32 %v14881_v33, 16  ;;  %v14882_v4 = vcombine.low %v1852_v43, %v1852_v43 }
  0x87   : > { %16812 = vmatpush3.bf16.msra.mxu0 %v19957_v7  ;;  %16807 = vmatprep.mubr.msk.bf16.mxu0 %vm582_vm6, %v14842_v9  ;;  %v1896_v47 = vrot.slane %v1894_v21, 1  ;;  %v1906_v7 = vshrl.u32 %v14881_v33, 16  ;;  %v14843_v9 = vcombine.low %v19843_v30, %v19901_v50  ;;  %v1458_v23 = vrot.slane %v19994_v48, 1  ;;  %v18821_v48 = vld [vmem:[%s23123_s1 + $0x38] sm:$0xff]   ;;  %v23262_v33 = vld [vmem:[#allocation7_spill] sm:$0xff] }
  0x88   : > { %16821 = vmatprep.subr.bf16.mxu0 %v18820_v29  ;;  %v1889_v42 = vsel %vm23172_vm13, %v1884_v49, %v1888_v54  ;;  %v1904_v38 = vrot.slane %v1902_v28, 1  ;;  %v1910_v58 = vshll.u32 %v14882_v4, 16  ;;  %v1438_v30 = vor.u32 %v1436_v37, %v19973_v1 }
  0x89   : > { %v1897_v0 = vsel %vm23172_vm13, %v1892_v24, %v1896_v47  ;;  %v1900_v15 = vor.u32 %v1898_v6, %v1896_v47  ;;  %v23255_v40 = vshrl.u32 %v19945_v56, 16  ;;  %v23256_v37 = vshrl.u32 %v19964_v16, 16  ;;  %v19150_v16 = vld [vmem:[%s19232_s10 + $0xc] sm:$0xf] }
  0x8a   : > { %v1908_v52 = vor.u32 %v1906_v7, %v1904_v38  ;;  %v1912_v22 = vrot.slane %v1910_v58, 1  ;;  %v1443_v36 = vsel %vm23172_vm13, %v1438_v30, %v19983_v11  ;;  %v14871_v53 = vcombine.low %v19154_v35, %v19920_v62  ;;  %v18826_v62 = vld [vmem:[%s23125_s3 + $0x20] sm:$0xff]  }
  0x8b   : > { %v1905_v57 = vsel %vm23172_vm13, %v1900_v15, %v1904_v38  ;;  %v1446_v39 = vor.u32 %v23255_v40, %v19983_v11  ;;  %v1454_v56 = vor.u32 %v23256_v37, %v1450_v18  ;;  %v18823_v11 = vld [vmem:[%s23123_s1 + $0x40] sm:$0xff]   ;;  %vm403_vm5 = vcmask 523264   ;;  %16851 = vmatprep.subr.bf16.mxu1 %v18826_v62 }
  0x8c   : > { %v1913_v50 = vsel %vm23172_vm13, %v1908_v52, %v1912_v22  ;;  %406 = vst.msk [vmem:[#allocation2 + $0x10] sm:$0xff] %vm403_vm5, %v23222_v5  ;;  %404 = vst.msk [vmem:[#allocation2] sm:$0xff] %vm403_vm5, %v23222_v5  ;;  %16852 = vmatpush3.bf16.msra.mxu1 %v18826_v62  ;;  %v23257_v31 = vshrl.u32 %v19618_v14, 16  ;;  %v23258_v3 = vshrl.u32 %v19822_v55, 16  ;;  %v23259_v20 = vshll.u32 %v19822_v55, 16  ;;  %v23264_v22 = vld [vmem:[#allocation4_spill] sm:$0xff] }
  0x8d   : > { %v1451_v26 = vsel %vm23172_vm13, %v1446_v39, %v1450_v18  ;;  %v1459_v1 = vsel %vm23172_vm13, %v1454_v56, %v1458_v23  ;;  %405 = vst.msk [vmem:[#allocation2 + $0x8] sm:$0xff] %vm403_vm5, %v23222_v5  ;;  %407 = vst.msk [vmem:[#allocation2 + $0x18] sm:$0xff] %vm403_vm5, %v23222_v5  ;;  %v23260_v13 = vshll.u32 %v19618_v14, 16  ;;  %v14888_v18 = vld [vmem:[%s23124_s2] ss:$0 sm:$0xff]  ;;  %vm2088_vm9 = vcmp.ne.s16.totalorder %v23264_v22, 0 }
  0x8e   : > { %16808 = vmatmul.mubr.msk.bf16.gmra.mrb[4].mxu0 %vm582_vm6, %v14843_v9  ;;  %408 = vst.msk [vmem:[#allocation2 + $0x20] sm:$0xff] %vm403_vm5, %v23222_v5  ;;  %409 = vst.msk [vmem:[#allocation2 + $0x28] sm:$0xff] %vm403_vm5, %v23222_v5  ;;  %v20133_v5 = vld [vmem:[%s23125_s3] sm:$0xff]   ;;  %v2898_v34 = vrot.slane %v23257_v31, 7  ;;  %vm2120_vm8 = vcmask 1043456   ;;  %vm2090_vm1 = vcmp.ne.s16.totalorder %v19677_v27, 0 }
  0x8f   : > { %16813 = vmatprep.mubr.msk.bf16.mxu0 %vm582_vm6, %v1435_v8  ;;  %vm2091_vm11 = vcmp.ne.s16.totalorder %v19758_v17, 0  ;;  %vm2092_vm4 = vcmp.ne.s16.totalorder %v19736_v41, 0  ;;  %vm23164_vm3 = vcmp.ne.s16.totalorder %v19682_v10, 0  ;;  %vm23161_vm0 = vcmp.ne.s16.totalorder %v19895_v59, 0  ;;  %v19145_v17 = vld [vmem:[%s23127_s5 + $0xd8] sm:$0xff]  }
  0x90   : > { %vm23163_vm15 = vcmp.ne.s16.totalorder %v19878_v19, 0 }
  0x93   : > { %v2036_v40 = vld [vmem:[#allocation2] sm:$0xf8] }
  0x96   : > { %16814 = vmatmul.mubr.msk.bf16.vlgmr.msra.gmra.mrb[0].mxu0 %vm582_vm6, %v1443_v36 }
  0x97   : > { %16822 = vmatpush3.bf16.msra.mxu0 %v18820_v29  ;;  %16817 = vmatprep.mubr.msk.bf16.mxu0 %vm582_vm6, %v1451_v26  ;;  %v14869_v29 = vcombine.low %v19150_v16, %v19151_v63  ;;  %v2106_v26 = vld [vmem:[#allocation2] sm:$0xf0] }
  0x98   : > { %16831 = vmatprep.subr.bf16.mxu0 %v18821_v48 }
  0x9e   : > { %16818 = vmatmul.mubr.msk.bf16.gmra.mrb[4].mxu0 %vm582_vm6, %v1459_v1  ;;  %v2093_v1 = vsel %vm2088_vm9, %v2036_v40, 0  ;;  %v23267_v40 = vld [vmem:[#allocation10_spill] sm:$0xff] }
  0x9f   : > { %16823 = vmatprep.mubr.msk.bf16.mxu0 %vm582_vm6, %v20020_v32  ;;  %v19153_v32 = vld [vmem:[%s19232_s10 + $0x18] sm:$0xf]  ;;  %v2232_v35 = vshrl.u32 %v2093_v1, 16  ;;  %v2235_v62 = vshll.u32 %v2093_v1, 16  ;;  %vm2425_vm2 = vcmp.ne.s16.totalorder %v23267_v40, 0  ;;  %v19127_v40 = vld [vmem:[%s23127_s5 + $0x48] sm:$0xff]  }
  0xa0   : > { %v14870_v60 = vcombine.low %v19152_v46, %v19153_v32 }
  0xa6   : > { %16824 = vmatmul.mubr.msk.bf16.vlgmr.msra.gmra.mrb[0].mxu0 %vm582_vm6, %v20023_v2  ;;  %v14872_v2 = vcombine.low %v19929_v25, %v19981_v45  ;;  %v18827_v25 = vld [vmem:[%s23125_s3 + $0x28] sm:$0xff]   ;;  %v18828_v45 = vld [vmem:[%s23125_s3 + $0x30] sm:$0xff]  }
  0xa7   : > { %16832 = vmatpush3.bf16.msra.mxu0 %v18821_v48  ;;  %16827 = vmatprep.mubr.msk.bf16.mxu0 %vm582_vm6, %v1621_v12  ;;  %v20140_v12 = vrot.slane %v23258_v3, 7  ;;  %v2234_v3 = vrot.slane %v2232_v35, 3 }
  0xa8   : > { %16841 = vmatprep.subr.bf16.mxu0 %v18823_v11  ;;  %16853 = vmatprep.subr.bf16.mxu1 %v18827_v25 }
  0xa9   : > { %16854 = vmatpush3.bf16.msra.mxu1 %v18827_v25  ;;  %v2902_v54 = vor.u32 %v20140_v12, %v23259_v20  ;;  %v2237_v20 = vrot.slane %v2235_v62, 4 }
  0xaa   : > { %16855 = vmatprep.subr.bf16.mxu1 %v18828_v45 }
  0xad   : > { %16856 = vmatpush3.bf16.msra.mxu1 %v18828_v45 }
  0xae   : > { %16828 = vmatmul.mubr.msk.bf16.gmra.mrb[4].mxu0 %vm582_vm6, %v1630_v51  ;;  %16857 = vmatprep.subr.bf16.mxu1 %v18829_v44  ;;  %v2899_v51 = vor.u32 %v2898_v34, %v23260_v13 }
  0xaf   : > { %16833 = vmatprep.mubr.msk.bf16.mxu0 %vm582_vm6, %v14869_v29  ;;  %v2121_v29 = vrot.slane %v2106_v26, 4 }
  0xb1   : > { %16858 = vmatpush3.bf16.msra.mxu1 %v18829_v44 }
  0xb2   : > { %16867 = vmatprep.subr.bf16.mxu1 %v20133_v5 }
  0xb6   : > { %16834 = vmatmul.mubr.msk.bf16.vlgmr.msra.gmra.mrb[0].mxu0 %vm582_vm6, %v14870_v60 }
  0xb7   : > { %16842 = vmatpush3.bf16.msra.mxu0 %v18823_v11  ;;  %16837 = vmatprep.mubr.msk.bf16.mxu0 %vm582_vm6, %v14871_v53  ;;  %v23265_v11 = vld [vmem:[#allocation8_spill] sm:$0xff] }
  0xb8   : > { %vm2089_vm7 = vcmp.ne.s16.totalorder %v23265_v11, 0 }
  0xbe   : > { %16838 = vmatmul.mubr.msk.bf16.gmra.mrb[4].mxu0 %vm582_vm6, %v14872_v2 }
  0xbf   : > { %16843 = vmatprep.mubr.msk.bf16.mxu0 %vm582_vm6, %v1889_v42 }
  0xc6   : > { %16844 = vmatmul.mubr.msk.bf16.vlgmr.msra.gmra.mrb[0].mxu0 %vm582_vm6, %v1897_v0 }
  0xc7   : > { %16847 = vmatprep.mubr.msk.bf16.mxu0 %vm582_vm6, %v1905_v57 }
  0xce   : > { %16848 = vmatmul.mubr.msk.bf16.gmra.mrb[4].mxu0 %vm582_vm6, %v1913_v50  ;;  %vm23261_vm6 = vsmask.f32 256 }
  0xcf   : > { %v20148_v21 = vsel %vm23261_vm6, %v2898_v34, %v2902_v54  ;;  %vm23263_vm12 = vmmov %vm23261_vm6  ;;  %v18831_v34 = vld [vmem:[%s23125_s3 + $0x8] sm:$0xff]  }
  0xd0   : > { %v20152_v6 = vsel %vm23263_vm12, %v23262_v33, %v2899_v51  ;;  %v18832_v33 = vld [vmem:[%s23125_s3 + $0x10] sm:$0xff]   ;;  %vm23269_vm12 = vsmask.f32 3328 }
 0x199   : > { %v16845_v49 = vpop.f32.mrb[0].mxu0 }
 0x19a   : > { %v20157_v24 = vadd.f32 %v16845_v49, %v14888_v18  ;;  %v1966_v55 = vpop.f32.mrb[1].mxu0  ;;  %v23266_v49 = vld [vmem:[#allocation6_spill] sm:$0xff] }
 0x19b   : > { %v20159_v43 = vadd.f32 %v14888_v18, %v1966_v55  ;;  %v16846_v47 = vpop.f32.mrb[2].mxu0  ;;  %vm2424_vm14 = vcmp.ne.s16.totalorder %v23266_v49, 0 }
 0x19c   : > { %v20161_v14 = vadd.f32 %v16846_v47, %v14888_v18  ;;  %v1969_v28 = vpop.f32.mrb[3].mxu0  ;;  %v2021_v7 = vmax.f32 %v20157_v24, 0.0 }
 0x19d   : > { %v20163_v4 = vadd.f32 %v14888_v18, %v1969_v28  ;;  %v2019_v42 = vmax.f32 %v20159_v43, 0.0 }
 0x19e   : > { %v2022_v9 = vmax.f32 %v20161_v14, 0.0 }
 0x19f   : > { %v2020_v0 = vmax.f32 %v20163_v4, 0.0 }
 0x1a0   : > { %v2028_v15 = vpack.c.bf16 %v2022_v9, %v2021_v7 }
 0x1a1   : > { %v2027_v38 = vpack.c.bf16 %v2020_v0, %v2019_v42  ;;  %v16849_v58 = vpop.f32.mrb[4].mxu0 }
 0x1a2   : > { %2032 = vst.msk [vmem:[#allocation2 + $0x10] sm:$0xff] %vm403_vm5, %v2028_v15  ;;  %v20178_v8 = vadd.f32 %v16849_v58, %v14888_v18  ;;  %v1982_v23 = vpop.f32.mrb[5].mxu0  ;;  %v2238_v58 = vor.u32 %v2237_v20, %v2234_v3 }
 0x1a3   : > { %2031 = vst.msk [vmem:[#allocation2 + $0x8] sm:$0xff] %vm403_vm5, %v2027_v38  ;;  %v20181_v57 = vadd.f32 %v14888_v18, %v1982_v23  ;;  %v16850_v52 = vpop.f32.mrb[6].mxu0 }
 0x1a4   : > { %v20184_v30 = vadd.f32 %v16850_v52, %v14888_v18  ;;  %v1985_v50 = vpop.f32.mrb[7].mxu0  ;;  %v2025_v48 = vmax.f32 %v20178_v8, 0.0 }
 0x1a5   : > { %v20186_v39 = vadd.f32 %v14888_v18, %v1985_v50  ;;  %v2023_v37 = vmax.f32 %v20181_v57, 0.0 }
 0x1a6   : > { %v23170_v36 = vmax.f32 %v20184_v30, 0.0 }
 0x1a7   : > { %v23169_v56 = vmax.f32 %v20186_v39, 0.0 }
 0x1a8   : > { %v2030_v16 = vpack.c.bf16 %v23170_v36, %v2025_v48 }
 0x1a9   : > { %v2029_v63 = vpack.c.bf16 %v23169_v56, %v2023_v37  ;;  %v20203_v46 = vld [vmem:[#allocation2 + $0x10] sm:$0xff] }
 0x1aa   : > { %2034 = vst.msk [vmem:[#allocation2 + $0x20] sm:$0xff] %vm403_vm5, %v2030_v16  ;;  %v20206_v32 = vld [vmem:[#allocation2 + $0x8] sm:$0xff]  ;;  %v20209_v60 = vrot.slane %v20203_v46, 4  ;;  %v2095_v51 = vsel %vm2090_vm1, %v20203_v46, 0 }
 0x1ab   : > { %2033 = vst.msk [vmem:[#allocation2 + $0x18] sm:$0xff] %vm403_vm5, %v2029_v63  ;;  %v2122_v53 = vrot.slane %v20206_v32, 4  ;;  %v2094_v2 = vsel %vm2089_vm7, %v20206_v32, 0  ;;  %v2249_v28 = vshrl.u32 %v2095_v51, 16  ;;  %v2252_v15 = vshll.u32 %v2095_v51, 16  ;;  %v18833_v63 = vld [vmem:[%s23125_s3 + $0x18] sm:$0xff]  }
 0x1ac   : > { %v2240_v25 = vshrl.u32 %v2094_v2, 16  ;;  %v2243_v45 = vshll.u32 %v2094_v2, 16 }
 0x1ad   : > { %v2123_v44 = vsel %vm2120_vm8, %v2121_v29, %v2122_v53  ;;  %v2125_v31 = vsel %vm2120_vm8, %v2122_v53, %v20209_v60  ;;  %v2429_v29 = vsel %vm2424_vm14, %v2106_v26, 0  ;;  %v2251_v35 = vrot.slane %v2249_v28, 3 }
 0x1ae   : > { %16859 = vmatprep.mubr.msk.bf16.mxu1 %vm403_vm5, %v2123_v44  ;;  %v2242_v54 = vrot.slane %v2240_v25, 3  ;;  %v2245_v13 = vrot.slane %v2243_v45, 4  ;;  %v2254_v53 = vrot.slane %v2252_v15, 4  ;;  %v2430_v26 = vsel %vm2425_vm2, %v20206_v32, 0 }
 0x1af   : > { %16860 = vmatmul.mubr.msk.bf16.vlgmr.msra.gmra.mrb[0].mxu1 %vm403_vm5, %v2125_v31  ;;  %v2443_v44 = vshrl.u32 %v2429_v29, 16  ;;  %v18834_v31 = vld [vmem:[%s23125_s3 + $0x40] sm:$0xff]   ;;  %v2451_v51 = vshrl.u32 %v2430_v26, 16 }
 0x1b0   : > { %16868 = vmatpush3.bf16.msra.mxu1 %v20133_v5  ;;  %v2246_v23 = vor.u32 %v2245_v13, %v2242_v54  ;;  %v2255_v3 = vor.u32 %v2254_v53, %v2251_v35 }
 0x1b1   : > { %16869 = vmatprep.subr.bf16.mxu1 %v18831_v34  ;;  %v2040_v18 = vld [vmem:[#allocation2 + $0x20] sm:$0xf] }
 0x1b2   : > { %v20234_v55 = vld [vmem:[#allocation2 + $0x18] sm:$0xff]  ;;  %v2128_v47 = vrot.slane %v2040_v18, 4  ;;  %v2247_v2 = vsel %vm683_vm10, %v2238_v58, %v2246_v23  ;;  %v2097_v45 = vsel %vm2092_vm4, %v2040_v18, 0  ;;  %v2454_v18 = vshll.u32 %v2430_v26, 16 }
 0x1b3   : > { %v20237_v38 = vrot.slane %v20234_v55, 4  ;;  %v2096_v5 = vsel %vm2091_vm11, %v20234_v55, 0  ;;  %v2267_v20 = vshrl.u32 %v2097_v45, 16  ;;  %v2270_v54 = vshll.u32 %v2097_v45, 16 }
 0x1b4   : > { %16870 = vmatpush3.bf16.msra.mxu1 %v18831_v34  ;;  %v2258_v52 = vshrl.u32 %v2096_v5, 16  ;;  %v2261_v50 = vshll.u32 %v2096_v5, 16  ;;  %v2446_v34 = vshll.u32 %v2429_v29, 16  ;;  %v2256_v15 = vsel %vm683_vm10, %v2246_v23, %v2255_v3  ;;  %v18836_v23 = vld [vmem:[%s23125_s3 + $0x50] sm:$0xff]  }
 0x1b5   : > { %v20247_v1 = vsel %vm2120_vm8, %v20209_v60, %v20237_v38  ;;  %16871 = vmatprep.subr.bf16.mxu1 %v18832_v33  ;;  %v2129_v16 = vsel %vm2120_vm8, %v20237_v38, %v2128_v47  ;;  %v18835_v47 = vld [vmem:[%s23125_s3 + $0x48] sm:$0xff]   ;;  %v2269_v58 = vrot.slane %v2267_v20, 3  ;;  %v2272_v5 = vrot.slane %v2270_v54, 4 }
 0x1b6   : > { %16863 = vmatprep.mubr.msk.bf16.mxu1 %vm403_vm5, %v20247_v1  ;;  %v2260_v62 = vrot.slane %v2258_v52, 3  ;;  %v2263_v25 = vrot.slane %v2261_v50, 4  ;;  %v2448_v28 = vrot.slane %v2446_v34, 5  ;;  %v2453_v50 = vrot.slane %v2451_v51, 4  ;;  %v18837_v34 = vld [vmem:[%s23125_s3 + $0x58] sm:$0xff]  }
 0x1b7   : > { %16864 = vmatmul.mubr.msk.bf16.gmra.mrb[4].mxu1 %vm403_vm5, %v2129_v16  ;;  %v2456_v16 = vrot.slane %v2454_v18, 5  ;;  %v2432_v29 = vsel %vm23161_vm0, %v20234_v55, 0  ;;  %v2273_v35 = vor.u32 %v2272_v5, %v2269_v58  ;;  %v2595_v58 = vld [vmem:[#allocation2] sm:$0x80] }
 0x1b8   : > { %16872 = vmatpush3.bf16.msra.mxu1 %v18832_v33  ;;  %16875 = vmatprep.mubr.msk.bf16.mxu1 %vm403_vm5, %v2247_v2  ;;  %v2264_v13 = vor.u32 %v2263_v25, %v2260_v62  ;;  %v2445_v33 = vrot.slane %v2443_v44, 4  ;;  %v2469_v45 = vshrl.u32 %v2432_v29, 16  ;;  %v2472_v26 = vshll.u32 %v2432_v29, 16  ;;  %v2376_v44 = vld [vmem:[#allocation2 + $0x20] sm:$0x1f] }
 0x1b9   : > { %16873 = vmatprep.subr.bf16.mxu1 %v18833_v63  ;;  %v2457_v25 = vor.u32 %v2456_v16, %v2453_v50 }
 0x1ba   : > { %v2265_v52 = vsel %vm683_vm10, %v2255_v3, %v2264_v13  ;;  %v2449_v62 = vor.u32 %v2448_v28, %v2445_v33  ;;  %v2274_v3 = vsel %vm683_vm10, %v2264_v13, %v2273_v35  ;;  %v2471_v18 = vrot.slane %v2469_v45, 4  ;;  %v18838_v13 = vld [vmem:[%s23125_s3 + $0x60] sm:$0xff]   ;;  %v18839_v35 = vld [vmem:[%s23125_s3 + $0x68] sm:$0xff]  }
 0x1bb   : > { %v2474_v33 = vrot.slane %v2472_v26, 5 }
 0x1bc   : > { %16874 = vmatpush3.bf16.msra.mxu1 %v18833_v63  ;;  %v2431_v63 = vsel %vm23164_vm3, %v20203_v46, 0  ;;  %v2458_v51 = vsel %vm23269_vm12, %v2449_v62, %v2457_v25  ;;  %vm2610_vm12 = vcmp.ne.s16.totalorder %v19661_v61, 0 }
 0x1bd   : > { %16883 = vmatprep.subr.bf16.mxu1 %v18834_v31  ;;  %v2460_v53 = vshrl.u32 %v2431_v63, 16  ;;  %v2463_v2 = vshll.u32 %v2431_v63, 16  ;;  %v2475_v16 = vor.u32 %v2474_v33, %v2471_v18  ;;  %v18840_v18 = vld [vmem:[%s23125_s3 + $0x70] sm:$0xff]  }
 0x1bf   : > { %16876 = vmatmul.mubr.msk.bf16.vlgmr.msra.gmra.mrb[0].mxu1 %vm403_vm5, %v2256_v15  ;;  %v2462_v20 = vrot.slane %v2460_v53, 4  ;;  %v2465_v54 = vrot.slane %v2463_v2, 5  ;;  %v23270_v15 = vld [vmem:[#allocation5_spill] sm:$0xff] }
 0x1c0   : > { %16884 = vmatpush3.bf16.msra.mxu1 %v18834_v31  ;;  %16879 = vmatprep.mubr.msk.bf16.mxu1 %vm403_vm5, %v2265_v52  ;;  %v23268_v31 = vld [vmem:[#allocation11_spill] sm:$0xff]  ;;  %vm2608_vm0 = vcmp.ne.s16.totalorder %v23270_v15, 0 }
 0x1c1   : > { %16885 = vmatprep.subr.bf16.mxu1 %v18835_v47  ;;  %vm23162_vm6 = vcmp.ne.s16.totalorder %v23268_v31, 0  ;;  %v2466_v5 = vor.u32 %v2465_v54, %v2462_v20  ;;  %v2613_v29 = vsel %vm2608_vm0, %v2595_v58, 0  ;;  %v23276_v54 = vld [vmem:[#allocation14_spill] sm:$0xff] }
 0x1c2   : > { %v2614_v28 = vsel %vm23162_vm6, %v20206_v32, 0  ;;  %v2627_v26 = vshrl.u32 %v2613_v29, 16 }
 0x1c3   : > { %v2631_v63 = vshrl.u32 %v2614_v28, 16  ;;  %v2634_v33 = vshll.u32 %v2614_v28, 16 }
 0x1c4   : > { %16886 = vmatpush3.bf16.msra.mxu1 %v18835_v47  ;;  %v2433_v47 = vsel %vm23163_vm15, %v2376_v44, 0  ;;  %vm23272_vm15 = vsmask.f32 3328 }
 0x1c5   : > { %16887 = vmatprep.subr.bf16.mxu1 %v18836_v23  ;;  %v2478_v52 = vshrl.u32 %v2433_v47, 16  ;;  %v2481_v50 = vshll.u32 %v2433_v47, 16  ;;  %v2467_v53 = vsel %vm23272_vm15, %v2457_v25, %v2466_v5  ;;  %vm23273_vm3 = vmmov %vm23272_vm15  ;;  %v2633_v44 = vrot.slane %v2631_v63, 7  ;;  %v18841_v63 = vld [vmem:[%s23125_s3 + $0x78] sm:$0xff]  }
 0x1c6   : > { %v2476_v45 = vsel %vm23273_vm3, %v2466_v5, %v2475_v16  ;;  %v2629_v5 = vrot.slane %v2627_v26, 7 }
 0x1c7   : > { %16880 = vmatmul.mubr.msk.bf16.gmra.mrb[4].mxu1 %vm403_vm5, %v2274_v3  ;;  %v2480_v2 = vrot.slane %v2478_v52, 4  ;;  %v2483_v62 = vrot.slane %v2481_v50, 5  ;;  %v23274_v3 = vld [vmem:[#allocation13_spill] sm:$0xff]  ;;  %v2636_v52 = vor.u32 %v2634_v33, %v2633_v44 }
 0x1c8   : > { %16888 = vmatpush3.bf16.msra.mxu1 %v18836_v23  ;;  %16891 = vmatprep.mubr.msk.bf16.mxu1 %vm403_vm5, %v2458_v51  ;;  %v23271_v23 = vld [vmem:[#allocation15_spill] sm:$0xff]  ;;  %v23275_v20 = vshrl.u32 %v23274_v3, 16 }
 0x1c9   : > { %16889 = vmatprep.subr.bf16.mxu1 %v18837_v34  ;;  %vm23165_vm6 = vcmp.ne.s16.totalorder %v23271_v23, 0  ;;  %v2484_v47 = vor.u32 %v2483_v62, %v2480_v2 }
 0x1ca   : > { %v20321_v51 = vor.u32 %v23276_v54, %v23275_v20  ;;  %v2616_v25 = vsel %vm23165_vm6, %v20234_v55, 0  ;;  %vm23277_vm6 = vsmask.f32 256  ;;  %v18843_v54 = vld [vmem:[%s23125_s3 + $0x88] sm:$0xff]  }
 0x1cb   : > { %v2647_v50 = vshrl.u32 %v2616_v25, 16  ;;  %v2485_v29 = vsel %vm23272_vm15, %v2475_v16, %v2484_v47  ;;  %v2637_v28 = vsel %vm23277_vm6, %v2629_v5, %v2636_v52  ;;  %v2650_v16 = vshll.u32 %v2616_v25, 16  ;;  %vm23278_vm15 = vmmov %vm23277_vm6  ;;  %v23279_v47 = vld [vmem:[#allocation3_spill] sm:$0xff]  ;;  %v23281_v5 = vld [vmem:[#allocation9_spill] sm:$0xff] }
 0x1cc   : > { %16890 = vmatpush3.bf16.msra.mxu1 %v18837_v34  ;;  %v2615_v34 = vsel %vm2610_vm12, %v20203_v46, 0  ;;  %vm23166_vm3 = vcmp.ne.s16.totalorder %v20321_v51, 0 }
 0x1cd   : > { %16899 = vmatprep.subr.bf16.mxu1 %v18838_v13  ;;  %v2639_v58 = vshrl.u32 %v2615_v34, 16  ;;  %v2649_v2 = vrot.slane %v2647_v50, 7  ;;  %v18844_v50 = vld [vmem:[%s23125_s3 + $0x90] sm:$0xff]  }
 0x1cf   : > { %16892 = vmatmul.mubr.msk.bf16.vlgmr.msra.gmra.mrb[0].mxu1 %vm403_vm5, %v2467_v53  ;;  %v2641_v53 = vrot.slane %v2639_v58, 7  ;;  %v2652_v20 = vor.u32 %v2650_v16, %v2649_v2  ;;  %v23280_v58 = vshll.u32 %v23279_v47, 16 }
 0x1d0   : > { %16900 = vmatpush3.bf16.msra.mxu1 %v18838_v13  ;;  %16895 = vmatprep.mubr.msk.bf16.mxu1 %vm403_vm5, %v2476_v45  ;;  %v20331_v13 = vld [vmem:[#allocation2 + $0x20] sm:$0xff] }
 0x1d1   : > { %16901 = vmatprep.subr.bf16.mxu1 %v18839_v35  ;;  %v2617_v62 = vsel %vm23166_vm3, %v20331_v13, 0  ;;  %v18842_v45 = vld [vmem:[%s23125_s3 + $0x80] sm:$0xff]   ;;  %v20356_v52 = vor.u32 %v23281_v5, %v23280_v58 }
 0x1d2   : > { %v2655_v3 = vshrl.u32 %v2617_v62, 16  ;;  %v2658_v25 = vshll.u32 %v2617_v62, 16  ;;  %v23282_v62 = vld [vmem:[#allocation12_spill] sm:$0xff] }
 0x1d3   : > { %vm23167_vm3 = vcmp.ne.s16.totalorder %v23282_v62, 0 }
 0x1d4   : > { %16902 = vmatpush3.bf16.msra.mxu1 %v18839_v35  ;;  %v2642_v35 = vshll.u32 %v2615_v34, 16  ;;  %v2657_v33 = vrot.slane %v2655_v3, 7  ;;  %v2653_v34 = vsel %vm23278_vm15, %v2641_v53, %v2652_v20 }
 0x1d5   : > { %16903 = vmatprep.subr.bf16.mxu1 %v18840_v18 }
 0x1d6   : > { %v2644_v26 = vor.u32 %v2642_v35, %v2641_v53 }
 0x1d7   : > { %16896 = vmatmul.mubr.msk.bf16.gmra.mrb[4].mxu1 %vm403_vm5, %v2485_v29 }
 0x1d8   : > { %16904 = vmatpush3.bf16.msra.mxu1 %v18840_v18  ;;  %16907 = vmatprep.mubr.msk.bf16.mxu1 %vm403_vm5, %v2637_v28  ;;  %v2645_v18 = vsel %vm23277_vm6, %v2633_v44, %v2644_v26  ;;  %v2660_v44 = vor.u32 %v2658_v25, %v2657_v33  ;;  %vm2904_vm6 = vcmp.ne.s16.totalorder %v20356_v52, 0  ;;  %v18846_v28 = vld [vmem:[%s23125_s3 + $0xa0] sm:$0xff]   ;;  %v18848_v26 = vld [vmem:[%s23125_s3 + $0xb0] sm:$0xff]   ;;  %v3067_v33 = vld [vmem:[#allocation2 + $0x8] sm:$0xf8] }
 0x1d9   : > { %16905 = vmatprep.subr.bf16.mxu1 %v18841_v63  ;;  %v2909_v53 = vsel %vm2904_vm6, %v20206_v32, 0  ;;  %v18849_v25 = vld [vmem:[%s23125_s3 + $0xb8] sm:$0xff]  }
 0x1da   : > { %v2661_v29 = vsel %vm23278_vm15, %v2649_v2, %v2660_v44  ;;  %v2925_v35 = vshll.u32 %v2909_v53, 16  ;;  %v18847_v2 = vld [vmem:[%s23125_s3 + $0xa8] sm:$0xff]   ;;  %vm23168_vm15 = vcmp.ne.s16.totalorder %v20152_v6, 0  ;;  %v2923_v3 = vshrl.u32 %v2909_v53, 16 }
 0x1db   : > { %v2911_v16 = vsel %vm23168_vm15, %v20234_v55, 0  ;;  %v2892_v44 = vld [vmem:[#allocation2 + $0x28] sm:$0x1]  ;;  %vm23171_vm15 = vcmp.ne.s16.totalorder %v20140_v12, 0 }
 0x1dc   : > { %16906 = vmatpush3.bf16.msra.mxu1 %v18841_v63  ;;  %v18845_v63 = vld [vmem:[%s23125_s3 + $0x98] sm:$0xff]   ;;  %v2942_v53 = vshrl.u32 %v2911_v16, 16 }
 0x1dd   : > { %16915 = vmatprep.subr.bf16.mxu1 %v18842_v45 }
 0x1df   : > { %16908 = vmatmul.mubr.msk.bf16.vlgmr.msra.gmra.mrb[0].mxu1 %vm403_vm5, %v2645_v18  ;;  %v2938_v18 = vshll.u32 %v2911_v16, 16 }
 0x1e0   : > { %16916 = vmatpush3.bf16.msra.mxu1 %v18842_v45  ;;  %16911 = vmatprep.mubr.msk.bf16.mxu1 %vm403_vm5, %v2653_v34  ;;  %v2927_v45 = vrot.slane %v2925_v35, 1 }
 0x1e1   : > { %16917 = vmatprep.subr.bf16.mxu1 %v18843_v54  ;;  %v2940_v5 = vrot.slane %v2938_v18, 1 }
 0x1e4   : > { %16918 = vmatpush3.bf16.msra.mxu1 %v18843_v54  ;;  %v2928_v54 = vor.u32 %v2927_v45, %v2923_v3  ;;  %v2913_v3 = vsel %vm23171_vm15, %v2892_v44, 0  ;;  %vm23283_vm15 = vcmp.ne.s16.totalorder %v19682_v10, 0 }
 0x1e5   : > { %16919 = vmatprep.subr.bf16.mxu1 %v18844_v50  ;;  %v2954_v56 = vshll.u32 %v2913_v3, 16 }
 0x1e7   : > { %16912 = vmatmul.mubr.msk.bf16.gmra.mrb[4].mxu1 %vm403_vm5, %v2661_v29  ;;  %v18850_v29 = vld [vmem:[%s23125_s3 + $0xc0] sm:$0xff]  }
 0x1e8   : > { %16920 = vmatpush3.bf16.msra.mxu1 %v18844_v50  ;;  %16923 = vmatprep.mubr.msk.bf16.mxu1 %vm403_vm5, %v20206_v32  ;;  %v2910_v32 = vsel %vm23167_vm3, %v20203_v46, 0  ;;  %vm23173_vm3 = vcmp.ne.s16.totalorder %v20148_v21, 0  ;;  %v3069_v50 = vsel %vm2088_vm9, %v3067_v33, 0 }
 0x1e9   : > { %16921 = vmatprep.subr.bf16.mxu1 %v18845_v63  ;;  %v2930_v20 = vshll.u32 %v2910_v32, 16  ;;  %v2912_v47 = vsel %vm23173_vm3, %v20331_v13, 0  ;;  %v2934_v35 = vshrl.u32 %v2910_v32, 16  ;;  %v3086_v45 = vshll.u32 %v3069_v50, 16 }
 0x1eb   : > { %v2932_v34 = vrot.slane %v2930_v20, 1  ;;  %v3088_v36 = vrot.slane %v3086_v45, 4 }
 0x1ec   : > { %16922 = vmatpush3.bf16.msra.mxu1 %v18845_v63  ;;  %v3070_v63 = vsel %vm2089_vm7, %v20203_v46, 0 }
 0x1ed   : > { %16931 = vmatprep.subr.bf16.mxu1 %v18846_v28  ;;  %v2933_v58 = vsel %vm23172_vm13, %v2928_v54, %v2932_v34  ;;  %v3091_v20 = vshrl.u32 %v3070_v63, 16  ;;  %v3094_v54 = vshll.u32 %v3070_v63, 16  ;;  %v2936_v18 = vor.u32 %v2934_v35, %v2932_v34  ;;  %v18852_v63 = vld [vmem:[%s23125_s3 + $0xd0] sm:$0xff]  }
 0x1ee   : > { %v3071_v34 = vsel %vm2090_vm1, %v20234_v55, 0  ;;  %v2956_v35 = vrot.slane %v2954_v56, 1 }
 0x1ef   : > { %16924 = vmatmul.mubr.msk.bf16.vlgmr.msra.gmra.mrb[0].mxu1 %vm403_vm5, %v20203_v46  ;;  %v2941_v16 = vsel %vm23172_vm13, %v2936_v18, %v2940_v5  ;;  %v3093_v44 = vrot.slane %v3091_v20, 3  ;;  %v3103_v45 = vshll.u32 %v3071_v34, 16 }
 0x1f0   : > { %16932 = vmatpush3.bf16.msra.mxu1 %v18846_v28  ;;  %16927 = vmatprep.mubr.msk.bf16.mxu1 %vm403_vm5, %v20234_v55  ;;  %v2946_v28 = vshll.u32 %v2912_v47, 16 }
 0x1f1   : > { %16933 = vmatprep.subr.bf16.mxu1 %v18847_v2 }
 0x1f2   : > { %v2948_v33 = vrot.slane %v2946_v28, 1 }
 0x1f4   : > { %16934 = vmatpush3.bf16.msra.mxu1 %v18847_v2  ;;  %v3083_v2 = vshrl.u32 %v3069_v50, 16 }
 0x1f5   : > { %16935 = vmatprep.subr.bf16.mxu1 %v18848_v26 }
 0x1f6   : > { %v3085_v32 = vrot.slane %v3083_v2, 3  ;;  %v3100_v2 = vshrl.u32 %v3071_v34, 16 }
 0x1f7   : > { %16928 = vmatmul.mubr.msk.bf16.gmra.mrb[4].mxu1 %vm403_vm5, %v20331_v13 }
 0x1f8   : > { %16936 = vmatpush3.bf16.msra.mxu1 %v18848_v26  ;;  %16939 = vmatprep.mubr.msk.bf16.mxu1 %vm403_vm5, %v2933_v58  ;;  %v2944_v26 = vor.u32 %v2942_v53, %v2940_v5  ;;  %v18851_v58 = vld [vmem:[%s23125_s3 + $0xc8] sm:$0xff]   ;;  %v3096_v53 = vrot.slane %v3094_v54, 4  ;;  %v3072_v5 = vsel %vm2091_vm11, %v20331_v13, 0 }
 0x1f9   : > { %16937 = vmatprep.subr.bf16.mxu1 %v18849_v25  ;;  %v3109_v20 = vshrl.u32 %v3072_v5, 16  ;;  %v20431_v54 = vld [vmem:[#allocation2 + $0x28] sm:$0xf] }
 0x1fa   : > { %v2949_v50 = vsel %vm23172_vm13, %v2944_v26, %v2948_v33  ;;  %v3089_v26 = vor.u32 %v3088_v36, %v3085_v32  ;;  %v3097_v3 = vor.u32 %v3096_v53, %v3093_v44  ;;  %v18854_v32 = vld [vmem:[%s23125_s3 + $0xe0] sm:$0xff]  }
 0x1fb   : > { %v3111_v36 = vrot.slane %v3109_v20, 3 }
 0x1fc   : > { %16938 = vmatpush3.bf16.msra.mxu1 %v18849_v25  ;;  %v2950_v25 = vshrl.u32 %v2912_v47, 16  ;;  %v18853_v47 = vld [vmem:[%s23125_s3 + $0xd8] sm:$0xff]   ;;  %v3098_v56 = vsel %vm683_vm10, %v3089_v26, %v3097_v3  ;;  %v18856_v26 = vld [vmem:[%s23125_s3 + $0xf0] sm:$0xff]  }
 0x1fd   : > { %16947 = vmatprep.subr.bf16.mxu1 %v18850_v29 }
 0x1fe   : > { %v2952_v28 = vor.u32 %v2950_v25, %v2948_v33 }
 0x1ff   : > { %16940 = vmatmul.mubr.msk.bf16.vlgmr.msra.gmra.mrb[0].mxu1 %vm403_vm5, %v2941_v16  ;;  %v3102_v16 = vrot.slane %v3100_v2, 3 }
 0x200   : > { %16948 = vmatpush3.bf16.msra.mxu1 %v18850_v29  ;;  %16943 = vmatprep.mubr.msk.bf16.mxu1 %vm403_vm5, %v2949_v50  ;;  %v3112_v29 = vshll.u32 %v3072_v5, 16  ;;  %v2957_v18 = vsel %vm23172_vm13, %v2952_v28, %v2956_v35  ;;  %v3105_v50 = vrot.slane %v3103_v45, 4  ;;  %v18855_v5 = vld [vmem:[%s23125_s3 + $0xe8] sm:$0xff]   ;;  %vm23284_vm13 = vcmp.ne.s16.totalorder %v19895_v59, 0 }
 0x201   : > { %16949 = vmatprep.subr.bf16.mxu1 %v18851_v58  ;;  %v3235_v45 = vld [vmem:[#allocation2 + $0x8] sm:$0xf0] }
 0x202   : > { %v3114_v33 = vrot.slane %v3112_v29, 4  ;;  %v3106_v44 = vor.u32 %v3105_v50, %v3102_v16  ;;  %v3249_v29 = vrot.slane %v3235_v45, 4  ;;  %v3368_v16 = vsel %vm2424_vm14, %v3235_v45, 0 }
 0x203   : > { %v3369_v50 = vsel %vm2425_vm2, %v20203_v46, 0 }
 0x204   : > { %16950 = vmatpush3.bf16.msra.mxu1 %v18851_v58  ;;  %v3073_v58 = vsel %vm2092_vm4, %v20431_v54, 0  ;;  %v3115_v25 = vor.u32 %v3114_v33, %v3111_v36  ;;  %v3107_v28 = vsel %vm683_vm10, %v3097_v3, %v3106_v44  ;;  %v18857_v3 = vld [vmem:[%s23125_s3 + $0xf8] sm:$0xff]   ;;  %v3254_v36 = vrot.slane %v20331_v13, 4 }
 0x205   : > { %16951 = vmatprep.subr.bf16.mxu1 %v18852_v63  ;;  %v3118_v53 = vshrl.u32 %v3073_v58, 16  ;;  %v3121_v34 = vshll.u32 %v3073_v58, 16  ;;  %v3382_v33 = vshrl.u32 %v3368_v16, 16  ;;  %v3385_v58 = vshll.u32 %v3368_v16, 16 }
 0x206   : > { %v3116_v2 = vsel %vm683_vm10, %v3106_v44, %v3115_v25  ;;  %v18859_v44 = vld [vmem:[%s23125_s3 + $0x108] sm:$0xff]   ;;  %v3255_v46 = vsel %vm2120_vm8, %v20237_v38, %v3254_v36  ;;  %v18860_v38 = vld [vmem:[%s23125_s3 + $0x110] sm:$0xff]  }
 0x207   : > { %16944 = vmatmul.mubr.msk.bf16.gmra.mrb[4].mxu1 %vm403_vm5, %v2957_v18  ;;  %v3123_v35 = vrot.slane %v3121_v34, 4  ;;  %v3251_v18 = vsel %vm2120_vm8, %v3249_v29, %v20209_v60  ;;  %v3390_v60 = vshrl.u32 %v3369_v50, 16  ;;  %v3384_v34 = vrot.slane %v3382_v33, 4  ;;  %v3367_v29 = vld [vmem:[#allocation2 + $0x28] sm:$0x1f] }
 0x208   : > { %16952 = vmatpush3.bf16.msra.mxu1 %v18852_v63  ;;  %16955 = vmatprep.mubr.msk.bf16.mxu1 %vm403_vm5, %v3098_v56  ;;  %v3120_v63 = vrot.slane %v3118_v53, 3  ;;  %v18858_v56 = vld [vmem:[%s23125_s3 + $0x100] sm:$0xff]   ;;  %v3370_v53 = vsel %vm23283_vm15, %v20234_v55, 0  ;;  %v3256_v55 = vrot.slane %v20431_v54, 4  ;;  %vm23286_vm15 = vcmp.ne.s16.totalorder %v19878_v19, 0 }
 0x209   : > { %16953 = vmatprep.subr.bf16.mxu1 %v18853_v47 }
 0x20a   : > { %v3124_v20 = vor.u32 %v3123_v35, %v3120_v63  ;;  %v3371_v63 = vsel %vm23284_vm13, %v20331_v13, 0  ;;  %v3399_v35 = vshrl.u32 %v3370_v53, 16  ;;  %v18861_v13 = vld [vmem:[%s23125_s3 + $0x118] sm:$0xff]   ;;  %vm23285_vm13 = vsmask.f32 3328 }
 0x20b   : > { %vm23287_vm3 = vmmov %vm23285_vm13 }
 0x20c   : > { %16954 = vmatpush3.bf16.msra.mxu1 %v18853_v47  ;;  %v3125_v47 = vsel %vm683_vm10, %v3115_v25, %v3124_v20  ;;  %v3387_v25 = vrot.slane %v3385_v58, 5  ;;  %v3411_v20 = vshll.u32 %v3371_v63, 16 }
 0x20d   : > { %16963 = vmatprep.subr.bf16.mxu1 %v18854_v32 }
 0x20f   : > { %16956 = vmatmul.mubr.msk.bf16.vlgmr.msra.gmra.mrb[0].mxu1 %vm403_vm5, %v3107_v28 }
 0x210   : > { %16964 = vmatpush3.bf16.msra.mxu1 %v18854_v32  ;;  %16959 = vmatprep.mubr.msk.bf16.mxu1 %vm403_vm5, %v3116_v2  ;;  %v3393_v32 = vshll.u32 %v3369_v50, 16  ;;  %v3388_v2 = vor.u32 %v3387_v25, %v3384_v34  ;;  %v3413_v50 = vrot.slane %v3411_v20, 5 }
 0x211   : > { %16965 = vmatprep.subr.bf16.mxu1 %v18855_v5 }
 0x212   : > { %v3395_v28 = vrot.slane %v3393_v32, 5 }
 0x214   : > { %16966 = vmatpush3.bf16.msra.mxu1 %v18855_v5  ;;  %v3392_v5 = vrot.slane %v3390_v60, 4 }
 0x215   : > { %16967 = vmatprep.subr.bf16.mxu1 %v18856_v26 }
 0x216   : > { %v3396_v45 = vor.u32 %v3395_v28, %v3392_v5  ;;  %v18862_v5 = vld [vmem:[%s23125_s3 + $0x140] sm:$0xff]   ;;  %v18863_v28 = vld [vmem:[%s23125_s3 + $0x148] sm:$0xff]  }
 0x217   : > { %16960 = vmatmul.mubr.msk.bf16.gmra.mrb[4].mxu1 %vm403_vm5, %v3125_v47  ;;  %v3401_v47 = vrot.slane %v3399_v35, 4  ;;  %16995 = vmatprep.subr.bf16.mxu0 %v18862_v5  ;;  %v14969_v35 = vld [vmem:[%s23126_s4] ss:$0 sm:$0xff] }
 0x218   : > { %16968 = vmatpush3.bf16.msra.mxu1 %v18856_v26  ;;  %16971 = vmatprep.mubr.msk.bf16.mxu1 %vm403_vm5, %v3251_v18  ;;  %v3408_v26 = vshrl.u32 %v3371_v63, 16  ;;  %v3397_v54 = vsel %vm23285_vm13, %v3388_v2, %v3396_v45  ;;  %vm23288_vm13 = vmmov %vm23287_vm3  ;;  %v18864_v63 = vld [vmem:[%s23125_s3 + $0x150] sm:$0xff]  }
 0x219   : > { %16969 = vmatprep.subr.bf16.mxu1 %v18857_v3  ;;  %16996 = vmatpush3.bf16.msra.mxu0 %v18862_v5 }
 0x21a   : > { %v3410_v16 = vrot.slane %v3408_v26, 4  ;;  %16997 = vmatprep.subr.bf16.mxu0 %v18863_v28 }
 0x21c   : > { %16970 = vmatpush3.bf16.msra.mxu1 %v18857_v3  ;;  %v3257_v3 = vsel %vm2120_vm8, %v3254_v36, %v3256_v55  ;;  %v3414_v32 = vor.u32 %v3413_v50, %v3410_v16  ;;  %v18866_v55 = vld [vmem:[%s23125_s3 + $0x120] sm:$0xff]  }
 0x21d   : > { %16979 = vmatprep.subr.bf16.mxu1 %v18858_v56  ;;  %16998 = vmatpush3.bf16.msra.mxu0 %v18863_v28  ;;  %v3585_v28 = vld [vmem:[#allocation2] sm:$0xf0] }
 0x21e   : > { %16999 = vmatprep.subr.bf16.mxu0 %v18864_v63 }
 0x21f   : > { %16972 = vmatmul.mubr.msk.bf16.vlgmr.msra.gmra.mrb[0].mxu1 %vm403_vm5, %v20247_v1  ;;  %v3402_v1 = vshll.u32 %v3370_v53, 16 }
 0x220   : > { %16980 = vmatpush3.bf16.msra.mxu1 %v18858_v56  ;;  %16975 = vmatprep.mubr.msk.bf16.mxu1 %vm403_vm5, %v3255_v46  ;;  %v3372_v56 = vsel %vm23286_vm15, %v3367_v29, 0  ;;  %vm23289_vm15 = vmmov %vm23287_vm3 }
 0x221   : > { %16981 = vmatprep.subr.bf16.mxu1 %v18859_v44  ;;  %v3404_v18 = vrot.slane %v3402_v1, 5  ;;  %v3417_v58 = vshrl.u32 %v3372_v56, 16  ;;  %v3420_v60 = vshll.u32 %v3372_v56, 16  ;;  %17000 = vmatpush3.bf16.msra.mxu0 %v18864_v63 }
 0x223   : > { %v3405_v33 = vor.u32 %v3404_v18, %v3401_v47  ;;  %v3422_v46 = vrot.slane %v3420_v60, 5 }
 0x224   : > { %16982 = vmatpush3.bf16.msra.mxu1 %v18859_v44  ;;  %v3419_v44 = vrot.slane %v3417_v58, 4 }
 0x225   : > { %16983 = vmatprep.subr.bf16.mxu1 %v18860_v38  ;;  %v3406_v36 = vsel %vm23287_vm3, %v3396_v45, %v3405_v33  ;;  %v3415_v53 = vsel %vm23288_vm13, %v3405_v33, %v3414_v32  ;;  %vm23290_vm3 = vcmp.ne.s16.totalorder %v19682_v10, 0  ;;  %vm23291_vm13 = vcmp.ne.s16.totalorder %v19895_v59, 0 }
 0x226   : > { %v3423_v34 = vor.u32 %v3422_v46, %v3419_v44 }
 0x227   : > { %16976 = vmatmul.mubr.msk.bf16.gmra.mrb[4].mxu1 %vm403_vm5, %v3257_v3 }
 0x228   : > { %16984 = vmatpush3.bf16.msra.mxu1 %v18860_v38  ;;  %16987 = vmatprep.mubr.msk.bf16.mxu1 %vm403_vm5, %v3397_v54  ;;  %v3424_v25 = vsel %vm23289_vm15, %v3414_v32, %v3423_v34  ;;  %v18865_v38 = vld [vmem:[%s23125_s3 + $0x158] sm:$0xff]  }
 0x229   : > { %16985 = vmatprep.subr.bf16.mxu1 %v18861_v13  ;;  %17001 = vmatprep.subr.bf16.mxu0 %v18865_v38 }
 0x22a   : > { %17002 = vmatpush3.bf16.msra.mxu0 %v18865_v38 }
 0x22b   : > { %17011 = vmatprep.subr.bf16.mxu0 %v18866_v55 }
 0x22c   : > { %16986 = vmatpush3.bf16.msra.mxu1 %v18861_v13 }
 0x22f   : > { %16988 = vmatmul.mubr.msk.bf16.vlgmr.msra.gmra.mrb[0].mxu1 %vm403_vm5, %v3406_v36 }
 0x230   : > { %16991 = vmatprep.mubr.msk.bf16.mxu1 %vm403_vm5, %v3415_v53  ;;  %v3566_v53 = vld [vmem:[#allocation2] sm:$0xf8] }
 0x237   : > { %16992 = vmatmul.mubr.msk.bf16.gmra.mrb[4].mxu1 %vm403_vm5, %v3424_v25 }
 0x302   : > { %v16989_v1 = vpop.f32.mrb[0].mxu1 }
 0x303   : > { %v3542_v2 = vadd.f32 %v16989_v1, %v14969_v35  ;;  %v3495_v45 = vpop.f32.mrb[1].mxu1  ;;  %v3571_v1 = vsel %vm2088_vm9, %v3566_v53, 0 }
 0x304   : > { %v3540_v26 = vadd.f32 %v14969_v35, %v3495_v45  ;;  %v16990_v20 = vpop.f32.mrb[2].mxu1 }
 0x305   : > { %v3543_v29 = vadd.f32 %v16990_v20, %v14969_v35  ;;  %v3498_v13 = vpop.f32.mrb[3].mxu1  ;;  %v3550_v47 = vmax.f32 %v3542_v2, 0.0 }
 0x306   : > { %v3541_v3 = vadd.f32 %v14969_v35, %v3498_v13  ;;  %v3548_v54 = vmax.f32 %v3540_v26, 0.0  ;;  %v3599_v26 = vrot.slane %v3585_v28, 4 }
 0x307   : > { %v3551_v18 = vmax.f32 %v3543_v29, 0.0 }
 0x308   : > { %v3549_v16 = vmax.f32 %v3541_v3, 0.0 }
 0x309   : > { %v3557_v50 = vpack.c.bf16 %v3551_v18, %v3550_v47  ;;  %v3713_v18 = vshll.u32 %v3571_v1, 16 }
 0x30a   : > { %v3556_v56 = vpack.c.bf16 %v3549_v16, %v3548_v54  ;;  %v16993_v33 = vpop.f32.mrb[4].mxu1 }
 0x30b   : > { %3561 = vst.msk [vmem:[#allocation2 + $0x10] sm:$0xff] %vm403_vm5, %v3557_v50  ;;  %v3546_v58 = vadd.f32 %v16993_v33, %v14969_v35  ;;  %v3511_v60 = vpop.f32.mrb[5].mxu1  ;;  %v18867_v33 = vld [vmem:[%s23125_s3 + $0x128] sm:$0xff]  }
 0x30c   : > { %3560 = vst.msk [vmem:[#allocation2 + $0x8] sm:$0xff] %vm403_vm5, %v3556_v56  ;;  %v3544_v32 = vadd.f32 %v14969_v35, %v3511_v60  ;;  %v16994_v36 = vpop.f32.mrb[6].mxu1  ;;  %v3715_v60 = vrot.slane %v3713_v18, 4  ;;  %v3855_v18 = vsel %vm2424_vm14, %v3585_v28, 0 }
 0x30d   : > { %v3547_v44 = vadd.f32 %v16994_v36, %v14969_v35  ;;  %v3514_v46 = vpop.f32.mrb[7].mxu1  ;;  %v3554_v25 = vmax.f32 %v3546_v58, 0.0 }
 0x30e   : > { %v3545_v34 = vadd.f32 %v14969_v35, %v3514_v46  ;;  %v3552_v63 = vmax.f32 %v3544_v32, 0.0  ;;  %v3710_v35 = vshrl.u32 %v3571_v1, 16  ;;  %v18868_v46 = vld [vmem:[%s23125_s3 + $0x130] sm:$0xff]  }
 0x30f   : > { %v3555_v5 = vmax.f32 %v3547_v44, 0.0 }
 0x310   : > { %v3553_v38 = vmax.f32 %v3545_v34, 0.0  ;;  %v3712_v58 = vrot.slane %v3710_v35, 3 }
 0x311   : > { %v3559_v2 = vpack.c.bf16 %v3555_v5, %v3554_v25 }
 0x312   : > { %v3558_v45 = vpack.c.bf16 %v3553_v38, %v3552_v63  ;;  %v20528_v20 = vld [vmem:[#allocation2 + $0x10] sm:$0xff]  ;;  %v3716_v1 = vor.u32 %v3715_v60, %v3712_v58  ;;  %v18870_v60 = vld [vmem:[%s23125_s3 + $0x160] sm:$0xff]  }
 0x313   : > { %3563 = vst.msk [vmem:[#allocation2 + $0x20] sm:$0xff] %vm403_vm5, %v3559_v2  ;;  %v20531_v29 = vld [vmem:[#allocation2 + $0x8] sm:$0xff]  ;;  %v20534_v13 = vrot.slane %v20528_v20, 4  ;;  %v3573_v44 = vsel %vm2090_vm1, %v20528_v20, 0 }
 0x314   : > { %3562 = vst.msk [vmem:[#allocation2 + $0x18] sm:$0xff] %vm403_vm5, %v3558_v45  ;;  %v3600_v3 = vrot.slane %v20531_v29, 4  ;;  %v3572_v47 = vsel %vm2089_vm7, %v20531_v29, 0  ;;  %v3727_v5 = vshrl.u32 %v3573_v44, 16  ;;  %v3730_v63 = vshll.u32 %v3573_v44, 16 }
 0x315   : > { %v3718_v54 = vshrl.u32 %v3572_v47, 16  ;;  %v3721_v16 = vshll.u32 %v3572_v47, 16  ;;  %v18869_v47 = vld [vmem:[%s23125_s3 + $0x138] sm:$0xff]   ;;  %v3856_v28 = vsel %vm2425_vm2, %v20531_v29, 0 }
 0x316   : > { %v3601_v50 = vsel %vm2120_vm8, %v3599_v26, %v3600_v3  ;;  %v3603_v56 = vsel %vm2120_vm8, %v3600_v3, %v20534_v13 }
 0x317   : > { %17003 = vmatprep.mubr.msk.bf16.mxu0 %vm403_vm5, %v3601_v50  ;;  %v3720_v32 = vrot.slane %v3718_v54, 3  ;;  %v3723_v36 = vrot.slane %v3721_v16, 4  ;;  %v3729_v54 = vrot.slane %v3727_v5, 3  ;;  %v3732_v16 = vrot.slane %v3730_v63, 4 }
 0x318   : > { %17004 = vmatmul.mubr.msk.bf16.vlgmr.msra.gmra.mrb[8].mxu0 %vm403_vm5, %v3603_v56  ;;  %v3872_v5 = vshll.u32 %v3855_v18, 16 }
 0x319   : > { %17012 = vmatpush3.bf16.msra.mxu0 %v18866_v55  ;;  %v3724_v2 = vor.u32 %v3723_v36, %v3720_v32  ;;  %v3869_v32 = vshrl.u32 %v3855_v18, 16  ;;  %v3733_v36 = vor.u32 %v3732_v16, %v3729_v54 }
 0x31a   : > { %17013 = vmatprep.subr.bf16.mxu0 %v18867_v33  ;;  %v3570_v53 = vld [vmem:[#allocation2 + $0x20] sm:$0xf] }
 0x31b   : > { %v20555_v34 = vld [vmem:[#allocation2 + $0x18] sm:$0xff]  ;;  %v3606_v25 = vrot.slane %v3570_v53, 4  ;;  %v3725_v50 = vsel %vm683_vm10, %v3716_v1, %v3724_v2  ;;  %v3575_v58 = vsel %vm2092_vm4, %v3570_v53, 0  ;;  %v3877_v1 = vshrl.u32 %v3856_v28, 16 }
 0x31c   : > { %v20558_v38 = vrot.slane %v20555_v34, 4  ;;  %v3574_v55 = vsel %vm2091_vm11, %v20555_v34, 0  ;;  %v3745_v44 = vshrl.u32 %v3575_v58, 16  ;;  %v3880_v53 = vshll.u32 %v3856_v28, 16 }
 0x31d   : > { %17014 = vmatpush3.bf16.msra.mxu0 %v18867_v33  ;;  %v3736_v45 = vshrl.u32 %v3574_v55, 16  ;;  %v3739_v26 = vshll.u32 %v3574_v55, 16  ;;  %v3871_v55 = vrot.slane %v3869_v32, 4  ;;  %v3879_v18 = vrot.slane %v3877_v1, 4 }
 0x31e   : > { %v20566_v35 = vsel %vm2120_vm8, %v20534_v13, %v20558_v38  ;;  %17015 = vmatprep.subr.bf16.mxu0 %v18868_v46  ;;  %v3607_v3 = vsel %vm2120_vm8, %v20558_v38, %v3606_v25  ;;  %v3748_v25 = vshll.u32 %v3575_v58, 16  ;;  %v3882_v16 = vrot.slane %v3880_v53, 5 }
 0x31f   : > { %17007 = vmatprep.mubr.msk.bf16.mxu0 %vm403_vm5, %v20566_v35  ;;  %v3738_v56 = vrot.slane %v3736_v45, 3  ;;  %v3741_v33 = vrot.slane %v3739_v26, 4  ;;  %v3734_v45 = vsel %vm683_vm10, %v3724_v2, %v3733_v36  ;;  %v3747_v26 = vrot.slane %v3745_v44, 3 }
 0x320   : > { %17008 = vmatmul.mubr.msk.bf16.gmra.mrb[12].mxu0 %vm403_vm5, %v3607_v3  ;;  %v3750_v3 = vrot.slane %v3748_v25, 4  ;;  %v3858_v2 = vsel %vm23291_vm13, %v20555_v34, 0  ;;  %vm23293_vm13 = vcmp.ne.s16.totalorder %v23268_v31, 0 }
 0x321   : > { %17016 = vmatpush3.bf16.msra.mxu0 %v18868_v46  ;;  %17019 = vmatprep.mubr.msk.bf16.mxu0 %vm403_vm5, %v3725_v50  ;;  %v3742_v63 = vor.u32 %v3741_v33, %v3738_v56  ;;  %v18871_v46 = vld [vmem:[%s23125_s3 + $0x168] sm:$0xff]   ;;  %v3874_v50 = vrot.slane %v3872_v5, 5  ;;  %v18872_v56 = vld [vmem:[%s23125_s3 + $0x170] sm:$0xff]   ;;  %v3895_v44 = vshrl.u32 %v3858_v2, 16  ;;  %v3898_v25 = vshll.u32 %v3858_v2, 16  ;;  %v18873_v5 = vld [vmem:[%s23125_s3 + $0x178] sm:$0xff]  }
 0x322   : > { %17017 = vmatprep.subr.bf16.mxu0 %v18869_v47  ;;  %v3751_v33 = vor.u32 %v3750_v3, %v3747_v26 }
 0x323   : > { %v3743_v54 = vsel %vm683_vm10, %v3733_v36, %v3742_v63  ;;  %v3875_v32 = vor.u32 %v3874_v50, %v3871_v55  ;;  %v3883_v36 = vor.u32 %v3882_v16, %v3879_v18  ;;  %v3897_v3 = vrot.slane %v3895_v44, 4 }
 0x324   : > { %v3752_v1 = vsel %vm683_vm10, %v3742_v63, %v3751_v33  ;;  %v3900_v55 = vrot.slane %v3898_v25, 5  ;;  %v18874_v63 = vld [vmem:[%s23125_s3 + $0x180] sm:$0xff]  }
 0x325   : > { %17018 = vmatpush3.bf16.msra.mxu0 %v18869_v47  ;;  %v3857_v47 = vsel %vm23290_vm3, %v20528_v20, 0  ;;  %v3884_v26 = vsel %vm23289_vm15, %v3875_v32, %v3883_v36  ;;  %vm23292_vm3 = vcmp.ne.s16.totalorder %v19878_v19, 0 }
 0x326   : > { %17027 = vmatprep.subr.bf16.mxu0 %v18870_v60  ;;  %v3886_v58 = vshrl.u32 %v3857_v47, 16  ;;  %v3889_v28 = vshll.u32 %v3857_v47, 16  ;;  %v3901_v2 = vor.u32 %v3900_v55, %v3897_v3 }
 0x328   : > { %17020 = vmatmul.mubr.msk.bf16.vlgmr.msra.gmra.mrb[8].mxu0 %vm403_vm5, %v3734_v45  ;;  %v3888_v53 = vrot.slane %v3886_v58, 4  ;;  %v3891_v45 = vrot.slane %v3889_v28, 5  ;;  %v18875_v58 = vld [vmem:[%s23125_s3 + $0x188] sm:$0xff]  }
 0x329   : > { %17028 = vmatpush3.bf16.msra.mxu0 %v18870_v60  ;;  %17023 = vmatprep.mubr.msk.bf16.mxu0 %vm403_vm5, %v3743_v54  ;;  %v3854_v60 = vld [vmem:[#allocation2 + $0x20] sm:$0x1f]  ;;  %v4021_v54 = vld [vmem:[#allocation2] sm:$0x80] }
 0x32a   : > { %17029 = vmatprep.subr.bf16.mxu0 %v18871_v46  ;;  %v3859_v50 = vsel %vm23292_vm3, %v3854_v60, 0  ;;  %v3892_v18 = vor.u32 %v3891_v45, %v3888_v53  ;;  %vm23294_vm3 = vmmov %vm23289_vm15 }
 0x32b   : > { %v3904_v16 = vshrl.u32 %v3859_v50, 16  ;;  %v3907_v47 = vshll.u32 %v3859_v50, 16 }
 0x32c   : > { %v3893_v28 = vsel %vm23289_vm15, %v3883_v36, %v3892_v18  ;;  %v3902_v25 = vsel %vm23294_vm3, %v3892_v18, %v3901_v2  ;;  %v18876_v36 = vld [vmem:[%s23125_s3 + $0x190] sm:$0xff]   ;;  %v20637_v18 = vld [vmem:[#allocation2 + $0x20] sm:$0xff]  ;;  %vm23296_vm15 = vmmov %vm23294_vm3  ;;  %vm23297_vm3 = vsmask.f32 256 }
 0x32d   : > { %17030 = vmatpush3.bf16.msra.mxu0 %v18871_v46  ;;  %v4024_v46 = vsel %vm23293_vm13, %v20531_v29, 0  ;;  %v3906_v32 = vrot.slane %v3904_v16, 4  ;;  %v3909_v44 = vrot.slane %v3907_v47, 5  ;;  %vm23295_vm13 = vcmp.ne.s16.totalorder %v23271_v23, 0 }
 0x32e   : > { %17031 = vmatprep.subr.bf16.mxu0 %v18872_v56  ;;  %v4041_v33 = vshrl.u32 %v4024_v46, 16  ;;  %v4026_v53 = vsel %vm23295_vm13, %v20555_v34, 0  ;;  %v4044_v45 = vshll.u32 %v4024_v46, 16  ;;  %vm23298_vm13 = vcmp.ne.s16.totalorder %v20321_v51, 0 }
 0x330   : > { %17024 = vmatmul.mubr.msk.bf16.gmra.mrb[12].mxu0 %vm403_vm5, %v3752_v1  ;;  %v4043_v1 = vrot.slane %v4041_v33, 7 }
 0x331   : > { %17032 = vmatpush3.bf16.msra.mxu0 %v18872_v56  ;;  %17035 = vmatprep.mubr.msk.bf16.mxu0 %vm403_vm5, %v3884_v26  ;;  %v4023_v56 = vsel %vm2608_vm0, %v4021_v54, 0  ;;  %v3910_v26 = vor.u32 %v3909_v44, %v3906_v32  ;;  %v4057_v54 = vshrl.u32 %v4026_v53, 16 }
 0x332   : > { %17033 = vmatprep.subr.bf16.mxu0 %v18873_v5  ;;  %v4037_v60 = vshrl.u32 %v4023_v56, 16  ;;  %v4046_v50 = vor.u32 %v4044_v45, %v4043_v1  ;;  %v4027_v56 = vsel %vm23298_vm13, %v20637_v18, 0  ;;  %vm23300_vm13 = vmmov %vm23297_vm3 }
 0x333   : > { %v3911_v16 = vsel %vm23296_vm15, %v3901_v2, %v3910_v26  ;;  %v4059_v33 = vrot.slane %v4057_v54, 7  ;;  %v4060_v2 = vshll.u32 %v4026_v53, 16  ;;  %v4065_v44 = vshrl.u32 %v4027_v56, 16  ;;  %vm23299_vm15 = vmmov %vm23297_vm3  ;;  %v18880_v26 = vld [vmem:[%s23125_s3 + $0x1b0] sm:$0xff]   ;;  %v18882_v54 = vld [vmem:[%s23125_s3 + $0x1c0] sm:$0xff]  }
 0x334   : > { %v4039_v55 = vrot.slane %v4037_v60, 7  ;;  %v18879_v60 = vld [vmem:[%s23125_s3 + $0x1a8] sm:$0xff]   ;;  %v4068_v53 = vshll.u32 %v4027_v56, 16 }
 0x335   : > { %17034 = vmatpush3.bf16.msra.mxu0 %v18873_v5  ;;  %v4025_v5 = vsel %vm2610_vm12, %v20528_v20, 0  ;;  %v4067_v45 = vrot.slane %v4065_v44, 7 }
 0x336   : > { %17043 = vmatprep.subr.bf16.mxu0 %v18874_v63  ;;  %v4049_v3 = vshrl.u32 %v4025_v5, 16  ;;  %v4047_v46 = vsel %vm23297_vm3, %v4039_v55, %v4046_v50  ;;  %v4303_v50 = vsel %vm2904_vm6, %v20531_v29, 0 }
 0x337   : > { %v4317_v56 = vshrl.u32 %v4303_v50, 16 }
 0x338   : > { %17036 = vmatmul.mubr.msk.bf16.vlgmr.msra.gmra.mrb[8].mxu0 %vm403_vm5, %v3893_v28  ;;  %v4051_v47 = vrot.slane %v4049_v3, 7  ;;  %v18878_v28 = vld [vmem:[%s23125_s3 + $0x1a0] sm:$0xff]   ;;  %v4070_v3 = vor.u32 %v4068_v53, %v4067_v45  ;;  %v4302_v53 = vld [vmem:[#allocation2 + $0x28] sm:$0x1] }
 0x339   : > { %17044 = vmatpush3.bf16.msra.mxu0 %v18874_v63  ;;  %17039 = vmatprep.mubr.msk.bf16.mxu0 %vm403_vm5, %v3902_v25  ;;  %v18877_v63 = vld [vmem:[%s23125_s3 + $0x198] sm:$0xff]   ;;  %v4062_v25 = vor.u32 %v4060_v2, %v4059_v33 }
 0x33a   : > { %17045 = vmatprep.subr.bf16.mxu0 %v18875_v58  ;;  %v4071_v55 = vsel %vm23300_vm13, %v4059_v33, %v4070_v3  ;;  %v18884_v33 = vld [vmem:[%s23125_s3 + $0x1d0] sm:$0xff]   ;;  %vm23303_vm13 = vcmp.ne.s16.totalorder %v20148_v21, 0  ;;  %v18886_v3 = vld [vmem:[%s23125_s3 + $0x1e0] sm:$0xff]  }
 0x33d   : > { %17046 = vmatpush3.bf16.msra.mxu0 %v18875_v58  ;;  %v4052_v58 = vshll.u32 %v4025_v5, 16  ;;  %v4063_v5 = vsel %vm23297_vm3, %v4051_v47, %v4062_v25  ;;  %vm23302_vm3 = vcmp.ne.s16.totalorder %v20152_v6, 0  ;;  %v18885_v25 = vld [vmem:[%s23125_s3 + $0x1d8] sm:$0xff]  }
 0x33e   : > { %17047 = vmatprep.subr.bf16.mxu0 %v18876_v36 }
 0x33f   : > { %v4054_v32 = vor.u32 %v4052_v58, %v4051_v47 }
 0x340   : > { %17040 = vmatmul.mubr.msk.bf16.gmra.mrb[12].mxu0 %vm403_vm5, %v3911_v16  ;;  %v18883_v16 = vld [vmem:[%s23125_s3 + $0x1c8] sm:$0xff]  }
 0x341   : > { %17048 = vmatpush3.bf16.msra.mxu0 %v18876_v36  ;;  %17051 = vmatprep.mubr.msk.bf16.mxu0 %vm403_vm5, %v4047_v46  ;;  %v4055_v36 = vsel %vm23299_vm15, %v4043_v1, %v4054_v32  ;;  %v18881_v1 = vld [vmem:[%s23125_s3 + $0x1b8] sm:$0xff]   ;;  %vm23301_vm15 = vcmp.ne.s16.totalorder %v23282_v62, 0  ;;  %v4305_v46 = vsel %vm23302_vm3, %v20555_v34, 0  ;;  %v4461_v32 = vld [vmem:[#allocation2 + $0x8] sm:$0xf8]  ;;  %vm23305_vm3 = vcmp.ne.s16.totalorder %v20140_v12, 0 }
 0x342   : > { %17049 = vmatprep.subr.bf16.mxu0 %v18877_v63  ;;  %v4304_v47 = vsel %vm23301_vm15, %v20528_v20, 0  ;;  %v4332_v2 = vshll.u32 %v4305_v46, 16  ;;  %vm23304_vm15 = vsmask.f32 7424 }
 0x343   : > { %v4324_v58 = vshll.u32 %v4304_v47, 16 }
 0x344   : > { %v4334_v45 = vrot.slane %v4332_v2, 1  ;;  %v18887_v2 = vld [vmem:[%s23125_s3 + $0x1e8] sm:$0xff]  }
 0x345   : > { %17050 = vmatpush3.bf16.msra.mxu0 %v18877_v63  ;;  %v4319_v63 = vshll.u32 %v4303_v50, 16  ;;  %v4326_v44 = vrot.slane %v4324_v58, 1  ;;  %v4328_v50 = vshrl.u32 %v4304_v47, 16 }
 0x346   : > { %17059 = vmatprep.subr.bf16.mxu0 %v18878_v28 }
 0x347   : > { %v4330_v58 = vor.u32 %v4328_v50, %v4326_v44 }
 0x348   : > { %17052 = vmatmul.mubr.msk.bf16.vlgmr.msra.gmra.mrb[8].mxu0 %vm403_vm5, %v4055_v36 }
 0x349   : > { %17060 = vmatpush3.bf16.msra.mxu0 %v18878_v28  ;;  %17055 = vmatprep.mubr.msk.bf16.mxu0 %vm403_vm5, %v4063_v5  ;;  %v4463_v5 = vsel %vm2088_vm9, %v4461_v32, 0 }
 0x34a   : > { %17061 = vmatprep.subr.bf16.mxu0 %v18879_v60 }
 0x34d   : > { %17062 = vmatpush3.bf16.msra.mxu0 %v18879_v60  ;;  %v4306_v60 = vsel %vm23303_vm13, %v20637_v18, 0  ;;  %vm23306_vm13 = vmmov %vm23304_vm15 }
 0x34e   : > { %17063 = vmatprep.subr.bf16.mxu0 %v18880_v26 }
 0x350   : > { %17056 = vmatmul.mubr.msk.bf16.gmra.mrb[12].mxu0 %vm403_vm5, %v4071_v55  ;;  %v4340_v55 = vshll.u32 %v4306_v60, 16 }
 0x351   : > { %17064 = vmatpush3.bf16.msra.mxu0 %v18880_v26  ;;  %17067 = vmatprep.mubr.msk.bf16.mxu0 %vm403_vm5, %v20531_v29  ;;  %v4321_v29 = vrot.slane %v4319_v63, 1  ;;  %v4464_v26 = vsel %vm2089_vm7, %v20528_v20, 0  ;;  %v4480_v63 = vshll.u32 %v4463_v5, 16 }
 0x352   : > { %17065 = vmatprep.subr.bf16.mxu0 %v18881_v1 }
 0x353   : > { %v4322_v28 = vor.u32 %v4321_v29, %v4317_v56  ;;  %v4307_v29 = vsel %vm23305_vm3, %v4302_v53, 0  ;;  %v4488_v56 = vshll.u32 %v4464_v26, 16  ;;  %vm23308_vm3 = vmmov %vm23306_vm13 }
 0x354   : > { %v4348_v32 = vshll.u32 %v4307_v29, 16 }
 0x355   : > { %17066 = vmatpush3.bf16.msra.mxu0 %v18881_v1  ;;  %v4327_v36 = vsel %vm23304_vm15, %v4322_v28, %v4326_v44  ;;  %v4336_v1 = vshrl.u32 %v4305_v46, 16  ;;  %v4342_v28 = vrot.slane %v4340_v55, 1  ;;  %v4335_v46 = vsel %vm23306_vm13, %v4330_v58, %v4334_v45  ;;  %vm23307_vm15 = vmmov %vm23306_vm13 }
 0x356   : > { %17075 = vmatprep.subr.bf16.mxu0 %v18882_v54  ;;  %v4465_v44 = vsel %vm2090_vm1, %v20555_v34, 0  ;;  %v4350_v50 = vrot.slane %v4348_v32, 1  ;;  %vm23309_vm13 = vcmp.ne.s16.totalorder %v19682_v10, 0 }
 0x358   : > { %17068 = vmatmul.mubr.msk.bf16.vlgmr.msra.gmra.mrb[8].mxu0 %vm403_vm5, %v20528_v20 }
 0x359   : > { %17076 = vmatpush3.bf16.msra.mxu0 %v18882_v54  ;;  %17071 = vmatprep.mubr.msk.bf16.mxu0 %vm403_vm5, %v20555_v34  ;;  %v4477_v54 = vshrl.u32 %v4463_v5, 16 }
 0x35a   : > { %17077 = vmatprep.subr.bf16.mxu0 %v18883_v16 }
 0x35b   : > { %v4479_v47 = vrot.slane %v4477_v54, 3  ;;  %v4494_v54 = vshrl.u32 %v4465_v44, 16 }
 0x35d   : > { %17078 = vmatpush3.bf16.msra.mxu0 %v18883_v16  ;;  %v4338_v16 = vor.u32 %v4336_v1, %v4334_v45  ;;  %v4490_v1 = vrot.slane %v4488_v56, 4  ;;  %v4466_v45 = vsel %vm2091_vm11, %v20637_v18, 0  ;;  %v20727_v56 = vld [vmem:[#allocation2 + $0x28] sm:$0xf] }
 0x35e   : > { %17079 = vmatprep.subr.bf16.mxu0 %v18884_v33 }
 0x35f   : > { %v4343_v5 = vsel %vm23307_vm15, %v4338_v16, %v4342_v28  ;;  %vm23310_vm15 = vcmp.ne.s16.totalorder %v19895_v59, 0 }
 0x360   : > { %17072 = vmatmul.mubr.msk.bf16.gmra.mrb[12].mxu0 %vm403_vm5, %v20637_v18 }
 0x361   : > { %17080 = vmatpush3.bf16.msra.mxu0 %v18884_v33  ;;  %17083 = vmatprep.mubr.msk.bf16.mxu0 %vm403_vm5, %v4327_v36  ;;  %v4485_v33 = vshrl.u32 %v4464_v26, 16  ;;  %v4482_v36 = vrot.slane %v4480_v63, 4  ;;  %v18888_v26 = vld [vmem:[%s23125_s3 + $0x1f0] sm:$0xff]   ;;  %v4497_v63 = vshll.u32 %v4465_v44, 16 }
 0x362   : > { %17081 = vmatprep.subr.bf16.mxu0 %v18885_v25 }
 0x363   : > { %v4487_v53 = vrot.slane %v4485_v33, 3  ;;  %v4483_v16 = vor.u32 %v4482_v36, %v4479_v47  ;;  %v4503_v33 = vshrl.u32 %v4466_v45, 16  ;;  %v18890_v36 = vld [vmem:[%s23125_s3 + $0x200] sm:$0xff]  }
 0x365   : > { %17082 = vmatpush3.bf16.msra.mxu0 %v18885_v25  ;;  %v4344_v25 = vshrl.u32 %v4306_v60, 16  ;;  %v4491_v29 = vor.u32 %v4490_v1, %v4487_v53  ;;  %v18889_v60 = vld [vmem:[%s23125_s3 + $0x1f8] sm:$0xff]   ;;  %v4505_v32 = vrot.slane %v4503_v33, 3 }
 0x366   : > { %17091 = vmatprep.subr.bf16.mxu0 %v18886_v3 }
 0x367   : > { %v4346_v55 = vor.u32 %v4344_v25, %v4342_v28  ;;  %v4492_v28 = vsel %vm683_vm10, %v4483_v16, %v4491_v29  ;;  %v18892_v16 = vld [vmem:[%s23125_s3 + $0x210] sm:$0xff]  }
 0x368   : > { %17084 = vmatmul.mubr.msk.bf16.vlgmr.msra.gmra.mrb[8].mxu0 %vm403_vm5, %v4335_v46  ;;  %v4496_v46 = vrot.slane %v4494_v54, 3 }
 0x369   : > { %17092 = vmatpush3.bf16.msra.mxu0 %v18886_v3  ;;  %17087 = vmatprep.mubr.msk.bf16.mxu0 %vm403_vm5, %v4343_v5  ;;  %v4506_v3 = vshll.u32 %v4466_v45, 16  ;;  %v4351_v58 = vsel %vm23308_vm3, %v4346_v55, %v4350_v50  ;;  %v4499_v5 = vrot.slane %v4497_v63, 4  ;;  %v18891_v45 = vld [vmem:[%s23125_s3 + $0x208] sm:$0xff]   ;;  %vm23311_vm3 = vsmask.f32 3328 }
 0x36a   : > { %17093 = vmatprep.subr.bf16.mxu0 %v18887_v2  ;;  %v4629_v63 = vld [vmem:[#allocation2 + $0x8] sm:$0xf0] }
 0x36b   : > { %v4508_v47 = vrot.slane %v4506_v3, 4  ;;  %v4500_v53 = vor.u32 %v4499_v5, %v4496_v46  ;;  %v4643_v3 = vrot.slane %v4629_v63, 4  ;;  %v4762_v46 = vsel %vm2424_vm14, %v4629_v63, 0 }
 0x36c   : > { %v4763_v5 = vsel %vm2425_vm2, %v20528_v20, 0 }
 0x36d   : > { %17094 = vmatpush3.bf16.msra.mxu0 %v18887_v2  ;;  %v4467_v2 = vsel %vm2092_vm4, %v20727_v56, 0  ;;  %v4509_v25 = vor.u32 %v4508_v47, %v4505_v32  ;;  %v4501_v55 = vsel %vm683_vm10, %v4491_v29, %v4500_v53  ;;  %v18893_v29 = vld [vmem:[%s23125_s3 + $0x218] sm:$0xff]   ;;  %v4648_v32 = vrot.slane %v20637_v18, 4 }
 0x36e   : > { %17095 = vmatprep.subr.bf16.mxu0 %v18888_v26  ;;  %v4512_v1 = vshrl.u32 %v4467_v2, 16  ;;  %v4515_v44 = vshll.u32 %v4467_v2, 16  ;;  %v4776_v47 = vshrl.u32 %v4762_v46, 16  ;;  %v4779_v2 = vshll.u32 %v4762_v46, 16 }
 0x36f   : > { %v4510_v54 = vsel %vm683_vm10, %v4500_v53, %v4509_v25  ;;  %v18895_v53 = vld [vmem:[%s23125_s3 + $0x228] sm:$0xff]   ;;  %v4649_v20 = vsel %vm2120_vm8, %v20558_v38, %v4648_v32  ;;  %v18896_v38 = vld [vmem:[%s23125_s3 + $0x230] sm:$0xff]  }
 0x370   : > { %17088 = vmatmul.mubr.msk.bf16.gmra.mrb[12].mxu0 %vm403_vm5, %v4351_v58  ;;  %v4517_v50 = vrot.slane %v4515_v44, 4  ;;  %v4645_v58 = vsel %vm2120_vm8, %v4643_v3, %v20534_v13  ;;  %v4784_v13 = vshrl.u32 %v4763_v5, 16  ;;  %v4778_v44 = vrot.slane %v4776_v47, 4  ;;  %v4761_v3 = vld [vmem:[#allocation2 + $0x28] sm:$0x1f] }
 0x371   : > { %17096 = vmatpush3.bf16.msra.mxu0 %v18888_v26  ;;  %17099 = vmatprep.mubr.msk.bf16.mxu0 %vm403_vm5, %v4492_v28  ;;  %v4514_v26 = vrot.slane %v4512_v1, 3  ;;  %v18894_v28 = vld [vmem:[%s23125_s3 + $0x220] sm:$0xff]   ;;  %v4764_v1 = vsel %vm23309_vm13, %v20555_v34, 0  ;;  %v4650_v34 = vrot.slane %v20727_v56, 4  ;;  %vm23312_vm13 = vcmp.ne.s16.totalorder %v19878_v19, 0 }
 0x372   : > { %17097 = vmatprep.subr.bf16.mxu0 %v18889_v60 }
 0x373   : > { %v4518_v33 = vor.u32 %v4517_v50, %v4514_v26  ;;  %v4765_v26 = vsel %vm23310_vm15, %v20637_v18, 0  ;;  %v4793_v50 = vshrl.u32 %v4764_v1, 16  ;;  %v18897_v18 = vld [vmem:[%s23125_s3 + $0x238] sm:$0xff]   ;;  %vm23313_vm15 = vmmov %vm23311_vm3 }
 0x375   : > { %17098 = vmatpush3.bf16.msra.mxu0 %v18889_v60  ;;  %v4519_v60 = vsel %vm683_vm10, %v4509_v25, %v4518_v33  ;;  %v4781_v25 = vrot.slane %v4779_v2, 5  ;;  %v4805_v33 = vshll.u32 %v4765_v26, 16 }
 0x376   : > { %17107 = vmatprep.subr.bf16.mxu0 %v18890_v36 }
 0x378   : > { %17100 = vmatmul.mubr.msk.bf16.vlgmr.msra.gmra.mrb[8].mxu0 %vm403_vm5, %v4501_v55 }
 0x379   : > { %17108 = vmatpush3.bf16.msra.mxu0 %v18890_v36  ;;  %17103 = vmatprep.mubr.msk.bf16.mxu0 %vm403_vm5, %v4510_v54  ;;  %v4787_v36 = vshll.u32 %v4763_v5, 16  ;;  %v4782_v54 = vor.u32 %v4781_v25, %v4778_v44  ;;  %v4807_v5 = vrot.slane %v4805_v33, 5 }
 0x37a   : > { %17109 = vmatprep.subr.bf16.mxu0 %v18891_v45 }
 0x37b   : > { %v4789_v55 = vrot.slane %v4787_v36, 5 }
 0x37d   : > { %17110 = vmatpush3.bf16.msra.mxu0 %v18891_v45  ;;  %v4786_v45 = vrot.slane %v4784_v13, 4 }
 0x37e   : > { %17111 = vmatprep.subr.bf16.mxu0 %v18892_v16 }
 0x37f   : > { %v4790_v63 = vor.u32 %v4789_v55, %v4786_v45  ;;  %v18898_v45 = vld [vmem:[%s23125_s3 + $0x260] sm:$0xff]   ;;  %v18899_v55 = vld [vmem:[%s23125_s3 + $0x268] sm:$0xff]  }
 0x380   : > { %17104 = vmatmul.mubr.msk.bf16.gmra.mrb[12].mxu0 %vm403_vm5, %v4519_v60  ;;  %v4795_v60 = vrot.slane %v4793_v50, 4  ;;  %17139 = vmatprep.subr.bf16.mxu1 %v18898_v45  ;;  %v15115_v50 = vld [vmem:[%s23126_s4 + $0x1] ss:$0 sm:$0xff] }
 0x381   : > { %17112 = vmatpush3.bf16.msra.mxu0 %v18892_v16  ;;  %17115 = vmatprep.mubr.msk.bf16.mxu0 %vm403_vm5, %v4645_v58  ;;  %v4802_v16 = vshrl.u32 %v4765_v26, 16  ;;  %v4791_v56 = vsel %vm23311_vm3, %v4782_v54, %v4790_v63  ;;  %v18900_v26 = vld [vmem:[%s23125_s3 + $0x270] sm:$0xff]  }
 0x382   : > { %17113 = vmatprep.subr.bf16.mxu0 %v18893_v29  ;;  %17140 = vmatpush3.bf16.msra.mxu1 %v18898_v45 }
 0x383   : > { %v4804_v46 = vrot.slane %v4802_v16, 4  ;;  %17141 = vmatprep.subr.bf16.mxu1 %v18899_v55 }
 0x385   : > { %17114 = vmatpush3.bf16.msra.mxu0 %v18893_v29  ;;  %v4651_v29 = vsel %vm2120_vm8, %v4648_v32, %v4650_v34  ;;  %v4808_v36 = vor.u32 %v4807_v5, %v4804_v46  ;;  %v20817_v34 = vld [vmem:[%s23125_s3 + $0x240] sm:$0xff]  }
 0x386   : > { %17123 = vmatprep.subr.bf16.mxu0 %v18894_v28  ;;  %17142 = vmatpush3.bf16.msra.mxu1 %v18899_v55  ;;  %v4987_v55 = vld [vmem:[#allocation2] sm:$0xf0] }
 0x387   : > { %17143 = vmatprep.subr.bf16.mxu1 %v18900_v26 }
 0x388   : > { %17116 = vmatmul.mubr.msk.bf16.vlgmr.msra.gmra.mrb[8].mxu0 %vm403_vm5, %v20566_v35  ;;  %v4796_v35 = vshll.u32 %v4764_v1, 16 }
 0x389   : > { %17124 = vmatpush3.bf16.msra.mxu0 %v18894_v28  ;;  %17119 = vmatprep.mubr.msk.bf16.mxu0 %vm403_vm5, %v4649_v20  ;;  %v4766_v28 = vsel %vm23312_vm13, %v4761_v3, 0  ;;  %vm23314_vm13 = vmmov %vm23311_vm3 }
 0x38a   : > { %17125 = vmatprep.subr.bf16.mxu0 %v18895_v53  ;;  %v4798_v58 = vrot.slane %v4796_v35, 5  ;;  %v4811_v2 = vshrl.u32 %v4766_v28, 16  ;;  %v4814_v13 = vshll.u32 %v4766_v28, 16  ;;  %17144 = vmatpush3.bf16.msra.mxu1 %v18900_v26 }
 0x38c   : > { %v4799_v47 = vor.u32 %v4798_v58, %v4795_v60  ;;  %v4816_v20 = vrot.slane %v4814_v13, 5 }
 0x38d   : > { %17126 = vmatpush3.bf16.msra.mxu0 %v18895_v53  ;;  %v4813_v53 = vrot.slane %v4811_v2, 4 }
 0x38e   : > { %17127 = vmatprep.subr.bf16.mxu0 %v18896_v38  ;;  %v4800_v32 = vsel %vm23313_vm15, %v4790_v63, %v4799_v47  ;;  %v4809_v1 = vsel %vm23311_vm3, %v4799_v47, %v4808_v36  ;;  %vm23317_vm15 = vcmp.ne.s16.totalorder %v19682_v10, 0  ;;  %vm23318_vm3 = vcmp.ne.s16.totalorder %v19895_v59, 0 }
 0x38f   : > { %v4817_v44 = vor.u32 %v4816_v20, %v4813_v53  ;;  %v23315_v20 = vmax.f32 %v20184_v30, 0.0 }
 0x390   : > { %17120 = vmatmul.mubr.msk.bf16.gmra.mrb[12].mxu0 %vm403_vm5, %v4651_v29 }
 0x391   : > { %17128 = vmatpush3.bf16.msra.mxu0 %v18896_v38  ;;  %17131 = vmatprep.mubr.msk.bf16.mxu0 %vm403_vm5, %v4791_v56  ;;  %v4818_v25 = vsel %vm23314_vm13, %v4808_v36, %v4817_v44  ;;  %v18901_v38 = vld [vmem:[%s23125_s3 + $0x278] sm:$0xff]   ;;  %v4968_v44 = vld [vmem:[#allocation2] sm:$0xf8] }
 0x392   : > { %17129 = vmatprep.subr.bf16.mxu0 %v18897_v18  ;;  %17145 = vmatprep.subr.bf16.mxu1 %v18901_v38 }
 0x393   : > { %17146 = vmatpush3.bf16.msra.mxu1 %v18901_v38  ;;  %v5001_v38 = vrot.slane %v4987_v55, 4 }
 0x394   : > { %17155 = vmatprep.subr.bf16.mxu1 %v20817_v34 }
 0x395   : > { %17130 = vmatpush3.bf16.msra.mxu0 %v18897_v18 }
 0x398   : > { %17132 = vmatmul.mubr.msk.bf16.vlgmr.msra.gmra.mrb[8].mxu0 %vm403_vm5, %v4800_v32 }
 0x399   : > { %17135 = vmatprep.mubr.msk.bf16.mxu0 %vm403_vm5, %v4809_v1 }
 0x3a0   : > { %17136 = vmatmul.mubr.msk.bf16.gmra.mrb[12].mxu0 %vm403_vm5, %v4818_v25  ;;  %v23316_v25 = vmax.f32 %v20186_v39, 0.0 }
 0x46b   : > { %v17133_v35 = vpop.f32.mrb[8].mxu0 }
 0x46c   : > { %v4936_v54 = vadd.f32 %v17133_v35, %v15115_v50  ;;  %v4889_v63 = vpop.f32.mrb[9].mxu0 }
 0x46d   : > { %v4934_v16 = vadd.f32 %v15115_v50, %v4889_v63  ;;  %v17134_v33 = vpop.f32.mrb[10].mxu0 }
 0x46e   : > { %v20825_v3 = vadd.f32 %v4936_v54, %v2021_v7  ;;  %v4937_v18 = vadd.f32 %v17134_v33, %v15115_v50  ;;  %v4892_v29 = vpop.f32.mrb[11].mxu0 }
 0x46f   : > { %v20829_v60 = vadd.f32 %v4934_v16, %v2019_v42  ;;  %v4935_v58 = vadd.f32 %v15115_v50, %v4892_v29 }
 0x470   : > { %v20833_v56 = vadd.f32 %v4937_v18, %v2022_v9  ;;  %v4952_v5 = vmax.f32 %v20825_v3, 0.0 }
 0x471   : > { %v20837_v46 = vadd.f32 %v4935_v58, %v2020_v0  ;;  %v4950_v7 = vmax.f32 %v20829_v60, 0.0 }
 0x472   : > { %v4953_v24 = vmax.f32 %v20833_v56, 0.0 }
 0x473   : > { %v4951_v28 = vmax.f32 %v20837_v46, 0.0  ;;  %v17137_v43 = vpop.f32.mrb[12].mxu0 }
 0x474   : > { %v4959_v14 = vpack.c.bf16 %v4953_v24, %v4952_v5  ;;  %v4940_v9 = vadd.f32 %v17137_v43, %v15115_v50  ;;  %v4905_v42 = vpop.f32.mrb[13].mxu0 }
 0x475   : > { %v4958_v4 = vpack.c.bf16 %v4951_v28, %v4950_v7  ;;  %v4938_v0 = vadd.f32 %v15115_v50, %v4905_v42  ;;  %v17138_v47 = vpop.f32.mrb[14].mxu0 }
 0x476   : > { %4963 = vst.msk [vmem:[#allocation2 + $0x10] sm:$0xff] %vm403_vm5, %v4959_v14  ;;  %v20854_v2 = vadd.f32 %v4940_v9, %v2025_v48  ;;  %v4941_v13 = vadd.f32 %v17138_v47, %v15115_v50  ;;  %v4908_v36 = vpop.f32.mrb[15].mxu0  ;;  %v18903_v9 = vld [vmem:[%s23125_s3 + $0x248] sm:$0xff]  }
 0x477   : > { %4962 = vst.msk [vmem:[#allocation2 + $0x8] sm:$0xff] %vm403_vm5, %v4958_v4  ;;  %v20859_v32 = vadd.f32 %v4938_v0, %v2023_v37  ;;  %v4939_v53 = vadd.f32 %v15115_v50, %v4908_v36  ;;  %v4973_v37 = vsel %vm2088_vm9, %v4968_v44, 0  ;;  %v18904_v36 = vld [vmem:[%s23125_s3 + $0x250] sm:$0xff]  }
 0x478   : > { %v20863_v1 = vadd.f32 %v4941_v13, %v23315_v20  ;;  %v4956_v8 = vmax.f32 %v20854_v2, 0.0  ;;  %v5112_v63 = vshrl.u32 %v4973_v37, 16  ;;  %v5115_v18 = vshll.u32 %v4973_v37, 16 }
 0x479   : > { %v20867_v45 = vadd.f32 %v4939_v53, %v23316_v25  ;;  %v4954_v26 = vmax.f32 %v20859_v32, 0.0 }
 0x47a   : > { %v23175_v48 = vmax.f32 %v20863_v1, 0.0  ;;  %v5114_v42 = vrot.slane %v5112_v63, 3  ;;  %v5117_v4 = vrot.slane %v5115_v18, 4 }
 0x47b   : > { %v23174_v57 = vmax.f32 %v20867_v45, 0.0 }
 0x47c   : > { %v4961_v30 = vpack.c.bf16 %v23175_v48, %v4956_v8 }
 0x47d   : > { %v4960_v39 = vpack.c.bf16 %v23174_v57, %v4954_v26  ;;  %v20883_v50 = vld [vmem:[#allocation2 + $0x10] sm:$0xff] }
 0x47e   : > { %4965 = vst.msk [vmem:[#allocation2 + $0x20] sm:$0xff] %vm403_vm5, %v4961_v30  ;;  %v20886_v35 = vld [vmem:[#allocation2 + $0x8] sm:$0xff]  ;;  %v20889_v54 = vrot.slane %v20883_v50, 4  ;;  %v4975_v13 = vsel %vm2090_vm1, %v20883_v50, 0 }
 0x47f   : > { %4964 = vst.msk [vmem:[#allocation2 + $0x18] sm:$0xff] %vm403_vm5, %v4960_v39  ;;  %v5002_v16 = vrot.slane %v20886_v35, 4  ;;  %v4974_v33 = vsel %vm2089_vm7, %v20886_v35, 0  ;;  %v5129_v25 = vshrl.u32 %v4975_v13, 16  ;;  %v5132_v37 = vshll.u32 %v4975_v13, 16 }
 0x480   : > { %v5120_v29 = vshrl.u32 %v4974_v33, 16  ;;  %v5123_v58 = vshll.u32 %v4974_v33, 16  ;;  %v5118_v39 = vor.u32 %v5117_v4, %v5114_v42 }
 0x481   : > { %v5003_v43 = vsel %vm2120_vm8, %v5001_v38, %v5002_v16  ;;  %v5005_v14 = vsel %vm2120_vm8, %v5002_v16, %v20889_v54 }
 0x482   : > { %17147 = vmatprep.mubr.msk.bf16.mxu1 %vm403_vm5, %v5003_v43  ;;  %v5122_v0 = vrot.slane %v5120_v29, 3  ;;  %v5125_v47 = vrot.slane %v5123_v58, 4  ;;  %v18905_v29 = vld [vmem:[%s23125_s3 + $0x258] sm:$0xff]   ;;  %v5257_v58 = vsel %vm2424_vm14, %v4987_v55, 0  ;;  %v5131_v43 = vrot.slane %v5129_v25, 3 }
 0x483   : > { %17148 = vmatmul.mubr.msk.bf16.vlgmr.msra.gmra.mrb[8].mxu1 %vm403_vm5, %v5005_v14  ;;  %v5134_v14 = vrot.slane %v5132_v37, 4  ;;  %v5258_v55 = vsel %vm2425_vm2, %v20886_v35, 0  ;;  %v5271_v13 = vshrl.u32 %v5257_v58, 16 }
 0x484   : > { %17156 = vmatpush3.bf16.msra.mxu1 %v20817_v34  ;;  %v5126_v38 = vor.u32 %v5125_v47, %v5122_v0  ;;  %v18906_v47 = vld [vmem:[%s23125_s3 + $0x280] sm:$0xff]  }
 0x485   : > { %17157 = vmatprep.subr.bf16.mxu1 %v18903_v9  ;;  %v4972_v53 = vld [vmem:[#allocation2 + $0x20] sm:$0xf] }
 0x486   : > { %v20911_v20 = vld [vmem:[#allocation2 + $0x18] sm:$0xff]  ;;  %v5008_v44 = vrot.slane %v4972_v53, 4  ;;  %v4977_v0 = vsel %vm2092_vm4, %v4972_v53, 0  ;;  %v5282_v53 = vshll.u32 %v5258_v55, 16 }
 0x487   : > { %v20914_v30 = vrot.slane %v20911_v20, 4  ;;  %v4976_v34 = vsel %vm2091_vm11, %v20911_v20, 0  ;;  %v5147_v25 = vshrl.u32 %v4977_v0, 16  ;;  %v5150_v37 = vshll.u32 %v4977_v0, 16 }
 0x488   : > { %17158 = vmatpush3.bf16.msra.mxu1 %v18903_v9  ;;  %v5138_v63 = vshrl.u32 %v4976_v34, 16  ;;  %v5141_v16 = vshll.u32 %v4976_v34, 16  ;;  %v5127_v9 = vsel %vm683_vm10, %v5118_v39, %v5126_v38  ;;  %v5274_v39 = vshll.u32 %v5257_v58, 16 }
 0x489   : > { %v20922_v33 = vsel %vm2120_vm8, %v20889_v54, %v20914_v30  ;;  %17159 = vmatprep.subr.bf16.mxu1 %v18904_v36  ;;  %v5009_v18 = vsel %vm2120_vm8, %v20914_v30, %v5008_v44  ;;  %v5135_v44 = vor.u32 %v5134_v14, %v5131_v43  ;;  %v5152_v57 = vrot.slane %v5150_v37, 4 }
 0x48a   : > { %17151 = vmatprep.mubr.msk.bf16.mxu1 %vm403_vm5, %v20922_v33  ;;  %v5140_v42 = vrot.slane %v5138_v63, 3  ;;  %v5143_v4 = vrot.slane %v5141_v16, 4  ;;  %v5279_v63 = vshrl.u32 %v5258_v55, 16  ;;  %v5273_v16 = vrot.slane %v5271_v13, 4 }
 0x48b   : > { %17152 = vmatmul.mubr.msk.bf16.gmra.mrb[12].mxu1 %vm403_vm5, %v5009_v18  ;;  %v5136_v18 = vsel %vm683_vm10, %v5126_v38, %v5135_v44  ;;  %v5276_v48 = vrot.slane %v5274_v39, 5  ;;  %v5284_v14 = vrot.slane %v5282_v53, 5  ;;  %v5260_v38 = vsel %vm23318_vm3, %v20911_v20, 0  ;;  %v18909_v39 = vld [vmem:[%s23125_s3 + $0x298] sm:$0xff]  }
 0x48c   : > { %17160 = vmatpush3.bf16.msra.mxu1 %v18904_v36  ;;  %17163 = vmatprep.mubr.msk.bf16.mxu1 %vm403_vm5, %v5127_v9  ;;  %v5144_v34 = vor.u32 %v5143_v4, %v5140_v42  ;;  %v18907_v36 = vld [vmem:[%s23125_s3 + $0x288] sm:$0xff]   ;;  %v5149_v9 = vrot.slane %v5147_v25, 3  ;;  %v5281_v58 = vrot.slane %v5279_v63, 4  ;;  %v18908_v42 = vld [vmem:[%s23125_s3 + $0x290] sm:$0xff]   ;;  %v5297_v25 = vshrl.u32 %v5260_v38, 16 }
 0x48d   : > { %17161 = vmatprep.subr.bf16.mxu1 %v18905_v29  ;;  %v5277_v13 = vor.u32 %v5276_v48, %v5273_v16  ;;  %v5300_v37 = vshll.u32 %v5260_v38, 16  ;;  %vm23320_vm3 = vcmp.ne.s16.totalorder %v23268_v31, 0 }
 0x48e   : > { %v5145_v43 = vsel %vm683_vm10, %v5135_v44, %v5144_v34  ;;  %v5153_v4 = vor.u32 %v5152_v57, %v5149_v9  ;;  %v5285_v44 = vor.u32 %v5284_v14, %v5281_v58  ;;  %v5299_v9 = vrot.slane %v5297_v25, 4 }
 0x48f   : > { %v5302_v48 = vrot.slane %v5300_v37, 5 }
 0x490   : > { %17162 = vmatpush3.bf16.msra.mxu1 %v18905_v29  ;;  %v5259_v29 = vsel %vm23317_vm15, %v20883_v50, 0  ;;  %v5154_v63 = vsel %vm683_vm10, %v5144_v34, %v5153_v4  ;;  %v5286_v57 = vsel %vm23314_vm13, %v5277_v13, %v5285_v44  ;;  %vm23319_vm15 = vcmp.ne.s16.totalorder %v19878_v19, 0  ;;  %v18910_v34 = vld [vmem:[%s23125_s3 + $0x2a0] sm:$0xff]  }
 0x491   : > { %17171 = vmatprep.subr.bf16.mxu1 %v18906_v47  ;;  %v5288_v0 = vshrl.u32 %v5259_v29, 16  ;;  %v5291_v55 = vshll.u32 %v5259_v29, 16  ;;  %v5303_v38 = vor.u32 %v5302_v48, %v5299_v9 }
 0x493   : > { %17164 = vmatmul.mubr.msk.bf16.vlgmr.msra.gmra.mrb[8].mxu1 %vm403_vm5, %v5136_v18  ;;  %v5290_v53 = vrot.slane %v5288_v0, 4  ;;  %v5293_v18 = vrot.slane %v5291_v55, 5  ;;  %v18911_v0 = vld [vmem:[%s23125_s3 + $0x2a8] sm:$0xff]  }
 0x494   : > { %17172 = vmatpush3.bf16.msra.mxu1 %v18906_v47  ;;  %17167 = vmatprep.mubr.msk.bf16.mxu1 %vm403_vm5, %v5145_v43  ;;  %v5256_v47 = vld [vmem:[#allocation2 + $0x20] sm:$0x1f]  ;;  %v5423_v43 = vld [vmem:[#allocation2] sm:$0x80] }
 0x495   : > { %17173 = vmatprep.subr.bf16.mxu1 %v18907_v36  ;;  %v5261_v16 = vsel %vm23319_vm15, %v5256_v47, 0  ;;  %v5294_v58 = vor.u32 %v5293_v18, %v5290_v53  ;;  %vm23321_vm15 = vmmov %vm23314_vm13 }
 0x496   : > { %v5306_v14 = vshrl.u32 %v5261_v16, 16  ;;  %v5309_v29 = vshll.u32 %v5261_v16, 16 }
 0x497   : > { %v5295_v55 = vsel %vm23314_vm13, %v5285_v44, %v5294_v58  ;;  %v5304_v37 = vsel %vm23321_vm15, %v5294_v58, %v5303_v38  ;;  %v18912_v44 = vld [vmem:[%s23125_s3 + $0x2b0] sm:$0xff]   ;;  %v20993_v58 = vld [vmem:[#allocation2 + $0x20] sm:$0xff]  ;;  %vm23323_vm15 = vsmask.f32 256 }
 0x498   : > { %17174 = vmatpush3.bf16.msra.mxu1 %v18907_v36  ;;  %v5426_v36 = vsel %vm23320_vm3, %v20886_v35, 0  ;;  %v5308_v13 = vrot.slane %v5306_v14, 4  ;;  %v5311_v25 = vrot.slane %v5309_v29, 5  ;;  %vm23322_vm3 = vcmp.ne.s16.totalorder %v23271_v23, 0 }
 0x499   : > { %17175 = vmatprep.subr.bf16.mxu1 %v18908_v42  ;;  %v5443_v4 = vshrl.u32 %v5426_v36, 16  ;;  %v5428_v53 = vsel %vm23322_vm3, %v20911_v20, 0  ;;  %v5446_v18 = vshll.u32 %v5426_v36, 16  ;;  %vm23324_vm3 = vcmp.ne.s16.totalorder %v20321_v51, 0 }
 0x49b   : > { %17168 = vmatmul.mubr.msk.bf16.gmra.mrb[12].mxu1 %vm403_vm5, %v5154_v63  ;;  %v5445_v63 = vrot.slane %v5443_v4, 7 }
 0x49c   : > { %17176 = vmatpush3.bf16.msra.mxu1 %v18908_v42  ;;  %17179 = vmatprep.mubr.msk.bf16.mxu1 %vm403_vm5, %v5286_v57  ;;  %v5425_v42 = vsel %vm2608_vm0, %v5423_v43, 0  ;;  %v5312_v57 = vor.u32 %v5311_v25, %v5308_v13  ;;  %v5459_v43 = vshrl.u32 %v5428_v53, 16 }
 0x49d   : > { %17177 = vmatprep.subr.bf16.mxu1 %v18909_v39  ;;  %v5439_v47 = vshrl.u32 %v5425_v42, 16  ;;  %v5448_v16 = vor.u32 %v5446_v18, %v5445_v63  ;;  %v5429_v42 = vsel %vm23324_vm3, %v20993_v58, 0 }
 0x49e   : > { %v5313_v14 = vsel %vm23314_vm13, %v5303_v38, %v5312_v57  ;;  %v5461_v4 = vrot.slane %v5459_v43, 7  ;;  %v5462_v38 = vshll.u32 %v5428_v53, 16  ;;  %v5467_v25 = vshrl.u32 %v5429_v42, 16  ;;  %vm23325_vm13 = vmmov %vm23323_vm15  ;;  %v18916_v57 = vld [vmem:[%s23125_s3 + $0x2d0] sm:$0xff]   ;;  %v18918_v43 = vld [vmem:[%s23125_s3 + $0x2e0] sm:$0xff]  }
 0x49f   : > { %v5441_v48 = vrot.slane %v5439_v47, 7  ;;  %v18915_v47 = vld [vmem:[%s23125_s3 + $0x2c8] sm:$0xff]   ;;  %v5470_v53 = vshll.u32 %v5429_v42, 16  ;;  %vm23327_vm3 = vmmov %vm23325_vm13 }
 0x4a0   : > { %17178 = vmatpush3.bf16.msra.mxu1 %v18909_v39  ;;  %v5427_v39 = vsel %vm2610_vm12, %v20883_v50, 0  ;;  %v5469_v18 = vrot.slane %v5467_v25, 7 }
 0x4a1   : > { %17187 = vmatprep.subr.bf16.mxu1 %v18910_v34  ;;  %v5451_v9 = vshrl.u32 %v5427_v39, 16  ;;  %v5449_v36 = vsel %vm23323_vm15, %v5441_v48, %v5448_v16  ;;  %vm23326_vm15 = vmmov %vm23325_vm13  ;;  %v5705_v16 = vsel %vm2904_vm6, %v20886_v35, 0 }
 0x4a2   : > { %v5719_v42 = vshrl.u32 %v5705_v16, 16 }
 0x4a3   : > { %17180 = vmatmul.mubr.msk.bf16.vlgmr.msra.gmra.mrb[8].mxu1 %vm403_vm5, %v5295_v55  ;;  %v5453_v29 = vrot.slane %v5451_v9, 7  ;;  %v18914_v55 = vld [vmem:[%s23125_s3 + $0x2c0] sm:$0xff]   ;;  %v5472_v9 = vor.u32 %v5470_v53, %v5469_v18  ;;  %v5704_v53 = vld [vmem:[#allocation2 + $0x28] sm:$0x1] }
 0x4a4   : > { %17188 = vmatpush3.bf16.msra.mxu1 %v18910_v34  ;;  %17183 = vmatprep.mubr.msk.bf16.mxu1 %vm403_vm5, %v5304_v37  ;;  %v18913_v34 = vld [vmem:[%s23125_s3 + $0x2b8] sm:$0xff]   ;;  %v5464_v37 = vor.u32 %v5462_v38, %v5461_v4 }
 0x4a5   : > { %17189 = vmatprep.subr.bf16.mxu1 %v18911_v0  ;;  %v5473_v48 = vsel %vm23327_vm3, %v5461_v4, %v5472_v9  ;;  %v18920_v4 = vld [vmem:[%s23125_s3 + $0x2f0] sm:$0xff]   ;;  %vm23330_vm3 = vcmp.ne.s16.totalorder %v20148_v21, 0  ;;  %v18922_v9 = vld [vmem:[%s23125_s3 + $0x300] sm:$0xff]  }
 0x4a8   : > { %17190 = vmatpush3.bf16.msra.mxu1 %v18911_v0  ;;  %v5454_v0 = vshll.u32 %v5427_v39, 16  ;;  %v5465_v39 = vsel %vm23326_vm15, %v5453_v29, %v5464_v37  ;;  %vm23329_vm15 = vcmp.ne.s16.totalorder %v20152_v6, 0  ;;  %v18921_v37 = vld [vmem:[%s23125_s3 + $0x2f8] sm:$0xff]  }
 0x4a9   : > { %17191 = vmatprep.subr.bf16.mxu1 %v18912_v44 }
 0x4aa   : > { %v5456_v13 = vor.u32 %v5454_v0, %v5453_v29 }
 0x4ab   : > { %17184 = vmatmul.mubr.msk.bf16.gmra.mrb[12].mxu1 %vm403_vm5, %v5313_v14  ;;  %v18919_v14 = vld [vmem:[%s23125_s3 + $0x2e8] sm:$0xff]  }
 0x4ac   : > { %17192 = vmatpush3.bf16.msra.mxu1 %v18912_v44  ;;  %17195 = vmatprep.mubr.msk.bf16.mxu1 %vm403_vm5, %v5449_v36  ;;  %v5457_v44 = vsel %vm23325_vm13, %v5445_v63, %v5456_v13  ;;  %v18917_v63 = vld [vmem:[%s23125_s3 + $0x2d8] sm:$0xff]   ;;  %vm23328_vm13 = vcmp.ne.s16.totalorder %v23282_v62, 0  ;;  %v5707_v36 = vsel %vm23329_vm15, %v20911_v20, 0  ;;  %v5863_v13 = vld [vmem:[#allocation2 + $0x8] sm:$0xf8]  ;;  %vm23332_vm15 = vcmp.ne.s16.totalorder %v20140_v12, 0 }
 0x4ad   : > { %17193 = vmatprep.subr.bf16.mxu1 %v18913_v34  ;;  %v5706_v29 = vsel %vm23328_vm13, %v20883_v50, 0  ;;  %v5734_v38 = vshll.u32 %v5707_v36, 16  ;;  %vm23331_vm13 = vsmask.f32 7424 }
 0x4ae   : > { %v5726_v0 = vshll.u32 %v5706_v29, 16 }
 0x4af   : > { %v5736_v18 = vrot.slane %v5734_v38, 1  ;;  %v18923_v38 = vld [vmem:[%s23125_s3 + $0x308] sm:$0xff]  }
 0x4b0   : > { %17194 = vmatpush3.bf16.msra.mxu1 %v18913_v34  ;;  %v5721_v34 = vshll.u32 %v5705_v16, 16  ;;  %v5728_v25 = vrot.slane %v5726_v0, 1  ;;  %v5730_v16 = vshrl.u32 %v5706_v29, 16 }
 0x4b1   : > { %17203 = vmatprep.subr.bf16.mxu1 %v18914_v55 }
 0x4b2   : > { %v5732_v0 = vor.u32 %v5730_v16, %v5728_v25 }
 0x4b3   : > { %17196 = vmatmul.mubr.msk.bf16.vlgmr.msra.gmra.mrb[8].mxu1 %vm403_vm5, %v5457_v44 }
 0x4b4   : > { %17204 = vmatpush3.bf16.msra.mxu1 %v18914_v55  ;;  %17199 = vmatprep.mubr.msk.bf16.mxu1 %vm403_vm5, %v5465_v39  ;;  %v5865_v39 = vsel %vm2088_vm9, %v5863_v13, 0 }
 0x4b5   : > { %17205 = vmatprep.subr.bf16.mxu1 %v18915_v47 }
 0x4b8   : > { %17206 = vmatpush3.bf16.msra.mxu1 %v18915_v47  ;;  %v5708_v47 = vsel %vm23330_vm3, %v20993_v58, 0  ;;  %vm23333_vm3 = vmmov %vm23331_vm13 }
 0x4b9   : > { %17207 = vmatprep.subr.bf16.mxu1 %v18916_v57 }
 0x4bb   : > { %17200 = vmatmul.mubr.msk.bf16.gmra.mrb[12].mxu1 %vm403_vm5, %v5473_v48  ;;  %v5742_v48 = vshll.u32 %v5708_v47, 16 }
 0x4bc   : > { %17208 = vmatpush3.bf16.msra.mxu1 %v18916_v57  ;;  %17211 = vmatprep.mubr.msk.bf16.mxu1 %vm403_vm5, %v20886_v35  ;;  %v5723_v35 = vrot.slane %v5721_v34, 1  ;;  %v5866_v57 = vsel %vm2089_vm7, %v20883_v50, 0  ;;  %v5882_v34 = vshll.u32 %v5865_v39, 16 }
 0x4bd   : > { %17209 = vmatprep.subr.bf16.mxu1 %v18917_v63 }
 0x4be   : > { %v5724_v55 = vor.u32 %v5723_v35, %v5719_v42  ;;  %v5709_v35 = vsel %vm23332_vm15, %v5704_v53, 0  ;;  %v5890_v42 = vshll.u32 %v5866_v57, 16  ;;  %vm23335_vm15 = vmmov %vm23333_vm3 }
 0x4bf   : > { %v5750_v13 = vshll.u32 %v5709_v35, 16 }
 0x4c0   : > { %17210 = vmatpush3.bf16.msra.mxu1 %v18917_v63  ;;  %v5729_v44 = vsel %vm23331_vm13, %v5724_v55, %v5728_v25  ;;  %v5738_v63 = vshrl.u32 %v5707_v36, 16  ;;  %v5744_v55 = vrot.slane %v5742_v48, 1  ;;  %v5737_v36 = vsel %vm23333_vm3, %v5732_v0, %v5736_v18  ;;  %vm23334_vm13 = vmmov %vm23333_vm3 }
 0x4c1   : > { %17219 = vmatprep.subr.bf16.mxu1 %v18918_v43  ;;  %v5867_v25 = vsel %vm2090_vm1, %v20911_v20, 0  ;;  %v5752_v16 = vrot.slane %v5750_v13, 1  ;;  %vm23336_vm3 = vcmp.ne.s16.totalorder %v19682_v10, 0 }
 0x4c3   : > { %17212 = vmatmul.mubr.msk.bf16.vlgmr.msra.gmra.mrb[8].mxu1 %vm403_vm5, %v20883_v50 }
 0x4c4   : > { %17220 = vmatpush3.bf16.msra.mxu1 %v18918_v43  ;;  %17215 = vmatprep.mubr.msk.bf16.mxu1 %vm403_vm5, %v20911_v20  ;;  %v5879_v43 = vshrl.u32 %v5865_v39, 16 }
 0x4c5   : > { %17221 = vmatprep.subr.bf16.mxu1 %v18919_v14 }
 0x4c6   : > { %v5881_v29 = vrot.slane %v5879_v43, 3  ;;  %v5896_v43 = vshrl.u32 %v5867_v25, 16 }
 0x4c8   : > { %17222 = vmatpush3.bf16.msra.mxu1 %v18919_v14  ;;  %v5740_v14 = vor.u32 %v5738_v63, %v5736_v18  ;;  %v5892_v63 = vrot.slane %v5890_v42, 4  ;;  %v5868_v18 = vsel %vm2091_vm11, %v20993_v58, 0  ;;  %v21083_v42 = vld [vmem:[#allocation2 + $0x28] sm:$0xf] }
 0x4c9   : > { %17223 = vmatprep.subr.bf16.mxu1 %v18920_v4 }
 0x4ca   : > { %v5745_v39 = vsel %vm23334_vm13, %v5740_v14, %v5744_v55  ;;  %vm23337_vm13 = vcmp.ne.s16.totalorder %v19895_v59, 0 }
 0x4cb   : > { %17216 = vmatmul.mubr.msk.bf16.gmra.mrb[12].mxu1 %vm403_vm5, %v20993_v58 }
 0x4cc   : > { %17224 = vmatpush3.bf16.msra.mxu1 %v18920_v4  ;;  %17227 = vmatprep.mubr.msk.bf16.mxu1 %vm403_vm5, %v5729_v44  ;;  %v5887_v4 = vshrl.u32 %v5866_v57, 16  ;;  %v5884_v44 = vrot.slane %v5882_v34, 4  ;;  %v18924_v57 = vld [vmem:[%s23125_s3 + $0x310] sm:$0xff]   ;;  %v5899_v34 = vshll.u32 %v5867_v25, 16 }
 0x4cd   : > { %17225 = vmatprep.subr.bf16.mxu1 %v18921_v37 }
 0x4ce   : > { %v5889_v53 = vrot.slane %v5887_v4, 3  ;;  %v5885_v14 = vor.u32 %v5884_v44, %v5881_v29  ;;  %v5905_v4 = vshrl.u32 %v5868_v18, 16  ;;  %v18926_v44 = vld [vmem:[%s23125_s3 + $0x320] sm:$0xff]  }
 0x4d0   : > { %17226 = vmatpush3.bf16.msra.mxu1 %v18921_v37  ;;  %v5746_v37 = vshrl.u32 %v5708_v47, 16  ;;  %v5893_v35 = vor.u32 %v5892_v63, %v5889_v53  ;;  %v18925_v47 = vld [vmem:[%s23125_s3 + $0x318] sm:$0xff]   ;;  %v5907_v13 = vrot.slane %v5905_v4, 3 }
 0x4d1   : > { %17235 = vmatprep.subr.bf16.mxu1 %v18922_v9 }
 0x4d2   : > { %v5748_v48 = vor.u32 %v5746_v37, %v5744_v55  ;;  %v5894_v55 = vsel %vm683_vm10, %v5885_v14, %v5893_v35  ;;  %v18928_v14 = vld [vmem:[%s23125_s3 + $0x330] sm:$0xff]  }
 0x4d3   : > { %17228 = vmatmul.mubr.msk.bf16.vlgmr.msra.gmra.mrb[8].mxu1 %vm403_vm5, %v5737_v36  ;;  %v5898_v36 = vrot.slane %v5896_v43, 3 }
 0x4d4   : > { %17236 = vmatpush3.bf16.msra.mxu1 %v18922_v9  ;;  %17231 = vmatprep.mubr.msk.bf16.mxu1 %vm403_vm5, %v5745_v39  ;;  %v5908_v9 = vshll.u32 %v5868_v18, 16  ;;  %v5753_v0 = vsel %vm23335_vm15, %v5748_v48, %v5752_v16  ;;  %v5901_v39 = vrot.slane %v5899_v34, 4  ;;  %v18927_v18 = vld [vmem:[%s23125_s3 + $0x328] sm:$0xff]   ;;  %vm23338_vm15 = vsmask.f32 3328 }
 0x4d5   : > { %17237 = vmatprep.subr.bf16.mxu1 %v18923_v38  ;;  %v6031_v34 = vld [vmem:[#allocation2 + $0x8] sm:$0xf0] }
 0x4d6   : > { %v5910_v29 = vrot.slane %v5908_v9, 4  ;;  %v5902_v53 = vor.u32 %v5901_v39, %v5898_v36  ;;  %v6045_v9 = vrot.slane %v6031_v34, 4  ;;  %v6164_v36 = vsel %vm2424_vm14, %v6031_v34, 0 }
 0x4d7   : > { %v6165_v39 = vsel %vm2425_vm2, %v20883_v50, 0 }
 0x4d8   : > { %17238 = vmatpush3.bf16.msra.mxu1 %v18923_v38  ;;  %v5869_v38 = vsel %vm2092_vm4, %v21083_v42, 0  ;;  %v5911_v37 = vor.u32 %v5910_v29, %v5907_v13  ;;  %v5903_v48 = vsel %vm683_vm10, %v5893_v35, %v5902_v53  ;;  %v18929_v35 = vld [vmem:[%s23125_s3 + $0x338] sm:$0xff]   ;;  %v6050_v13 = vrot.slane %v20993_v58, 4 }
 0x4d9   : > { %17239 = vmatprep.subr.bf16.mxu1 %v18924_v57  ;;  %v5914_v63 = vshrl.u32 %v5869_v38, 16  ;;  %v5917_v25 = vshll.u32 %v5869_v38, 16  ;;  %v6178_v29 = vshrl.u32 %v6164_v36, 16  ;;  %v6181_v38 = vshll.u32 %v6164_v36, 16 }
 0x4da   : > { %v5912_v43 = vsel %vm683_vm10, %v5902_v53, %v5911_v37  ;;  %v18931_v53 = vld [vmem:[%s23125_s3 + $0x348] sm:$0xff]   ;;  %v6051_v50 = vsel %vm2120_vm8, %v20914_v30, %v6050_v13  ;;  %v18932_v30 = vld [vmem:[%s23125_s3 + $0x350] sm:$0xff]  }
 0x4db   : > { %17232 = vmatmul.mubr.msk.bf16.gmra.mrb[12].mxu1 %vm403_vm5, %v5753_v0  ;;  %v5919_v16 = vrot.slane %v5917_v25, 4  ;;  %v6047_v0 = vsel %vm2120_vm8, %v6045_v9, %v20889_v54  ;;  %v6186_v54 = vshrl.u32 %v6165_v39, 16  ;;  %v6180_v25 = vrot.slane %v6178_v29, 4  ;;  %v6163_v9 = vld [vmem:[#allocation2 + $0x28] sm:$0x1f] }
 0x4dc   : > { %17240 = vmatpush3.bf16.msra.mxu1 %v18924_v57  ;;  %17243 = vmatprep.mubr.msk.bf16.mxu1 %vm403_vm5, %v5894_v55  ;;  %v5916_v57 = vrot.slane %v5914_v63, 3  ;;  %v18930_v55 = vld [vmem:[%s23125_s3 + $0x340] sm:$0xff]   ;;  %v6166_v63 = vsel %vm23336_vm3, %v20911_v20, 0  ;;  %v6052_v20 = vrot.slane %v21083_v42, 4  ;;  %vm23339_vm3 = vcmp.ne.s16.totalorder %v19878_v19, 0 }
 0x4dd   : > { %17241 = vmatprep.subr.bf16.mxu1 %v18925_v47 }
 0x4de   : > { %v5920_v4 = vor.u32 %v5919_v16, %v5916_v57  ;;  %v6167_v57 = vsel %vm23337_vm13, %v20993_v58, 0  ;;  %v6195_v16 = vshrl.u32 %v6166_v63, 16  ;;  %v18933_v58 = vld [vmem:[%s23125_s3 + $0x358] sm:$0xff]   ;;  %vm23340_vm13 = vmmov %vm23338_vm15 }
 0x4e0   : > { %17242 = vmatpush3.bf16.msra.mxu1 %v18925_v47  ;;  %v5921_v47 = vsel %vm683_vm10, %v5911_v37, %v5920_v4  ;;  %v6183_v37 = vrot.slane %v6181_v38, 5  ;;  %v6207_v4 = vshll.u32 %v6167_v57, 16 }
 0x4e1   : > { %17251 = vmatprep.subr.bf16.mxu1 %v18926_v44 }
 0x4e3   : > { %17244 = vmatmul.mubr.msk.bf16.vlgmr.msra.gmra.mrb[8].mxu1 %vm403_vm5, %v5903_v48 }
 0x4e4   : > { %17252 = vmatpush3.bf16.msra.mxu1 %v18926_v44  ;;  %17247 = vmatprep.mubr.msk.bf16.mxu1 %vm403_vm5, %v5912_v43  ;;  %v6189_v44 = vshll.u32 %v6165_v39, 16  ;;  %v6184_v43 = vor.u32 %v6183_v37, %v6180_v25  ;;  %v6209_v39 = vrot.slane %v6207_v4, 5 }
 0x4e5   : > { %17253 = vmatprep.subr.bf16.mxu1 %v18927_v18 }
 0x4e6   : > { %v6191_v48 = vrot.slane %v6189_v44, 5 }
 0x4e8   : > { %17254 = vmatpush3.bf16.msra.mxu1 %v18927_v18  ;;  %v6188_v18 = vrot.slane %v6186_v54, 4 }
 0x4e9   : > { %17255 = vmatprep.subr.bf16.mxu1 %v18928_v14 }
 0x4ea   : > { %v6192_v34 = vor.u32 %v6191_v48, %v6188_v18  ;;  %v18934_v18 = vld [vmem:[%s23125_s3 + $0x380] sm:$0xff]   ;;  %v18935_v48 = vld [vmem:[%s23125_s3 + $0x388] sm:$0xff]  }
 0x4eb   : > { %17248 = vmatmul.mubr.msk.bf16.gmra.mrb[12].mxu1 %vm403_vm5, %v5921_v47  ;;  %v6197_v47 = vrot.slane %v6195_v16, 4  ;;  %17283 = vmatprep.subr.bf16.mxu0 %v18934_v18  ;;  %v15261_v16 = vld [vmem:[%s23126_s4 + $0x2] ss:$0 sm:$0xff] }
 0x4ec   : > { %17256 = vmatpush3.bf16.msra.mxu1 %v18928_v14  ;;  %17259 = vmatprep.mubr.msk.bf16.mxu1 %vm403_vm5, %v6047_v0  ;;  %v6204_v14 = vshrl.u32 %v6167_v57, 16  ;;  %v6193_v42 = vsel %vm23338_vm15, %v6184_v43, %v6192_v34  ;;  %vm23341_vm15 = vmmov %vm23340_vm13  ;;  %v18936_v57 = vld [vmem:[%s23125_s3 + $0x390] sm:$0xff]  }
 0x4ed   : > { %17257 = vmatprep.subr.bf16.mxu1 %v18929_v35  ;;  %17284 = vmatpush3.bf16.msra.mxu0 %v18934_v18 }
 0x4ee   : > { %v6206_v36 = vrot.slane %v6204_v14, 4  ;;  %17285 = vmatprep.subr.bf16.mxu0 %v18935_v48 }
 0x4f0   : > { %17258 = vmatpush3.bf16.msra.mxu1 %v18929_v35  ;;  %v6053_v35 = vsel %vm2120_vm8, %v6050_v13, %v6052_v20  ;;  %v6210_v44 = vor.u32 %v6209_v39, %v6206_v36  ;;  %v18938_v20 = vld [vmem:[%s23125_s3 + $0x360] sm:$0xff]  }
 0x4f1   : > { %17267 = vmatprep.subr.bf16.mxu1 %v18930_v55  ;;  %17286 = vmatpush3.bf16.msra.mxu0 %v18935_v48  ;;  %v6381_v48 = vld [vmem:[#allocation2] sm:$0xf0] }
 0x4f2   : > { %17287 = vmatprep.subr.bf16.mxu0 %v18936_v57 }
 0x4f3   : > { %17260 = vmatmul.mubr.msk.bf16.vlgmr.msra.gmra.mrb[8].mxu1 %vm403_vm5, %v20922_v33  ;;  %v6198_v33 = vshll.u32 %v6166_v63, 16 }
 0x4f4   : > { %17268 = vmatpush3.bf16.msra.mxu1 %v18930_v55  ;;  %17263 = vmatprep.mubr.msk.bf16.mxu1 %vm403_vm5, %v6051_v50  ;;  %v6168_v55 = vsel %vm23339_vm3, %v6163_v9, 0  ;;  %vm23342_vm3 = vmmov %vm23340_vm13 }
 0x4f5   : > { %17269 = vmatprep.subr.bf16.mxu1 %v18931_v53  ;;  %v6200_v0 = vrot.slane %v6198_v33, 5  ;;  %v6213_v38 = vshrl.u32 %v6168_v55, 16  ;;  %v6216_v54 = vshll.u32 %v6168_v55, 16  ;;  %17288 = vmatpush3.bf16.msra.mxu0 %v18936_v57 }
 0x4f7   : > { %v6201_v29 = vor.u32 %v6200_v0, %v6197_v47  ;;  %v6218_v50 = vrot.slane %v6216_v54, 5 }
 0x4f8   : > { %17270 = vmatpush3.bf16.msra.mxu1 %v18931_v53  ;;  %v6215_v53 = vrot.slane %v6213_v38, 4 }
 0x4f9   : > { %17271 = vmatprep.subr.bf16.mxu1 %v18932_v30  ;;  %v6202_v13 = vsel %vm23340_vm13, %v6192_v34, %v6201_v29  ;;  %v6211_v63 = vsel %vm23341_vm15, %v6201_v29, %v6210_v44  ;;  %vm23343_vm13 = vcmp.ne.s16.totalorder %v19682_v10, 0  ;;  %vm23344_vm15 = vcmp.ne.s16.totalorder %v19895_v59, 0 }
 0x4fa   : > { %v6219_v25 = vor.u32 %v6218_v50, %v6215_v53 }
 0x4fb   : > { %17264 = vmatmul.mubr.msk.bf16.gmra.mrb[12].mxu1 %vm403_vm5, %v6053_v35 }
 0x4fc   : > { %17272 = vmatpush3.bf16.msra.mxu1 %v18932_v30  ;;  %17275 = vmatprep.mubr.msk.bf16.mxu1 %vm403_vm5, %v6193_v42  ;;  %v6220_v37 = vsel %vm23342_vm3, %v6210_v44, %v6219_v25  ;;  %v18937_v30 = vld [vmem:[%s23125_s3 + $0x398] sm:$0xff]  }
 0x4fd   : > { %17273 = vmatprep.subr.bf16.mxu1 %v18933_v58  ;;  %17289 = vmatprep.subr.bf16.mxu0 %v18937_v30 }
 0x4fe   : > { %17290 = vmatpush3.bf16.msra.mxu0 %v18937_v30 }
 0x4ff   : > { %17299 = vmatprep.subr.bf16.mxu0 %v18938_v20 }
 0x500   : > { %17274 = vmatpush3.bf16.msra.mxu1 %v18933_v58 }
 0x503   : > { %17276 = vmatmul.mubr.msk.bf16.vlgmr.msra.gmra.mrb[8].mxu1 %vm403_vm5, %v6202_v13 }
 0x504   : > { %17279 = vmatprep.mubr.msk.bf16.mxu1 %vm403_vm5, %v6211_v63  ;;  %v6362_v63 = vld [vmem:[#allocation2] sm:$0xf8] }
 0x50b   : > { %17280 = vmatmul.mubr.msk.bf16.gmra.mrb[12].mxu1 %vm403_vm5, %v6220_v37 }
 0x5d6   : > { %v17277_v33 = vpop.f32.mrb[8].mxu1 }
 0x5d7   : > { %v6338_v43 = vadd.f32 %v17277_v33, %v15261_v16  ;;  %v6291_v34 = vpop.f32.mrb[9].mxu1  ;;  %v6367_v33 = vsel %vm2088_vm9, %v6362_v63, 0 }
 0x5d8   : > { %v6336_v14 = vadd.f32 %v15261_v16, %v6291_v34  ;;  %v17278_v4 = vpop.f32.mrb[10].mxu1 }
 0x5d9   : > { %v6339_v9 = vadd.f32 %v17278_v4, %v15261_v16  ;;  %v6294_v58 = vpop.f32.mrb[11].mxu1  ;;  %v6346_v47 = vmax.f32 %v6338_v43, 0.0 }
 0x5da   : > { %v6337_v35 = vadd.f32 %v15261_v16, %v6294_v58  ;;  %v6344_v42 = vmax.f32 %v6336_v14, 0.0  ;;  %v6395_v14 = vrot.slane %v6381_v48, 4 }
 0x5db   : > { %v6347_v0 = vmax.f32 %v6339_v9, 0.0 }
 0x5dc   : > { %v6345_v36 = vmax.f32 %v6337_v35, 0.0 }
 0x5dd   : > { %v6353_v39 = vpack.c.bf16 %v6347_v0, %v6346_v47  ;;  %v6509_v0 = vshll.u32 %v6367_v33, 16 }
 0x5de   : > { %v6352_v55 = vpack.c.bf16 %v6345_v36, %v6344_v42  ;;  %v17281_v29 = vpop.f32.mrb[12].mxu1 }
 0x5df   : > { %6357 = vst.msk [vmem:[#allocation2 + $0x10] sm:$0xff] %vm403_vm5, %v6353_v39  ;;  %v6342_v38 = vadd.f32 %v17281_v29, %v15261_v16  ;;  %v6307_v54 = vpop.f32.mrb[13].mxu1  ;;  %v18939_v29 = vld [vmem:[%s23125_s3 + $0x368] sm:$0xff]  }
 0x5e0   : > { %6356 = vst.msk [vmem:[#allocation2 + $0x8] sm:$0xff] %vm403_vm5, %v6352_v55  ;;  %v6340_v44 = vadd.f32 %v15261_v16, %v6307_v54  ;;  %v17282_v13 = vpop.f32.mrb[14].mxu1  ;;  %v6511_v54 = vrot.slane %v6509_v0, 4  ;;  %v6651_v0 = vsel %vm2424_vm14, %v6381_v48, 0 }
 0x5e1   : > { %v6343_v53 = vadd.f32 %v17282_v13, %v15261_v16  ;;  %v6310_v50 = vpop.f32.mrb[15].mxu1  ;;  %v6350_v37 = vmax.f32 %v6342_v38, 0.0 }
 0x5e2   : > { %v6341_v25 = vadd.f32 %v15261_v16, %v6310_v50  ;;  %v6348_v57 = vmax.f32 %v6340_v44, 0.0  ;;  %v6506_v16 = vshrl.u32 %v6367_v33, 16  ;;  %v18940_v50 = vld [vmem:[%s23125_s3 + $0x370] sm:$0xff]  }
 0x5e3   : > { %v6351_v18 = vmax.f32 %v6343_v53, 0.0 }
 0x5e4   : > { %v6349_v30 = vmax.f32 %v6341_v25, 0.0  ;;  %v6508_v38 = vrot.slane %v6506_v16, 3 }
 0x5e5   : > { %v6355_v43 = vpack.c.bf16 %v6351_v18, %v6350_v37 }
 0x5e6   : > { %v6354_v34 = vpack.c.bf16 %v6349_v30, %v6348_v57  ;;  %v21180_v4 = vld [vmem:[#allocation2 + $0x10] sm:$0xff]  ;;  %v6512_v33 = vor.u32 %v6511_v54, %v6508_v38  ;;  %v18942_v54 = vld [vmem:[%s23125_s3 + $0x3a0] sm:$0xff]  }
 0x5e7   : > { %6359 = vst.msk [vmem:[#allocation2 + $0x20] sm:$0xff] %vm403_vm5, %v6355_v43  ;;  %v21183_v9 = vld [vmem:[#allocation2 + $0x8] sm:$0xff]  ;;  %v21186_v58 = vrot.slane %v21180_v4, 4  ;;  %v6369_v53 = vsel %vm2090_vm1, %v21180_v4, 0 }
 0x5e8   : > { %6358 = vst.msk [vmem:[#allocation2 + $0x18] sm:$0xff] %vm403_vm5, %v6354_v34  ;;  %v6396_v35 = vrot.slane %v21183_v9, 4  ;;  %v6368_v47 = vsel %vm2089_vm7, %v21183_v9, 0  ;;  %v6523_v18 = vshrl.u32 %v6369_v53, 16  ;;  %v6526_v57 = vshll.u32 %v6369_v53, 16 }
 0x5e9   : > { %v6514_v42 = vshrl.u32 %v6368_v47, 16  ;;  %v6517_v36 = vshll.u32 %v6368_v47, 16  ;;  %v18941_v47 = vld [vmem:[%s23125_s3 + $0x378] sm:$0xff]   ;;  %v6652_v48 = vsel %vm2425_vm2, %v21183_v9, 0 }
 0x5ea   : > { %v6397_v39 = vsel %vm2120_vm8, %v6395_v14, %v6396_v35  ;;  %v6399_v55 = vsel %vm2120_vm8, %v6396_v35, %v21186_v58 }
 0x5eb   : > { %17291 = vmatprep.mubr.msk.bf16.mxu0 %vm403_vm5, %v6397_v39  ;;  %v6516_v44 = vrot.slane %v6514_v42, 3  ;;  %v6519_v13 = vrot.slane %v6517_v36, 4  ;;  %v6525_v42 = vrot.slane %v6523_v18, 3  ;;  %v6528_v36 = vrot.slane %v6526_v57, 4 }
 0x5ec   : > { %17292 = vmatmul.mubr.msk.bf16.vlgmr.msra.gmra.mrb[16].mxu0 %vm403_vm5, %v6399_v55  ;;  %v6668_v18 = vshll.u32 %v6651_v0, 16 }
 0x5ed   : > { %17300 = vmatpush3.bf16.msra.mxu0 %v18938_v20  ;;  %v6520_v43 = vor.u32 %v6519_v13, %v6516_v44  ;;  %v6665_v44 = vshrl.u32 %v6651_v0, 16  ;;  %v6529_v13 = vor.u32 %v6528_v36, %v6525_v42 }
 0x5ee   : > { %17301 = vmatprep.subr.bf16.mxu0 %v18939_v29  ;;  %v6366_v63 = vld [vmem:[#allocation2 + $0x20] sm:$0xf] }
 0x5ef   : > { %v21207_v25 = vld [vmem:[#allocation2 + $0x18] sm:$0xff]  ;;  %v6402_v37 = vrot.slane %v6366_v63, 4  ;;  %v6521_v39 = vsel %vm683_vm10, %v6512_v33, %v6520_v43  ;;  %v6371_v38 = vsel %vm2092_vm4, %v6366_v63, 0  ;;  %v6673_v33 = vshrl.u32 %v6652_v48, 16 }
 0x5f0   : > { %v21210_v30 = vrot.slane %v21207_v25, 4  ;;  %v6370_v20 = vsel %vm2091_vm11, %v21207_v25, 0  ;;  %v6541_v53 = vshrl.u32 %v6371_v38, 16  ;;  %v6676_v63 = vshll.u32 %v6652_v48, 16 }
 0x5f1   : > { %17302 = vmatpush3.bf16.msra.mxu0 %v18939_v29  ;;  %v6532_v34 = vshrl.u32 %v6370_v20, 16  ;;  %v6535_v14 = vshll.u32 %v6370_v20, 16  ;;  %v6667_v20 = vrot.slane %v6665_v44, 4  ;;  %v6675_v0 = vrot.slane %v6673_v33, 4 }
 0x5f2   : > { %v21218_v16 = vsel %vm2120_vm8, %v21186_v58, %v21210_v30  ;;  %17303 = vmatprep.subr.bf16.mxu0 %v18940_v50  ;;  %v6403_v35 = vsel %vm2120_vm8, %v21210_v30, %v6402_v37  ;;  %v6544_v37 = vshll.u32 %v6371_v38, 16  ;;  %v6678_v36 = vrot.slane %v6676_v63, 5 }
 0x5f3   : > { %17295 = vmatprep.mubr.msk.bf16.mxu0 %vm403_vm5, %v21218_v16  ;;  %v6534_v55 = vrot.slane %v6532_v34, 3  ;;  %v6537_v29 = vrot.slane %v6535_v14, 4  ;;  %v6530_v34 = vsel %vm683_vm10, %v6520_v43, %v6529_v13  ;;  %v6543_v14 = vrot.slane %v6541_v53, 3 }
 0x5f4   : > { %17296 = vmatmul.mubr.msk.bf16.gmra.mrb[20].mxu0 %vm403_vm5, %v6403_v35  ;;  %v6546_v35 = vrot.slane %v6544_v37, 4  ;;  %v6654_v43 = vsel %vm23344_vm15, %v21207_v25, 0  ;;  %vm23346_vm15 = vcmp.ne.s16.totalorder %v23268_v31, 0 }
 0x5f5   : > { %17304 = vmatpush3.bf16.msra.mxu0 %v18940_v50  ;;  %17307 = vmatprep.mubr.msk.bf16.mxu0 %vm403_vm5, %v6521_v39  ;;  %v6538_v57 = vor.u32 %v6537_v29, %v6534_v55  ;;  %v18943_v50 = vld [vmem:[%s23125_s3 + $0x3a8] sm:$0xff]   ;;  %v6670_v39 = vrot.slane %v6668_v18, 5  ;;  %v18944_v55 = vld [vmem:[%s23125_s3 + $0x3b0] sm:$0xff]   ;;  %v6691_v53 = vshrl.u32 %v6654_v43, 16  ;;  %v6694_v37 = vshll.u32 %v6654_v43, 16  ;;  %v18945_v18 = vld [vmem:[%s23125_s3 + $0x3b8] sm:$0xff]  }
 0x5f6   : > { %17305 = vmatprep.subr.bf16.mxu0 %v18941_v47  ;;  %v6547_v29 = vor.u32 %v6546_v35, %v6543_v14 }
 0x5f7   : > { %v6539_v42 = vsel %vm683_vm10, %v6529_v13, %v6538_v57  ;;  %v6671_v44 = vor.u32 %v6670_v39, %v6667_v20  ;;  %v6679_v13 = vor.u32 %v6678_v36, %v6675_v0  ;;  %v6693_v35 = vrot.slane %v6691_v53, 4 }
 0x5f8   : > { %v6548_v33 = vsel %vm683_vm10, %v6538_v57, %v6547_v29  ;;  %v6696_v20 = vrot.slane %v6694_v37, 5  ;;  %v18946_v57 = vld [vmem:[%s23125_s3 + $0x3c0] sm:$0xff]  }
 0x5f9   : > { %17306 = vmatpush3.bf16.msra.mxu0 %v18941_v47  ;;  %v6653_v47 = vsel %vm23343_vm13, %v21180_v4, 0  ;;  %v6680_v14 = vsel %vm23342_vm3, %v6671_v44, %v6679_v13  ;;  %vm23345_vm13 = vcmp.ne.s16.totalorder %v19878_v19, 0 }
 0x5fa   : > { %17315 = vmatprep.subr.bf16.mxu0 %v18942_v54  ;;  %v6682_v38 = vshrl.u32 %v6653_v47, 16  ;;  %v6685_v48 = vshll.u32 %v6653_v47, 16  ;;  %v6697_v43 = vor.u32 %v6696_v20, %v6693_v35 }
 0x5fc   : > { %17308 = vmatmul.mubr.msk.bf16.vlgmr.msra.gmra.mrb[16].mxu0 %vm403_vm5, %v6530_v34  ;;  %v6684_v63 = vrot.slane %v6682_v38, 4  ;;  %v6687_v34 = vrot.slane %v6685_v48, 5  ;;  %v18947_v38 = vld [vmem:[%s23125_s3 + $0x3c8] sm:$0xff]  }
 0x5fd   : > { %17316 = vmatpush3.bf16.msra.mxu0 %v18942_v54  ;;  %17311 = vmatprep.mubr.msk.bf16.mxu0 %vm403_vm5, %v6539_v42  ;;  %v6650_v54 = vld [vmem:[#allocation2 + $0x20] sm:$0x1f]  ;;  %v6817_v42 = vld [vmem:[#allocation2] sm:$0x80] }
 0x5fe   : > { %17317 = vmatprep.subr.bf16.mxu0 %v18943_v50  ;;  %v6655_v39 = vsel %vm23345_vm13, %v6650_v54, 0  ;;  %v6688_v0 = vor.u32 %v6687_v34, %v6684_v63  ;;  %vm23347_vm13 = vmmov %vm23342_vm3 }
 0x5ff   : > { %v6700_v36 = vshrl.u32 %v6655_v39, 16  ;;  %v6703_v47 = vshll.u32 %v6655_v39, 16 }
 0x600   : > { %v6689_v48 = vsel %vm23342_vm3, %v6679_v13, %v6688_v0  ;;  %v6698_v37 = vsel %vm23347_vm13, %v6688_v0, %v6697_v43  ;;  %v18948_v13 = vld [vmem:[%s23125_s3 + $0x3d0] sm:$0xff]   ;;  %v21289_v0 = vld [vmem:[#allocation2 + $0x20] sm:$0xff]  ;;  %vm23349_vm13 = vsmask.f32 256 }
 0x601   : > { %17318 = vmatpush3.bf16.msra.mxu0 %v18943_v50  ;;  %v6820_v50 = vsel %vm23346_vm15, %v21183_v9, 0  ;;  %v6702_v44 = vrot.slane %v6700_v36, 4  ;;  %v6705_v53 = vrot.slane %v6703_v47, 5  ;;  %vm23348_vm15 = vcmp.ne.s16.totalorder %v23271_v23, 0 }
 0x602   : > { %17319 = vmatprep.subr.bf16.mxu0 %v18944_v55  ;;  %v6837_v29 = vshrl.u32 %v6820_v50, 16  ;;  %v6822_v63 = vsel %vm23348_vm15, %v21207_v25, 0  ;;  %v6840_v34 = vshll.u32 %v6820_v50, 16  ;;  %vm23350_vm15 = vcmp.ne.s16.totalorder %v20321_v51, 0 }
 0x604   : > { %17312 = vmatmul.mubr.msk.bf16.gmra.mrb[20].mxu0 %vm403_vm5, %v6548_v33  ;;  %v6839_v33 = vrot.slane %v6837_v29, 7 }
 0x605   : > { %17320 = vmatpush3.bf16.msra.mxu0 %v18944_v55  ;;  %17323 = vmatprep.mubr.msk.bf16.mxu0 %vm403_vm5, %v6680_v14  ;;  %v6819_v55 = vsel %vm2608_vm0, %v6817_v42, 0  ;;  %v6706_v14 = vor.u32 %v6705_v53, %v6702_v44  ;;  %v6853_v42 = vshrl.u32 %v6822_v63, 16 }
 0x606   : > { %17321 = vmatprep.subr.bf16.mxu0 %v18945_v18  ;;  %v6833_v54 = vshrl.u32 %v6819_v55, 16  ;;  %v6842_v39 = vor.u32 %v6840_v34, %v6839_v33  ;;  %v6823_v55 = vsel %vm23350_vm15, %v21289_v0, 0 }
 0x607   : > { %v6707_v36 = vsel %vm23342_vm3, %v6697_v43, %v6706_v14  ;;  %v6855_v29 = vrot.slane %v6853_v42, 7  ;;  %v6856_v43 = vshll.u32 %v6822_v63, 16  ;;  %v6861_v53 = vshrl.u32 %v6823_v55, 16  ;;  %vm23351_vm3 = vmmov %vm23349_vm13  ;;  %v18952_v14 = vld [vmem:[%s23125_s3 + $0x3f0] sm:$0xff]   ;;  %v18954_v42 = vld [vmem:[%s23125_s3 + $0x400] sm:$0xff]  }
 0x608   : > { %v6835_v20 = vrot.slane %v6833_v54, 7  ;;  %v18951_v54 = vld [vmem:[%s23125_s3 + $0x3e8] sm:$0xff]   ;;  %v6864_v63 = vshll.u32 %v6823_v55, 16  ;;  %vm23353_vm15 = vmmov %vm23351_vm3 }
 0x609   : > { %17322 = vmatpush3.bf16.msra.mxu0 %v18945_v18  ;;  %v6821_v18 = vsel %vm2610_vm12, %v21180_v4, 0  ;;  %v6863_v34 = vrot.slane %v6861_v53, 7 }
 0x60a   : > { %17331 = vmatprep.subr.bf16.mxu0 %v18946_v57  ;;  %v6845_v35 = vshrl.u32 %v6821_v18, 16  ;;  %v6843_v50 = vsel %vm23349_vm13, %v6835_v20, %v6842_v39  ;;  %vm23352_vm13 = vmmov %vm23351_vm3  ;;  %v7099_v39 = vsel %vm2904_vm6, %v21183_v9, 0 }
 0x60b   : > { %v7113_v55 = vshrl.u32 %v7099_v39, 16 }
 0x60c   : > { %17324 = vmatmul.mubr.msk.bf16.vlgmr.msra.gmra.mrb[16].mxu0 %vm403_vm5, %v6689_v48  ;;  %v6847_v47 = vrot.slane %v6845_v35, 7  ;;  %v18950_v48 = vld [vmem:[%s23125_s3 + $0x3e0] sm:$0xff]   ;;  %v6866_v35 = vor.u32 %v6864_v63, %v6863_v34  ;;  %v7098_v63 = vld [vmem:[#allocation2 + $0x28] sm:$0x1] }
 0x60d   : > { %17332 = vmatpush3.bf16.msra.mxu0 %v18946_v57  ;;  %17327 = vmatprep.mubr.msk.bf16.mxu0 %vm403_vm5, %v6698_v37  ;;  %v18949_v57 = vld [vmem:[%s23125_s3 + $0x3d8] sm:$0xff]   ;;  %v6858_v37 = vor.u32 %v6856_v43, %v6855_v29 }
 0x60e   : > { %17333 = vmatprep.subr.bf16.mxu0 %v18947_v38  ;;  %v6867_v20 = vsel %vm23353_vm15, %v6855_v29, %v6866_v35  ;;  %v18956_v29 = vld [vmem:[%s23125_s3 + $0x410] sm:$0xff]   ;;  %vm23356_vm15 = vcmp.ne.s16.totalorder %v20148_v21, 0  ;;  %v18958_v35 = vld [vmem:[%s23125_s3 + $0x420] sm:$0xff]  }
 0x611   : > { %17334 = vmatpush3.bf16.msra.mxu0 %v18947_v38  ;;  %v6848_v38 = vshll.u32 %v6821_v18, 16  ;;  %v6859_v18 = vsel %vm23352_vm13, %v6847_v47, %v6858_v37  ;;  %vm23355_vm13 = vcmp.ne.s16.totalorder %v20152_v6, 0  ;;  %v18957_v37 = vld [vmem:[%s23125_s3 + $0x418] sm:$0xff]  }
 0x612   : > { %17335 = vmatprep.subr.bf16.mxu0 %v18948_v13 }
 0x613   : > { %v6850_v44 = vor.u32 %v6848_v38, %v6847_v47 }
 0x614   : > { %17328 = vmatmul.mubr.msk.bf16.gmra.mrb[20].mxu0 %vm403_vm5, %v6707_v36  ;;  %v18955_v36 = vld [vmem:[%s23125_s3 + $0x408] sm:$0xff]  }
 0x615   : > { %17336 = vmatpush3.bf16.msra.mxu0 %v18948_v13  ;;  %17339 = vmatprep.mubr.msk.bf16.mxu0 %vm403_vm5, %v6843_v50  ;;  %v6851_v13 = vsel %vm23351_vm3, %v6839_v33, %v6850_v44  ;;  %v18953_v33 = vld [vmem:[%s23125_s3 + $0x3f8] sm:$0xff]   ;;  %vm23354_vm3 = vcmp.ne.s16.totalorder %v23282_v62, 0  ;;  %v7101_v50 = vsel %vm23355_vm13, %v21207_v25, 0  ;;  %v7257_v44 = vld [vmem:[#allocation2 + $0x8] sm:$0xf8]  ;;  %vm23358_vm13 = vcmp.ne.s16.totalorder %v20140_v12, 0 }
 0x616   : > { %17337 = vmatprep.subr.bf16.mxu0 %v18949_v57  ;;  %v7100_v47 = vsel %vm23354_vm3, %v21180_v4, 0  ;;  %v7128_v43 = vshll.u32 %v7101_v50, 16  ;;  %vm23357_vm3 = vsmask.f32 7424 }
 0x617   : > { %v7120_v38 = vshll.u32 %v7100_v47, 16 }
 0x618   : > { %v7130_v34 = vrot.slane %v7128_v43, 1  ;;  %v18959_v43 = vld [vmem:[%s23125_s3 + $0x428] sm:$0xff]  }
 0x619   : > { %17338 = vmatpush3.bf16.msra.mxu0 %v18949_v57  ;;  %v7115_v57 = vshll.u32 %v7099_v39, 16  ;;  %v7122_v53 = vrot.slane %v7120_v38, 1  ;;  %v7124_v39 = vshrl.u32 %v7100_v47, 16 }
 0x61a   : > { %17347 = vmatprep.subr.bf16.mxu0 %v18950_v48 }
 0x61b   : > { %v7126_v38 = vor.u32 %v7124_v39, %v7122_v53 }
 0x61c   : > { %17340 = vmatmul.mubr.msk.bf16.vlgmr.msra.gmra.mrb[16].mxu0 %vm403_vm5, %v6851_v13 }
 0x61d   : > { %17348 = vmatpush3.bf16.msra.mxu0 %v18950_v48  ;;  %17343 = vmatprep.mubr.msk.bf16.mxu0 %vm403_vm5, %v6859_v18  ;;  %v7259_v18 = vsel %vm2088_vm9, %v7257_v44, 0 }
 0x61e   : > { %17349 = vmatprep.subr.bf16.mxu0 %v18951_v54 }
 0x621   : > { %17350 = vmatpush3.bf16.msra.mxu0 %v18951_v54  ;;  %v7102_v54 = vsel %vm23356_vm15, %v21289_v0, 0  ;;  %vm23359_vm15 = vmmov %vm23357_vm3 }
 0x622   : > { %17351 = vmatprep.subr.bf16.mxu0 %v18952_v14 }
 0x624   : > { %17344 = vmatmul.mubr.msk.bf16.gmra.mrb[20].mxu0 %vm403_vm5, %v6867_v20  ;;  %v7136_v20 = vshll.u32 %v7102_v54, 16 }
 0x625   : > { %17352 = vmatpush3.bf16.msra.mxu0 %v18952_v14  ;;  %17355 = vmatprep.mubr.msk.bf16.mxu0 %vm403_vm5, %v21183_v9  ;;  %v7117_v9 = vrot.slane %v7115_v57, 1  ;;  %v7260_v14 = vsel %vm2089_vm7, %v21180_v4, 0  ;;  %v7276_v57 = vshll.u32 %v7259_v18, 16 }
 0x626   : > { %17353 = vmatprep.subr.bf16.mxu0 %v18953_v33 }
 0x627   : > { %v7118_v48 = vor.u32 %v7117_v9, %v7113_v55  ;;  %v7103_v9 = vsel %vm23358_vm13, %v7098_v63, 0  ;;  %v7284_v55 = vshll.u32 %v7260_v14, 16  ;;  %vm23360_vm13 = vmmov %vm23357_vm3 }
 0x628   : > { %v7144_v44 = vshll.u32 %v7103_v9, 16 }
 0x629   : > { %17354 = vmatpush3.bf16.msra.mxu0 %v18953_v33  ;;  %v7123_v13 = vsel %vm23357_vm3, %v7118_v48, %v7122_v53  ;;  %v7132_v33 = vshrl.u32 %v7101_v50, 16  ;;  %v7138_v48 = vrot.slane %v7136_v20, 1  ;;  %v7131_v50 = vsel %vm23359_vm15, %v7126_v38, %v7130_v34 }
 0x62a   : > { %17363 = vmatprep.subr.bf16.mxu0 %v18954_v42  ;;  %v7261_v53 = vsel %vm2090_vm1, %v21207_v25, 0  ;;  %v7146_v39 = vrot.slane %v7144_v44, 1  ;;  %vm23361_vm15 = vcmp.ne.s16.totalorder %v19682_v10, 0 }
 0x62c   : > { %17356 = vmatmul.mubr.msk.bf16.vlgmr.msra.gmra.mrb[16].mxu0 %vm403_vm5, %v21180_v4 }
 0x62d   : > { %17364 = vmatpush3.bf16.msra.mxu0 %v18954_v42  ;;  %17359 = vmatprep.mubr.msk.bf16.mxu0 %vm403_vm5, %v21207_v25  ;;  %v7273_v42 = vshrl.u32 %v7259_v18, 16 }
 0x62e   : > { %17365 = vmatprep.subr.bf16.mxu0 %v18955_v36 }
 0x62f   : > { %v7275_v47 = vrot.slane %v7273_v42, 3  ;;  %v7290_v42 = vshrl.u32 %v7261_v53, 16 }
 0x631   : > { %17366 = vmatpush3.bf16.msra.mxu0 %v18955_v36  ;;  %v7134_v36 = vor.u32 %v7132_v33, %v7130_v34  ;;  %v7286_v33 = vrot.slane %v7284_v55, 4  ;;  %v7262_v34 = vsel %vm2091_vm11, %v21289_v0, 0  ;;  %v21379_v55 = vld [vmem:[#allocation2 + $0x28] sm:$0xf] }
 0x632   : > { %17367 = vmatprep.subr.bf16.mxu0 %v18956_v29 }
 0x633   : > { %v7139_v18 = vsel %vm23357_vm3, %v7134_v36, %v7138_v48  ;;  %vm23362_vm3 = vcmp.ne.s16.totalorder %v19895_v59, 0 }
 0x634   : > { %17360 = vmatmul.mubr.msk.bf16.gmra.mrb[20].mxu0 %vm403_vm5, %v21289_v0 }
 0x635   : > { %17368 = vmatpush3.bf16.msra.mxu0 %v18956_v29  ;;  %17371 = vmatprep.mubr.msk.bf16.mxu0 %vm403_vm5, %v7123_v13  ;;  %v7281_v29 = vshrl.u32 %v7260_v14, 16  ;;  %v7278_v13 = vrot.slane %v7276_v57, 4  ;;  %v18960_v14 = vld [vmem:[%s23125_s3 + $0x430] sm:$0xff]   ;;  %v7293_v57 = vshll.u32 %v7261_v53, 16 }
 0x636   : > { %17369 = vmatprep.subr.bf16.mxu0 %v18957_v37 }
 0x637   : > { %v7283_v63 = vrot.slane %v7281_v29, 3  ;;  %v7279_v36 = vor.u32 %v7278_v13, %v7275_v47  ;;  %v7299_v29 = vshrl.u32 %v7262_v34, 16  ;;  %v18962_v13 = vld [vmem:[%s23125_s3 + $0x440] sm:$0xff]  }
 0x639   : > { %17370 = vmatpush3.bf16.msra.mxu0 %v18957_v37  ;;  %v7140_v37 = vshrl.u32 %v7102_v54, 16  ;;  %v7287_v9 = vor.u32 %v7286_v33, %v7283_v63  ;;  %v18961_v54 = vld [vmem:[%s23125_s3 + $0x438] sm:$0xff]   ;;  %v7301_v44 = vrot.slane %v7299_v29, 3 }
 0x63a   : > { %17379 = vmatprep.subr.bf16.mxu0 %v18958_v35 }
 0x63b   : > { %v7142_v20 = vor.u32 %v7140_v37, %v7138_v48  ;;  %v7288_v48 = vsel %vm683_vm10, %v7279_v36, %v7287_v9  ;;  %v18964_v36 = vld [vmem:[%s23125_s3 + $0x450] sm:$0xff]  }
 0x63c   : > { %17372 = vmatmul.mubr.msk.bf16.vlgmr.msra.gmra.mrb[16].mxu0 %vm403_vm5, %v7131_v50  ;;  %v7292_v50 = vrot.slane %v7290_v42, 3 }
 0x63d   : > { %17380 = vmatpush3.bf16.msra.mxu0 %v18958_v35  ;;  %17375 = vmatprep.mubr.msk.bf16.mxu0 %vm403_vm5, %v7139_v18  ;;  %v7302_v35 = vshll.u32 %v7262_v34, 16  ;;  %v7147_v38 = vsel %vm23360_vm13, %v7142_v20, %v7146_v39  ;;  %v7295_v18 = vrot.slane %v7293_v57, 4  ;;  %v18963_v34 = vld [vmem:[%s23125_s3 + $0x448] sm:$0xff]   ;;  %vm23363_vm13 = vsmask.f32 3328 }
 0x63e   : > { %17381 = vmatprep.subr.bf16.mxu0 %v18959_v43  ;;  %v7425_v57 = vld [vmem:[#allocation2 + $0x8] sm:$0xf0] }
 0x63f   : > { %v7304_v47 = vrot.slane %v7302_v35, 4  ;;  %v7296_v63 = vor.u32 %v7295_v18, %v7292_v50  ;;  %v7439_v35 = vrot.slane %v7425_v57, 4  ;;  %v7558_v50 = vsel %vm2424_vm14, %v7425_v57, 0 }
 0x640   : > { %v7559_v18 = vsel %vm2425_vm2, %v21180_v4, 0 }
 0x641   : > { %17382 = vmatpush3.bf16.msra.mxu0 %v18959_v43  ;;  %v7263_v43 = vsel %vm2092_vm4, %v21379_v55, 0  ;;  %v7305_v37 = vor.u32 %v7304_v47, %v7301_v44  ;;  %v7297_v20 = vsel %vm683_vm10, %v7287_v9, %v7296_v63  ;;  %v18965_v9 = vld [vmem:[%s23125_s3 + $0x458] sm:$0xff]   ;;  %v7444_v44 = vrot.slane %v21289_v0, 4 }
 0x642   : > { %17383 = vmatprep.subr.bf16.mxu0 %v18960_v14  ;;  %v7308_v33 = vshrl.u32 %v7263_v43, 16  ;;  %v7311_v53 = vshll.u32 %v7263_v43, 16  ;;  %v7572_v47 = vshrl.u32 %v7558_v50, 16  ;;  %v7575_v43 = vshll.u32 %v7558_v50, 16 }
 0x643   : > { %v7306_v42 = vsel %vm683_vm10, %v7296_v63, %v7305_v37  ;;  %v18967_v63 = vld [vmem:[%s23125_s3 + $0x468] sm:$0xff]   ;;  %v7445_v4 = vsel %vm2120_vm8, %v21210_v30, %v7444_v44  ;;  %v18968_v30 = vld [vmem:[%s23125_s3 + $0x470] sm:$0xff]  }
 0x644   : > { %17376 = vmatmul.mubr.msk.bf16.gmra.mrb[20].mxu0 %vm403_vm5, %v7147_v38  ;;  %v7313_v39 = vrot.slane %v7311_v53, 4  ;;  %v7441_v38 = vsel %vm2120_vm8, %v7439_v35, %v21186_v58  ;;  %v7580_v58 = vshrl.u32 %v7559_v18, 16  ;;  %v7574_v53 = vrot.slane %v7572_v47, 4  ;;  %v7557_v35 = vld [vmem:[#allocation2 + $0x28] sm:$0x1f] }
 0x645   : > { %17384 = vmatpush3.bf16.msra.mxu0 %v18960_v14  ;;  %17387 = vmatprep.mubr.msk.bf16.mxu0 %vm403_vm5, %v7288_v48  ;;  %v7310_v14 = vrot.slane %v7308_v33, 3  ;;  %v18966_v48 = vld [vmem:[%s23125_s3 + $0x460] sm:$0xff]   ;;  %v7560_v33 = vsel %vm23361_vm15, %v21207_v25, 0  ;;  %v7446_v25 = vrot.slane %v21379_v55, 4  ;;  %vm23364_vm15 = vcmp.ne.s16.totalorder %v19878_v19, 0 }
 0x646   : > { %17385 = vmatprep.subr.bf16.mxu0 %v18961_v54 }
 0x647   : > { %v7314_v29 = vor.u32 %v7313_v39, %v7310_v14  ;;  %v7561_v14 = vsel %vm23362_vm3, %v21289_v0, 0  ;;  %v7589_v39 = vshrl.u32 %v7560_v33, 16  ;;  %v18969_v0 = vld [vmem:[%s23125_s3 + $0x478] sm:$0xff]   ;;  %vm23365_vm3 = vmmov %vm23363_vm13 }
 0x649   : > { %17386 = vmatpush3.bf16.msra.mxu0 %v18961_v54  ;;  %v7315_v54 = vsel %vm683_vm10, %v7305_v37, %v7314_v29  ;;  %v7577_v37 = vrot.slane %v7575_v43, 5  ;;  %v7601_v29 = vshll.u32 %v7561_v14, 16 }
 0x64a   : > { %17395 = vmatprep.subr.bf16.mxu0 %v18962_v13 }
 0x64c   : > { %17388 = vmatmul.mubr.msk.bf16.vlgmr.msra.gmra.mrb[16].mxu0 %vm403_vm5, %v7297_v20 }
 0x64d   : > { %17396 = vmatpush3.bf16.msra.mxu0 %v18962_v13  ;;  %17391 = vmatprep.mubr.msk.bf16.mxu0 %vm403_vm5, %v7306_v42  ;;  %v7583_v13 = vshll.u32 %v7559_v18, 16  ;;  %v7578_v42 = vor.u32 %v7577_v37, %v7574_v53  ;;  %v7603_v18 = vrot.slane %v7601_v29, 5 }
 0x64e   : > { %17397 = vmatprep.subr.bf16.mxu0 %v18963_v34 }
 0x64f   : > { %v7585_v20 = vrot.slane %v7583_v13, 5 }
 0x651   : > { %17398 = vmatpush3.bf16.msra.mxu0 %v18963_v34  ;;  %v7582_v34 = vrot.slane %v7580_v58, 4 }
 0x652   : > { %17399 = vmatprep.subr.bf16.mxu0 %v18964_v36 }
 0x653   : > { %v7586_v57 = vor.u32 %v7585_v20, %v7582_v34  ;;  %v18970_v34 = vld [vmem:[%s23125_s3 + $0x4a0] sm:$0xff]   ;;  %v18971_v20 = vld [vmem:[%s23125_s3 + $0x4a8] sm:$0xff]  }
 0x654   : > { %17392 = vmatmul.mubr.msk.bf16.gmra.mrb[20].mxu0 %vm403_vm5, %v7315_v54  ;;  %v7591_v54 = vrot.slane %v7589_v39, 4  ;;  %17427 = vmatprep.subr.bf16.mxu1 %v18970_v34  ;;  %v15407_v39 = vld [vmem:[%s23126_s4 + $0x3] ss:$0 sm:$0xff] }
 0x655   : > { %17400 = vmatpush3.bf16.msra.mxu0 %v18964_v36  ;;  %17403 = vmatprep.mubr.msk.bf16.mxu0 %vm403_vm5, %v7441_v38  ;;  %v7598_v36 = vshrl.u32 %v7561_v14, 16  ;;  %v7587_v55 = vsel %vm23363_vm13, %v7578_v42, %v7586_v57  ;;  %vm23366_vm13 = vmmov %vm23365_vm3  ;;  %v18972_v14 = vld [vmem:[%s23125_s3 + $0x4b0] sm:$0xff]  }
 0x656   : > { %17401 = vmatprep.subr.bf16.mxu0 %v18965_v9  ;;  %17428 = vmatpush3.bf16.msra.mxu1 %v18970_v34 }
 0x657   : > { %v7600_v50 = vrot.slane %v7598_v36, 4  ;;  %17429 = vmatprep.subr.bf16.mxu1 %v18971_v20 }
 0x659   : > { %17402 = vmatpush3.bf16.msra.mxu0 %v18965_v9  ;;  %v7447_v9 = vsel %vm2120_vm8, %v7444_v44, %v7446_v25  ;;  %v7604_v13 = vor.u32 %v7603_v18, %v7600_v50  ;;  %v21469_v25 = vld [vmem:[%s23125_s3 + $0x480] sm:$0xff]  }
 0x65a   : > { %17411 = vmatprep.subr.bf16.mxu0 %v18966_v48  ;;  %17430 = vmatpush3.bf16.msra.mxu1 %v18971_v20  ;;  %v7783_v20 = vld [vmem:[#allocation2] sm:$0xf0] }
 0x65b   : > { %17431 = vmatprep.subr.bf16.mxu1 %v18972_v14 }
 0x65c   : > { %17404 = vmatmul.mubr.msk.bf16.vlgmr.msra.gmra.mrb[16].mxu0 %vm403_vm5, %v21218_v16  ;;  %v7592_v16 = vshll.u32 %v7560_v33, 16 }
 0x65d   : > { %17412 = vmatpush3.bf16.msra.mxu0 %v18966_v48  ;;  %17407 = vmatprep.mubr.msk.bf16.mxu0 %vm403_vm5, %v7445_v4  ;;  %v7562_v48 = vsel %vm23364_vm15, %v7557_v35, 0  ;;  %vm23367_vm15 = vmmov %vm23365_vm3 }
 0x65e   : > { %17413 = vmatprep.subr.bf16.mxu0 %v18967_v63  ;;  %v7594_v38 = vrot.slane %v7592_v16, 5  ;;  %v7607_v43 = vshrl.u32 %v7562_v48, 16  ;;  %v7610_v58 = vshll.u32 %v7562_v48, 16  ;;  %17432 = vmatpush3.bf16.msra.mxu1 %v18972_v14 }
 0x660   : > { %v7595_v47 = vor.u32 %v7594_v38, %v7591_v54  ;;  %v7612_v4 = vrot.slane %v7610_v58, 5 }
 0x661   : > { %17414 = vmatpush3.bf16.msra.mxu0 %v18967_v63  ;;  %v7609_v63 = vrot.slane %v7607_v43, 4 }
 0x662   : > { %17415 = vmatprep.subr.bf16.mxu0 %v18968_v30  ;;  %v7596_v44 = vsel %vm23365_vm3, %v7586_v57, %v7595_v47  ;;  %v7605_v33 = vsel %vm23366_vm13, %v7595_v47, %v7604_v13  ;;  %vm23370_vm3 = vcmp.ne.s16.totalorder %v19682_v10, 0  ;;  %vm23371_vm13 = vcmp.ne.s16.totalorder %v19895_v59, 0 }
 0x663   : > { %v7613_v53 = vor.u32 %v7612_v4, %v7609_v63  ;;  %v23368_v4 = vmax.f32 %v20863_v1, 0.0 }
 0x664   : > { %17408 = vmatmul.mubr.msk.bf16.gmra.mrb[20].mxu0 %vm403_vm5, %v7447_v9 }
 0x665   : > { %17416 = vmatpush3.bf16.msra.mxu0 %v18968_v30  ;;  %17419 = vmatprep.mubr.msk.bf16.mxu0 %vm403_vm5, %v7587_v55  ;;  %v7614_v37 = vsel %vm23367_vm15, %v7604_v13, %v7613_v53  ;;  %v18973_v30 = vld [vmem:[%s23125_s3 + $0x4b8] sm:$0xff]   ;;  %v7764_v53 = vld [vmem:[#allocation2] sm:$0xf8] }
 0x666   : > { %17417 = vmatprep.subr.bf16.mxu0 %v18969_v0  ;;  %17433 = vmatprep.subr.bf16.mxu1 %v18973_v30 }
 0x667   : > { %17434 = vmatpush3.bf16.msra.mxu1 %v18973_v30  ;;  %v7797_v30 = vrot.slane %v7783_v20, 4 }
 0x668   : > { %17443 = vmatprep.subr.bf16.mxu1 %v21469_v25 }
 0x669   : > { %17418 = vmatpush3.bf16.msra.mxu0 %v18969_v0 }
 0x66c   : > { %17420 = vmatmul.mubr.msk.bf16.vlgmr.msra.gmra.mrb[16].mxu0 %vm403_vm5, %v7596_v44 }
 0x66d   : > { %17423 = vmatprep.mubr.msk.bf16.mxu0 %vm403_vm5, %v7605_v33 }
 0x674   : > { %17424 = vmatmul.mubr.msk.bf16.gmra.mrb[20].mxu0 %vm403_vm5, %v7614_v37  ;;  %v23369_v37 = vmax.f32 %v20867_v45, 0.0 }
 0x73f   : > { %v17421_v16 = vpop.f32.mrb[16].mxu0 }
 0x740   : > { %v7732_v42 = vadd.f32 %v17421_v16, %v15407_v39  ;;  %v7685_v57 = vpop.f32.mrb[17].mxu0 }
 0x741   : > { %v7730_v36 = vadd.f32 %v15407_v39, %v7685_v57  ;;  %v17422_v29 = vpop.f32.mrb[18].mxu0 }
 0x742   : > { %v21477_v35 = vadd.f32 %v7732_v42, %v4952_v5  ;;  %v7733_v0 = vadd.f32 %v17422_v29, %v15407_v39  ;;  %v7688_v9 = vpop.f32.mrb[19].mxu0 }
 0x743   : > { %v21481_v54 = vadd.f32 %v7730_v36, %v4950_v7  ;;  %v7731_v38 = vadd.f32 %v15407_v39, %v7688_v9 }
 0x744   : > { %v21485_v55 = vadd.f32 %v7733_v0, %v4953_v24  ;;  %v7748_v18 = vmax.f32 %v21477_v35, 0.0 }
 0x745   : > { %v21489_v50 = vadd.f32 %v7731_v38, %v4951_v28  ;;  %v7746_v5 = vmax.f32 %v21481_v54, 0.0 }
 0x746   : > { %v7749_v3 = vmax.f32 %v21485_v55, 0.0 }
 0x747   : > { %v7747_v48 = vmax.f32 %v21489_v50, 0.0  ;;  %v17425_v60 = vpop.f32.mrb[20].mxu0 }
 0x748   : > { %v7755_v56 = vpack.c.bf16 %v7749_v3, %v7748_v18  ;;  %v7736_v24 = vadd.f32 %v17425_v60, %v15407_v39  ;;  %v7701_v7 = vpop.f32.mrb[21].mxu0 }
 0x749   : > { %v7754_v46 = vpack.c.bf16 %v7747_v48, %v7746_v5  ;;  %v7734_v28 = vadd.f32 %v15407_v39, %v7701_v7  ;;  %v17426_v47 = vpop.f32.mrb[22].mxu0 }
 0x74a   : > { %7759 = vst.msk [vmem:[#allocation2 + $0x10] sm:$0xff] %vm403_vm5, %v7755_v56  ;;  %v21506_v43 = vadd.f32 %v7736_v24, %v4956_v8  ;;  %v7737_v58 = vadd.f32 %v17426_v47, %v15407_v39  ;;  %v7704_v13 = vpop.f32.mrb[23].mxu0  ;;  %v18975_v24 = vld [vmem:[%s23125_s3 + $0x488] sm:$0xff]  }
 0x74b   : > { %7758 = vst.msk [vmem:[#allocation2 + $0x8] sm:$0xff] %vm403_vm5, %v7754_v46  ;;  %v21511_v44 = vadd.f32 %v7734_v28, %v4954_v26  ;;  %v7735_v63 = vadd.f32 %v15407_v39, %v7704_v13  ;;  %v7769_v26 = vsel %vm2088_vm9, %v7764_v53, 0  ;;  %v18976_v13 = vld [vmem:[%s23125_s3 + $0x490] sm:$0xff]  }
 0x74c   : > { %v21515_v33 = vadd.f32 %v7737_v58, %v23368_v4  ;;  %v7752_v2 = vmax.f32 %v21506_v43, 0.0  ;;  %v7908_v57 = vshrl.u32 %v7769_v26, 16  ;;  %v7911_v0 = vshll.u32 %v7769_v26, 16 }
 0x74d   : > { %v21519_v34 = vadd.f32 %v7735_v63, %v23369_v37  ;;  %v7750_v14 = vmax.f32 %v21511_v44, 0.0 }
 0x74e   : > { %v23177_v8 = vmax.f32 %v21515_v33, 0.0  ;;  %v7910_v7 = vrot.slane %v7908_v57, 3  ;;  %v7913_v46 = vrot.slane %v7911_v0, 4 }
 0x74f   : > { %v23176_v32 = vmax.f32 %v21519_v34, 0.0 }
 0x750   : > { %v7757_v1 = vpack.c.bf16 %v23177_v8, %v7752_v2 }
 0x751   : > { %v7756_v45 = vpack.c.bf16 %v23176_v32, %v7750_v14  ;;  %v21535_v39 = vld [vmem:[#allocation2 + $0x10] sm:$0xff] }
 0x752   : > { %7761 = vst.msk [vmem:[#allocation2 + $0x20] sm:$0xff] %vm403_vm5, %v7757_v1  ;;  %v21538_v16 = vld [vmem:[#allocation2 + $0x8] sm:$0xff]  ;;  %v21541_v42 = vrot.slane %v21535_v39, 4  ;;  %v7771_v58 = vsel %vm2090_vm1, %v21535_v39, 0 }
 0x753   : > { %7760 = vst.msk [vmem:[#allocation2 + $0x18] sm:$0xff] %vm403_vm5, %v7756_v45  ;;  %v7798_v36 = vrot.slane %v21538_v16, 4  ;;  %v7770_v29 = vsel %vm2089_vm7, %v21538_v16, 0  ;;  %v7925_v37 = vshrl.u32 %v7771_v58, 16  ;;  %v7928_v26 = vshll.u32 %v7771_v58, 16 }
 0x754   : > { %v7916_v9 = vshrl.u32 %v7770_v29, 16  ;;  %v7919_v38 = vshll.u32 %v7770_v29, 16  ;;  %v7914_v45 = vor.u32 %v7913_v46, %v7910_v7 }
 0x755   : > { %v7799_v60 = vsel %vm2120_vm8, %v7797_v30, %v7798_v36  ;;  %v7801_v56 = vsel %vm2120_vm8, %v7798_v36, %v21541_v42 }
 0x756   : > { %17435 = vmatprep.mubr.msk.bf16.mxu1 %vm403_vm5, %v7799_v60  ;;  %v7918_v28 = vrot.slane %v7916_v9, 3  ;;  %v7921_v47 = vrot.slane %v7919_v38, 4  ;;  %v18977_v9 = vld [vmem:[%s23125_s3 + $0x498] sm:$0xff]   ;;  %v8053_v38 = vsel %vm2424_vm14, %v7783_v20, 0  ;;  %v7927_v60 = vrot.slane %v7925_v37, 3 }
 0x757   : > { %17436 = vmatmul.mubr.msk.bf16.vlgmr.msra.gmra.mrb[16].mxu1 %vm403_vm5, %v7801_v56  ;;  %v7930_v56 = vrot.slane %v7928_v26, 4  ;;  %v8054_v20 = vsel %vm2425_vm2, %v21538_v16, 0  ;;  %v8067_v58 = vshrl.u32 %v8053_v38, 16 }
 0x758   : > { %17444 = vmatpush3.bf16.msra.mxu1 %v21469_v25  ;;  %v7922_v30 = vor.u32 %v7921_v47, %v7918_v28  ;;  %v18978_v47 = vld [vmem:[%s23125_s3 + $0x4c0] sm:$0xff]  }
 0x759   : > { %17445 = vmatprep.subr.bf16.mxu1 %v18975_v24  ;;  %v7768_v63 = vld [vmem:[#allocation2 + $0x20] sm:$0xf] }
 0x75a   : > { %v21563_v4 = vld [vmem:[#allocation2 + $0x18] sm:$0xff]  ;;  %v7804_v53 = vrot.slane %v7768_v63, 4  ;;  %v7773_v28 = vsel %vm2092_vm4, %v7768_v63, 0  ;;  %v8078_v63 = vshll.u32 %v8054_v20, 16 }
 0x75b   : > { %v21566_v1 = vrot.slane %v21563_v4, 4  ;;  %v7772_v25 = vsel %vm2091_vm11, %v21563_v4, 0  ;;  %v7943_v37 = vshrl.u32 %v7773_v28, 16  ;;  %v7946_v26 = vshll.u32 %v7773_v28, 16 }
 0x75c   : > { %17446 = vmatpush3.bf16.msra.mxu1 %v18975_v24  ;;  %v7934_v57 = vshrl.u32 %v7772_v25, 16  ;;  %v7937_v36 = vshll.u32 %v7772_v25, 16  ;;  %v7923_v24 = vsel %vm683_vm10, %v7914_v45, %v7922_v30  ;;  %v8070_v45 = vshll.u32 %v8053_v38, 16 }
 0x75d   : > { %v21574_v29 = vsel %vm2120_vm8, %v21541_v42, %v21566_v1  ;;  %17447 = vmatprep.subr.bf16.mxu1 %v18976_v13  ;;  %v7805_v0 = vsel %vm2120_vm8, %v21566_v1, %v7804_v53  ;;  %v7931_v53 = vor.u32 %v7930_v56, %v7927_v60  ;;  %v7948_v32 = vrot.slane %v7946_v26, 4 }
 0x75e   : > { %17439 = vmatprep.mubr.msk.bf16.mxu1 %vm403_vm5, %v21574_v29  ;;  %v7936_v7 = vrot.slane %v7934_v57, 3  ;;  %v7939_v46 = vrot.slane %v7937_v36, 4  ;;  %v8075_v57 = vshrl.u32 %v8054_v20, 16  ;;  %v8069_v36 = vrot.slane %v8067_v58, 4 }
 0x75f   : > { %17440 = vmatmul.mubr.msk.bf16.gmra.mrb[20].mxu1 %vm403_vm5, %v7805_v0  ;;  %v7932_v0 = vsel %vm683_vm10, %v7922_v30, %v7931_v53  ;;  %v8072_v8 = vrot.slane %v8070_v45, 5  ;;  %v8080_v56 = vrot.slane %v8078_v63, 5  ;;  %v8056_v30 = vsel %vm23371_vm13, %v21563_v4, 0  ;;  %v18981_v45 = vld [vmem:[%s23125_s3 + $0x4d8] sm:$0xff]  }
 0x760   : > { %17448 = vmatpush3.bf16.msra.mxu1 %v18976_v13  ;;  %17451 = vmatprep.mubr.msk.bf16.mxu1 %vm403_vm5, %v7923_v24  ;;  %v7940_v25 = vor.u32 %v7939_v46, %v7936_v7  ;;  %v18979_v13 = vld [vmem:[%s23125_s3 + $0x4c8] sm:$0xff]   ;;  %v7945_v24 = vrot.slane %v7943_v37, 3  ;;  %v8077_v38 = vrot.slane %v8075_v57, 4  ;;  %v18980_v7 = vld [vmem:[%s23125_s3 + $0x4d0] sm:$0xff]   ;;  %v8093_v37 = vshrl.u32 %v8056_v30, 16 }
 0x761   : > { %17449 = vmatprep.subr.bf16.mxu1 %v18977_v9  ;;  %v8073_v58 = vor.u32 %v8072_v8, %v8069_v36  ;;  %v8096_v26 = vshll.u32 %v8056_v30, 16  ;;  %vm23373_vm13 = vcmp.ne.s16.totalorder %v23268_v31, 0 }
 0x762   : > { %v7941_v60 = vsel %vm683_vm10, %v7931_v53, %v7940_v25  ;;  %v7949_v46 = vor.u32 %v7948_v32, %v7945_v24  ;;  %v8081_v53 = vor.u32 %v8080_v56, %v8077_v38  ;;  %v8095_v24 = vrot.slane %v8093_v37, 4 }
 0x763   : > { %v8098_v8 = vrot.slane %v8096_v26, 5 }
 0x764   : > { %17450 = vmatpush3.bf16.msra.mxu1 %v18977_v9  ;;  %v8055_v9 = vsel %vm23370_vm3, %v21535_v39, 0  ;;  %v7950_v57 = vsel %vm683_vm10, %v7940_v25, %v7949_v46  ;;  %v8082_v32 = vsel %vm23367_vm15, %v8073_v58, %v8081_v53  ;;  %vm23372_vm3 = vcmp.ne.s16.totalorder %v19878_v19, 0  ;;  %v18982_v25 = vld [vmem:[%s23125_s3 + $0x4e0] sm:$0xff]  }
 0x765   : > { %17459 = vmatprep.subr.bf16.mxu1 %v18978_v47  ;;  %v8084_v28 = vshrl.u32 %v8055_v9, 16  ;;  %v8087_v20 = vshll.u32 %v8055_v9, 16  ;;  %v8099_v30 = vor.u32 %v8098_v8, %v8095_v24 }
 0x767   : > { %17452 = vmatmul.mubr.msk.bf16.vlgmr.msra.gmra.mrb[16].mxu1 %vm403_vm5, %v7932_v0  ;;  %v8086_v63 = vrot.slane %v8084_v28, 4  ;;  %v8089_v0 = vrot.slane %v8087_v20, 5  ;;  %v18983_v28 = vld [vmem:[%s23125_s3 + $0x4e8] sm:$0xff]  }
 0x768   : > { %17460 = vmatpush3.bf16.msra.mxu1 %v18978_v47  ;;  %17455 = vmatprep.mubr.msk.bf16.mxu1 %vm403_vm5, %v7941_v60  ;;  %v8052_v47 = vld [vmem:[#allocation2 + $0x20] sm:$0x1f]  ;;  %v8219_v60 = vld [vmem:[#allocation2] sm:$0x80] }
 0x769   : > { %17461 = vmatprep.subr.bf16.mxu1 %v18979_v13  ;;  %v8057_v36 = vsel %vm23372_vm3, %v8052_v47, 0  ;;  %v8090_v38 = vor.u32 %v8089_v0, %v8086_v63  ;;  %vm23374_vm3 = vmmov %vm23367_vm15 }
 0x76a   : > { %v8102_v56 = vshrl.u32 %v8057_v36, 16  ;;  %v8105_v9 = vshll.u32 %v8057_v36, 16 }
 0x76b   : > { %v8091_v20 = vsel %vm23367_vm15, %v8081_v53, %v8090_v38  ;;  %v8100_v26 = vsel %vm23374_vm3, %v8090_v38, %v8099_v30  ;;  %v18984_v53 = vld [vmem:[%s23125_s3 + $0x4f0] sm:$0xff]   ;;  %v21645_v38 = vld [vmem:[#allocation2 + $0x20] sm:$0xff]  ;;  %vm23376_vm15 = vmmov %vm23374_vm3  ;;  %vm23377_vm3 = vsmask.f32 256 }
 0x76c   : > { %17462 = vmatpush3.bf16.msra.mxu1 %v18979_v13  ;;  %v8222_v13 = vsel %vm23373_vm13, %v21538_v16, 0  ;;  %v8104_v58 = vrot.slane %v8102_v56, 4  ;;  %v8107_v37 = vrot.slane %v8105_v9, 5  ;;  %vm23375_vm13 = vcmp.ne.s16.totalorder %v23271_v23, 0 }
 0x76d   : > { %17463 = vmatprep.subr.bf16.mxu1 %v18980_v7  ;;  %v8239_v46 = vshrl.u32 %v8222_v13, 16  ;;  %v8224_v63 = vsel %vm23375_vm13, %v21563_v4, 0  ;;  %v8242_v0 = vshll.u32 %v8222_v13, 16  ;;  %vm23378_vm13 = vcmp.ne.s16.totalorder %v20321_v51, 0 }
 0x76f   : > { %17456 = vmatmul.mubr.msk.bf16.gmra.mrb[20].mxu1 %vm403_vm5, %v7950_v57  ;;  %v8241_v57 = vrot.slane %v8239_v46, 7 }
 0x770   : > { %17464 = vmatpush3.bf16.msra.mxu1 %v18980_v7  ;;  %17467 = vmatprep.mubr.msk.bf16.mxu1 %vm403_vm5, %v8082_v32  ;;  %v8221_v7 = vsel %vm2608_vm0, %v8219_v60, 0  ;;  %v8108_v32 = vor.u32 %v8107_v37, %v8104_v58  ;;  %v8255_v60 = vshrl.u32 %v8224_v63, 16 }
 0x771   : > { %17465 = vmatprep.subr.bf16.mxu1 %v18981_v45  ;;  %v8235_v47 = vshrl.u32 %v8221_v7, 16  ;;  %v8244_v36 = vor.u32 %v8242_v0, %v8241_v57  ;;  %v8225_v7 = vsel %vm23378_vm13, %v21645_v38, 0  ;;  %vm23380_vm13 = vmmov %vm23377_vm3 }
 0x772   : > { %v8109_v56 = vsel %vm23376_vm15, %v8099_v30, %v8108_v32  ;;  %v8257_v46 = vrot.slane %v8255_v60, 7  ;;  %v8258_v30 = vshll.u32 %v8224_v63, 16  ;;  %v8263_v37 = vshrl.u32 %v8225_v7, 16  ;;  %vm23379_vm15 = vmmov %vm23377_vm3  ;;  %v18988_v32 = vld [vmem:[%s23125_s3 + $0x510] sm:$0xff]   ;;  %v18990_v60 = vld [vmem:[%s23125_s3 + $0x520] sm:$0xff]  }
 0x773   : > { %v8237_v8 = vrot.slane %v8235_v47, 7  ;;  %v18987_v47 = vld [vmem:[%s23125_s3 + $0x508] sm:$0xff]   ;;  %v8266_v63 = vshll.u32 %v8225_v7, 16 }
 0x774   : > { %17466 = vmatpush3.bf16.msra.mxu1 %v18981_v45  ;;  %v8223_v45 = vsel %vm2610_vm12, %v21535_v39, 0  ;;  %v8265_v0 = vrot.slane %v8263_v37, 7 }
 0x775   : > { %17475 = vmatprep.subr.bf16.mxu1 %v18982_v25  ;;  %v8247_v24 = vshrl.u32 %v8223_v45, 16  ;;  %v8245_v13 = vsel %vm23377_vm3, %v8237_v8, %v8244_v36  ;;  %v8501_v36 = vsel %vm2904_vm6, %v21538_v16, 0 }
 0x776   : > { %v8515_v7 = vshrl.u32 %v8501_v36, 16 }
 0x777   : > { %17468 = vmatmul.mubr.msk.bf16.vlgmr.msra.gmra.mrb[16].mxu1 %vm403_vm5, %v8091_v20  ;;  %v8249_v9 = vrot.slane %v8247_v24, 7  ;;  %v18986_v20 = vld [vmem:[%s23125_s3 + $0x500] sm:$0xff]   ;;  %v8268_v24 = vor.u32 %v8266_v63, %v8265_v0  ;;  %v8500_v63 = vld [vmem:[#allocation2 + $0x28] sm:$0x1] }
 0x778   : > { %17476 = vmatpush3.bf16.msra.mxu1 %v18982_v25  ;;  %17471 = vmatprep.mubr.msk.bf16.mxu1 %vm403_vm5, %v8100_v26  ;;  %v18985_v25 = vld [vmem:[%s23125_s3 + $0x4f8] sm:$0xff]   ;;  %v8260_v26 = vor.u32 %v8258_v30, %v8257_v46 }
 0x779   : > { %17477 = vmatprep.subr.bf16.mxu1 %v18983_v28  ;;  %v8269_v8 = vsel %vm23380_vm13, %v8257_v46, %v8268_v24  ;;  %v18992_v46 = vld [vmem:[%s23125_s3 + $0x530] sm:$0xff]   ;;  %vm23383_vm13 = vcmp.ne.s16.totalorder %v20148_v21, 0  ;;  %v18994_v24 = vld [vmem:[%s23125_s3 + $0x540] sm:$0xff]  }
 0x77c   : > { %17478 = vmatpush3.bf16.msra.mxu1 %v18983_v28  ;;  %v8250_v28 = vshll.u32 %v8223_v45, 16  ;;  %v8261_v45 = vsel %vm23377_vm3, %v8249_v9, %v8260_v26  ;;  %vm23382_vm3 = vcmp.ne.s16.totalorder %v20152_v6, 0  ;;  %v18993_v26 = vld [vmem:[%s23125_s3 + $0x538] sm:$0xff]  }
 0x77d   : > { %17479 = vmatprep.subr.bf16.mxu1 %v18984_v53 }
 0x77e   : > { %v8252_v58 = vor.u32 %v8250_v28, %v8249_v9 }
 0x77f   : > { %17472 = vmatmul.mubr.msk.bf16.gmra.mrb[20].mxu1 %vm403_vm5, %v8109_v56  ;;  %v18991_v56 = vld [vmem:[%s23125_s3 + $0x528] sm:$0xff]  }
 0x780   : > { %17480 = vmatpush3.bf16.msra.mxu1 %v18984_v53  ;;  %17483 = vmatprep.mubr.msk.bf16.mxu1 %vm403_vm5, %v8245_v13  ;;  %v8253_v53 = vsel %vm23379_vm15, %v8241_v57, %v8252_v58  ;;  %v18989_v57 = vld [vmem:[%s23125_s3 + $0x518] sm:$0xff]   ;;  %vm23381_vm15 = vcmp.ne.s16.totalorder %v23282_v62, 0  ;;  %v8503_v13 = vsel %vm23382_vm3, %v21563_v4, 0  ;;  %v8659_v58 = vld [vmem:[#allocation2 + $0x8] sm:$0xf8]  ;;  %vm23385_vm3 = vcmp.ne.s16.totalorder %v20140_v12, 0 }
 0x781   : > { %17481 = vmatprep.subr.bf16.mxu1 %v18985_v25  ;;  %v8502_v9 = vsel %vm23381_vm15, %v21535_v39, 0  ;;  %v8530_v30 = vshll.u32 %v8503_v13, 16  ;;  %vm23384_vm15 = vsmask.f32 7424 }
 0x782   : > { %v8522_v28 = vshll.u32 %v8502_v9, 16 }
 0x783   : > { %v8532_v0 = vrot.slane %v8530_v30, 1  ;;  %v18995_v30 = vld [vmem:[%s23125_s3 + $0x548] sm:$0xff]  }
 0x784   : > { %17482 = vmatpush3.bf16.msra.mxu1 %v18985_v25  ;;  %v8517_v25 = vshll.u32 %v8501_v36, 16  ;;  %v8524_v37 = vrot.slane %v8522_v28, 1  ;;  %v8526_v36 = vshrl.u32 %v8502_v9, 16 }
 0x785   : > { %17491 = vmatprep.subr.bf16.mxu1 %v18986_v20 }
 0x786   : > { %v8528_v28 = vor.u32 %v8526_v36, %v8524_v37 }
 0x787   : > { %17484 = vmatmul.mubr.msk.bf16.vlgmr.msra.gmra.mrb[16].mxu1 %vm403_vm5, %v8253_v53 }
 0x788   : > { %17492 = vmatpush3.bf16.msra.mxu1 %v18986_v20  ;;  %17487 = vmatprep.mubr.msk.bf16.mxu1 %vm403_vm5, %v8261_v45  ;;  %v8661_v45 = vsel %vm2088_vm9, %v8659_v58, 0 }
 0x789   : > { %17493 = vmatprep.subr.bf16.mxu1 %v18987_v47 }
 0x78c   : > { %17494 = vmatpush3.bf16.msra.mxu1 %v18987_v47  ;;  %v8504_v47 = vsel %vm23383_vm13, %v21645_v38, 0  ;;  %vm23386_vm13 = vmmov %vm23384_vm15 }
 0x78d   : > { %17495 = vmatprep.subr.bf16.mxu1 %v18988_v32 }
 0x78f   : > { %17488 = vmatmul.mubr.msk.bf16.gmra.mrb[20].mxu1 %vm403_vm5, %v8269_v8  ;;  %v8538_v8 = vshll.u32 %v8504_v47, 16 }
 0x790   : > { %17496 = vmatpush3.bf16.msra.mxu1 %v18988_v32  ;;  %17499 = vmatprep.mubr.msk.bf16.mxu1 %vm403_vm5, %v21538_v16  ;;  %v8519_v16 = vrot.slane %v8517_v25, 1  ;;  %v8662_v32 = vsel %vm2089_vm7, %v21535_v39, 0  ;;  %v8678_v25 = vshll.u32 %v8661_v45, 16 }
 0x791   : > { %17497 = vmatprep.subr.bf16.mxu1 %v18989_v57 }
 0x792   : > { %v8520_v20 = vor.u32 %v8519_v16, %v8515_v7  ;;  %v8505_v16 = vsel %vm23385_vm3, %v8500_v63, 0  ;;  %v8686_v7 = vshll.u32 %v8662_v32, 16  ;;  %vm23388_vm3 = vmmov %vm23386_vm13 }
 0x793   : > { %v8546_v58 = vshll.u32 %v8505_v16, 16 }
 0x794   : > { %17498 = vmatpush3.bf16.msra.mxu1 %v18989_v57  ;;  %v8525_v53 = vsel %vm23384_vm15, %v8520_v20, %v8524_v37  ;;  %v8534_v57 = vshrl.u32 %v8503_v13, 16  ;;  %v8540_v20 = vrot.slane %v8538_v8, 1  ;;  %v8533_v13 = vsel %vm23386_vm13, %v8528_v28, %v8532_v0  ;;  %vm23387_vm15 = vmmov %vm23386_vm13 }
 0x795   : > { %17507 = vmatprep.subr.bf16.mxu1 %v18990_v60  ;;  %v8663_v37 = vsel %vm2090_vm1, %v21563_v4, 0  ;;  %v8548_v36 = vrot.slane %v8546_v58, 1  ;;  %vm23389_vm13 = vcmp.ne.s16.totalorder %v19682_v10, 0 }
 0x797   : > { %17500 = vmatmul.mubr.msk.bf16.vlgmr.msra.gmra.mrb[16].mxu1 %vm403_vm5, %v21535_v39 }
 0x798   : > { %17508 = vmatpush3.bf16.msra.mxu1 %v18990_v60  ;;  %17503 = vmatprep.mubr.msk.bf16.mxu1 %vm403_vm5, %v21563_v4  ;;  %v8675_v60 = vshrl.u32 %v8661_v45, 16 }
 0x799   : > { %17509 = vmatprep.subr.bf16.mxu1 %v18991_v56 }
 0x79a   : > { %v8677_v9 = vrot.slane %v8675_v60, 3  ;;  %v8692_v60 = vshrl.u32 %v8663_v37, 16 }
 0x79c   : > { %17510 = vmatpush3.bf16.msra.mxu1 %v18991_v56  ;;  %v8536_v56 = vor.u32 %v8534_v57, %v8532_v0  ;;  %v8688_v57 = vrot.slane %v8686_v7, 4  ;;  %v8664_v0 = vsel %vm2091_vm11, %v21645_v38, 0  ;;  %v21735_v7 = vld [vmem:[#allocation2 + $0x28] sm:$0xf] }
 0x79d   : > { %17511 = vmatprep.subr.bf16.mxu1 %v18992_v46 }
 0x79e   : > { %v8541_v45 = vsel %vm23387_vm15, %v8536_v56, %v8540_v20  ;;  %vm23390_vm15 = vcmp.ne.s16.totalorder %v19895_v59, 0 }
 0x79f   : > { %17504 = vmatmul.mubr.msk.bf16.gmra.mrb[20].mxu1 %vm403_vm5, %v21645_v38 }
 0x7a0   : > { %17512 = vmatpush3.bf16.msra.mxu1 %v18992_v46  ;;  %17515 = vmatprep.mubr.msk.bf16.mxu1 %vm403_vm5, %v8525_v53  ;;  %v8683_v46 = vshrl.u32 %v8662_v32, 16  ;;  %v8680_v53 = vrot.slane %v8678_v25, 4  ;;  %v18996_v32 = vld [vmem:[%s23125_s3 + $0x550] sm:$0xff]   ;;  %v8695_v25 = vshll.u32 %v8663_v37, 16 }
 0x7a1   : > { %17513 = vmatprep.subr.bf16.mxu1 %v18993_v26 }
 0x7a2   : > { %v8685_v63 = vrot.slane %v8683_v46, 3  ;;  %v8681_v56 = vor.u32 %v8680_v53, %v8677_v9  ;;  %v8701_v46 = vshrl.u32 %v8664_v0, 16  ;;  %v18998_v53 = vld [vmem:[%s23125_s3 + $0x560] sm:$0xff]  }
 0x7a4   : > { %17514 = vmatpush3.bf16.msra.mxu1 %v18993_v26  ;;  %v8542_v26 = vshrl.u32 %v8504_v47, 16  ;;  %v8689_v16 = vor.u32 %v8688_v57, %v8685_v63  ;;  %v18997_v47 = vld [vmem:[%s23125_s3 + $0x558] sm:$0xff]   ;;  %v8703_v58 = vrot.slane %v8701_v46, 3 }
 0x7a5   : > { %17523 = vmatprep.subr.bf16.mxu1 %v18994_v24 }
 0x7a6   : > { %v8544_v8 = vor.u32 %v8542_v26, %v8540_v20  ;;  %v8690_v20 = vsel %vm683_vm10, %v8681_v56, %v8689_v16  ;;  %v19000_v56 = vld [vmem:[%s23125_s3 + $0x570] sm:$0xff]  }
 0x7a7   : > { %17516 = vmatmul.mubr.msk.bf16.vlgmr.msra.gmra.mrb[16].mxu1 %vm403_vm5, %v8533_v13  ;;  %v8694_v13 = vrot.slane %v8692_v60, 3 }
 0x7a8   : > { %17524 = vmatpush3.bf16.msra.mxu1 %v18994_v24  ;;  %17519 = vmatprep.mubr.msk.bf16.mxu1 %vm403_vm5, %v8541_v45  ;;  %v8704_v24 = vshll.u32 %v8664_v0, 16  ;;  %v8549_v28 = vsel %vm23388_vm3, %v8544_v8, %v8548_v36  ;;  %v8697_v45 = vrot.slane %v8695_v25, 4  ;;  %v18999_v0 = vld [vmem:[%s23125_s3 + $0x568] sm:$0xff]   ;;  %vm23391_vm3 = vsmask.f32 3328 }
 0x7a9   : > { %17525 = vmatprep.subr.bf16.mxu1 %v18995_v30  ;;  %v8827_v25 = vld [vmem:[#allocation2 + $0x8] sm:$0xf0] }
 0x7aa   : > { %v8706_v9 = vrot.slane %v8704_v24, 4  ;;  %v8698_v63 = vor.u32 %v8697_v45, %v8694_v13  ;;  %v8841_v24 = vrot.slane %v8827_v25, 4  ;;  %v8960_v13 = vsel %vm2424_vm14, %v8827_v25, 0 }
 0x7ab   : > { %v8961_v45 = vsel %vm2425_vm2, %v21535_v39, 0 }
 0x7ac   : > { %17526 = vmatpush3.bf16.msra.mxu1 %v18995_v30  ;;  %v8665_v30 = vsel %vm2092_vm4, %v21735_v7, 0  ;;  %v8707_v26 = vor.u32 %v8706_v9, %v8703_v58  ;;  %v8699_v8 = vsel %vm683_vm10, %v8689_v16, %v8698_v63  ;;  %v19001_v16 = vld [vmem:[%s23125_s3 + $0x578] sm:$0xff]   ;;  %v8846_v58 = vrot.slane %v21645_v38, 4 }
 0x7ad   : > { %17527 = vmatprep.subr.bf16.mxu1 %v18996_v32  ;;  %v8710_v57 = vshrl.u32 %v8665_v30, 16  ;;  %v8713_v37 = vshll.u32 %v8665_v30, 16  ;;  %v8974_v9 = vshrl.u32 %v8960_v13, 16  ;;  %v8977_v30 = vshll.u32 %v8960_v13, 16 }
 0x7ae   : > { %v8708_v60 = vsel %vm683_vm10, %v8698_v63, %v8707_v26  ;;  %v19003_v63 = vld [vmem:[%s23125_s3 + $0x588] sm:$0xff]   ;;  %v8847_v39 = vsel %vm2120_vm8, %v21566_v1, %v8846_v58  ;;  %v19004_v1 = vld [vmem:[%s23125_s3 + $0x590] sm:$0xff]  }
 0x7af   : > { %17520 = vmatmul.mubr.msk.bf16.gmra.mrb[20].mxu1 %vm403_vm5, %v8549_v28  ;;  %v8715_v36 = vrot.slane %v8713_v37, 4  ;;  %v8843_v28 = vsel %vm2120_vm8, %v8841_v24, %v21541_v42  ;;  %v8982_v42 = vshrl.u32 %v8961_v45, 16  ;;  %v8976_v37 = vrot.slane %v8974_v9, 4  ;;  %v8959_v24 = vld [vmem:[#allocation2 + $0x28] sm:$0x1f] }
 0x7b0   : > { %17528 = vmatpush3.bf16.msra.mxu1 %v18996_v32  ;;  %17531 = vmatprep.mubr.msk.bf16.mxu1 %vm403_vm5, %v8690_v20  ;;  %v8712_v32 = vrot.slane %v8710_v57, 3  ;;  %v19002_v20 = vld [vmem:[%s23125_s3 + $0x580] sm:$0xff]   ;;  %v8962_v57 = vsel %vm23389_vm13, %v21563_v4, 0  ;;  %v8848_v4 = vrot.slane %v21735_v7, 4  ;;  %vm23392_vm13 = vcmp.ne.s16.totalorder %v19878_v19, 0 }
 0x7b1   : > { %17529 = vmatprep.subr.bf16.mxu1 %v18997_v47 }
 0x7b2   : > { %v8716_v46 = vor.u32 %v8715_v36, %v8712_v32  ;;  %v8963_v32 = vsel %vm23390_vm15, %v21645_v38, 0  ;;  %v8991_v36 = vshrl.u32 %v8962_v57, 16  ;;  %v19005_v38 = vld [vmem:[%s23125_s3 + $0x598] sm:$0xff]   ;;  %vm23393_vm15 = vmmov %vm23391_vm3 }
 0x7b4   : > { %17530 = vmatpush3.bf16.msra.mxu1 %v18997_v47  ;;  %v8717_v47 = vsel %vm683_vm10, %v8707_v26, %v8716_v46  ;;  %v8979_v26 = vrot.slane %v8977_v30, 5  ;;  %v9003_v46 = vshll.u32 %v8963_v32, 16 }
 0x7b5   : > { %17539 = vmatprep.subr.bf16.mxu1 %v18998_v53 }
 0x7b7   : > { %17532 = vmatmul.mubr.msk.bf16.vlgmr.msra.gmra.mrb[16].mxu1 %vm403_vm5, %v8699_v8 }
 0x7b8   : > { %17540 = vmatpush3.bf16.msra.mxu1 %v18998_v53  ;;  %17535 = vmatprep.mubr.msk.bf16.mxu1 %vm403_vm5, %v8708_v60  ;;  %v8985_v53 = vshll.u32 %v8961_v45, 16  ;;  %v8980_v60 = vor.u32 %v8979_v26, %v8976_v37  ;;  %v9005_v45 = vrot.slane %v9003_v46, 5 }
 0x7b9   : > { %17541 = vmatprep.subr.bf16.mxu1 %v18999_v0 }
 0x7ba   : > { %v8987_v8 = vrot.slane %v8985_v53, 5 }
 0x7bc   : > { %17542 = vmatpush3.bf16.msra.mxu1 %v18999_v0  ;;  %v8984_v0 = vrot.slane %v8982_v42, 4 }
 0x7bd   : > { %17543 = vmatprep.subr.bf16.mxu1 %v19000_v56 }
 0x7be   : > { %v8988_v25 = vor.u32 %v8987_v8, %v8984_v0  ;;  %v19006_v0 = vld [vmem:[%s23125_s3 + $0x5c0] sm:$0xff]   ;;  %v19007_v8 = vld [vmem:[%s23125_s3 + $0x5c8] sm:$0xff]  }
 0x7bf   : > { %17536 = vmatmul.mubr.msk.bf16.gmra.mrb[20].mxu1 %vm403_vm5, %v8717_v47  ;;  %v8993_v47 = vrot.slane %v8991_v36, 4  ;;  %17571 = vmatprep.subr.bf16.mxu0 %v19006_v0  ;;  %v15553_v36 = vld [vmem:[%s23126_s4 + $0x4] ss:$0 sm:$0xff] }
 0x7c0   : > { %17544 = vmatpush3.bf16.msra.mxu1 %v19000_v56  ;;  %17547 = vmatprep.mubr.msk.bf16.mxu1 %vm403_vm5, %v8843_v28  ;;  %v9000_v56 = vshrl.u32 %v8963_v32, 16  ;;  %v8989_v7 = vsel %vm23391_vm3, %v8980_v60, %v8988_v25  ;;  %v19008_v32 = vld [vmem:[%s23125_s3 + $0x5d0] sm:$0xff]  }
 0x7c1   : > { %17545 = vmatprep.subr.bf16.mxu1 %v19001_v16  ;;  %17572 = vmatpush3.bf16.msra.mxu0 %v19006_v0 }
 0x7c2   : > { %v9002_v13 = vrot.slane %v9000_v56, 4  ;;  %17573 = vmatprep.subr.bf16.mxu0 %v19007_v8 }
 0x7c4   : > { %17546 = vmatpush3.bf16.msra.mxu1 %v19001_v16  ;;  %v8849_v16 = vsel %vm2120_vm8, %v8846_v58, %v8848_v4  ;;  %v9006_v53 = vor.u32 %v9005_v45, %v9002_v13  ;;  %v19010_v4 = vld [vmem:[%s23125_s3 + $0x5a0] sm:$0xff]  }
 0x7c5   : > { %17555 = vmatprep.subr.bf16.mxu1 %v19002_v20  ;;  %17574 = vmatpush3.bf16.msra.mxu0 %v19007_v8  ;;  %v9177_v8 = vld [vmem:[#allocation2] sm:$0xf0] }
 0x7c6   : > { %17575 = vmatprep.subr.bf16.mxu0 %v19008_v32 }
 0x7c7   : > { %17548 = vmatmul.mubr.msk.bf16.vlgmr.msra.gmra.mrb[16].mxu1 %vm403_vm5, %v21574_v29  ;;  %v8994_v29 = vshll.u32 %v8962_v57, 16 }
 0x7c8   : > { %17556 = vmatpush3.bf16.msra.mxu1 %v19002_v20  ;;  %17551 = vmatprep.mubr.msk.bf16.mxu1 %vm403_vm5, %v8847_v39  ;;  %v8964_v20 = vsel %vm23392_vm13, %v8959_v24, 0  ;;  %vm23394_vm13 = vmmov %vm23391_vm3 }
 0x7c9   : > { %17557 = vmatprep.subr.bf16.mxu1 %v19003_v63  ;;  %v8996_v28 = vrot.slane %v8994_v29, 5  ;;  %v9009_v30 = vshrl.u32 %v8964_v20, 16  ;;  %v9012_v42 = vshll.u32 %v8964_v20, 16  ;;  %17576 = vmatpush3.bf16.msra.mxu0 %v19008_v32 }
 0x7cb   : > { %v8997_v9 = vor.u32 %v8996_v28, %v8993_v47  ;;  %v9014_v39 = vrot.slane %v9012_v42, 5 }
 0x7cc   : > { %17558 = vmatpush3.bf16.msra.mxu1 %v19003_v63  ;;  %v9011_v63 = vrot.slane %v9009_v30, 4 }
 0x7cd   : > { %17559 = vmatprep.subr.bf16.mxu1 %v19004_v1  ;;  %v8998_v58 = vsel %vm23393_vm15, %v8988_v25, %v8997_v9  ;;  %v9007_v57 = vsel %vm23391_vm3, %v8997_v9, %v9006_v53  ;;  %vm23395_vm15 = vcmp.ne.s16.totalorder %v19682_v10, 0  ;;  %vm23396_vm3 = vcmp.ne.s16.totalorder %v19895_v59, 0 }
 0x7ce   : > { %v9015_v37 = vor.u32 %v9014_v39, %v9011_v63 }
 0x7cf   : > { %17552 = vmatmul.mubr.msk.bf16.gmra.mrb[20].mxu1 %vm403_vm5, %v8849_v16 }
 0x7d0   : > { %17560 = vmatpush3.bf16.msra.mxu1 %v19004_v1  ;;  %17563 = vmatprep.mubr.msk.bf16.mxu1 %vm403_vm5, %v8989_v7  ;;  %v9016_v26 = vsel %vm23394_vm13, %v9006_v53, %v9015_v37  ;;  %v19009_v1 = vld [vmem:[%s23125_s3 + $0x5d8] sm:$0xff]  }
 0x7d1   : > { %17561 = vmatprep.subr.bf16.mxu1 %v19005_v38  ;;  %17577 = vmatprep.subr.bf16.mxu0 %v19009_v1 }
 0x7d2   : > { %17578 = vmatpush3.bf16.msra.mxu0 %v19009_v1 }
 0x7d3   : > { %17587 = vmatprep.subr.bf16.mxu0 %v19010_v4 }
 0x7d4   : > { %17562 = vmatpush3.bf16.msra.mxu1 %v19005_v38 }
 0x7d7   : > { %17564 = vmatmul.mubr.msk.bf16.vlgmr.msra.gmra.mrb[16].mxu1 %vm403_vm5, %v8998_v58 }
 0x7d8   : > { %17567 = vmatprep.mubr.msk.bf16.mxu1 %vm403_vm5, %v9007_v57  ;;  %v9158_v57 = vld [vmem:[#allocation2] sm:$0xf8] }
 0x7df   : > { %17568 = vmatmul.mubr.msk.bf16.gmra.mrb[20].mxu1 %vm403_vm5, %v9016_v26 }
 0x8aa   : > { %v17565_v29 = vpop.f32.mrb[16].mxu1 }
 0x8ab   : > { %v9134_v60 = vadd.f32 %v17565_v29, %v15553_v36  ;;  %v9087_v25 = vpop.f32.mrb[17].mxu1  ;;  %v9163_v29 = vsel %vm2088_vm9, %v9158_v57, 0 }
 0x8ac   : > { %v9132_v56 = vadd.f32 %v15553_v36, %v9087_v25  ;;  %v17566_v46 = vpop.f32.mrb[18].mxu1 }
 0x8ad   : > { %v9135_v24 = vadd.f32 %v17566_v46, %v15553_v36  ;;  %v9090_v38 = vpop.f32.mrb[19].mxu1  ;;  %v9142_v47 = vmax.f32 %v9134_v60, 0.0 }
 0x8ae   : > { %v9133_v16 = vadd.f32 %v15553_v36, %v9090_v38  ;;  %v9140_v7 = vmax.f32 %v9132_v56, 0.0  ;;  %v9191_v56 = vrot.slane %v9177_v8, 4 }
 0x8af   : > { %v9143_v28 = vmax.f32 %v9135_v24, 0.0 }
 0x8b0   : > { %v9141_v13 = vmax.f32 %v9133_v16, 0.0 }
 0x8b1   : > { %v9149_v45 = vpack.c.bf16 %v9143_v28, %v9142_v47  ;;  %v9305_v28 = vshll.u32 %v9163_v29, 16 }
 0x8b2   : > { %v9148_v20 = vpack.c.bf16 %v9141_v13, %v9140_v7  ;;  %v17569_v9 = vpop.f32.mrb[20].mxu1 }
 0x8b3   : > { %9153 = vst.msk [vmem:[#allocation2 + $0x10] sm:$0xff] %vm403_vm5, %v9149_v45  ;;  %v9138_v30 = vadd.f32 %v17569_v9, %v15553_v36  ;;  %v9103_v42 = vpop.f32.mrb[21].mxu1  ;;  %v19011_v9 = vld [vmem:[%s23125_s3 + $0x5a8] sm:$0xff]  }
 0x8b4   : > { %9152 = vst.msk [vmem:[#allocation2 + $0x8] sm:$0xff] %vm403_vm5, %v9148_v20  ;;  %v9136_v53 = vadd.f32 %v15553_v36, %v9103_v42  ;;  %v17570_v58 = vpop.f32.mrb[22].mxu1  ;;  %v9307_v42 = vrot.slane %v9305_v28, 4  ;;  %v9447_v28 = vsel %vm2424_vm14, %v9177_v8, 0 }
 0x8b5   : > { %v9139_v63 = vadd.f32 %v17570_v58, %v15553_v36  ;;  %v9106_v39 = vpop.f32.mrb[23].mxu1  ;;  %v9146_v26 = vmax.f32 %v9138_v30, 0.0 }
 0x8b6   : > { %v9137_v37 = vadd.f32 %v15553_v36, %v9106_v39  ;;  %v9144_v32 = vmax.f32 %v9136_v53, 0.0  ;;  %v9302_v36 = vshrl.u32 %v9163_v29, 16  ;;  %v19012_v39 = vld [vmem:[%s23125_s3 + $0x5b0] sm:$0xff]  }
 0x8b7   : > { %v9147_v0 = vmax.f32 %v9139_v63, 0.0 }
 0x8b8   : > { %v9145_v1 = vmax.f32 %v9137_v37, 0.0  ;;  %v9304_v30 = vrot.slane %v9302_v36, 3 }
 0x8b9   : > { %v9151_v60 = vpack.c.bf16 %v9147_v0, %v9146_v26 }
 0x8ba   : > { %v9150_v25 = vpack.c.bf16 %v9145_v1, %v9144_v32  ;;  %v21832_v46 = vld [vmem:[#allocation2 + $0x10] sm:$0xff]  ;;  %v9308_v29 = vor.u32 %v9307_v42, %v9304_v30  ;;  %v19014_v42 = vld [vmem:[%s23125_s3 + $0x5e0] sm:$0xff]  }
 0x8bb   : > { %9155 = vst.msk [vmem:[#allocation2 + $0x20] sm:$0xff] %vm403_vm5, %v9151_v60  ;;  %v21835_v24 = vld [vmem:[#allocation2 + $0x8] sm:$0xff]  ;;  %v21838_v38 = vrot.slane %v21832_v46, 4  ;;  %v9165_v63 = vsel %vm2090_vm1, %v21832_v46, 0 }
 0x8bc   : > { %9154 = vst.msk [vmem:[#allocation2 + $0x18] sm:$0xff] %vm403_vm5, %v9150_v25  ;;  %v9192_v16 = vrot.slane %v21835_v24, 4  ;;  %v9164_v47 = vsel %vm2089_vm7, %v21835_v24, 0  ;;  %v9319_v0 = vshrl.u32 %v9165_v63, 16  ;;  %v9322_v32 = vshll.u32 %v9165_v63, 16 }
 0x8bd   : > { %v9310_v7 = vshrl.u32 %v9164_v47, 16  ;;  %v9313_v13 = vshll.u32 %v9164_v47, 16  ;;  %v19013_v47 = vld [vmem:[%s23125_s3 + $0x5b8] sm:$0xff]   ;;  %v9448_v8 = vsel %vm2425_vm2, %v21835_v24, 0 }
 0x8be   : > { %v9193_v45 = vsel %vm2120_vm8, %v9191_v56, %v9192_v16  ;;  %v9195_v20 = vsel %vm2120_vm8, %v9192_v16, %v21838_v38 }
 0x8bf   : > { %17579 = vmatprep.mubr.msk.bf16.mxu0 %vm403_vm5, %v9193_v45  ;;  %v9312_v53 = vrot.slane %v9310_v7, 3  ;;  %v9315_v58 = vrot.slane %v9313_v13, 4  ;;  %v9321_v7 = vrot.slane %v9319_v0, 3  ;;  %v9324_v13 = vrot.slane %v9322_v32, 4 }
 0x8c0   : > { %17580 = vmatmul.mubr.msk.bf16.vlgmr.msra.gmra.mrb[24].mxu0 %vm403_vm5, %v9195_v20  ;;  %v9464_v0 = vshll.u32 %v9447_v28, 16 }
 0x8c1   : > { %17588 = vmatpush3.bf16.msra.mxu0 %v19010_v4  ;;  %v9316_v60 = vor.u32 %v9315_v58, %v9312_v53  ;;  %v9461_v53 = vshrl.u32 %v9447_v28, 16  ;;  %v9325_v58 = vor.u32 %v9324_v13, %v9321_v7 }
 0x8c2   : > { %17589 = vmatprep.subr.bf16.mxu0 %v19011_v9  ;;  %v9162_v57 = vld [vmem:[#allocation2 + $0x20] sm:$0xf] }
 0x8c3   : > { %v21859_v37 = vld [vmem:[#allocation2 + $0x18] sm:$0xff]  ;;  %v9198_v26 = vrot.slane %v9162_v57, 4  ;;  %v9317_v45 = vsel %vm683_vm10, %v9308_v29, %v9316_v60  ;;  %v9167_v30 = vsel %vm2092_vm4, %v9162_v57, 0  ;;  %v9469_v29 = vshrl.u32 %v9448_v8, 16 }
 0x8c4   : > { %v21862_v1 = vrot.slane %v21859_v37, 4  ;;  %v9166_v4 = vsel %vm2091_vm11, %v21859_v37, 0  ;;  %v9337_v63 = vshrl.u32 %v9167_v30, 16  ;;  %v9472_v57 = vshll.u32 %v9448_v8, 16 }
 0x8c5   : > { %17590 = vmatpush3.bf16.msra.mxu0 %v19011_v9  ;;  %v9328_v25 = vshrl.u32 %v9166_v4, 16  ;;  %v9331_v56 = vshll.u32 %v9166_v4, 16  ;;  %v9463_v4 = vrot.slane %v9461_v53, 4  ;;  %v9471_v28 = vrot.slane %v9469_v29, 4 }
 0x8c6   : > { %v21870_v36 = vsel %vm2120_vm8, %v21838_v38, %v21862_v1  ;;  %17591 = vmatprep.subr.bf16.mxu0 %v19012_v39  ;;  %v9199_v16 = vsel %vm2120_vm8, %v21862_v1, %v9198_v26  ;;  %v9340_v26 = vshll.u32 %v9167_v30, 16  ;;  %v9474_v13 = vrot.slane %v9472_v57, 5 }
 0x8c7   : > { %17583 = vmatprep.mubr.msk.bf16.mxu0 %vm403_vm5, %v21870_v36  ;;  %v9330_v20 = vrot.slane %v9328_v25, 3  ;;  %v9333_v9 = vrot.slane %v9331_v56, 4  ;;  %v9326_v25 = vsel %vm683_vm10, %v9316_v60, %v9325_v58  ;;  %v9339_v56 = vrot.slane %v9337_v63, 3 }
 0x8c8   : > { %17584 = vmatmul.mubr.msk.bf16.gmra.mrb[28].mxu0 %vm403_vm5, %v9199_v16  ;;  %v9342_v16 = vrot.slane %v9340_v26, 4  ;;  %v9450_v60 = vsel %vm23396_vm3, %v21859_v37, 0  ;;  %vm23398_vm3 = vcmp.ne.s16.totalorder %v23268_v31, 0 }
 0x8c9   : > { %17592 = vmatpush3.bf16.msra.mxu0 %v19012_v39  ;;  %17595 = vmatprep.mubr.msk.bf16.mxu0 %vm403_vm5, %v9317_v45  ;;  %v9334_v32 = vor.u32 %v9333_v9, %v9330_v20  ;;  %v19015_v39 = vld [vmem:[%s23125_s3 + $0x5e8] sm:$0xff]   ;;  %v9466_v45 = vrot.slane %v9464_v0, 5  ;;  %v19016_v20 = vld [vmem:[%s23125_s3 + $0x5f0] sm:$0xff]   ;;  %v9487_v63 = vshrl.u32 %v9450_v60, 16  ;;  %v9490_v26 = vshll.u32 %v9450_v60, 16  ;;  %v19017_v0 = vld [vmem:[%s23125_s3 + $0x5f8] sm:$0xff]  }
 0x8ca   : > { %17593 = vmatprep.subr.bf16.mxu0 %v19013_v47  ;;  %v9343_v9 = vor.u32 %v9342_v16, %v9339_v56 }
 0x8cb   : > { %v9335_v7 = vsel %vm683_vm10, %v9325_v58, %v9334_v32  ;;  %v9467_v53 = vor.u32 %v9466_v45, %v9463_v4  ;;  %v9475_v58 = vor.u32 %v9474_v13, %v9471_v28  ;;  %v9489_v16 = vrot.slane %v9487_v63, 4 }
 0x8cc   : > { %v9344_v29 = vsel %vm683_vm10, %v9334_v32, %v9343_v9  ;;  %v9492_v4 = vrot.slane %v9490_v26, 5  ;;  %v19018_v32 = vld [vmem:[%s23125_s3 + $0x600] sm:$0xff]  }
 0x8cd   : > { %17594 = vmatpush3.bf16.msra.mxu0 %v19013_v47  ;;  %v9449_v47 = vsel %vm23395_vm15, %v21832_v46, 0  ;;  %v9476_v56 = vsel %vm23394_vm13, %v9467_v53, %v9475_v58  ;;  %vm23397_vm15 = vcmp.ne.s16.totalorder %v19878_v19, 0 }
 0x8ce   : > { %17603 = vmatprep.subr.bf16.mxu0 %v19014_v42  ;;  %v9478_v30 = vshrl.u32 %v9449_v47, 16  ;;  %v9481_v8 = vshll.u32 %v9449_v47, 16  ;;  %v9493_v60 = vor.u32 %v9492_v4, %v9489_v16 }
 0x8d0   : > { %17596 = vmatmul.mubr.msk.bf16.vlgmr.msra.gmra.mrb[24].mxu0 %vm403_vm5, %v9326_v25  ;;  %v9480_v57 = vrot.slane %v9478_v30, 4  ;;  %v9483_v25 = vrot.slane %v9481_v8, 5  ;;  %v19019_v30 = vld [vmem:[%s23125_s3 + $0x608] sm:$0xff]  }
 0x8d1   : > { %17604 = vmatpush3.bf16.msra.mxu0 %v19014_v42  ;;  %17599 = vmatprep.mubr.msk.bf16.mxu0 %vm403_vm5, %v9335_v7  ;;  %v9446_v42 = vld [vmem:[#allocation2 + $0x20] sm:$0x1f]  ;;  %v9613_v7 = vld [vmem:[#allocation2] sm:$0x80] }
 0x8d2   : > { %17605 = vmatprep.subr.bf16.mxu0 %v19015_v39  ;;  %v9451_v45 = vsel %vm23397_vm15, %v9446_v42, 0  ;;  %v9484_v28 = vor.u32 %v9483_v25, %v9480_v57  ;;  %vm23399_vm15 = vmmov %vm23394_vm13 }
 0x8d3   : > { %v9496_v13 = vshrl.u32 %v9451_v45, 16  ;;  %v9499_v47 = vshll.u32 %v9451_v45, 16 }
 0x8d4   : > { %v9485_v8 = vsel %vm23394_vm13, %v9475_v58, %v9484_v28  ;;  %v9494_v26 = vsel %vm23399_vm15, %v9484_v28, %v9493_v60  ;;  %v19020_v58 = vld [vmem:[%s23125_s3 + $0x610] sm:$0xff]   ;;  %v21941_v28 = vld [vmem:[#allocation2 + $0x20] sm:$0xff]  ;;  %vm23401_vm15 = vsmask.f32 256 }
 0x8d5   : > { %17606 = vmatpush3.bf16.msra.mxu0 %v19015_v39  ;;  %v9616_v39 = vsel %vm23398_vm3, %v21835_v24, 0  ;;  %v9498_v53 = vrot.slane %v9496_v13, 4  ;;  %v9501_v63 = vrot.slane %v9499_v47, 5  ;;  %vm23400_vm3 = vcmp.ne.s16.totalorder %v23271_v23, 0 }
 0x8d6   : > { %17607 = vmatprep.subr.bf16.mxu0 %v19016_v20  ;;  %v9633_v9 = vshrl.u32 %v9616_v39, 16  ;;  %v9618_v57 = vsel %vm23400_vm3, %v21859_v37, 0  ;;  %v9636_v25 = vshll.u32 %v9616_v39, 16  ;;  %vm23402_vm3 = vcmp.ne.s16.totalorder %v20321_v51, 0 }
 0x8d8   : > { %17600 = vmatmul.mubr.msk.bf16.gmra.mrb[28].mxu0 %vm403_vm5, %v9344_v29  ;;  %v9635_v29 = vrot.slane %v9633_v9, 7 }
 0x8d9   : > { %17608 = vmatpush3.bf16.msra.mxu0 %v19016_v20  ;;  %17611 = vmatprep.mubr.msk.bf16.mxu0 %vm403_vm5, %v9476_v56  ;;  %v9615_v20 = vsel %vm2608_vm0, %v9613_v7, 0  ;;  %v9502_v56 = vor.u32 %v9501_v63, %v9498_v53  ;;  %v9649_v7 = vshrl.u32 %v9618_v57, 16 }
 0x8da   : > { %17609 = vmatprep.subr.bf16.mxu0 %v19017_v0  ;;  %v9629_v42 = vshrl.u32 %v9615_v20, 16  ;;  %v9638_v45 = vor.u32 %v9636_v25, %v9635_v29  ;;  %v9619_v20 = vsel %vm23402_vm3, %v21941_v28, 0 }
 0x8db   : > { %v9503_v13 = vsel %vm23394_vm13, %v9493_v60, %v9502_v56  ;;  %v9651_v9 = vrot.slane %v9649_v7, 7  ;;  %v9652_v60 = vshll.u32 %v9618_v57, 16  ;;  %v9657_v63 = vshrl.u32 %v9619_v20, 16  ;;  %vm23403_vm13 = vmmov %vm23401_vm15  ;;  %v19024_v56 = vld [vmem:[%s23125_s3 + $0x630] sm:$0xff]   ;;  %v19026_v7 = vld [vmem:[%s23125_s3 + $0x640] sm:$0xff]  }
 0x8dc   : > { %v9631_v4 = vrot.slane %v9629_v42, 7  ;;  %v19023_v42 = vld [vmem:[%s23125_s3 + $0x628] sm:$0xff]   ;;  %v9660_v57 = vshll.u32 %v9619_v20, 16  ;;  %vm23405_vm3 = vmmov %vm23403_vm13 }
 0x8dd   : > { %17610 = vmatpush3.bf16.msra.mxu0 %v19017_v0  ;;  %v9617_v0 = vsel %vm2610_vm12, %v21832_v46, 0  ;;  %v9659_v25 = vrot.slane %v9657_v63, 7 }
 0x8de   : > { %17619 = vmatprep.subr.bf16.mxu0 %v19018_v32  ;;  %v9641_v16 = vshrl.u32 %v9617_v0, 16  ;;  %v9639_v39 = vsel %vm23401_vm15, %v9631_v4, %v9638_v45  ;;  %vm23404_vm15 = vmmov %vm23403_vm13  ;;  %v9895_v45 = vsel %vm2904_vm6, %v21835_v24, 0 }
 0x8df   : > { %v9909_v20 = vshrl.u32 %v9895_v45, 16 }
 0x8e0   : > { %17612 = vmatmul.mubr.msk.bf16.vlgmr.msra.gmra.mrb[24].mxu0 %vm403_vm5, %v9485_v8  ;;  %v9643_v47 = vrot.slane %v9641_v16, 7  ;;  %v19022_v8 = vld [vmem:[%s23125_s3 + $0x620] sm:$0xff]   ;;  %v9662_v16 = vor.u32 %v9660_v57, %v9659_v25  ;;  %v9894_v57 = vld [vmem:[#allocation2 + $0x28] sm:$0x1] }
 0x8e1   : > { %17620 = vmatpush3.bf16.msra.mxu0 %v19018_v32  ;;  %17615 = vmatprep.mubr.msk.bf16.mxu0 %vm403_vm5, %v9494_v26  ;;  %v19021_v32 = vld [vmem:[%s23125_s3 + $0x618] sm:$0xff]   ;;  %v9654_v26 = vor.u32 %v9652_v60, %v9651_v9 }
 0x8e2   : > { %17621 = vmatprep.subr.bf16.mxu0 %v19019_v30  ;;  %v9663_v4 = vsel %vm23405_vm3, %v9651_v9, %v9662_v16  ;;  %v19028_v9 = vld [vmem:[%s23125_s3 + $0x650] sm:$0xff]   ;;  %vm23408_vm3 = vcmp.ne.s16.totalorder %v20148_v21, 0  ;;  %v19030_v16 = vld [vmem:[%s23125_s3 + $0x660] sm:$0xff]  }
 0x8e5   : > { %17622 = vmatpush3.bf16.msra.mxu0 %v19019_v30  ;;  %v9644_v30 = vshll.u32 %v9617_v0, 16  ;;  %v9655_v0 = vsel %vm23404_vm15, %v9643_v47, %v9654_v26  ;;  %vm23407_vm15 = vcmp.ne.s16.totalorder %v20152_v6, 0  ;;  %v19029_v26 = vld [vmem:[%s23125_s3 + $0x658] sm:$0xff]  }
 0x8e6   : > { %17623 = vmatprep.subr.bf16.mxu0 %v19020_v58 }
 0x8e7   : > { %v9646_v53 = vor.u32 %v9644_v30, %v9643_v47 }
 0x8e8   : > { %17616 = vmatmul.mubr.msk.bf16.gmra.mrb[28].mxu0 %vm403_vm5, %v9503_v13  ;;  %v19027_v13 = vld [vmem:[%s23125_s3 + $0x648] sm:$0xff]  }
 0x8e9   : > { %17624 = vmatpush3.bf16.msra.mxu0 %v19020_v58  ;;  %17627 = vmatprep.mubr.msk.bf16.mxu0 %vm403_vm5, %v9639_v39  ;;  %v9647_v58 = vsel %vm23403_vm13, %v9635_v29, %v9646_v53  ;;  %v19025_v29 = vld [vmem:[%s23125_s3 + $0x638] sm:$0xff]   ;;  %vm23406_vm13 = vcmp.ne.s16.totalorder %v23282_v62, 0  ;;  %v9897_v39 = vsel %vm23407_vm15, %v21859_v37, 0  ;;  %v10053_v53 = vld [vmem:[#allocation2 + $0x8] sm:$0xf8]  ;;  %vm23410_vm15 = vcmp.ne.s16.totalorder %v20140_v12, 0 }
 0x8ea   : > { %17625 = vmatprep.subr.bf16.mxu0 %v19021_v32  ;;  %v9896_v47 = vsel %vm23406_vm13, %v21832_v46, 0  ;;  %v9924_v60 = vshll.u32 %v9897_v39, 16  ;;  %vm23409_vm13 = vsmask.f32 7424 }
 0x8eb   : > { %v9916_v30 = vshll.u32 %v9896_v47, 16 }
 0x8ec   : > { %v9926_v25 = vrot.slane %v9924_v60, 1  ;;  %v19031_v60 = vld [vmem:[%s23125_s3 + $0x668] sm:$0xff]  }
 0x8ed   : > { %17626 = vmatpush3.bf16.msra.mxu0 %v19021_v32  ;;  %v9911_v32 = vshll.u32 %v9895_v45, 16  ;;  %v9918_v63 = vrot.slane %v9916_v30, 1  ;;  %v9920_v45 = vshrl.u32 %v9896_v47, 16 }
 0x8ee   : > { %17635 = vmatprep.subr.bf16.mxu0 %v19022_v8 }
 0x8ef   : > { %v9922_v30 = vor.u32 %v9920_v45, %v9918_v63 }
 0x8f0   : > { %17628 = vmatmul.mubr.msk.bf16.vlgmr.msra.gmra.mrb[24].mxu0 %vm403_vm5, %v9647_v58 }
 0x8f1   : > { %17636 = vmatpush3.bf16.msra.mxu0 %v19022_v8  ;;  %17631 = vmatprep.mubr.msk.bf16.mxu0 %vm403_vm5, %v9655_v0  ;;  %v10055_v0 = vsel %vm2088_vm9, %v10053_v53, 0 }
 0x8f2   : > { %17637 = vmatprep.subr.bf16.mxu0 %v19023_v42 }
 0x8f5   : > { %17638 = vmatpush3.bf16.msra.mxu0 %v19023_v42  ;;  %v9898_v42 = vsel %vm23408_vm3, %v21941_v28, 0  ;;  %vm23411_vm3 = vmmov %vm23409_vm13 }
 0x8f6   : > { %17639 = vmatprep.subr.bf16.mxu0 %v19024_v56 }
 0x8f8   : > { %17632 = vmatmul.mubr.msk.bf16.gmra.mrb[28].mxu0 %vm403_vm5, %v9663_v4  ;;  %v9932_v4 = vshll.u32 %v9898_v42, 16 }
 0x8f9   : > { %17640 = vmatpush3.bf16.msra.mxu0 %v19024_v56  ;;  %17643 = vmatprep.mubr.msk.bf16.mxu0 %vm403_vm5, %v21835_v24  ;;  %v9913_v24 = vrot.slane %v9911_v32, 1  ;;  %v10056_v56 = vsel %vm2089_vm7, %v21832_v46, 0  ;;  %v10072_v32 = vshll.u32 %v10055_v0, 16 }
 0x8fa   : > { %17641 = vmatprep.subr.bf16.mxu0 %v19025_v29 }
 0x8fb   : > { %v9914_v8 = vor.u32 %v9913_v24, %v9909_v20  ;;  %v9899_v24 = vsel %vm23410_vm15, %v9894_v57, 0  ;;  %v10080_v20 = vshll.u32 %v10056_v56, 16  ;;  %vm23413_vm15 = vmmov %vm23411_vm3 }
 0x8fc   : > { %v9940_v53 = vshll.u32 %v9899_v24, 16 }
 0x8fd   : > { %17642 = vmatpush3.bf16.msra.mxu0 %v19025_v29  ;;  %v9919_v58 = vsel %vm23409_vm13, %v9914_v8, %v9918_v63  ;;  %v9928_v29 = vshrl.u32 %v9897_v39, 16  ;;  %v9934_v8 = vrot.slane %v9932_v4, 1  ;;  %v9927_v39 = vsel %vm23411_vm3, %v9922_v30, %v9926_v25  ;;  %vm23412_vm13 = vmmov %vm23411_vm3 }
 0x8fe   : > { %17651 = vmatprep.subr.bf16.mxu0 %v19026_v7  ;;  %v10057_v63 = vsel %vm2090_vm1, %v21859_v37, 0  ;;  %v9942_v45 = vrot.slane %v9940_v53, 1  ;;  %vm23414_vm3 = vcmp.ne.s16.totalorder %v19682_v10, 0 }
 0x900   : > { %17644 = vmatmul.mubr.msk.bf16.vlgmr.msra.gmra.mrb[24].mxu0 %vm403_vm5, %v21832_v46 }
 0x901   : > { %17652 = vmatpush3.bf16.msra.mxu0 %v19026_v7  ;;  %17647 = vmatprep.mubr.msk.bf16.mxu0 %vm403_vm5, %v21859_v37  ;;  %v10069_v7 = vshrl.u32 %v10055_v0, 16 }
 0x902   : > { %17653 = vmatprep.subr.bf16.mxu0 %v19027_v13 }
 0x903   : > { %v10071_v47 = vrot.slane %v10069_v7, 3  ;;  %v10086_v7 = vshrl.u32 %v10057_v63, 16 }
 0x905   : > { %17654 = vmatpush3.bf16.msra.mxu0 %v19027_v13  ;;  %v9930_v13 = vor.u32 %v9928_v29, %v9926_v25  ;;  %v10082_v29 = vrot.slane %v10080_v20, 4  ;;  %v10058_v25 = vsel %vm2091_vm11, %v21941_v28, 0  ;;  %v22031_v20 = vld [vmem:[#allocation2 + $0x28] sm:$0xf] }
 0x906   : > { %17655 = vmatprep.subr.bf16.mxu0 %v19028_v9 }
 0x907   : > { %v9935_v0 = vsel %vm23412_vm13, %v9930_v13, %v9934_v8  ;;  %vm23415_vm13 = vcmp.ne.s16.totalorder %v19895_v59, 0 }
 0x908   : > { %17648 = vmatmul.mubr.msk.bf16.gmra.mrb[28].mxu0 %vm403_vm5, %v21941_v28 }
 0x909   : > { %17656 = vmatpush3.bf16.msra.mxu0 %v19028_v9  ;;  %17659 = vmatprep.mubr.msk.bf16.mxu0 %vm403_vm5, %v9919_v58  ;;  %v10077_v9 = vshrl.u32 %v10056_v56, 16  ;;  %v10074_v58 = vrot.slane %v10072_v32, 4  ;;  %v19032_v56 = vld [vmem:[%s23125_s3 + $0x670] sm:$0xff]   ;;  %v10089_v32 = vshll.u32 %v10057_v63, 16 }
 0x90a   : > { %17657 = vmatprep.subr.bf16.mxu0 %v19029_v26 }
 0x90b   : > { %v10079_v57 = vrot.slane %v10077_v9, 3  ;;  %v10075_v13 = vor.u32 %v10074_v58, %v10071_v47  ;;  %v10095_v9 = vshrl.u32 %v10058_v25, 16  ;;  %v19034_v58 = vld [vmem:[%s23125_s3 + $0x680] sm:$0xff]  }
 0x90d   : > { %17658 = vmatpush3.bf16.msra.mxu0 %v19029_v26  ;;  %v9936_v26 = vshrl.u32 %v9898_v42, 16  ;;  %v10083_v24 = vor.u32 %v10082_v29, %v10079_v57  ;;  %v19033_v42 = vld [vmem:[%s23125_s3 + $0x678] sm:$0xff]   ;;  %v10097_v53 = vrot.slane %v10095_v9, 3 }
 0x90e   : > { %17667 = vmatprep.subr.bf16.mxu0 %v19030_v16 }
 0x90f   : > { %v9938_v4 = vor.u32 %v9936_v26, %v9934_v8  ;;  %v10084_v8 = vsel %vm683_vm10, %v10075_v13, %v10083_v24  ;;  %v19036_v13 = vld [vmem:[%s23125_s3 + $0x690] sm:$0xff]  }
 0x910   : > { %17660 = vmatmul.mubr.msk.bf16.vlgmr.msra.gmra.mrb[24].mxu0 %vm403_vm5, %v9927_v39  ;;  %v10088_v39 = vrot.slane %v10086_v7, 3 }
 0x911   : > { %17668 = vmatpush3.bf16.msra.mxu0 %v19030_v16  ;;  %17663 = vmatprep.mubr.msk.bf16.mxu0 %vm403_vm5, %v9935_v0  ;;  %v10098_v16 = vshll.u32 %v10058_v25, 16  ;;  %v9943_v30 = vsel %vm23413_vm15, %v9938_v4, %v9942_v45  ;;  %v10091_v0 = vrot.slane %v10089_v32, 4  ;;  %v19035_v25 = vld [vmem:[%s23125_s3 + $0x688] sm:$0xff]   ;;  %vm23416_vm15 = vsmask.f32 3328 }
 0x912   : > { %17669 = vmatprep.subr.bf16.mxu0 %v19031_v60  ;;  %v10221_v32 = vld [vmem:[#allocation2 + $0x8] sm:$0xf0] }
 0x913   : > { %v10100_v47 = vrot.slane %v10098_v16, 4  ;;  %v10092_v57 = vor.u32 %v10091_v0, %v10088_v39  ;;  %v10235_v16 = vrot.slane %v10221_v32, 4  ;;  %v10354_v39 = vsel %vm2424_vm14, %v10221_v32, 0 }
 0x914   : > { %v10355_v0 = vsel %vm2425_vm2, %v21832_v46, 0 }
 0x915   : > { %17670 = vmatpush3.bf16.msra.mxu0 %v19031_v60  ;;  %v10059_v60 = vsel %vm2092_vm4, %v22031_v20, 0  ;;  %v10101_v26 = vor.u32 %v10100_v47, %v10097_v53  ;;  %v10093_v4 = vsel %vm683_vm10, %v10083_v24, %v10092_v57  ;;  %v19037_v24 = vld [vmem:[%s23125_s3 + $0x698] sm:$0xff]   ;;  %v10240_v53 = vrot.slane %v21941_v28, 4 }
 0x916   : > { %17671 = vmatprep.subr.bf16.mxu0 %v19032_v56  ;;  %v10104_v29 = vshrl.u32 %v10059_v60, 16  ;;  %v10107_v63 = vshll.u32 %v10059_v60, 16  ;;  %v10368_v47 = vshrl.u32 %v10354_v39, 16  ;;  %v10371_v60 = vshll.u32 %v10354_v39, 16 }
 0x917   : > { %v10102_v7 = vsel %vm683_vm10, %v10092_v57, %v10101_v26  ;;  %v19039_v57 = vld [vmem:[%s23125_s3 + $0x6a8] sm:$0xff]   ;;  %v10241_v46 = vsel %vm2120_vm8, %v21862_v1, %v10240_v53  ;;  %v19040_v1 = vld [vmem:[%s23125_s3 + $0x6b0] sm:$0xff]  }
 0x918   : > { %17664 = vmatmul.mubr.msk.bf16.gmra.mrb[28].mxu0 %vm403_vm5, %v9943_v30  ;;  %v10109_v45 = vrot.slane %v10107_v63, 4  ;;  %v10237_v30 = vsel %vm2120_vm8, %v10235_v16, %v21838_v38  ;;  %v10376_v38 = vshrl.u32 %v10355_v0, 16  ;;  %v10370_v63 = vrot.slane %v10368_v47, 4  ;;  %v10353_v16 = vld [vmem:[#allocation2 + $0x28] sm:$0x1f] }
 0x919   : > { %17672 = vmatpush3.bf16.msra.mxu0 %v19032_v56  ;;  %17675 = vmatprep.mubr.msk.bf16.mxu0 %vm403_vm5, %v10084_v8  ;;  %v10106_v56 = vrot.slane %v10104_v29, 3  ;;  %v19038_v8 = vld [vmem:[%s23125_s3 + $0x6a0] sm:$0xff]   ;;  %v10356_v29 = vsel %vm23414_vm3, %v21859_v37, 0  ;;  %v10242_v37 = vrot.slane %v22031_v20, 4  ;;  %vm23417_vm3 = vcmp.ne.s16.totalorder %v19878_v19, 0 }
 0x91a   : > { %17673 = vmatprep.subr.bf16.mxu0 %v19033_v42 }
 0x91b   : > { %v10110_v9 = vor.u32 %v10109_v45, %v10106_v56  ;;  %v10357_v56 = vsel %vm23415_vm13, %v21941_v28, 0  ;;  %v10385_v45 = vshrl.u32 %v10356_v29, 16  ;;  %v19041_v28 = vld [vmem:[%s23125_s3 + $0x6b8] sm:$0xff]   ;;  %vm23418_vm13 = vmmov %vm23416_vm15 }
 0x91d   : > { %17674 = vmatpush3.bf16.msra.mxu0 %v19033_v42  ;;  %v10111_v42 = vsel %vm683_vm10, %v10101_v26, %v10110_v9  ;;  %v10373_v26 = vrot.slane %v10371_v60, 5  ;;  %v10397_v9 = vshll.u32 %v10357_v56, 16 }
 0x91e   : > { %17683 = vmatprep.subr.bf16.mxu0 %v19034_v58 }
 0x920   : > { %17676 = vmatmul.mubr.msk.bf16.vlgmr.msra.gmra.mrb[24].mxu0 %vm403_vm5, %v10093_v4 }
 0x921   : > { %17684 = vmatpush3.bf16.msra.mxu0 %v19034_v58  ;;  %17679 = vmatprep.mubr.msk.bf16.mxu0 %vm403_vm5, %v10102_v7  ;;  %v10379_v58 = vshll.u32 %v10355_v0, 16  ;;  %v10374_v7 = vor.u32 %v10373_v26, %v10370_v63  ;;  %v10399_v0 = vrot.slane %v10397_v9, 5 }
 0x922   : > { %17685 = vmatprep.subr.bf16.mxu0 %v19035_v25 }
 0x923   : > { %v10381_v4 = vrot.slane %v10379_v58, 5 }
 0x925   : > { %17686 = vmatpush3.bf16.msra.mxu0 %v19035_v25  ;;  %v10378_v25 = vrot.slane %v10376_v38, 4 }
 0x926   : > { %17687 = vmatprep.subr.bf16.mxu0 %v19036_v13 }
 0x927   : > { %v10382_v32 = vor.u32 %v10381_v4, %v10378_v25  ;;  %v19042_v25 = vld [vmem:[%s23125_s3 + $0x6e0] sm:$0xff]   ;;  %v19043_v4 = vld [vmem:[%s23125_s3 + $0x6e8] sm:$0xff]  }
 0x928   : > { %17680 = vmatmul.mubr.msk.bf16.gmra.mrb[28].mxu0 %vm403_vm5, %v10111_v42  ;;  %v10387_v42 = vrot.slane %v10385_v45, 4  ;;  %17715 = vmatprep.subr.bf16.mxu1 %v19042_v25  ;;  %v15699_v45 = vld [vmem:[%s23126_s4 + $0x5] ss:$0 sm:$0xff] }
 0x929   : > { %17688 = vmatpush3.bf16.msra.mxu0 %v19036_v13  ;;  %17691 = vmatprep.mubr.msk.bf16.mxu0 %vm403_vm5, %v10237_v30  ;;  %v10394_v13 = vshrl.u32 %v10357_v56, 16  ;;  %v10383_v20 = vsel %vm23416_vm15, %v10374_v7, %v10382_v32  ;;  %vm23419_vm15 = vmmov %vm23418_vm13  ;;  %v19044_v56 = vld [vmem:[%s23125_s3 + $0x6f0] sm:$0xff]  }
 0x92a   : > { %17689 = vmatprep.subr.bf16.mxu0 %v19037_v24  ;;  %17716 = vmatpush3.bf16.msra.mxu1 %v19042_v25 }
 0x92b   : > { %v10396_v39 = vrot.slane %v10394_v13, 4  ;;  %17717 = vmatprep.subr.bf16.mxu1 %v19043_v4 }
 0x92d   : > { %17690 = vmatpush3.bf16.msra.mxu0 %v19037_v24  ;;  %v10243_v24 = vsel %vm2120_vm8, %v10240_v53, %v10242_v37  ;;  %v10400_v58 = vor.u32 %v10399_v0, %v10396_v39  ;;  %v22121_v37 = vld [vmem:[%s23125_s3 + $0x6c0] sm:$0xff]  }
 0x92e   : > { %17699 = vmatprep.subr.bf16.mxu0 %v19038_v8  ;;  %17718 = vmatpush3.bf16.msra.mxu1 %v19043_v4  ;;  %v10579_v4 = vld [vmem:[#allocation2] sm:$0xf0] }
 0x92f   : > { %17719 = vmatprep.subr.bf16.mxu1 %v19044_v56 }
 0x930   : > { %17692 = vmatmul.mubr.msk.bf16.vlgmr.msra.gmra.mrb[24].mxu0 %vm403_vm5, %v21870_v36  ;;  %v10388_v36 = vshll.u32 %v10356_v29, 16 }
 0x931   : > { %17700 = vmatpush3.bf16.msra.mxu0 %v19038_v8  ;;  %17695 = vmatprep.mubr.msk.bf16.mxu0 %vm403_vm5, %v10241_v46  ;;  %v10358_v8 = vsel %vm23417_vm3, %v10353_v16, 0  ;;  %vm23420_vm3 = vmmov %vm23418_vm13 }
 0x932   : > { %17701 = vmatprep.subr.bf16.mxu0 %v19039_v57  ;;  %v10390_v30 = vrot.slane %v10388_v36, 5  ;;  %v10403_v60 = vshrl.u32 %v10358_v8, 16  ;;  %v10406_v38 = vshll.u32 %v10358_v8, 16  ;;  %17720 = vmatpush3.bf16.msra.mxu1 %v19044_v56 }
 0x934   : > { %v10391_v47 = vor.u32 %v10390_v30, %v10387_v42  ;;  %v10408_v46 = vrot.slane %v10406_v38, 5 }
 0x935   : > { %17702 = vmatpush3.bf16.msra.mxu0 %v19039_v57  ;;  %v10405_v57 = vrot.slane %v10403_v60, 4 }
 0x936   : > { %17703 = vmatprep.subr.bf16.mxu0 %v19040_v1  ;;  %v10392_v53 = vsel %vm23418_vm13, %v10382_v32, %v10391_v47  ;;  %v10401_v29 = vsel %vm23419_vm15, %v10391_v47, %v10400_v58  ;;  %vm23423_vm13 = vcmp.ne.s16.totalorder %v19682_v10, 0  ;;  %vm23424_vm15 = vcmp.ne.s16.totalorder %v19895_v59, 0 }
 0x937   : > { %v10409_v63 = vor.u32 %v10408_v46, %v10405_v57  ;;  %v23421_v46 = vmax.f32 %v21515_v33, 0.0 }
 0x938   : > { %17696 = vmatmul.mubr.msk.bf16.gmra.mrb[28].mxu0 %vm403_vm5, %v10243_v24 }
 0x939   : > { %17704 = vmatpush3.bf16.msra.mxu0 %v19040_v1  ;;  %17707 = vmatprep.mubr.msk.bf16.mxu0 %vm403_vm5, %v10383_v20  ;;  %v10410_v26 = vsel %vm23420_vm3, %v10400_v58, %v10409_v63  ;;  %v19045_v1 = vld [vmem:[%s23125_s3 + $0x6f8] sm:$0xff]   ;;  %v10560_v63 = vld [vmem:[#allocation2] sm:$0xf8] }
 0x93a   : > { %17705 = vmatprep.subr.bf16.mxu0 %v19041_v28  ;;  %17721 = vmatprep.subr.bf16.mxu1 %v19045_v1 }
 0x93b   : > { %17722 = vmatpush3.bf16.msra.mxu1 %v19045_v1  ;;  %v10593_v1 = vrot.slane %v10579_v4, 4 }
 0x93c   : > { %17731 = vmatprep.subr.bf16.mxu1 %v22121_v37 }
 0x93d   : > { %17706 = vmatpush3.bf16.msra.mxu0 %v19041_v28 }
 0x940   : > { %17708 = vmatmul.mubr.msk.bf16.vlgmr.msra.gmra.mrb[24].mxu0 %vm403_vm5, %v10392_v53 }
 0x941   : > { %17711 = vmatprep.mubr.msk.bf16.mxu0 %vm403_vm5, %v10401_v29 }
 0x948   : > { %17712 = vmatmul.mubr.msk.bf16.gmra.mrb[28].mxu0 %vm403_vm5, %v10410_v26  ;;  %v23422_v26 = vmax.f32 %v21519_v34, 0.0 }
 0xa13   : > { %v17709_v36 = vpop.f32.mrb[24].mxu0 }
 0xa14   : > { %v10528_v7 = vadd.f32 %v17709_v36, %v15699_v45  ;;  %v10481_v32 = vpop.f32.mrb[25].mxu0 }
 0xa15   : > { %v10526_v13 = vadd.f32 %v15699_v45, %v10481_v32  ;;  %v17710_v9 = vpop.f32.mrb[26].mxu0 }
 0xa16   : > { %v22129_v16 = vadd.f32 %v10528_v7, %v7748_v18  ;;  %v10529_v28 = vadd.f32 %v17710_v9, %v15699_v45  ;;  %v10484_v24 = vpop.f32.mrb[27].mxu0 }
 0xa17   : > { %v22133_v42 = vadd.f32 %v10526_v13, %v7746_v5  ;;  %v10527_v30 = vadd.f32 %v15699_v45, %v10484_v24 }
 0xa18   : > { %v22137_v20 = vadd.f32 %v10529_v28, %v7749_v3  ;;  %v10544_v0 = vmax.f32 %v22129_v16, 0.0 }
 0xa19   : > { %v22141_v39 = vadd.f32 %v10527_v30, %v7747_v48  ;;  %v10542_v18 = vmax.f32 %v22133_v42, 0.0 }
 0xa1a   : > { %v10545_v35 = vmax.f32 %v22137_v20, 0.0 }
 0xa1b   : > { %v10543_v8 = vmax.f32 %v22141_v39, 0.0  ;;  %v17713_v54 = vpop.f32.mrb[28].mxu0 }
 0xa1c   : > { %v10551_v55 = vpack.c.bf16 %v10545_v35, %v10544_v0  ;;  %v10532_v3 = vadd.f32 %v17713_v54, %v15699_v45  ;;  %v10497_v5 = vpop.f32.mrb[29].mxu0 }
 0xa1d   : > { %v10550_v50 = vpack.c.bf16 %v10543_v8, %v10542_v18  ;;  %v10530_v48 = vadd.f32 %v15699_v45, %v10497_v5  ;;  %v17714_v47 = vpop.f32.mrb[30].mxu0 }
 0xa1e   : > { %10555 = vst.msk [vmem:[#allocation2 + $0x10] sm:$0xff] %vm403_vm5, %v10551_v55  ;;  %v22158_v60 = vadd.f32 %v10532_v3, %v7752_v2  ;;  %v10533_v38 = vadd.f32 %v17714_v47, %v15699_v45  ;;  %v10500_v58 = vpop.f32.mrb[31].mxu0  ;;  %v19047_v3 = vld [vmem:[%s23125_s3 + $0x6c8] sm:$0xff]  }
 0xa1f   : > { %10554 = vst.msk [vmem:[#allocation2 + $0x8] sm:$0xff] %vm403_vm5, %v10550_v50  ;;  %v22163_v53 = vadd.f32 %v10530_v48, %v7750_v14  ;;  %v10531_v57 = vadd.f32 %v15699_v45, %v10500_v58  ;;  %v10565_v14 = vsel %vm2088_vm9, %v10560_v63, 0  ;;  %v19048_v58 = vld [vmem:[%s23125_s3 + $0x6d0] sm:$0xff]  }
 0xa20   : > { %v22167_v29 = vadd.f32 %v10533_v38, %v23421_v46  ;;  %v10548_v43 = vmax.f32 %v22158_v60, 0.0  ;;  %v10704_v32 = vshrl.u32 %v10565_v14, 16  ;;  %v10707_v28 = vshll.u32 %v10565_v14, 16 }
 0xa21   : > { %v22171_v25 = vadd.f32 %v10531_v57, %v23422_v26  ;;  %v10546_v56 = vmax.f32 %v22163_v53, 0.0 }
 0xa22   : > { %v23179_v2 = vmax.f32 %v22167_v29, 0.0  ;;  %v10706_v5 = vrot.slane %v10704_v32, 3  ;;  %v10709_v50 = vrot.slane %v10707_v28, 4 }
 0xa23   : > { %v23178_v44 = vmax.f32 %v22171_v25, 0.0 }
 0xa24   : > { %v10553_v33 = vpack.c.bf16 %v23179_v2, %v10548_v43 }
 0xa25   : > { %v10552_v34 = vpack.c.bf16 %v23178_v44, %v10546_v56  ;;  %v22187_v45 = vld [vmem:[#allocation2 + $0x10] sm:$0xff] }
 0xa26   : > { %10557 = vst.msk [vmem:[#allocation2 + $0x20] sm:$0xff] %vm403_vm5, %v10553_v33  ;;  %v22190_v36 = vld [vmem:[#allocation2 + $0x8] sm:$0xff]  ;;  %v22193_v7 = vrot.slane %v22187_v45, 4  ;;  %v10567_v38 = vsel %vm2090_vm1, %v22187_v45, 0 }
 0xa27   : > { %10556 = vst.msk [vmem:[#allocation2 + $0x18] sm:$0xff] %vm403_vm5, %v10552_v34  ;;  %v10594_v13 = vrot.slane %v22190_v36, 4  ;;  %v10566_v9 = vsel %vm2089_vm7, %v22190_v36, 0  ;;  %v10721_v26 = vshrl.u32 %v10567_v38, 16  ;;  %v10724_v14 = vshll.u32 %v10567_v38, 16 }
 0xa28   : > { %v10712_v24 = vshrl.u32 %v10566_v9, 16  ;;  %v10715_v30 = vshll.u32 %v10566_v9, 16  ;;  %v10710_v34 = vor.u32 %v10709_v50, %v10706_v5 }
 0xa29   : > { %v10595_v54 = vsel %vm2120_vm8, %v10593_v1, %v10594_v13  ;;  %v10597_v55 = vsel %vm2120_vm8, %v10594_v13, %v22193_v7 }
 0xa2a   : > { %17723 = vmatprep.mubr.msk.bf16.mxu1 %vm403_vm5, %v10595_v54  ;;  %v10714_v48 = vrot.slane %v10712_v24, 3  ;;  %v10717_v47 = vrot.slane %v10715_v30, 4  ;;  %v19049_v24 = vld [vmem:[%s23125_s3 + $0x6d8] sm:$0xff]   ;;  %v10849_v30 = vsel %vm2424_vm14, %v10579_v4, 0  ;;  %v10723_v54 = vrot.slane %v10721_v26, 3 }
 0xa2b   : > { %17724 = vmatmul.mubr.msk.bf16.vlgmr.msra.gmra.mrb[24].mxu1 %vm403_vm5, %v10597_v55  ;;  %v10726_v55 = vrot.slane %v10724_v14, 4  ;;  %v10850_v4 = vsel %vm2425_vm2, %v22190_v36, 0  ;;  %v10863_v38 = vshrl.u32 %v10849_v30, 16 }
 0xa2c   : > { %17732 = vmatpush3.bf16.msra.mxu1 %v22121_v37  ;;  %v10718_v1 = vor.u32 %v10717_v47, %v10714_v48  ;;  %v19050_v47 = vld [vmem:[%s23125_s3 + $0x700] sm:$0xff]  }
 0xa2d   : > { %17733 = vmatprep.subr.bf16.mxu1 %v19047_v3  ;;  %v10564_v57 = vld [vmem:[#allocation2 + $0x20] sm:$0xf] }
 0xa2e   : > { %v22215_v46 = vld [vmem:[#allocation2 + $0x18] sm:$0xff]  ;;  %v10600_v63 = vrot.slane %v10564_v57, 4  ;;  %v10569_v48 = vsel %vm2092_vm4, %v10564_v57, 0  ;;  %v10874_v57 = vshll.u32 %v10850_v4, 16 }
 0xa2f   : > { %v22218_v33 = vrot.slane %v22215_v46, 4  ;;  %v10568_v37 = vsel %vm2091_vm11, %v22215_v46, 0  ;;  %v10739_v26 = vshrl.u32 %v10569_v48, 16  ;;  %v10742_v14 = vshll.u32 %v10569_v48, 16 }
 0xa30   : > { %17734 = vmatpush3.bf16.msra.mxu1 %v19047_v3  ;;  %v10730_v32 = vshrl.u32 %v10568_v37, 16  ;;  %v10733_v13 = vshll.u32 %v10568_v37, 16  ;;  %v10719_v3 = vsel %vm683_vm10, %v10710_v34, %v10718_v1  ;;  %v10866_v34 = vshll.u32 %v10849_v30, 16 }
 0xa31   : > { %v22226_v9 = vsel %vm2120_vm8, %v22193_v7, %v22218_v33  ;;  %17735 = vmatprep.subr.bf16.mxu1 %v19048_v58  ;;  %v10601_v28 = vsel %vm2120_vm8, %v22218_v33, %v10600_v63  ;;  %v10727_v63 = vor.u32 %v10726_v55, %v10723_v54  ;;  %v10744_v44 = vrot.slane %v10742_v14, 4 }
 0xa32   : > { %17727 = vmatprep.mubr.msk.bf16.mxu1 %vm403_vm5, %v22226_v9  ;;  %v10732_v5 = vrot.slane %v10730_v32, 3  ;;  %v10735_v50 = vrot.slane %v10733_v13, 4  ;;  %v10871_v32 = vshrl.u32 %v10850_v4, 16  ;;  %v10865_v13 = vrot.slane %v10863_v38, 4 }
 0xa33   : > { %17728 = vmatmul.mubr.msk.bf16.gmra.mrb[28].mxu1 %vm403_vm5, %v10601_v28  ;;  %v10728_v28 = vsel %vm683_vm10, %v10718_v1, %v10727_v63  ;;  %v10868_v2 = vrot.slane %v10866_v34, 5  ;;  %v10876_v55 = vrot.slane %v10874_v57, 5  ;;  %v10852_v1 = vsel %vm23424_vm15, %v22215_v46, 0  ;;  %v19053_v34 = vld [vmem:[%s23125_s3 + $0x718] sm:$0xff]  }
 0xa34   : > { %17736 = vmatpush3.bf16.msra.mxu1 %v19048_v58  ;;  %17739 = vmatprep.mubr.msk.bf16.mxu1 %vm403_vm5, %v10719_v3  ;;  %v10736_v37 = vor.u32 %v10735_v50, %v10732_v5  ;;  %v19051_v58 = vld [vmem:[%s23125_s3 + $0x708] sm:$0xff]   ;;  %v10741_v3 = vrot.slane %v10739_v26, 3  ;;  %v10873_v30 = vrot.slane %v10871_v32, 4  ;;  %v19052_v5 = vld [vmem:[%s23125_s3 + $0x710] sm:$0xff]   ;;  %v10889_v26 = vshrl.u32 %v10852_v1, 16 }
 0xa35   : > { %17737 = vmatprep.subr.bf16.mxu1 %v19049_v24  ;;  %v10869_v38 = vor.u32 %v10868_v2, %v10865_v13  ;;  %v10892_v14 = vshll.u32 %v10852_v1, 16  ;;  %vm23426_vm15 = vcmp.ne.s16.totalorder %v23268_v31, 0 }
 0xa36   : > { %v10737_v54 = vsel %vm683_vm10, %v10727_v63, %v10736_v37  ;;  %v10745_v50 = vor.u32 %v10744_v44, %v10741_v3  ;;  %v10877_v63 = vor.u32 %v10876_v55, %v10873_v30  ;;  %v10891_v3 = vrot.slane %v10889_v26, 4 }
 0xa37   : > { %v10894_v2 = vrot.slane %v10892_v14, 5 }
 0xa38   : > { %17738 = vmatpush3.bf16.msra.mxu1 %v19049_v24  ;;  %v10851_v24 = vsel %vm23423_vm13, %v22187_v45, 0  ;;  %v10746_v32 = vsel %vm683_vm10, %v10736_v37, %v10745_v50  ;;  %v10878_v44 = vsel %vm23420_vm3, %v10869_v38, %v10877_v63  ;;  %vm23425_vm13 = vcmp.ne.s16.totalorder %v19878_v19, 0  ;;  %v19054_v37 = vld [vmem:[%s23125_s3 + $0x720] sm:$0xff]  }
 0xa39   : > { %17747 = vmatprep.subr.bf16.mxu1 %v19050_v47  ;;  %v10880_v48 = vshrl.u32 %v10851_v24, 16  ;;  %v10883_v4 = vshll.u32 %v10851_v24, 16  ;;  %v10895_v1 = vor.u32 %v10894_v2, %v10891_v3 }
 0xa3b   : > { %17740 = vmatmul.mubr.msk.bf16.vlgmr.msra.gmra.mrb[24].mxu1 %vm403_vm5, %v10728_v28  ;;  %v10882_v57 = vrot.slane %v10880_v48, 4  ;;  %v10885_v28 = vrot.slane %v10883_v4, 5  ;;  %v19055_v48 = vld [vmem:[%s23125_s3 + $0x728] sm:$0xff]  }
 0xa3c   : > { %17748 = vmatpush3.bf16.msra.mxu1 %v19050_v47  ;;  %17743 = vmatprep.mubr.msk.bf16.mxu1 %vm403_vm5, %v10737_v54  ;;  %v10848_v47 = vld [vmem:[#allocation2 + $0x20] sm:$0x1f]  ;;  %v11015_v54 = vld [vmem:[#allocation2] sm:$0x80] }
 0xa3d   : > { %17749 = vmatprep.subr.bf16.mxu1 %v19051_v58  ;;  %v10853_v13 = vsel %vm23425_vm13, %v10848_v47, 0  ;;  %v10886_v30 = vor.u32 %v10885_v28, %v10882_v57  ;;  %vm23427_vm13 = vmmov %vm23420_vm3 }
 0xa3e   : > { %v10898_v55 = vshrl.u32 %v10853_v13, 16  ;;  %v10901_v24 = vshll.u32 %v10853_v13, 16 }
 0xa3f   : > { %v10887_v4 = vsel %vm23420_vm3, %v10877_v63, %v10886_v30  ;;  %v10896_v14 = vsel %vm23427_vm13, %v10886_v30, %v10895_v1  ;;  %v19056_v63 = vld [vmem:[%s23125_s3 + $0x730] sm:$0xff]   ;;  %v22297_v30 = vld [vmem:[#allocation2 + $0x20] sm:$0xff]  ;;  %vm23429_vm13 = vsmask.f32 256 }
 0xa40   : > { %17750 = vmatpush3.bf16.msra.mxu1 %v19051_v58  ;;  %v11018_v58 = vsel %vm23426_vm15, %v22190_v36, 0  ;;  %v10900_v38 = vrot.slane %v10898_v55, 4  ;;  %v10903_v26 = vrot.slane %v10901_v24, 5  ;;  %vm23428_vm15 = vcmp.ne.s16.totalorder %v23271_v23, 0 }
 0xa41   : > { %17751 = vmatprep.subr.bf16.mxu1 %v19052_v5  ;;  %v11035_v50 = vshrl.u32 %v11018_v58, 16  ;;  %v11020_v57 = vsel %vm23428_vm15, %v22215_v46, 0  ;;  %v11038_v28 = vshll.u32 %v11018_v58, 16  ;;  %vm23430_vm15 = vcmp.ne.s16.totalorder %v20321_v51, 0 }
 0xa43   : > { %17744 = vmatmul.mubr.msk.bf16.gmra.mrb[28].mxu1 %vm403_vm5, %v10746_v32  ;;  %v11037_v32 = vrot.slane %v11035_v50, 7 }
 0xa44   : > { %17752 = vmatpush3.bf16.msra.mxu1 %v19052_v5  ;;  %17755 = vmatprep.mubr.msk.bf16.mxu1 %vm403_vm5, %v10878_v44  ;;  %v11017_v5 = vsel %vm2608_vm0, %v11015_v54, 0  ;;  %v10904_v44 = vor.u32 %v10903_v26, %v10900_v38  ;;  %v11051_v54 = vshrl.u32 %v11020_v57, 16 }
 0xa45   : > { %17753 = vmatprep.subr.bf16.mxu1 %v19053_v34  ;;  %v11031_v47 = vshrl.u32 %v11017_v5, 16  ;;  %v11040_v13 = vor.u32 %v11038_v28, %v11037_v32  ;;  %v11021_v5 = vsel %vm23430_vm15, %v22297_v30, 0 }
 0xa46   : > { %v10905_v55 = vsel %vm23420_vm3, %v10895_v1, %v10904_v44  ;;  %v11053_v50 = vrot.slane %v11051_v54, 7  ;;  %v11054_v1 = vshll.u32 %v11020_v57, 16  ;;  %v11059_v26 = vshrl.u32 %v11021_v5, 16  ;;  %vm23431_vm3 = vmmov %vm23429_vm13  ;;  %v19060_v44 = vld [vmem:[%s23125_s3 + $0x750] sm:$0xff]   ;;  %v19062_v54 = vld [vmem:[%s23125_s3 + $0x760] sm:$0xff]  }
 0xa47   : > { %v11033_v2 = vrot.slane %v11031_v47, 7  ;;  %v19059_v47 = vld [vmem:[%s23125_s3 + $0x748] sm:$0xff]   ;;  %v11062_v57 = vshll.u32 %v11021_v5, 16  ;;  %vm23433_vm15 = vmmov %vm23431_vm3 }
 0xa48   : > { %17754 = vmatpush3.bf16.msra.mxu1 %v19053_v34  ;;  %v11019_v34 = vsel %vm2610_vm12, %v22187_v45, 0  ;;  %v11061_v28 = vrot.slane %v11059_v26, 7 }
 0xa49   : > { %17763 = vmatprep.subr.bf16.mxu1 %v19054_v37  ;;  %v11043_v3 = vshrl.u32 %v11019_v34, 16  ;;  %v11041_v58 = vsel %vm23429_vm13, %v11033_v2, %v11040_v13  ;;  %vm23432_vm13 = vmmov %vm23431_vm3  ;;  %v11297_v13 = vsel %vm2904_vm6, %v22190_v36, 0 }
 0xa4a   : > { %v11311_v5 = vshrl.u32 %v11297_v13, 16 }
 0xa4b   : > { %17756 = vmatmul.mubr.msk.bf16.vlgmr.msra.gmra.mrb[24].mxu1 %vm403_vm5, %v10887_v4  ;;  %v11045_v24 = vrot.slane %v11043_v3, 7  ;;  %v19058_v4 = vld [vmem:[%s23125_s3 + $0x740] sm:$0xff]   ;;  %v11064_v3 = vor.u32 %v11062_v57, %v11061_v28  ;;  %v11296_v57 = vld [vmem:[#allocation2 + $0x28] sm:$0x1] }
 0xa4c   : > { %17764 = vmatpush3.bf16.msra.mxu1 %v19054_v37  ;;  %17759 = vmatprep.mubr.msk.bf16.mxu1 %vm403_vm5, %v10896_v14  ;;  %v19057_v37 = vld [vmem:[%s23125_s3 + $0x738] sm:$0xff]   ;;  %v11056_v14 = vor.u32 %v11054_v1, %v11053_v50 }
 0xa4d   : > { %17765 = vmatprep.subr.bf16.mxu1 %v19055_v48  ;;  %v11065_v2 = vsel %vm23433_vm15, %v11053_v50, %v11064_v3  ;;  %v19064_v50 = vld [vmem:[%s23125_s3 + $0x770] sm:$0xff]   ;;  %vm23436_vm15 = vcmp.ne.s16.totalorder %v20148_v21, 0  ;;  %v19066_v3 = vld [vmem:[%s23125_s3 + $0x780] sm:$0xff]  }
 0xa50   : > { %17766 = vmatpush3.bf16.msra.mxu1 %v19055_v48  ;;  %v11046_v48 = vshll.u32 %v11019_v34, 16  ;;  %v11057_v34 = vsel %vm23432_vm13, %v11045_v24, %v11056_v14  ;;  %vm23435_vm13 = vcmp.ne.s16.totalorder %v20152_v6, 0  ;;  %v19065_v14 = vld [vmem:[%s23125_s3 + $0x778] sm:$0xff]  }
 0xa51   : > { %17767 = vmatprep.subr.bf16.mxu1 %v19056_v63 }
 0xa52   : > { %v11048_v38 = vor.u32 %v11046_v48, %v11045_v24 }
 0xa53   : > { %17760 = vmatmul.mubr.msk.bf16.gmra.mrb[28].mxu1 %vm403_vm5, %v10905_v55  ;;  %v19063_v55 = vld [vmem:[%s23125_s3 + $0x768] sm:$0xff]  }
 0xa54   : > { %17768 = vmatpush3.bf16.msra.mxu1 %v19056_v63  ;;  %17771 = vmatprep.mubr.msk.bf16.mxu1 %vm403_vm5, %v11041_v58  ;;  %v11049_v63 = vsel %vm23431_vm3, %v11037_v32, %v11048_v38  ;;  %v19061_v32 = vld [vmem:[%s23125_s3 + $0x758] sm:$0xff]   ;;  %vm23434_vm3 = vcmp.ne.s16.totalorder %v23282_v62, 0  ;;  %v11299_v58 = vsel %vm23435_vm13, %v22215_v46, 0  ;;  %v11455_v38 = vld [vmem:[#allocation2 + $0x8] sm:$0xf8]  ;;  %vm23438_vm13 = vcmp.ne.s16.totalorder %v20140_v12, 0 }
 0xa55   : > { %17769 = vmatprep.subr.bf16.mxu1 %v19057_v37  ;;  %v11298_v24 = vsel %vm23434_vm3, %v22187_v45, 0  ;;  %v11326_v1 = vshll.u32 %v11299_v58, 16  ;;  %vm23437_vm3 = vsmask.f32 7424 }
 0xa56   : > { %v11318_v48 = vshll.u32 %v11298_v24, 16 }
 0xa57   : > { %v11328_v28 = vrot.slane %v11326_v1, 1  ;;  %v19067_v1 = vld [vmem:[%s23125_s3 + $0x788] sm:$0xff]  }
 0xa58   : > { %17770 = vmatpush3.bf16.msra.mxu1 %v19057_v37  ;;  %v11313_v37 = vshll.u32 %v11297_v13, 16  ;;  %v11320_v26 = vrot.slane %v11318_v48, 1  ;;  %v11322_v13 = vshrl.u32 %v11298_v24, 16 }
 0xa59   : > { %17779 = vmatprep.subr.bf16.mxu1 %v19058_v4 }
 0xa5a   : > { %v11324_v48 = vor.u32 %v11322_v13, %v11320_v26 }
 0xa5b   : > { %17772 = vmatmul.mubr.msk.bf16.vlgmr.msra.gmra.mrb[24].mxu1 %vm403_vm5, %v11049_v63 }
 0xa5c   : > { %17780 = vmatpush3.bf16.msra.mxu1 %v19058_v4  ;;  %17775 = vmatprep.mubr.msk.bf16.mxu1 %vm403_vm5, %v11057_v34  ;;  %v11457_v34 = vsel %vm2088_vm9, %v11455_v38, 0 }
 0xa5d   : > { %17781 = vmatprep.subr.bf16.mxu1 %v19059_v47 }
 0xa60   : > { %17782 = vmatpush3.bf16.msra.mxu1 %v19059_v47  ;;  %v11300_v47 = vsel %vm23436_vm15, %v22297_v30, 0  ;;  %vm23439_vm15 = vmmov %vm23437_vm3 }
 0xa61   : > { %17783 = vmatprep.subr.bf16.mxu1 %v19060_v44 }
 0xa63   : > { %17776 = vmatmul.mubr.msk.bf16.gmra.mrb[28].mxu1 %vm403_vm5, %v11065_v2  ;;  %v11334_v2 = vshll.u32 %v11300_v47, 16 }
 0xa64   : > { %17784 = vmatpush3.bf16.msra.mxu1 %v19060_v44  ;;  %17787 = vmatprep.mubr.msk.bf16.mxu1 %vm403_vm5, %v22190_v36  ;;  %v11315_v36 = vrot.slane %v11313_v37, 1  ;;  %v11458_v44 = vsel %vm2089_vm7, %v22187_v45, 0  ;;  %v11474_v37 = vshll.u32 %v11457_v34, 16 }
 0xa65   : > { %17785 = vmatprep.subr.bf16.mxu1 %v19061_v32 }
 0xa66   : > { %v11316_v4 = vor.u32 %v11315_v36, %v11311_v5  ;;  %v11301_v36 = vsel %vm23438_vm13, %v11296_v57, 0  ;;  %v11482_v5 = vshll.u32 %v11458_v44, 16  ;;  %vm23440_vm13 = vmmov %vm23437_vm3 }
 0xa67   : > { %v11342_v38 = vshll.u32 %v11301_v36, 16 }
 0xa68   : > { %17786 = vmatpush3.bf16.msra.mxu1 %v19061_v32  ;;  %v11321_v63 = vsel %vm23437_vm3, %v11316_v4, %v11320_v26  ;;  %v11330_v32 = vshrl.u32 %v11299_v58, 16  ;;  %v11336_v4 = vrot.slane %v11334_v2, 1  ;;  %v11329_v58 = vsel %vm23439_vm15, %v11324_v48, %v11328_v28 }
 0xa69   : > { %17795 = vmatprep.subr.bf16.mxu1 %v19062_v54  ;;  %v11459_v26 = vsel %vm2090_vm1, %v22215_v46, 0  ;;  %v11344_v13 = vrot.slane %v11342_v38, 1  ;;  %vm23441_vm15 = vcmp.ne.s16.totalorder %v19682_v10, 0 }
 0xa6b   : > { %17788 = vmatmul.mubr.msk.bf16.vlgmr.msra.gmra.mrb[24].mxu1 %vm403_vm5, %v22187_v45 }
 0xa6c   : > { %17796 = vmatpush3.bf16.msra.mxu1 %v19062_v54  ;;  %17791 = vmatprep.mubr.msk.bf16.mxu1 %vm403_vm5, %v22215_v46  ;;  %v11471_v54 = vshrl.u32 %v11457_v34, 16 }
 0xa6d   : > { %17797 = vmatprep.subr.bf16.mxu1 %v19063_v55 }
 0xa6e   : > { %v11473_v24 = vrot.slane %v11471_v54, 3  ;;  %v11488_v54 = vshrl.u32 %v11459_v26, 16 }
 0xa70   : > { %17798 = vmatpush3.bf16.msra.mxu1 %v19063_v55  ;;  %v11332_v55 = vor.u32 %v11330_v32, %v11328_v28  ;;  %v11484_v32 = vrot.slane %v11482_v5, 4  ;;  %v11460_v28 = vsel %vm2091_vm11, %v22297_v30, 0  ;;  %v22387_v5 = vld [vmem:[#allocation2 + $0x28] sm:$0xf] }
 0xa71   : > { %17799 = vmatprep.subr.bf16.mxu1 %v19064_v50 }
 0xa72   : > { %v11337_v34 = vsel %vm23437_vm3, %v11332_v55, %v11336_v4  ;;  %vm23442_vm3 = vcmp.ne.s16.totalorder %v19895_v59, 0 }
 0xa73   : > { %17792 = vmatmul.mubr.msk.bf16.gmra.mrb[28].mxu1 %vm403_vm5, %v22297_v30 }
 0xa74   : > { %17800 = vmatpush3.bf16.msra.mxu1 %v19064_v50  ;;  %17803 = vmatprep.mubr.msk.bf16.mxu1 %vm403_vm5, %v11321_v63  ;;  %v11479_v50 = vshrl.u32 %v11458_v44, 16  ;;  %v11476_v63 = vrot.slane %v11474_v37, 4  ;;  %v19068_v44 = vld [vmem:[%s23125_s3 + $0x790] sm:$0xff]   ;;  %v11491_v37 = vshll.u32 %v11459_v26, 16 }
 0xa75   : > { %17801 = vmatprep.subr.bf16.mxu1 %v19065_v14 }
 0xa76   : > { %v11481_v57 = vrot.slane %v11479_v50, 3  ;;  %v11477_v55 = vor.u32 %v11476_v63, %v11473_v24  ;;  %v11497_v50 = vshrl.u32 %v11460_v28, 16  ;;  %v19070_v63 = vld [vmem:[%s23125_s3 + $0x7a0] sm:$0xff]  }
 0xa78   : > { %17802 = vmatpush3.bf16.msra.mxu1 %v19065_v14  ;;  %v11338_v14 = vshrl.u32 %v11300_v47, 16  ;;  %v11485_v36 = vor.u32 %v11484_v32, %v11481_v57  ;;  %v19069_v47 = vld [vmem:[%s23125_s3 + $0x798] sm:$0xff]   ;;  %v11499_v38 = vrot.slane %v11497_v50, 3 }
 0xa79   : > { %17811 = vmatprep.subr.bf16.mxu1 %v19066_v3 }
 0xa7a   : > { %v11340_v2 = vor.u32 %v11338_v14, %v11336_v4  ;;  %v11486_v4 = vsel %vm683_vm10, %v11477_v55, %v11485_v36  ;;  %v19072_v55 = vld [vmem:[%s23125_s3 + $0x7b0] sm:$0xff]  }
 0xa7b   : > { %17804 = vmatmul.mubr.msk.bf16.vlgmr.msra.gmra.mrb[24].mxu1 %vm403_vm5, %v11329_v58  ;;  %v11490_v58 = vrot.slane %v11488_v54, 3 }
 0xa7c   : > { %17812 = vmatpush3.bf16.msra.mxu1 %v19066_v3  ;;  %17807 = vmatprep.mubr.msk.bf16.mxu1 %vm403_vm5, %v11337_v34  ;;  %v11500_v3 = vshll.u32 %v11460_v28, 16  ;;  %v11345_v48 = vsel %vm23440_vm13, %v11340_v2, %v11344_v13  ;;  %v11493_v34 = vrot.slane %v11491_v37, 4  ;;  %v19071_v28 = vld [vmem:[%s23125_s3 + $0x7a8] sm:$0xff]   ;;  %vm23443_vm13 = vsmask.f32 3328 }
 0xa7d   : > { %17813 = vmatprep.subr.bf16.mxu1 %v19067_v1  ;;  %v11623_v37 = vld [vmem:[#allocation2 + $0x8] sm:$0xf0] }
 0xa7e   : > { %v11502_v24 = vrot.slane %v11500_v3, 4  ;;  %v11494_v57 = vor.u32 %v11493_v34, %v11490_v58  ;;  %v11637_v3 = vrot.slane %v11623_v37, 4  ;;  %v11756_v58 = vsel %vm2424_vm14, %v11623_v37, 0 }
 0xa7f   : > { %v11757_v34 = vsel %vm2425_vm2, %v22187_v45, 0 }
 0xa80   : > { %17814 = vmatpush3.bf16.msra.mxu1 %v19067_v1  ;;  %v11461_v1 = vsel %vm2092_vm4, %v22387_v5, 0  ;;  %v11503_v14 = vor.u32 %v11502_v24, %v11499_v38  ;;  %v11495_v2 = vsel %vm683_vm10, %v11485_v36, %v11494_v57  ;;  %v19073_v36 = vld [vmem:[%s23125_s3 + $0x7b8] sm:$0xff]   ;;  %v11642_v38 = vrot.slane %v22297_v30, 4 }
 0xa81   : > { %17815 = vmatprep.subr.bf16.mxu1 %v19068_v44  ;;  %v11506_v32 = vshrl.u32 %v11461_v1, 16  ;;  %v11509_v26 = vshll.u32 %v11461_v1, 16  ;;  %v11770_v24 = vshrl.u32 %v11756_v58, 16  ;;  %v11773_v1 = vshll.u32 %v11756_v58, 16 }
 0xa82   : > { %v11504_v54 = vsel %vm683_vm10, %v11494_v57, %v11503_v14  ;;  %v19075_v57 = vld [vmem:[%s23125_s3 + $0x7c8] sm:$0xff]   ;;  %v11643_v45 = vsel %vm2120_vm8, %v22218_v33, %v11642_v38  ;;  %v19076_v33 = vld [vmem:[%s23125_s3 + $0x7d0] sm:$0xff]  }
 0xa83   : > { %17808 = vmatmul.mubr.msk.bf16.gmra.mrb[28].mxu1 %vm403_vm5, %v11345_v48  ;;  %v11511_v13 = vrot.slane %v11509_v26, 4  ;;  %v11639_v48 = vsel %vm2120_vm8, %v11637_v3, %v22193_v7  ;;  %v11778_v7 = vshrl.u32 %v11757_v34, 16  ;;  %v11772_v26 = vrot.slane %v11770_v24, 4  ;;  %v11755_v3 = vld [vmem:[#allocation2 + $0x28] sm:$0x1f] }
 0xa84   : > { %17816 = vmatpush3.bf16.msra.mxu1 %v19068_v44  ;;  %17819 = vmatprep.mubr.msk.bf16.mxu1 %vm403_vm5, %v11486_v4  ;;  %v11508_v44 = vrot.slane %v11506_v32, 3  ;;  %v19074_v4 = vld [vmem:[%s23125_s3 + $0x7c0] sm:$0xff]   ;;  %v11758_v32 = vsel %vm23441_vm15, %v22215_v46, 0  ;;  %v11644_v46 = vrot.slane %v22387_v5, 4  ;;  %vm23444_vm15 = vcmp.ne.s16.totalorder %v19878_v19, 0 }
 0xa85   : > { %17817 = vmatprep.subr.bf16.mxu1 %v19069_v47 }
 0xa86   : > { %v11512_v50 = vor.u32 %v11511_v13, %v11508_v44  ;;  %v11759_v44 = vsel %vm23442_vm3, %v22297_v30, 0  ;;  %v11787_v13 = vshrl.u32 %v11758_v32, 16  ;;  %v19077_v30 = vld [vmem:[%s23125_s3 + $0x7d8] sm:$0xff]   ;;  %vm23445_vm3 = vmmov %vm23443_vm13 }
 0xa88   : > { %17818 = vmatpush3.bf16.msra.mxu1 %v19069_v47  ;;  %v11513_v47 = vsel %vm683_vm10, %v11503_v14, %v11512_v50  ;;  %v11775_v14 = vrot.slane %v11773_v1, 5  ;;  %v11799_v50 = vshll.u32 %v11759_v44, 16 }
 0xa89   : > { %17827 = vmatprep.subr.bf16.mxu1 %v19070_v63 }
 0xa8b   : > { %17820 = vmatmul.mubr.msk.bf16.vlgmr.msra.gmra.mrb[24].mxu1 %vm403_vm5, %v11495_v2 }
 0xa8c   : > { %17828 = vmatpush3.bf16.msra.mxu1 %v19070_v63  ;;  %17823 = vmatprep.mubr.msk.bf16.mxu1 %vm403_vm5, %v11504_v54  ;;  %v11781_v63 = vshll.u32 %v11757_v34, 16  ;;  %v11776_v54 = vor.u32 %v11775_v14, %v11772_v26  ;;  %v11801_v34 = vrot.slane %v11799_v50, 5 }
 0xa8d   : > { %17829 = vmatprep.subr.bf16.mxu1 %v19071_v28 }
 0xa8e   : > { %v11783_v2 = vrot.slane %v11781_v63, 5 }
 0xa90   : > { %17830 = vmatpush3.bf16.msra.mxu1 %v19071_v28  ;;  %v11780_v28 = vrot.slane %v11778_v7, 4 }
 0xa91   : > { %17831 = vmatprep.subr.bf16.mxu1 %v19072_v55 }
 0xa92   : > { %v11784_v37 = vor.u32 %v11783_v2, %v11780_v28  ;;  %v19078_v28 = vld [vmem:[%s23125_s3 + $0x800] sm:$0xff]   ;;  %v19079_v2 = vld [vmem:[%s23125_s3 + $0x808] sm:$0xff]  }
 0xa93   : > { %17824 = vmatmul.mubr.msk.bf16.gmra.mrb[28].mxu1 %vm403_vm5, %v11513_v47  ;;  %v11789_v47 = vrot.slane %v11787_v13, 4  ;;  %17859 = vmatprep.subr.bf16.mxu0 %v19078_v28  ;;  %v15845_v13 = vld [vmem:[%s23126_s4 + $0x6] ss:$0 sm:$0xff] }
 0xa94   : > { %17832 = vmatpush3.bf16.msra.mxu1 %v19072_v55  ;;  %17835 = vmatprep.mubr.msk.bf16.mxu1 %vm403_vm5, %v11639_v48  ;;  %v11796_v55 = vshrl.u32 %v11759_v44, 16  ;;  %v11785_v5 = vsel %vm23443_vm13, %v11776_v54, %v11784_v37  ;;  %vm23446_vm13 = vmmov %vm23445_vm3  ;;  %v19080_v44 = vld [vmem:[%s23125_s3 + $0x810] sm:$0xff]  }
 0xa95   : > { %17833 = vmatprep.subr.bf16.mxu1 %v19073_v36  ;;  %17860 = vmatpush3.bf16.msra.mxu0 %v19078_v28 }
 0xa96   : > { %v11798_v58 = vrot.slane %v11796_v55, 4  ;;  %17861 = vmatprep.subr.bf16.mxu0 %v19079_v2 }
 0xa98   : > { %17834 = vmatpush3.bf16.msra.mxu1 %v19073_v36  ;;  %v11645_v36 = vsel %vm2120_vm8, %v11642_v38, %v11644_v46  ;;  %v11802_v63 = vor.u32 %v11801_v34, %v11798_v58  ;;  %v19082_v46 = vld [vmem:[%s23125_s3 + $0x7e0] sm:$0xff]  }
 0xa99   : > { %17843 = vmatprep.subr.bf16.mxu1 %v19074_v4  ;;  %17862 = vmatpush3.bf16.msra.mxu0 %v19079_v2  ;;  %v11973_v2 = vld [vmem:[#allocation2] sm:$0xf0] }
 0xa9a   : > { %17863 = vmatprep.subr.bf16.mxu0 %v19080_v44 }
 0xa9b   : > { %17836 = vmatmul.mubr.msk.bf16.vlgmr.msra.gmra.mrb[24].mxu1 %vm403_vm5, %v22226_v9  ;;  %v11790_v9 = vshll.u32 %v11758_v32, 16 }
 0xa9c   : > { %17844 = vmatpush3.bf16.msra.mxu1 %v19074_v4  ;;  %17839 = vmatprep.mubr.msk.bf16.mxu1 %vm403_vm5, %v11643_v45  ;;  %v11760_v4 = vsel %vm23444_vm15, %v11755_v3, 0  ;;  %vm23447_vm15 = vmmov %vm23445_vm3 }
 0xa9d   : > { %17845 = vmatprep.subr.bf16.mxu1 %v19075_v57  ;;  %v11792_v48 = vrot.slane %v11790_v9, 5  ;;  %v11805_v1 = vshrl.u32 %v11760_v4, 16  ;;  %v11808_v7 = vshll.u32 %v11760_v4, 16  ;;  %17864 = vmatpush3.bf16.msra.mxu0 %v19080_v44 }
 0xa9f   : > { %v11793_v24 = vor.u32 %v11792_v48, %v11789_v47  ;;  %v11810_v45 = vrot.slane %v11808_v7, 5 }
 0xaa0   : > { %17846 = vmatpush3.bf16.msra.mxu1 %v19075_v57  ;;  %v11807_v57 = vrot.slane %v11805_v1, 4 }
 0xaa1   : > { %17847 = vmatprep.subr.bf16.mxu1 %v19076_v33  ;;  %v11794_v38 = vsel %vm23445_vm3, %v11784_v37, %v11793_v24  ;;  %v11803_v32 = vsel %vm23446_vm13, %v11793_v24, %v11802_v63  ;;  %vm23448_vm3 = vcmp.ne.s16.totalorder %v19682_v10, 0  ;;  %vm23449_vm13 = vcmp.ne.s16.totalorder %v19895_v59, 0 }
 0xaa2   : > { %v11811_v26 = vor.u32 %v11810_v45, %v11807_v57 }
 0xaa3   : > { %17840 = vmatmul.mubr.msk.bf16.gmra.mrb[28].mxu1 %vm403_vm5, %v11645_v36 }
 0xaa4   : > { %17848 = vmatpush3.bf16.msra.mxu1 %v19076_v33  ;;  %17851 = vmatprep.mubr.msk.bf16.mxu1 %vm403_vm5, %v11785_v5  ;;  %v11812_v14 = vsel %vm23447_vm15, %v11802_v63, %v11811_v26  ;;  %v19081_v33 = vld [vmem:[%s23125_s3 + $0x818] sm:$0xff]  }
 0xaa5   : > { %17849 = vmatprep.subr.bf16.mxu1 %v19077_v30  ;;  %17865 = vmatprep.subr.bf16.mxu0 %v19081_v33 }
 0xaa6   : > { %17866 = vmatpush3.bf16.msra.mxu0 %v19081_v33 }
 0xaa7   : > { %17875 = vmatprep.subr.bf16.mxu0 %v19082_v46 }
 0xaa8   : > { %17850 = vmatpush3.bf16.msra.mxu1 %v19077_v30 }
 0xaab   : > { %17852 = vmatmul.mubr.msk.bf16.vlgmr.msra.gmra.mrb[24].mxu1 %vm403_vm5, %v11794_v38 }
 0xaac   : > { %17855 = vmatprep.mubr.msk.bf16.mxu1 %vm403_vm5, %v11803_v32  ;;  %v11954_v32 = vld [vmem:[#allocation2] sm:$0xf8] }
 0xab3   : > { %17856 = vmatmul.mubr.msk.bf16.gmra.mrb[28].mxu1 %vm403_vm5, %v11812_v14 }
 0xb7e   : > { %v17853_v9 = vpop.f32.mrb[24].mxu1 }
 0xb7f   : > { %v11930_v54 = vadd.f32 %v17853_v9, %v15845_v13  ;;  %v11883_v37 = vpop.f32.mrb[25].mxu1  ;;  %v11959_v9 = vsel %vm2088_vm9, %v11954_v32, 0 }
 0xb80   : > { %v11928_v55 = vadd.f32 %v15845_v13, %v11883_v37  ;;  %v17854_v50 = vpop.f32.mrb[26].mxu1 }
 0xb81   : > { %v11931_v3 = vadd.f32 %v17854_v50, %v15845_v13  ;;  %v11886_v30 = vpop.f32.mrb[27].mxu1  ;;  %v11938_v47 = vmax.f32 %v11930_v54, 0.0 }
 0xb82   : > { %v11929_v36 = vadd.f32 %v15845_v13, %v11886_v30  ;;  %v11936_v5 = vmax.f32 %v11928_v55, 0.0  ;;  %v11987_v55 = vrot.slane %v11973_v2, 4 }
 0xb83   : > { %v11939_v48 = vmax.f32 %v11931_v3, 0.0 }
 0xb84   : > { %v11937_v58 = vmax.f32 %v11929_v36, 0.0 }
 0xb85   : > { %v11945_v34 = vpack.c.bf16 %v11939_v48, %v11938_v47  ;;  %v12101_v48 = vshll.u32 %v11959_v9, 16 }
 0xb86   : > { %v11944_v4 = vpack.c.bf16 %v11937_v58, %v11936_v5  ;;  %v17857_v24 = vpop.f32.mrb[28].mxu1 }
 0xb87   : > { %11949 = vst.msk [vmem:[#allocation2 + $0x10] sm:$0xff] %vm403_vm5, %v11945_v34  ;;  %v11934_v1 = vadd.f32 %v17857_v24, %v15845_v13  ;;  %v11899_v7 = vpop.f32.mrb[29].mxu1  ;;  %v19083_v24 = vld [vmem:[%s23125_s3 + $0x7e8] sm:$0xff]  }
 0xb88   : > { %11948 = vst.msk [vmem:[#allocation2 + $0x8] sm:$0xff] %vm403_vm5, %v11944_v4  ;;  %v11932_v63 = vadd.f32 %v15845_v13, %v11899_v7  ;;  %v17858_v38 = vpop.f32.mrb[30].mxu1  ;;  %v12103_v7 = vrot.slane %v12101_v48, 4  ;;  %v12243_v48 = vsel %vm2424_vm14, %v11973_v2, 0 }
 0xb89   : > { %v11935_v57 = vadd.f32 %v17858_v38, %v15845_v13  ;;  %v11902_v45 = vpop.f32.mrb[31].mxu1  ;;  %v11942_v14 = vmax.f32 %v11934_v1, 0.0 }
 0xb8a   : > { %v11933_v26 = vadd.f32 %v15845_v13, %v11902_v45  ;;  %v11940_v44 = vmax.f32 %v11932_v63, 0.0  ;;  %v12098_v13 = vshrl.u32 %v11959_v9, 16  ;;  %v19084_v45 = vld [vmem:[%s23125_s3 + $0x7f0] sm:$0xff]  }
 0xb8b   : > { %v11943_v28 = vmax.f32 %v11935_v57, 0.0 }
 0xb8c   : > { %v11941_v33 = vmax.f32 %v11933_v26, 0.0  ;;  %v12100_v1 = vrot.slane %v12098_v13, 3 }
 0xb8d   : > { %v11947_v54 = vpack.c.bf16 %v11943_v28, %v11942_v14 }
 0xb8e   : > { %v11946_v37 = vpack.c.bf16 %v11941_v33, %v11940_v44  ;;  %v22484_v50 = vld [vmem:[#allocation2 + $0x10] sm:$0xff]  ;;  %v12104_v9 = vor.u32 %v12103_v7, %v12100_v1  ;;  %v19086_v7 = vld [vmem:[%s23125_s3 + $0x820] sm:$0xff]  }
 0xb8f   : > { %11951 = vst.msk [vmem:[#allocation2 + $0x20] sm:$0xff] %vm403_vm5, %v11947_v54  ;;  %v22487_v3 = vld [vmem:[#allocation2 + $0x8] sm:$0xff]  ;;  %v22490_v30 = vrot.slane %v22484_v50, 4  ;;  %v11961_v57 = vsel %vm2090_vm1, %v22484_v50, 0 }
 0xb90   : > { %11950 = vst.msk [vmem:[#allocation2 + $0x18] sm:$0xff] %vm403_vm5, %v11946_v37  ;;  %v11988_v36 = vrot.slane %v22487_v3, 4  ;;  %v11960_v47 = vsel %vm2089_vm7, %v22487_v3, 0  ;;  %v12115_v28 = vshrl.u32 %v11961_v57, 16  ;;  %v12118_v44 = vshll.u32 %v11961_v57, 16 }
 0xb91   : > { %v12106_v5 = vshrl.u32 %v11960_v47, 16  ;;  %v12109_v58 = vshll.u32 %v11960_v47, 16  ;;  %v19085_v47 = vld [vmem:[%s23125_s3 + $0x7f8] sm:$0xff]   ;;  %v12244_v2 = vsel %vm2425_vm2, %v22487_v3, 0 }
 0xb92   : > { %v11989_v34 = vsel %vm2120_vm8, %v11987_v55, %v11988_v36  ;;  %v11991_v4 = vsel %vm2120_vm8, %v11988_v36, %v22490_v30 }
 0xb93   : > { %17867 = vmatprep.mubr.msk.bf16.mxu0 %vm403_vm5, %v11989_v34  ;;  %v12108_v63 = vrot.slane %v12106_v5, 3  ;;  %v12111_v38 = vrot.slane %v12109_v58, 4  ;;  %v12117_v5 = vrot.slane %v12115_v28, 3  ;;  %v12120_v58 = vrot.slane %v12118_v44, 4 }
 0xb94   : > { %17868 = vmatmul.mubr.msk.bf16.vlgmr.msra.gmra.mrb[32].mxu0 %vm403_vm5, %v11991_v4  ;;  %v12260_v28 = vshll.u32 %v12243_v48, 16 }
 0xb95   : > { %17876 = vmatpush3.bf16.msra.mxu0 %v19082_v46  ;;  %v12112_v54 = vor.u32 %v12111_v38, %v12108_v63  ;;  %v12257_v63 = vshrl.u32 %v12243_v48, 16  ;;  %v12121_v38 = vor.u32 %v12120_v58, %v12117_v5 }
 0xb96   : > { %17877 = vmatprep.subr.bf16.mxu0 %v19083_v24  ;;  %v11958_v32 = vld [vmem:[#allocation2 + $0x20] sm:$0xf] }
 0xb97   : > { %v22511_v26 = vld [vmem:[#allocation2 + $0x18] sm:$0xff]  ;;  %v11994_v14 = vrot.slane %v11958_v32, 4  ;;  %v12113_v34 = vsel %vm683_vm10, %v12104_v9, %v12112_v54  ;;  %v11963_v1 = vsel %vm2092_vm4, %v11958_v32, 0  ;;  %v12265_v9 = vshrl.u32 %v12244_v2, 16 }
 0xb98   : > { %v22514_v33 = vrot.slane %v22511_v26, 4  ;;  %v11962_v46 = vsel %vm2091_vm11, %v22511_v26, 0  ;;  %v12133_v57 = vshrl.u32 %v11963_v1, 16  ;;  %v12268_v32 = vshll.u32 %v12244_v2, 16 }
 0xb99   : > { %17878 = vmatpush3.bf16.msra.mxu0 %v19083_v24  ;;  %v12124_v37 = vshrl.u32 %v11962_v46, 16  ;;  %v12127_v55 = vshll.u32 %v11962_v46, 16  ;;  %v12259_v46 = vrot.slane %v12257_v63, 4  ;;  %v12267_v48 = vrot.slane %v12265_v9, 4 }
 0xb9a   : > { %v22522_v13 = vsel %vm2120_vm8, %v22490_v30, %v22514_v33  ;;  %17879 = vmatprep.subr.bf16.mxu0 %v19084_v45  ;;  %v11995_v36 = vsel %vm2120_vm8, %v22514_v33, %v11994_v14  ;;  %v12136_v14 = vshll.u32 %v11963_v1, 16  ;;  %v12270_v58 = vrot.slane %v12268_v32, 5 }
 0xb9b   : > { %17871 = vmatprep.mubr.msk.bf16.mxu0 %vm403_vm5, %v22522_v13  ;;  %v12126_v4 = vrot.slane %v12124_v37, 3  ;;  %v12129_v24 = vrot.slane %v12127_v55, 4  ;;  %v12122_v37 = vsel %vm683_vm10, %v12112_v54, %v12121_v38  ;;  %v12135_v55 = vrot.slane %v12133_v57, 3 }
 0xb9c   : > { %17872 = vmatmul.mubr.msk.bf16.gmra.mrb[36].mxu0 %vm403_vm5, %v11995_v36  ;;  %v12138_v36 = vrot.slane %v12136_v14, 4  ;;  %v12246_v54 = vsel %vm23449_vm13, %v22511_v26, 0  ;;  %vm23451_vm13 = vcmp.ne.s16.totalorder %v23268_v31, 0 }
 0xb9d   : > { %17880 = vmatpush3.bf16.msra.mxu0 %v19084_v45  ;;  %17883 = vmatprep.mubr.msk.bf16.mxu0 %vm403_vm5, %v12113_v34  ;;  %v12130_v44 = vor.u32 %v12129_v24, %v12126_v4  ;;  %v19087_v45 = vld [vmem:[%s23125_s3 + $0x828] sm:$0xff]   ;;  %v12262_v34 = vrot.slane %v12260_v28, 5  ;;  %v19088_v4 = vld [vmem:[%s23125_s3 + $0x830] sm:$0xff]   ;;  %v12283_v57 = vshrl.u32 %v12246_v54, 16  ;;  %v12286_v14 = vshll.u32 %v12246_v54, 16  ;;  %v19089_v28 = vld [vmem:[%s23125_s3 + $0x838] sm:$0xff]  }
 0xb9e   : > { %17881 = vmatprep.subr.bf16.mxu0 %v19085_v47  ;;  %v12139_v24 = vor.u32 %v12138_v36, %v12135_v55 }
 0xb9f   : > { %v12131_v5 = vsel %vm683_vm10, %v12121_v38, %v12130_v44  ;;  %v12263_v63 = vor.u32 %v12262_v34, %v12259_v46  ;;  %v12271_v38 = vor.u32 %v12270_v58, %v12267_v48  ;;  %v12285_v36 = vrot.slane %v12283_v57, 4 }
 0xba0   : > { %v12140_v9 = vsel %vm683_vm10, %v12130_v44, %v12139_v24  ;;  %v12288_v46 = vrot.slane %v12286_v14, 5  ;;  %v19090_v44 = vld [vmem:[%s23125_s3 + $0x840] sm:$0xff]  }
 0xba1   : > { %17882 = vmatpush3.bf16.msra.mxu0 %v19085_v47  ;;  %v12245_v47 = vsel %vm23448_vm3, %v22484_v50, 0  ;;  %v12272_v55 = vsel %vm23447_vm15, %v12263_v63, %v12271_v38  ;;  %vm23450_vm3 = vcmp.ne.s16.totalorder %v19878_v19, 0 }
 0xba2   : > { %17891 = vmatprep.subr.bf16.mxu0 %v19086_v7  ;;  %v12274_v1 = vshrl.u32 %v12245_v47, 16  ;;  %v12277_v2 = vshll.u32 %v12245_v47, 16  ;;  %v12289_v54 = vor.u32 %v12288_v46, %v12285_v36 }
 0xba4   : > { %17884 = vmatmul.mubr.msk.bf16.vlgmr.msra.gmra.mrb[32].mxu0 %vm403_vm5, %v12122_v37  ;;  %v12276_v32 = vrot.slane %v12274_v1, 4  ;;  %v12279_v37 = vrot.slane %v12277_v2, 5  ;;  %v19091_v1 = vld [vmem:[%s23125_s3 + $0x848] sm:$0xff]  }
 0xba5   : > { %17892 = vmatpush3.bf16.msra.mxu0 %v19086_v7  ;;  %17887 = vmatprep.mubr.msk.bf16.mxu0 %vm403_vm5, %v12131_v5  ;;  %v12242_v7 = vld [vmem:[#allocation2 + $0x20] sm:$0x1f]  ;;  %v12409_v5 = vld [vmem:[#allocation2] sm:$0x80] }
 0xba6   : > { %17893 = vmatprep.subr.bf16.mxu0 %v19087_v45  ;;  %v12247_v34 = vsel %vm23450_vm3, %v12242_v7, 0  ;;  %v12280_v48 = vor.u32 %v12279_v37, %v12276_v32  ;;  %vm23452_vm3 = vmmov %vm23447_vm15 }
 0xba7   : > { %v12292_v58 = vshrl.u32 %v12247_v34, 16  ;;  %v12295_v47 = vshll.u32 %v12247_v34, 16 }
 0xba8   : > { %v12281_v2 = vsel %vm23447_vm15, %v12271_v38, %v12280_v48  ;;  %v12290_v14 = vsel %vm23452_vm3, %v12280_v48, %v12289_v54  ;;  %v19092_v38 = vld [vmem:[%s23125_s3 + $0x850] sm:$0xff]   ;;  %v22593_v48 = vld [vmem:[#allocation2 + $0x20] sm:$0xff]  ;;  %vm23454_vm15 = vmmov %vm23452_vm3  ;;  %vm23455_vm3 = vsmask.f32 256 }
 0xba9   : > { %17894 = vmatpush3.bf16.msra.mxu0 %v19087_v45  ;;  %v12412_v45 = vsel %vm23451_vm13, %v22487_v3, 0  ;;  %v12294_v63 = vrot.slane %v12292_v58, 4  ;;  %v12297_v57 = vrot.slane %v12295_v47, 5  ;;  %vm23453_vm13 = vcmp.ne.s16.totalorder %v23271_v23, 0 }
 0xbaa   : > { %17895 = vmatprep.subr.bf16.mxu0 %v19088_v4  ;;  %v12429_v24 = vshrl.u32 %v12412_v45, 16  ;;  %v12414_v32 = vsel %vm23453_vm13, %v22511_v26, 0  ;;  %v12432_v37 = vshll.u32 %v12412_v45, 16  ;;  %vm23456_vm13 = vcmp.ne.s16.totalorder %v20321_v51, 0 }
 0xbac   : > { %17888 = vmatmul.mubr.msk.bf16.gmra.mrb[36].mxu0 %vm403_vm5, %v12140_v9  ;;  %v12431_v9 = vrot.slane %v12429_v24, 7 }
 0xbad   : > { %17896 = vmatpush3.bf16.msra.mxu0 %v19088_v4  ;;  %17899 = vmatprep.mubr.msk.bf16.mxu0 %vm403_vm5, %v12272_v55  ;;  %v12411_v4 = vsel %vm2608_vm0, %v12409_v5, 0  ;;  %v12298_v55 = vor.u32 %v12297_v57, %v12294_v63  ;;  %v12445_v5 = vshrl.u32 %v12414_v32, 16 }
 0xbae   : > { %17897 = vmatprep.subr.bf16.mxu0 %v19089_v28  ;;  %v12425_v7 = vshrl.u32 %v12411_v4, 16  ;;  %v12434_v34 = vor.u32 %v12432_v37, %v12431_v9  ;;  %v12415_v4 = vsel %vm23456_vm13, %v22593_v48, 0  ;;  %vm23458_vm13 = vmmov %vm23455_vm3 }
 0xbaf   : > { %v12299_v58 = vsel %vm23454_vm15, %v12289_v54, %v12298_v55  ;;  %v12447_v24 = vrot.slane %v12445_v5, 7  ;;  %v12448_v54 = vshll.u32 %v12414_v32, 16  ;;  %v12453_v57 = vshrl.u32 %v12415_v4, 16  ;;  %vm23457_vm15 = vmmov %vm23455_vm3  ;;  %v19096_v55 = vld [vmem:[%s23125_s3 + $0x870] sm:$0xff]   ;;  %v19098_v5 = vld [vmem:[%s23125_s3 + $0x880] sm:$0xff]  }
 0xbb0   : > { %v12427_v46 = vrot.slane %v12425_v7, 7  ;;  %v19095_v7 = vld [vmem:[%s23125_s3 + $0x868] sm:$0xff]   ;;  %v12456_v32 = vshll.u32 %v12415_v4, 16 }
 0xbb1   : > { %17898 = vmatpush3.bf16.msra.mxu0 %v19089_v28  ;;  %v12413_v28 = vsel %vm2610_vm12, %v22484_v50, 0  ;;  %v12455_v37 = vrot.slane %v12453_v57, 7 }
 0xbb2   : > { %17907 = vmatprep.subr.bf16.mxu0 %v19090_v44  ;;  %v12437_v36 = vshrl.u32 %v12413_v28, 16  ;;  %v12435_v45 = vsel %vm23455_vm3, %v12427_v46, %v12434_v34  ;;  %v12691_v34 = vsel %vm2904_vm6, %v22487_v3, 0 }
 0xbb3   : > { %v12705_v4 = vshrl.u32 %v12691_v34, 16 }
 0xbb4   : > { %17900 = vmatmul.mubr.msk.bf16.vlgmr.msra.gmra.mrb[32].mxu0 %vm403_vm5, %v12281_v2  ;;  %v12439_v47 = vrot.slane %v12437_v36, 7  ;;  %v19094_v2 = vld [vmem:[%s23125_s3 + $0x860] sm:$0xff]   ;;  %v12458_v36 = vor.u32 %v12456_v32, %v12455_v37  ;;  %v12690_v32 = vld [vmem:[#allocation2 + $0x28] sm:$0x1] }
 0xbb5   : > { %17908 = vmatpush3.bf16.msra.mxu0 %v19090_v44  ;;  %17903 = vmatprep.mubr.msk.bf16.mxu0 %vm403_vm5, %v12290_v14  ;;  %v19093_v44 = vld [vmem:[%s23125_s3 + $0x858] sm:$0xff]   ;;  %v12450_v14 = vor.u32 %v12448_v54, %v12447_v24 }
 0xbb6   : > { %17909 = vmatprep.subr.bf16.mxu0 %v19091_v1  ;;  %v12459_v46 = vsel %vm23458_vm13, %v12447_v24, %v12458_v36  ;;  %v19100_v24 = vld [vmem:[%s23125_s3 + $0x890] sm:$0xff]   ;;  %vm23461_vm13 = vcmp.ne.s16.totalorder %v20148_v21, 0  ;;  %v19102_v36 = vld [vmem:[%s23125_s3 + $0x8a0] sm:$0xff]  }
 0xbb9   : > { %17910 = vmatpush3.bf16.msra.mxu0 %v19091_v1  ;;  %v12440_v1 = vshll.u32 %v12413_v28, 16  ;;  %v12451_v28 = vsel %vm23455_vm3, %v12439_v47, %v12450_v14  ;;  %vm23460_vm3 = vcmp.ne.s16.totalorder %v20152_v6, 0  ;;  %v19101_v14 = vld [vmem:[%s23125_s3 + $0x898] sm:$0xff]  }
 0xbba   : > { %17911 = vmatprep.subr.bf16.mxu0 %v19092_v38 }
 0xbbb   : > { %v12442_v63 = vor.u32 %v12440_v1, %v12439_v47 }
 0xbbc   : > { %17904 = vmatmul.mubr.msk.bf16.gmra.mrb[36].mxu0 %vm403_vm5, %v12299_v58  ;;  %v19099_v58 = vld [vmem:[%s23125_s3 + $0x888] sm:$0xff]  }
 0xbbd   : > { %17912 = vmatpush3.bf16.msra.mxu0 %v19092_v38  ;;  %17915 = vmatprep.mubr.msk.bf16.mxu0 %vm403_vm5, %v12435_v45  ;;  %v12443_v38 = vsel %vm23457_vm15, %v12431_v9, %v12442_v63  ;;  %v19097_v9 = vld [vmem:[%s23125_s3 + $0x878] sm:$0xff]   ;;  %vm23459_vm15 = vcmp.ne.s16.totalorder %v23282_v62, 0  ;;  %v12693_v45 = vsel %vm23460_vm3, %v22511_v26, 0  ;;  %v12849_v63 = vld [vmem:[#allocation2 + $0x8] sm:$0xf8]  ;;  %vm23463_vm3 = vcmp.ne.s16.totalorder %v20140_v12, 0 }
 0xbbe   : > { %17913 = vmatprep.subr.bf16.mxu0 %v19093_v44  ;;  %v12692_v47 = vsel %vm23459_vm15, %v22484_v50, 0  ;;  %v12720_v54 = vshll.u32 %v12693_v45, 16  ;;  %vm23462_vm15 = vsmask.f32 7424 }
 0xbbf   : > { %v12712_v1 = vshll.u32 %v12692_v47, 16 }
 0xbc0   : > { %v12722_v37 = vrot.slane %v12720_v54, 1  ;;  %v19103_v54 = vld [vmem:[%s23125_s3 + $0x8a8] sm:$0xff]  }
 0xbc1   : > { %17914 = vmatpush3.bf16.msra.mxu0 %v19093_v44  ;;  %v12707_v44 = vshll.u32 %v12691_v34, 16  ;;  %v12714_v57 = vrot.slane %v12712_v1, 1  ;;  %v12716_v34 = vshrl.u32 %v12692_v47, 16 }
 0xbc2   : > { %17923 = vmatprep.subr.bf16.mxu0 %v19094_v2 }
 0xbc3   : > { %v12718_v1 = vor.u32 %v12716_v34, %v12714_v57 }
 0xbc4   : > { %17916 = vmatmul.mubr.msk.bf16.vlgmr.msra.gmra.mrb[32].mxu0 %vm403_vm5, %v12443_v38 }
 0xbc5   : > { %17924 = vmatpush3.bf16.msra.mxu0 %v19094_v2  ;;  %17919 = vmatprep.mubr.msk.bf16.mxu0 %vm403_vm5, %v12451_v28  ;;  %v12851_v28 = vsel %vm2088_vm9, %v12849_v63, 0 }
 0xbc6   : > { %17925 = vmatprep.subr.bf16.mxu0 %v19095_v7 }
 0xbc9   : > { %17926 = vmatpush3.bf16.msra.mxu0 %v19095_v7  ;;  %v12694_v7 = vsel %vm23461_vm13, %v22593_v48, 0  ;;  %vm23464_vm13 = vmmov %vm23462_vm15 }
 0xbca   : > { %17927 = vmatprep.subr.bf16.mxu0 %v19096_v55 }
 0xbcc   : > { %17920 = vmatmul.mubr.msk.bf16.gmra.mrb[36].mxu0 %vm403_vm5, %v12459_v46  ;;  %v12728_v46 = vshll.u32 %v12694_v7, 16 }
 0xbcd   : > { %17928 = vmatpush3.bf16.msra.mxu0 %v19096_v55  ;;  %17931 = vmatprep.mubr.msk.bf16.mxu0 %vm403_vm5, %v22487_v3  ;;  %v12709_v3 = vrot.slane %v12707_v44, 1  ;;  %v12852_v55 = vsel %vm2089_vm7, %v22484_v50, 0  ;;  %v12868_v44 = vshll.u32 %v12851_v28, 16 }
 0xbce   : > { %17929 = vmatprep.subr.bf16.mxu0 %v19097_v9 }
 0xbcf   : > { %v12710_v2 = vor.u32 %v12709_v3, %v12705_v4  ;;  %v12695_v3 = vsel %vm23463_vm3, %v12690_v32, 0  ;;  %v12876_v4 = vshll.u32 %v12852_v55, 16  ;;  %vm23466_vm3 = vmmov %vm23464_vm13 }
 0xbd0   : > { %v12736_v63 = vshll.u32 %v12695_v3, 16 }
 0xbd1   : > { %17930 = vmatpush3.bf16.msra.mxu0 %v19097_v9  ;;  %v12715_v38 = vsel %vm23462_vm15, %v12710_v2, %v12714_v57  ;;  %v12724_v9 = vshrl.u32 %v12693_v45, 16  ;;  %v12730_v2 = vrot.slane %v12728_v46, 1  ;;  %v12723_v45 = vsel %vm23464_vm13, %v12718_v1, %v12722_v37  ;;  %vm23465_vm15 = vmmov %vm23464_vm13 }
 0xbd2   : > { %17939 = vmatprep.subr.bf16.mxu0 %v19098_v5  ;;  %v12853_v57 = vsel %vm2090_vm1, %v22511_v26, 0  ;;  %v12738_v34 = vrot.slane %v12736_v63, 1  ;;  %vm23467_vm13 = vcmp.ne.s16.totalorder %v19682_v10, 0 }
 0xbd4   : > { %17932 = vmatmul.mubr.msk.bf16.vlgmr.msra.gmra.mrb[32].mxu0 %vm403_vm5, %v22484_v50 }
 0xbd5   : > { %17940 = vmatpush3.bf16.msra.mxu0 %v19098_v5  ;;  %17935 = vmatprep.mubr.msk.bf16.mxu0 %vm403_vm5, %v22511_v26  ;;  %v12865_v5 = vshrl.u32 %v12851_v28, 16 }
 0xbd6   : > { %17941 = vmatprep.subr.bf16.mxu0 %v19099_v58 }
 0xbd7   : > { %v12867_v47 = vrot.slane %v12865_v5, 3  ;;  %v12882_v5 = vshrl.u32 %v12853_v57, 16 }
 0xbd9   : > { %17942 = vmatpush3.bf16.msra.mxu0 %v19099_v58  ;;  %v12726_v58 = vor.u32 %v12724_v9, %v12722_v37  ;;  %v12878_v9 = vrot.slane %v12876_v4, 4  ;;  %v12854_v37 = vsel %vm2091_vm11, %v22593_v48, 0  ;;  %v22683_v4 = vld [vmem:[#allocation2 + $0x28] sm:$0xf] }
 0xbda   : > { %17943 = vmatprep.subr.bf16.mxu0 %v19100_v24 }
 0xbdb   : > { %v12731_v28 = vsel %vm23465_vm15, %v12726_v58, %v12730_v2  ;;  %vm23468_vm15 = vcmp.ne.s16.totalorder %v19895_v59, 0 }
 0xbdc   : > { %17936 = vmatmul.mubr.msk.bf16.gmra.mrb[36].mxu0 %vm403_vm5, %v22593_v48 }
 0xbdd   : > { %17944 = vmatpush3.bf16.msra.mxu0 %v19100_v24  ;;  %17947 = vmatprep.mubr.msk.bf16.mxu0 %vm403_vm5, %v12715_v38  ;;  %v12873_v24 = vshrl.u32 %v12852_v55, 16  ;;  %v12870_v38 = vrot.slane %v12868_v44, 4  ;;  %v19104_v55 = vld [vmem:[%s23125_s3 + $0x8b0] sm:$0xff]   ;;  %v12885_v44 = vshll.u32 %v12853_v57, 16 }
 0xbde   : > { %17945 = vmatprep.subr.bf16.mxu0 %v19101_v14 }
 0xbdf   : > { %v12875_v32 = vrot.slane %v12873_v24, 3  ;;  %v12871_v58 = vor.u32 %v12870_v38, %v12867_v47  ;;  %v12891_v24 = vshrl.u32 %v12854_v37, 16  ;;  %v19106_v38 = vld [vmem:[%s23125_s3 + $0x8c0] sm:$0xff]  }
 0xbe1   : > { %17946 = vmatpush3.bf16.msra.mxu0 %v19101_v14  ;;  %v12732_v14 = vshrl.u32 %v12694_v7, 16  ;;  %v12879_v3 = vor.u32 %v12878_v9, %v12875_v32  ;;  %v19105_v7 = vld [vmem:[%s23125_s3 + $0x8b8] sm:$0xff]   ;;  %v12893_v63 = vrot.slane %v12891_v24, 3 }
 0xbe2   : > { %17955 = vmatprep.subr.bf16.mxu0 %v19102_v36 }
 0xbe3   : > { %v12734_v46 = vor.u32 %v12732_v14, %v12730_v2  ;;  %v12880_v2 = vsel %vm683_vm10, %v12871_v58, %v12879_v3  ;;  %v19108_v58 = vld [vmem:[%s23125_s3 + $0x8d0] sm:$0xff]  }
 0xbe4   : > { %17948 = vmatmul.mubr.msk.bf16.vlgmr.msra.gmra.mrb[32].mxu0 %vm403_vm5, %v12723_v45  ;;  %v12884_v45 = vrot.slane %v12882_v5, 3 }
 0xbe5   : > { %17956 = vmatpush3.bf16.msra.mxu0 %v19102_v36  ;;  %17951 = vmatprep.mubr.msk.bf16.mxu0 %vm403_vm5, %v12731_v28  ;;  %v12894_v36 = vshll.u32 %v12854_v37, 16  ;;  %v12739_v1 = vsel %vm23466_vm3, %v12734_v46, %v12738_v34  ;;  %v12887_v28 = vrot.slane %v12885_v44, 4  ;;  %v19107_v37 = vld [vmem:[%s23125_s3 + $0x8c8] sm:$0xff]   ;;  %vm23469_vm3 = vsmask.f32 3328 }
 0xbe6   : > { %17957 = vmatprep.subr.bf16.mxu0 %v19103_v54  ;;  %v13017_v44 = vld [vmem:[#allocation2 + $0x8] sm:$0xf0] }
 0xbe7   : > { %v12896_v47 = vrot.slane %v12894_v36, 4  ;;  %v12888_v32 = vor.u32 %v12887_v28, %v12884_v45  ;;  %v13031_v36 = vrot.slane %v13017_v44, 4  ;;  %v13150_v45 = vsel %vm2424_vm14, %v13017_v44, 0 }
 0xbe8   : > { %v13151_v28 = vsel %vm2425_vm2, %v22484_v50, 0 }
 0xbe9   : > { %17958 = vmatpush3.bf16.msra.mxu0 %v19103_v54  ;;  %v12855_v54 = vsel %vm2092_vm4, %v22683_v4, 0  ;;  %v12897_v14 = vor.u32 %v12896_v47, %v12893_v63  ;;  %v12889_v46 = vsel %vm683_vm10, %v12879_v3, %v12888_v32  ;;  %v19109_v3 = vld [vmem:[%s23125_s3 + $0x8d8] sm:$0xff]   ;;  %v13036_v63 = vrot.slane %v22593_v48, 4 }
 0xbea   : > { %17959 = vmatprep.subr.bf16.mxu0 %v19104_v55  ;;  %v12900_v9 = vshrl.u32 %v12855_v54, 16  ;;  %v12903_v57 = vshll.u32 %v12855_v54, 16  ;;  %v13164_v47 = vshrl.u32 %v13150_v45, 16  ;;  %v13167_v54 = vshll.u32 %v13150_v45, 16 }
 0xbeb   : > { %v12898_v5 = vsel %vm683_vm10, %v12888_v32, %v12897_v14  ;;  %v19111_v32 = vld [vmem:[%s23125_s3 + $0x8e8] sm:$0xff]   ;;  %v13037_v50 = vsel %vm2120_vm8, %v22514_v33, %v13036_v63  ;;  %v19112_v33 = vld [vmem:[%s23125_s3 + $0x8f0] sm:$0xff]  }
 0xbec   : > { %17952 = vmatmul.mubr.msk.bf16.gmra.mrb[36].mxu0 %vm403_vm5, %v12739_v1  ;;  %v12905_v34 = vrot.slane %v12903_v57, 4  ;;  %v13033_v1 = vsel %vm2120_vm8, %v13031_v36, %v22490_v30  ;;  %v13172_v30 = vshrl.u32 %v13151_v28, 16  ;;  %v13166_v57 = vrot.slane %v13164_v47, 4  ;;  %v13149_v36 = vld [vmem:[#allocation2 + $0x28] sm:$0x1f] }
 0xbed   : > { %17960 = vmatpush3.bf16.msra.mxu0 %v19104_v55  ;;  %17963 = vmatprep.mubr.msk.bf16.mxu0 %vm403_vm5, %v12880_v2  ;;  %v12902_v55 = vrot.slane %v12900_v9, 3  ;;  %v19110_v2 = vld [vmem:[%s23125_s3 + $0x8e0] sm:$0xff]   ;;  %v13152_v9 = vsel %vm23467_vm13, %v22511_v26, 0  ;;  %v13038_v26 = vrot.slane %v22683_v4, 4  ;;  %vm23470_vm13 = vcmp.ne.s16.totalorder %v19878_v19, 0 }
 0xbee   : > { %17961 = vmatprep.subr.bf16.mxu0 %v19105_v7 }
 0xbef   : > { %v12906_v24 = vor.u32 %v12905_v34, %v12902_v55  ;;  %v13153_v55 = vsel %vm23468_vm15, %v22593_v48, 0  ;;  %v13181_v34 = vshrl.u32 %v13152_v9, 16  ;;  %v19113_v48 = vld [vmem:[%s23125_s3 + $0x8f8] sm:$0xff]   ;;  %vm23471_vm15 = vmmov %vm23469_vm3 }
 0xbf1   : > { %17962 = vmatpush3.bf16.msra.mxu0 %v19105_v7  ;;  %v12907_v7 = vsel %vm683_vm10, %v12897_v14, %v12906_v24  ;;  %v13169_v14 = vrot.slane %v13167_v54, 5  ;;  %v13193_v24 = vshll.u32 %v13153_v55, 16 }
 0xbf2   : > { %17971 = vmatprep.subr.bf16.mxu0 %v19106_v38 }
 0xbf4   : > { %17964 = vmatmul.mubr.msk.bf16.vlgmr.msra.gmra.mrb[32].mxu0 %vm403_vm5, %v12889_v46 }
 0xbf5   : > { %17972 = vmatpush3.bf16.msra.mxu0 %v19106_v38  ;;  %17967 = vmatprep.mubr.msk.bf16.mxu0 %vm403_vm5, %v12898_v5  ;;  %v13175_v38 = vshll.u32 %v13151_v28, 16  ;;  %v13170_v5 = vor.u32 %v13169_v14, %v13166_v57  ;;  %v13195_v28 = vrot.slane %v13193_v24, 5 }
 0xbf6   : > { %17973 = vmatprep.subr.bf16.mxu0 %v19107_v37 }
 0xbf7   : > { %v13177_v46 = vrot.slane %v13175_v38, 5 }
 0xbf9   : > { %17974 = vmatpush3.bf16.msra.mxu0 %v19107_v37  ;;  %v13174_v37 = vrot.slane %v13172_v30, 4 }
 0xbfa   : > { %17975 = vmatprep.subr.bf16.mxu0 %v19108_v58 }
 0xbfb   : > { %v13178_v44 = vor.u32 %v13177_v46, %v13174_v37  ;;  %v19114_v37 = vld [vmem:[%s23127_s5 + $0x20] sm:$0xff]   ;;  %v19115_v46 = vld [vmem:[%s23127_s5 + $0x28] sm:$0xff]  }
 0xbfc   : > { %17968 = vmatmul.mubr.msk.bf16.gmra.mrb[36].mxu0 %vm403_vm5, %v12907_v7  ;;  %v13183_v7 = vrot.slane %v13181_v34, 4  ;;  %18003 = vmatprep.subr.bf16.mxu1 %v19114_v37  ;;  %v22780_v34 = vld [vmem:[%s23127_s5 + $0x108] sm:$0xff]  }
 0xbfd   : > { %17976 = vmatpush3.bf16.msra.mxu0 %v19108_v58  ;;  %17979 = vmatprep.mubr.msk.bf16.mxu0 %vm403_vm5, %v13033_v1  ;;  %v13190_v58 = vshrl.u32 %v13153_v55, 16  ;;  %v13179_v4 = vsel %vm23469_vm3, %v13170_v5, %v13178_v44  ;;  %v19116_v55 = vld [vmem:[%s23127_s5 + $0x30] sm:$0xff]  }
 0xbfe   : > { %17977 = vmatprep.subr.bf16.mxu0 %v19109_v3  ;;  %18004 = vmatpush3.bf16.msra.mxu1 %v19114_v37  ;;  %v22792_v5 = vld [vmem:[%s23127_s5 + $0x110] sm:$0xff]  }
 0xbff   : > { %v13192_v45 = vrot.slane %v13190_v58, 4  ;;  %18005 = vmatprep.subr.bf16.mxu1 %v19115_v46  ;;  %v15991_v58 = vld [vmem:[%s23126_s4 + $0x7] ss:$0 sm:$0xff] }
 0xc01   : > { %17978 = vmatpush3.bf16.msra.mxu0 %v19109_v3  ;;  %v13039_v3 = vsel %vm2120_vm8, %v13036_v63, %v13038_v26  ;;  %v13196_v38 = vor.u32 %v13195_v28, %v13192_v45  ;;  %v19117_v26 = vld [vmem:[%s23127_s5 + $0x38] sm:$0xff]  }
 0xc02   : > { %17987 = vmatprep.subr.bf16.mxu0 %v19110_v2  ;;  %18006 = vmatpush3.bf16.msra.mxu1 %v19115_v46 }
 0xc03   : > { %18007 = vmatprep.subr.bf16.mxu1 %v19116_v55 }
 0xc04   : > { %17980 = vmatmul.mubr.msk.bf16.vlgmr.msra.gmra.mrb[32].mxu0 %vm403_vm5, %v22522_v13  ;;  %v13184_v13 = vshll.u32 %v13152_v9, 16 }
 0xc05   : > { %17988 = vmatpush3.bf16.msra.mxu0 %v19110_v2  ;;  %17983 = vmatprep.mubr.msk.bf16.mxu0 %vm403_vm5, %v13037_v50  ;;  %v13154_v2 = vsel %vm23470_vm13, %v13149_v36, 0  ;;  %vm23472_vm13 = vmmov %vm23469_vm3 }
 0xc06   : > { %17989 = vmatprep.subr.bf16.mxu0 %v19111_v32  ;;  %v13186_v1 = vrot.slane %v13184_v13, 5  ;;  %v13199_v54 = vshrl.u32 %v13154_v2, 16  ;;  %v13202_v30 = vshll.u32 %v13154_v2, 16  ;;  %18008 = vmatpush3.bf16.msra.mxu1 %v19116_v55  ;;  %v22786_v13 = vld [vmem:[%s23127_s5] sm:$0xff]   ;;  %v23473_v55 = vmax.f32 %v22167_v29, 0.0 }
 0xc07   : > { %18009 = vmatprep.subr.bf16.mxu1 %v19117_v26 }
 0xc08   : > { %v13187_v47 = vor.u32 %v13186_v1, %v13183_v7  ;;  %v13204_v50 = vrot.slane %v13202_v30, 5 }
 0xc09   : > { %17990 = vmatpush3.bf16.msra.mxu0 %v19111_v32  ;;  %v13201_v32 = vrot.slane %v13199_v54, 4 }
 0xc0a   : > { %17991 = vmatprep.subr.bf16.mxu0 %v19112_v33  ;;  %v13188_v63 = vsel %vm23471_vm15, %v13178_v44, %v13187_v47  ;;  %v13197_v9 = vsel %vm23469_vm3, %v13187_v47, %v13196_v38  ;;  %18010 = vmatpush3.bf16.msra.mxu1 %v19117_v26  ;;  %v22800_v44 = vld [vmem:[%s23127_s5 + $0x118] sm:$0xff]   ;;  %vm23475_vm15 = vmmov %vm23469_vm3  ;;  %vm23476_vm3 = vcmp.ne.s16.totalorder %v19682_v10, 0 }
 0xc0b   : > { %v13205_v57 = vor.u32 %v13204_v50, %v13201_v32  ;;  %18019 = vmatprep.subr.bf16.mxu1 %v22786_v13 }
 0xc0c   : > { %17984 = vmatmul.mubr.msk.bf16.gmra.mrb[36].mxu0 %vm403_vm5, %v13039_v3 }
 0xc0d   : > { %17992 = vmatpush3.bf16.msra.mxu0 %v19112_v33  ;;  %17995 = vmatprep.mubr.msk.bf16.mxu0 %vm403_vm5, %v13179_v4  ;;  %v13206_v14 = vsel %vm23472_vm13, %v13196_v38, %v13205_v57  ;;  %v22770_v33 = vld [vmem:[%s23127_s5 + $0x100] sm:$0xff]  }
 0xc0e   : > { %17993 = vmatprep.subr.bf16.mxu0 %v19113_v48  ;;  %v13355_v57 = vld [vmem:[#allocation2] sm:$0xf8] }
 0xc0f   : > { %v13360_v46 = vsel %vm2088_vm9, %v13355_v57, 0 }
 0xc11   : > { %17994 = vmatpush3.bf16.msra.mxu0 %v19113_v48 }
 0xc12   : > { %18131 = vmatprep.subr.bf16.mxu0 %v22770_v33 }
 0xc14   : > { %17996 = vmatmul.mubr.msk.bf16.vlgmr.msra.gmra.mrb[32].mxu0 %vm403_vm5, %v13188_v63 }
 0xc15   : > { %17999 = vmatprep.mubr.msk.bf16.mxu0 %vm403_vm5, %v13197_v9  ;;  %18132 = vmatpush3.bf16.msra.mxu0 %v22770_v33 }
 0xc16   : > { %18133 = vmatprep.subr.bf16.mxu0 %v22780_v34 }
 0xc19   : > { %18134 = vmatpush3.bf16.msra.mxu0 %v22780_v34 }
 0xc1a   : > { %18135 = vmatprep.subr.bf16.mxu0 %v22792_v5 }
 0xc1c   : > { %18000 = vmatmul.mubr.msk.bf16.gmra.mrb[36].mxu0 %vm403_vm5, %v13206_v14 }
 0xc1d   : > { %18136 = vmatpush3.bf16.msra.mxu0 %v22792_v5 }
 0xc1e   : > { %18137 = vmatprep.subr.bf16.mxu0 %v22800_v44 }
 0xc21   : > { %18138 = vmatpush3.bf16.msra.mxu0 %v22800_v44 }
 0xce7   : > { %v17997_v24 = vpop.f32.mrb[32].mxu0 }
 0xce8   : > { %v13324_v36 = vadd.f32 %v17997_v24, %v15991_v58  ;;  %v13277_v48 = vpop.f32.mrb[33].mxu0  ;;  %v23474_v24 = vmax.f32 %v22171_v25, 0.0 }
 0xce9   : > { %v13322_v3 = vadd.f32 %v15991_v58, %v13277_v48  ;;  %v17998_v7 = vpop.f32.mrb[34].mxu0 }
 0xcea   : > { %v13332_v1 = vadd.f32 %v13324_v36, %v10544_v0  ;;  %v13325_v4 = vadd.f32 %v17998_v7, %v15991_v58  ;;  %v13280_v45 = vpop.f32.mrb[35].mxu0 }
 0xceb   : > { %v13330_v28 = vadd.f32 %v13322_v3, %v10542_v18  ;;  %v13323_v2 = vadd.f32 %v15991_v58, %v13280_v45  ;;  %v13498_v3 = vshrl.u32 %v13360_v46, 16  ;;  %v13501_v45 = vshll.u32 %v13360_v46, 16 }
 0xcec   : > { %v13333_v47 = vadd.f32 %v13325_v4, %v10545_v35  ;;  %v13340_v30 = vmax.f32 %v13332_v1, 0.0 }
 0xced   : > { %v13331_v54 = vadd.f32 %v13323_v2, %v10543_v8  ;;  %v13338_v63 = vmax.f32 %v13330_v28, 0.0 }
 0xcee   : > { %v13341_v38 = vmax.f32 %v13333_v47, 0.0  ;;  %v13500_v47 = vrot.slane %v13498_v3, 3 }
 0xcef   : > { %v13339_v32 = vmax.f32 %v13331_v54, 0.0  ;;  %v18001_v50 = vpop.f32.mrb[36].mxu0 }
 0xcf0   : > { %v13347_v9 = vpack.c.bf16 %v13341_v38, %v13340_v30  ;;  %v13328_v16 = vadd.f32 %v18001_v50, %v15991_v58  ;;  %v13293_v0 = vpop.f32.mrb[37].mxu0 }
 0xcf1   : > { %v13346_v14 = vpack.c.bf16 %v13339_v32, %v13338_v63  ;;  %v13326_v37 = vadd.f32 %v15991_v58, %v13293_v0  ;;  %v18002_v42 = vpop.f32.mrb[38].mxu0 }
 0xcf2   : > { %13351 = vst.msk [vmem:[#allocation2 + $0x10] sm:$0xff] %vm403_vm5, %v13347_v9  ;;  %v13336_v20 = vadd.f32 %v13328_v16, %v10548_v43  ;;  %v13329_v35 = vadd.f32 %v18002_v42, %v15991_v58  ;;  %v13296_v39 = vpop.f32.mrb[39].mxu0  ;;  %v13373_v43 = vld [vmem:[#allocation2] sm:$0xf0]  ;;  %v13503_v16 = vrot.slane %v13501_v45, 4 }
 0xcf3   : > { %13350 = vst.msk [vmem:[#allocation2 + $0x8] sm:$0xff] %vm403_vm5, %v13346_v14  ;;  %v13334_v18 = vadd.f32 %v13326_v37, %v10546_v56  ;;  %v13327_v8 = vadd.f32 %v15991_v58, %v13296_v39  ;;  %v13387_v56 = vrot.slane %v13373_v43, 4  ;;  %v19121_v14 = vld [vmem:[%s23127_s5 + $0x8] sm:$0xff]  }
 0xcf4   : > { %v13337_v26 = vadd.f32 %v13329_v35, %v23473_v55  ;;  %v13344_v48 = vmax.f32 %v13336_v20, 0.0 }
 0xcf5   : > { %v13335_v36 = vadd.f32 %v13327_v8, %v23474_v24  ;;  %v13342_v7 = vmax.f32 %v13334_v18, 0.0 }
 0xcf6   : > { %v13345_v60 = vmax.f32 %v13337_v26, 0.0 }
 0xcf7   : > { %v13343_v1 = vmax.f32 %v13335_v36, 0.0  ;;  %v19123_v36 = vld [vmem:[%s23127_s5 + $0x10] sm:$0xff]  }
 0xcf8   : > { %v13349_v4 = vpack.c.bf16 %v13345_v60, %v13344_v48  ;;  %v13504_v60 = vor.u32 %v13503_v16, %v13500_v47 }
 0xcf9   : > { %v13348_v53 = vpack.c.bf16 %v13343_v1, %v13342_v7  ;;  %v22827_v58 = vld [vmem:[#allocation2 + $0x10] sm:$0xff] }
 0xcfa   : > { %13353 = vst.msk [vmem:[#allocation2 + $0x20] sm:$0xff] %vm403_vm5, %v13349_v4  ;;  %v22830_v28 = vld [vmem:[#allocation2 + $0x8] sm:$0xff]  ;;  %v22833_v29 = vrot.slane %v22827_v58, 4  ;;  %v14551_v2 = vsel %vm2425_vm2, %v22827_v58, 0  ;;  %v13362_v46 = vsel %vm2090_vm1, %v22827_v58, 0 }
 0xcfb   : > { %v22835_v25 = vld [vmem:[#allocation2 + $0x8] sm:$0xf0]  ;;  %13352 = vst.msk [vmem:[#allocation2 + $0x18] sm:$0xff] %vm403_vm5, %v13348_v53  ;;  %v13388_v54 = vrot.slane %v22830_v28, 4  ;;  %v14572_v38 = vshrl.u32 %v14551_v2, 16  ;;  %v14575_v63 = vshll.u32 %v14551_v2, 16 }
 0xcfc   : > { %v14550_v30 = vsel %vm2424_vm14, %v22835_v25, 0  ;;  %v13361_v9 = vsel %vm2089_vm7, %v22830_v28, 0  ;;  %v13515_v4 = vshrl.u32 %v13362_v46, 16  ;;  %v13518_v45 = vshll.u32 %v13362_v46, 16 }
 0xcfd   : > { %v14564_v32 = vshrl.u32 %v14550_v30, 16  ;;  %v14567_v50 = vshll.u32 %v14550_v30, 16  ;;  %v13389_v0 = vsel %vm2120_vm8, %v13387_v56, %v13388_v54  ;;  %v13391_v57 = vsel %vm2120_vm8, %v13388_v54, %v22833_v29 }
 0xcfe   : > { %v14574_v37 = vrot.slane %v14572_v38, 4  ;;  %v14577_v42 = vrot.slane %v14575_v63, 5  ;;  %18011 = vmatprep.mubr.msk.bf16.mxu1 %vm403_vm5, %v13389_v0  ;;  %v13506_v39 = vshrl.u32 %v13361_v9, 16  ;;  %v13509_v18 = vshll.u32 %v13361_v9, 16 }
 0xcff   : > { %v14566_v20 = vrot.slane %v14564_v32, 4  ;;  %v14569_v35 = vrot.slane %v14567_v50, 5  ;;  %18012 = vmatmul.mubr.msk.bf16.vlgmr.msra.gmra.mrb[32].mxu1 %vm403_vm5, %v13391_v57  ;;  %v13643_v38 = vsel %vm2424_vm14, %v13373_v43, 0  ;;  %v19125_v50 = vld [vmem:[%s23127_s5 + $0x18] sm:$0xff]   ;;  %v13517_v43 = vrot.slane %v13515_v4, 3  ;;  %vm23477_vm14 = vmmov %vm23472_vm13 }
 0xd00   : > { %v14578_v8 = vor.u32 %v14577_v42, %v14574_v37  ;;  %18020 = vmatpush3.bf16.msra.mxu1 %v22786_v13  ;;  %v13508_v26 = vrot.slane %v13506_v39, 3  ;;  %v13511_v24 = vrot.slane %v13509_v18, 4  ;;  %v13520_v0 = vrot.slane %v13518_v45, 4  ;;  %v19126_v39 = vld [vmem:[%s23127_s5 + $0x40] sm:$0xff]  }
 0xd01   : > { %v14570_v55 = vor.u32 %v14569_v35, %v14566_v20  ;;  %18021 = vmatprep.subr.bf16.mxu1 %v19121_v14  ;;  %v13359_v48 = vld [vmem:[#allocation2 + $0x20] sm:$0xf]  ;;  %v13644_v35 = vsel %vm2425_vm2, %v22830_v28, 0  ;;  %v13657_v18 = vshrl.u32 %v13643_v38, 16  ;;  %v13660_v46 = vshll.u32 %v13643_v38, 16  ;;  %vm23478_vm2 = vmmov %vm23476_vm3  ;;  %v19128_v38 = vld [vmem:[%s23127_s5 + $0x50] sm:$0xff]  }
 0xd02   : > { %v22864_v7 = vld [vmem:[#allocation2 + $0x18] sm:$0xff]  ;;  %v13394_v1 = vrot.slane %v13359_v48, 4  ;;  %v13512_v53 = vor.u32 %v13511_v24, %v13508_v26  ;;  %v13364_v57 = vsel %vm2092_vm4, %v13359_v48, 0  ;;  %v13521_v26 = vor.u32 %v13520_v0, %v13517_v43  ;;  %v13642_v0 = vld [vmem:[#allocation2 + $0x20] sm:$0x1f] }
 0xd03   : > { %v14579_v3 = vsel %vm23475_vm15, %v14570_v55, %v14578_v8  ;;  %v22868_v13 = vrot.slane %v22864_v7, 4  ;;  %v14552_v56 = vsel %vm23476_vm3, %v22864_v7, 0  ;;  %v13363_v2 = vsel %vm2091_vm11, %v22864_v7, 0  ;;  %vm23480_vm15 = vmmov %vm23477_vm14 }
 0xd04   : > { %18139 = vmatprep.mubr.msk.bf16.mxu0 %vm403_vm5, %v14579_v3  ;;  %18022 = vmatpush3.bf16.msra.mxu1 %v19121_v14  ;;  %v14581_v47 = vshrl.u32 %v14552_v56, 16  ;;  %v14584_v54 = vshll.u32 %v14552_v56, 16  ;;  %v13524_v30 = vshrl.u32 %v13363_v2, 16  ;;  %v13527_v9 = vshll.u32 %v13363_v2, 16 }
 0xd05   : > { %v22881_v63 = vsel %vm2120_vm8, %v22833_v29, %v22868_v13  ;;  %18023 = vmatprep.subr.bf16.mxu1 %v19123_v36  ;;  %v13395_v32 = vsel %vm2120_vm8, %v22868_v13, %v13394_v1  ;;  %v13513_v14 = vsel %vm683_vm10, %v13504_v60, %v13512_v53  ;;  %v13533_v24 = vshrl.u32 %v13364_v57, 16 }
 0xd06   : > { %18015 = vmatprep.mubr.msk.bf16.mxu1 %vm403_vm5, %v22881_v63  ;;  %v14583_v16 = vrot.slane %v14581_v47, 4  ;;  %v14586_v49 = vrot.slane %v14584_v54, 5  ;;  %v13526_v37 = vrot.slane %v13524_v30, 3  ;;  %v13529_v42 = vrot.slane %v13527_v9, 4 }
 0xd07   : > { %18016 = vmatmul.mubr.msk.bf16.gmra.mrb[36].mxu1 %vm403_vm5, %v13395_v32  ;;  %v13665_v60 = vshrl.u32 %v13644_v35, 16  ;;  %v13668_v3 = vshll.u32 %v13644_v35, 16  ;;  %v13659_v1 = vrot.slane %v13657_v18, 4  ;;  %v13522_v4 = vsel %vm683_vm10, %v13512_v53, %v13521_v26 }
 0xd08   : > { %18024 = vmatpush3.bf16.msra.mxu1 %v19123_v36  ;;  %18027 = vmatprep.mubr.msk.bf16.mxu1 %vm403_vm5, %v13513_v14  ;;  %v22895_v20 = vor.u32 %v14586_v49, %v14583_v16  ;;  %v13536_v36 = vshll.u32 %v13364_v57, 16  ;;  %v13530_v48 = vor.u32 %v13529_v42, %v13526_v37  ;;  %v13535_v45 = vrot.slane %v13533_v24, 3  ;;  %v19129_v57 = vld [vmem:[%s23127_s5 + $0x58] sm:$0xff]   ;;  %v19130_v24 = vld [vmem:[%s23127_s5 + $0x60] sm:$0xff]  }
 0xd09   : > { %18025 = vmatprep.subr.bf16.mxu1 %v19125_v50  ;;  %v13667_v47 = vrot.slane %v13665_v60, 4  ;;  %v13670_v54 = vrot.slane %v13668_v3, 5  ;;  %v13645_v30 = vsel %vm23478_vm2, %v22827_v58, 0  ;;  %vm23479_vm13 = vcmp.ne.s16.totalorder %v19895_v59, 0  ;;  %vm23483_vm2 = vmmov %vm23480_vm15 }
 0xd0a   : > { %v14588_v55 = vsel %vm23477_vm14, %v14578_v8, %v22895_v20  ;;  %v13538_v56 = vrot.slane %v13536_v36, 4  ;;  %v13662_v8 = vrot.slane %v13660_v46, 5  ;;  %v13531_v2 = vsel %vm683_vm10, %v13521_v26, %v13530_v48 }
 0xd0b   : > { %18140 = vmatmul.mubr.msk.bf16.vlgmr.msra.gmra.mrb[40].mxu0 %vm403_vm5, %v14588_v55  ;;  %v13646_v53 = vsel %vm23479_vm13, %v22864_v7, 0  ;;  %v13677_v9 = vshll.u32 %v13645_v30, 16  ;;  %v13671_v49 = vor.u32 %v13670_v54, %v13667_v47  ;;  %vm23481_vm3 = vcmp.ne.s16.totalorder %v19878_v19, 0  ;;  %v13809_v55 = vld [vmem:[#allocation2] sm:$0x80]  ;;  %vm23484_vm13 = vmmov %vm23483_vm2 }
 0xd0c   : > { %18026 = vmatpush3.bf16.msra.mxu1 %v19125_v50  ;;  %v13539_v32 = vor.u32 %v13538_v56, %v13535_v45  ;;  %v13674_v50 = vshrl.u32 %v13645_v30, 16  ;;  %v13663_v16 = vor.u32 %v13662_v8, %v13659_v1  ;;  %v13683_v43 = vshrl.u32 %v13646_v53, 16 }
 0xd0d   : > { %18035 = vmatprep.subr.bf16.mxu1 %v19126_v39  ;;  %v13686_v10 = vshll.u32 %v13646_v53, 16  ;;  %v13679_v42 = vrot.slane %v13677_v9, 5  ;;  %v13647_v46 = vsel %vm23481_vm3, %v13642_v0, 0  ;;  %vm23482_vm14 = vcmp.ne.s16.totalorder %v23268_v31, 0  ;;  %v19131_v31 = vld [vmem:[%s23127_s5 + $0x68] sm:$0xff]  }
 0xd0e   : > { %v13540_v14 = vsel %vm683_vm10, %v13530_v48, %v13539_v32  ;;  %v13676_v37 = vrot.slane %v13674_v50, 4  ;;  %v13672_v35 = vsel %vm23480_vm15, %v13663_v16, %v13671_v49  ;;  %v13812_v26 = vsel %vm23482_vm14, %v22830_v28, 0  ;;  %v19132_v32 = vld [vmem:[%s23127_s5 + $0x70] sm:$0xff]  }
 0xd0f   : > { %18028 = vmatmul.mubr.msk.bf16.vlgmr.msra.gmra.mrb[32].mxu1 %vm403_vm5, %v13522_v4  ;;  %v13688_v18 = vrot.slane %v13686_v10, 5  ;;  %v13692_v48 = vshrl.u32 %v13647_v46, 16  ;;  %v13695_v60 = vshll.u32 %v13647_v46, 16  ;;  %v13829_v1 = vshrl.u32 %v13812_v26, 16  ;;  %v22942_v4 = vld [vmem:[#allocation2 + $0x20] sm:$0xff] }
 0xd10   : > { %18036 = vmatpush3.bf16.msra.mxu1 %v19126_v39  ;;  %18031 = vmatprep.mubr.msk.bf16.mxu1 %vm403_vm5, %v13531_v2  ;;  %v13685_v39 = vrot.slane %v13683_v43, 4  ;;  %v13680_v36 = vor.u32 %v13679_v42, %v13676_v37  ;;  %v13813_v54 = vsel %vm2610_vm12, %v22827_v58, 0  ;;  %v14431_v53 = vrot.slane %v22835_v25, 4  ;;  %vm23487_vm12 = vmmov %vm23483_vm2  ;;  %v19134_v46 = vld [vmem:[%s23127_s5 + $0x80] sm:$0xff]  }
 0xd11   : > { %18037 = vmatprep.subr.bf16.mxu1 %v19127_v40  ;;  %v13694_v56 = vrot.slane %v13692_v48, 4  ;;  %v13697_v8 = vrot.slane %v13695_v60, 5  ;;  %v13831_v15 = vrot.slane %v13829_v1, 7  ;;  %vm23486_vm15 = vcmp.ne.s16.totalorder %v19895_v59, 0  ;;  %v19133_v59 = vld [vmem:[%s23127_s5 + $0x78] sm:$0xff]   ;;  %v19135_v48 = vld [vmem:[%s23127_s5 + $0x88] sm:$0xff]  }
 0xd12   : > { %v13689_v3 = vor.u32 %v13688_v18, %v13685_v39  ;;  %v13681_v45 = vsel %vm23483_vm2, %v13671_v49, %v13680_v36  ;;  %v13832_v61 = vshll.u32 %v13812_v26, 16  ;;  %v13837_v49 = vshrl.u32 %v13813_v54, 16  ;;  %v19136_v1 = vld [vmem:[%s23127_s5 + $0x90] sm:$0xff]  }
 0xd13   : > { %v13698_v9 = vor.u32 %v13697_v8, %v13694_v56  ;;  %vm23488_vm3 = vsmask.f32 256  ;;  %vm23489_vm14 = vcmp.ne.s16.totalorder %v20321_v51, 0  ;;  %v13840_v18 = vshll.u32 %v13813_v54, 16 }
 0xd14   : > { %18038 = vmatpush3.bf16.msra.mxu1 %v19127_v40  ;;  %v13811_v40 = vsel %vm2608_vm0, %v13809_v55, 0  ;;  %v13690_v47 = vsel %vm23484_vm13, %v13680_v36, %v13689_v3  ;;  %vm23485_vm0 = vcmp.ne.s16.totalorder %v23271_v23, 0  ;;  %v22963_v23 = vsel %vm2120_vm8, %v14431_v53, %v22833_v29  ;;  %vm23490_vm13 = vmmov %vm23488_vm3 }
 0xd15   : > { %18039 = vmatprep.subr.bf16.mxu1 %v19128_v38  ;;  %v13825_v2 = vshrl.u32 %v13811_v40, 16  ;;  %v13814_v30 = vsel %vm23485_vm0, %v22864_v7, 0  ;;  %v13834_v43 = vor.u32 %v13832_v61, %v13831_v15  ;;  %v13839_v37 = vrot.slane %v13837_v49, 7  ;;  %vm23491_vm0 = vmmov %vm23488_vm3  ;;  %v14249_v61 = vld [vmem:[#allocation2 + $0x8] sm:$0xf8] }
 0xd16   : > { %v13845_v25 = vshrl.u32 %v13814_v30, 16  ;;  %v13848_v55 = vshll.u32 %v13814_v30, 16  ;;  %v14091_v8 = vsel %vm2904_vm6, %v22830_v28, 0  ;;  %vm23494_vm6 = vcmp.ne.s16.totalorder %v20152_v6, 0  ;;  %v19140_v30 = vld [vmem:[%s23127_s5 + $0xb0] sm:$0xff]  }
 0xd17   : > { %18032 = vmatmul.mubr.msk.bf16.gmra.mrb[36].mxu1 %vm403_vm5, %v13540_v14  ;;  %v13827_v16 = vrot.slane %v13825_v2, 7  ;;  %v13699_v14 = vsel %vm23487_vm12, %v13689_v3, %v13698_v9  ;;  %v19138_v2 = vld [vmem:[%s23127_s5 + $0xa0] sm:$0xff]   ;;  %vm23493_vm12 = vcmp.ne.s16.totalorder %v23282_v62, 0  ;;  %v14105_v53 = vshrl.u32 %v14091_v8, 16  ;;  %v19141_v9 = vld [vmem:[%s23127_s5 + $0xb8] sm:$0xff]  }
 0xd18   : > { %18040 = vmatpush3.bf16.msra.mxu1 %v19128_v38  ;;  %18043 = vmatprep.mubr.msk.bf16.mxu1 %vm403_vm5, %v13672_v35  ;;  %v14553_v38 = vsel %vm23486_vm15, %v22942_v4, 0  ;;  %v13847_v29 = vrot.slane %v13845_v25, 7  ;;  %v13815_v35 = vsel %vm23489_vm14, %v22942_v4, 0  ;;  %vm23492_vm15 = vmmov %vm23491_vm0  ;;  %v14092_v54 = vsel %vm23493_vm12, %v22827_v58, 0  ;;  %v14090_v25 = vld [vmem:[#allocation2 + $0x28] sm:$0x1] }
 0xd19   : > { %18041 = vmatprep.subr.bf16.mxu1 %v19129_v57  ;;  %v14590_v50 = vshrl.u32 %v14553_v38, 16  ;;  %v14593_v0 = vshll.u32 %v14553_v38, 16  ;;  %v13835_v42 = vsel %vm23488_vm3, %v13827_v16, %v13834_v43  ;;  %v13853_v51 = vshrl.u32 %v13815_v35, 16 }
 0xd1a   : > { %v13850_v36 = vor.u32 %v13848_v55, %v13847_v29  ;;  %v14112_v62 = vshll.u32 %v14092_v54, 16  ;;  %vm23495_vm3 = vcmp.ne.s16.totalorder %v20148_v21, 0  ;;  %vm23496_vm14 = vsmask.f32 7424  ;;  %v19142_v21 = vld [vmem:[%s23127_s5 + $0xc0] sm:$0xff]  }
 0xd1b   : > { %v14592_v10 = vrot.slane %v14590_v50, 4  ;;  %v13855_v3 = vrot.slane %v13853_v51, 7  ;;  %v14094_v6 = vsel %vm23495_vm3, %v22942_v4, 0  ;;  %v14251_v43 = vsel %vm2088_vm9, %v14249_v61, 0 }
 0xd1c   : > { %18042 = vmatpush3.bf16.msra.mxu1 %v19129_v57  ;;  %v14595_v57 = vrot.slane %v14593_v0, 5  ;;  %v13851_v40 = vsel %vm23491_vm0, %v13839_v37, %v13850_v36  ;;  %v14114_v50 = vrot.slane %v14112_v62, 1  ;;  %vm23497_vm9 = vcmp.ne.s16.totalorder %v20140_v12, 0 }
 0xd1d   : > { %18051 = vmatprep.subr.bf16.mxu1 %v19130_v24 }
 0xd1e   : > { %v22974_v39 = vor.u32 %v14595_v57, %v14592_v10  ;;  %v14252_v10 = vsel %vm2089_vm7, %v22827_v58, 0  ;;  %v14116_v57 = vshrl.u32 %v14092_v54, 16  ;;  %vm23498_vm7 = vmmov %vm23496_vm14 }
 0xd1f   : > { %18044 = vmatmul.mubr.msk.bf16.vlgmr.msra.gmra.mrb[32].mxu1 %vm403_vm5, %v13681_v45  ;;  %v19137_v45 = vld [vmem:[%s23127_s5 + $0x98] sm:$0xff]  }
 0xd20   : > { %18052 = vmatpush3.bf16.msra.mxu1 %v19130_v24  ;;  %18047 = vmatprep.mubr.msk.bf16.mxu1 %vm403_vm5, %v13690_v47  ;;  %v22983_v26 = vsel %vm23483_vm2, %v22895_v20, %v22974_v39  ;;  %v13842_v24 = vor.u32 %v13840_v18, %v13839_v37  ;;  %v13856_v20 = vshll.u32 %v13815_v35, 16  ;;  %v14107_v47 = vshll.u32 %v14091_v8, 16  ;;  %vm23499_vm2 = vmmov %vm23498_vm7 }
 0xd21   : > { %18053 = vmatprep.subr.bf16.mxu1 %v19131_v31  ;;  %v14268_v37 = vshll.u32 %v14251_v43, 16  ;;  %v14276_v35 = vshll.u32 %v14252_v10, 16  ;;  %v14118_v18 = vor.u32 %v14116_v57, %v14114_v50 }
 0xd22   : > { %v13843_v60 = vsel %vm23490_vm13, %v13831_v15, %v13842_v24  ;;  %v19139_v15 = vld [vmem:[%s23127_s5 + $0xa8] sm:$0xff]   ;;  %v14109_v52 = vrot.slane %v14107_v47, 1 }
 0xd23   : > { %v14270_v51 = vrot.slane %v14268_v37, 4  ;;  %v14250_v47 = vld [vmem:[#allocation2 + $0x28] sm:$0xf] }
 0xd24   : > { %18054 = vmatpush3.bf16.msra.mxu1 %v19131_v31  ;;  %v13858_v31 = vor.u32 %v13856_v20, %v13855_v3  ;;  %v14110_v38 = vor.u32 %v14109_v52, %v14105_v53  ;;  %v14132_v3 = vshrl.u32 %v14094_v6, 16  ;;  %v19144_v20 = vld [vmem:[%s23127_s5 + $0xd0] sm:$0xff]   ;;  %v14255_v62 = vsel %vm2092_vm4, %v14250_v47, 0 }
 0xd25   : > { %18055 = vmatprep.subr.bf16.mxu1 %v19132_v32  ;;  %v14300_v61 = vshrl.u32 %v14255_v62, 16 }
 0xd26   : > { %v13859_v56 = vsel %vm23492_vm15, %v13847_v29, %v13858_v31  ;;  %v14115_v16 = vsel %vm23496_vm14, %v14110_v38, %v14114_v50  ;;  %v14273_v29 = vshrl.u32 %v14252_v10, 16  ;;  %v19146_v38 = vld [vmem:[%s23127_s5 + $0xe0] sm:$0xff]   ;;  %v14303_v50 = vshll.u32 %v14255_v62, 16 }
 0xd27   : > { %18048 = vmatmul.mubr.msk.bf16.gmra.mrb[36].mxu1 %vm403_vm5, %v13699_v14  ;;  %v14265_v14 = vshrl.u32 %v14251_v43, 16 }
 0xd28   : > { %18056 = vmatpush3.bf16.msra.mxu1 %v19132_v32  ;;  %18059 = vmatprep.mubr.msk.bf16.mxu1 %vm403_vm5, %v13835_v42  ;;  %v14095_v42 = vsel %vm23497_vm9, %v14090_v25, 0  ;;  %v14275_v36 = vrot.slane %v14273_v29, 3  ;;  %v19148_v25 = vld [vmem:[%s23127_s5 + $0xf0] sm:$0xff]  }
 0xd29   : > { %18057 = vmatprep.subr.bf16.mxu1 %v19133_v59  ;;  %v14136_v55 = vshll.u32 %v14095_v42, 16  ;;  %v14267_v24 = vrot.slane %v14265_v14, 3  ;;  %v14549_v14 = vld [vmem:[#allocation2 + $0x28] sm:$0x1f] }
 0xd2b   : > { %v14138_v31 = vrot.slane %v14136_v55, 1  ;;  %v14271_v8 = vor.u32 %v14270_v51, %v14267_v24 }
 0xd2c   : > { %18058 = vmatpush3.bf16.msra.mxu1 %v19133_v59  ;;  %v14128_v59 = vshll.u32 %v14094_v6, 16  ;;  %v19147_v6 = vld [vmem:[%s23127_s5 + $0xe8] sm:$0xff]  }
 0xd2d   : > { %18067 = vmatprep.subr.bf16.mxu1 %v19134_v46 }
 0xd2e   : > { %v14130_v11 = vrot.slane %v14128_v59, 1  ;;  %v14436_v59 = vrot.slane %v22942_v4, 4 }
 0xd2f   : > { %18060 = vmatmul.mubr.msk.bf16.vlgmr.msra.gmra.mrb[32].mxu1 %vm403_vm5, %v13843_v60  ;;  %v14253_v60 = vsel %vm2090_vm1, %v22864_v7, 0  ;;  %vm23500_vm1 = vmmov %vm23499_vm2 }
 0xd30   : > { %18068 = vmatpush3.bf16.msra.mxu1 %v19134_v46  ;;  %18063 = vmatprep.mubr.msk.bf16.mxu1 %vm403_vm5, %v13851_v40  ;;  %v14254_v40 = vsel %vm2091_vm11, %v22942_v4, 0  ;;  %v14437_v57 = vsel %vm2120_vm8, %v22868_v13, %v14436_v59  ;;  %vm23502_vm11 = vsmask.f32 3328 }
 0xd31   : > { %18069 = vmatprep.subr.bf16.mxu1 %v19135_v48 }
 0xd34   : > { %18070 = vmatpush3.bf16.msra.mxu1 %v19135_v48  ;;  %v14278_v48 = vrot.slane %v14276_v35, 4 }
 0xd35   : > { %18071 = vmatprep.subr.bf16.mxu1 %v19136_v1 }
 0xd36   : > { %v14279_v27 = vor.u32 %v14278_v48, %v14275_v36 }
 0xd37   : > { %18064 = vmatmul.mubr.msk.bf16.gmra.mrb[36].mxu1 %vm403_vm5, %v13859_v56  ;;  %v14285_v56 = vshll.u32 %v14253_v60, 16 }
 0xd38   : > { %18072 = vmatpush3.bf16.msra.mxu1 %v19136_v1  ;;  %18075 = vmatprep.mubr.msk.bf16.mxu1 %vm403_vm5, %v22830_v28  ;;  %v14093_v28 = vsel %vm23494_vm6, %v22864_v7, 0  ;;  %v14134_v1 = vor.u32 %v14132_v3, %v14130_v11 }
 0xd39   : > { %18073 = vmatprep.subr.bf16.mxu1 %v19137_v45  ;;  %v14120_v32 = vshll.u32 %v14093_v28, 16  ;;  %v14124_v0 = vshrl.u32 %v14093_v28, 16  ;;  %v14287_v52 = vrot.slane %v14285_v56, 4  ;;  %v14280_v28 = vsel %vm683_vm10, %v14271_v8, %v14279_v27 }
 0xd3b   : > { %v14122_v49 = vrot.slane %v14120_v32, 1 }
 0xd3c   : > { %18074 = vmatpush3.bf16.msra.mxu1 %v19137_v45  ;;  %v14282_v45 = vshrl.u32 %v14253_v60, 16 }
 0xd3d   : > { %18083 = vmatprep.subr.bf16.mxu1 %v19138_v2  ;;  %v14126_v22 = vor.u32 %v14124_v0, %v14122_v49  ;;  %v14123_v46 = vsel %vm23498_vm7, %v14118_v18, %v14122_v49  ;;  %v14305_v49 = vrot.slane %v14303_v50, 4 }
 0xd3e   : > { %v14284_v54 = vrot.slane %v14282_v45, 3 }
 0xd3f   : > { %18076 = vmatmul.mubr.msk.bf16.vlgmr.msra.gmra.mrb[32].mxu1 %vm403_vm5, %v22827_v58  ;;  %v19143_v58 = vld [vmem:[%s23127_s5 + $0xc8] sm:$0xff]   ;;  %v14131_v12 = vsel %vm23499_vm2, %v14126_v22, %v14130_v11 }
 0xd40   : > { %18084 = vmatpush3.bf16.msra.mxu1 %v19138_v2  ;;  %18079 = vmatprep.mubr.msk.bf16.mxu1 %vm403_vm5, %v22864_v7  ;;  %v14291_v7 = vshrl.u32 %v14254_v40, 16  ;;  %v14294_v2 = vshll.u32 %v14254_v40, 16  ;;  %v14288_v32 = vor.u32 %v14287_v52, %v14284_v54 }
 0xd41   : > { %18085 = vmatprep.subr.bf16.mxu1 %v19139_v15 }
 0xd42   : > { %v14296_v53 = vrot.slane %v14294_v2, 4  ;;  %v14289_v41 = vsel %vm683_vm10, %v14279_v27, %v14288_v32 }
 0xd44   : > { %18086 = vmatpush3.bf16.msra.mxu1 %v19139_v15  ;;  %v14139_v15 = vsel %vm23500_vm1, %v14134_v1, %v14138_v31 }
 0xd45   : > { %18087 = vmatprep.subr.bf16.mxu1 %v19140_v30 }
 0xd47   : > { %18080 = vmatmul.mubr.msk.bf16.gmra.mrb[36].mxu1 %vm403_vm5, %v22942_v4 }
 0xd48   : > { %18088 = vmatpush3.bf16.msra.mxu1 %v19140_v30  ;;  %18091 = vmatprep.mubr.msk.bf16.mxu1 %vm403_vm5, %v14115_v16  ;;  %v14293_v30 = vrot.slane %v14291_v7, 3  ;;  %v14302_v16 = vrot.slane %v14300_v61, 3 }
 0xd49   : > { %18089 = vmatprep.subr.bf16.mxu1 %v19141_v9 }
 0xd4a   : > { %v14306_v10 = vor.u32 %v14305_v49, %v14302_v16 }
 0xd4c   : > { %18090 = vmatpush3.bf16.msra.mxu1 %v19141_v9  ;;  %v14297_v9 = vor.u32 %v14296_v53, %v14293_v30 }
 0xd4d   : > { %18099 = vmatprep.subr.bf16.mxu1 %v19142_v21 }
 0xd4e   : > { %v14298_v43 = vsel %vm683_vm10, %v14288_v32, %v14297_v9  ;;  %v14307_v0 = vsel %vm683_vm10, %v14297_v9, %v14306_v10  ;;  %vm23501_vm10 = vcmp.ne.s16.totalorder %v19878_v19, 0 }
 0xd4f   : > { %18092 = vmatmul.mubr.msk.bf16.vlgmr.msra.gmra.mrb[32].mxu1 %vm403_vm5, %v14123_v46  ;;  %v14554_v4 = vsel %vm23501_vm10, %v14549_v14, 0 }
 0xd50   : > { %18100 = vmatpush3.bf16.msra.mxu1 %v19142_v21  ;;  %18095 = vmatprep.mubr.msk.bf16.mxu1 %vm403_vm5, %v14131_v12  ;;  %v19149_v21 = vld [vmem:[%s23127_s5 + $0xf8] sm:$0xff]   ;;  %v14599_v37 = vshrl.u32 %v14554_v4, 16  ;;  %v14602_v13 = vshll.u32 %v14554_v4, 16 }
 0xd51   : > { %18101 = vmatprep.subr.bf16.mxu1 %v19143_v58 }
 0xd52   : > { %v14601_v19 = vrot.slane %v14599_v37, 4 }
 0xd54   : > { %18102 = vmatpush3.bf16.msra.mxu1 %v19143_v58 }
 0xd55   : > { %18103 = vmatprep.subr.bf16.mxu1 %v19144_v20 }
 0xd57   : > { %18096 = vmatmul.mubr.msk.bf16.gmra.mrb[36].mxu1 %vm403_vm5, %v14139_v15 }
 0xd58   : > { %18104 = vmatpush3.bf16.msra.mxu1 %v19144_v20  ;;  %18107 = vmatprep.mubr.msk.bf16.mxu1 %vm403_vm5, %v14280_v28 }
 0xd59   : > { %18105 = vmatprep.subr.bf16.mxu1 %v19145_v17 }
 0xd5c   : > { %18106 = vmatpush3.bf16.msra.mxu1 %v19145_v17 }
 0xd5d   : > { %18115 = vmatprep.subr.bf16.mxu1 %v19146_v38 }
 0xd5f   : > { %18108 = vmatmul.mubr.msk.bf16.vlgmr.msra.gmra.mrb[32].mxu1 %vm403_vm5, %v14289_v41 }
 0xd60   : > { %18116 = vmatpush3.bf16.msra.mxu1 %v19146_v38  ;;  %18111 = vmatprep.mubr.msk.bf16.mxu1 %vm403_vm5, %v14298_v43 }
 0xd61   : > { %18117 = vmatprep.subr.bf16.mxu1 %v19147_v6 }
 0xd64   : > { %18118 = vmatpush3.bf16.msra.mxu1 %v19147_v6 }
 0xd65   : > { %18119 = vmatprep.subr.bf16.mxu1 %v19148_v25 }
 0xd67   : > { %18112 = vmatmul.mubr.msk.bf16.gmra.mrb[36].mxu1 %vm403_vm5, %v14307_v0 }
 0xd68   : > { %18120 = vmatpush3.bf16.msra.mxu1 %v19148_v25  ;;  %18123 = vmatprep.mubr.msk.bf16.mxu1 %vm403_vm5, %v22963_v23  ;;  %v14438_v23 = vrot.slane %v14250_v47, 4 }
 0xd69   : > { %18121 = vmatprep.subr.bf16.mxu1 %v19149_v21 }
 0xd6c   : > { %18122 = vmatpush3.bf16.msra.mxu1 %v19149_v21 }
 0xd6d   : > { %18147 = vmatprep.subr.bf16.mxu1 %v22770_v33 }
 0xd6f   : > { %18124 = vmatmul.mubr.msk.bf16.vlgmr.msra.gmra.mrb[32].mxu1 %vm403_vm5, %v22881_v63  ;;  %v14439_v63 = vsel %vm2120_vm8, %v14436_v59, %v14438_v23 }
 0xd70   : > { %18151 = vmatpush3.bf16.msra.mxu1 %v22770_v33  ;;  %18127 = vmatprep.mubr.msk.bf16.mxu1 %vm403_vm5, %v14437_v57  ;;  %v14604_v33 = vrot.slane %v14602_v13, 5 }
 0xd71   : > { %18148 = vmatprep.subr.bf16.mxu1 %v22780_v34 }
 0xd74   : > { %18152 = vmatpush3.bf16.msra.mxu1 %v22780_v34  ;;  %v14605_v34 = vor.u32 %v14604_v33, %v14601_v19 }
 0xd75   : > { %18149 = vmatprep.subr.bf16.mxu1 %v22792_v5 }
 0xd76   : > { %v14606_v22 = vsel %vm23502_vm11, %v22974_v39, %v14605_v34 }
 0xd77   : > { %18128 = vmatmul.mubr.msk.bf16.gmra.mrb[36].mxu1 %vm403_vm5, %v14439_v63 }
 0xd78   : > { %18143 = vmatprep.mubr.msk.bf16.mxu1 %vm403_vm5, %v22983_v26  ;;  %18153 = vmatpush3.bf16.msra.mxu1 %v22792_v5  ;;  %v16064_v5 = vld [vmem:[%s23128_s6] ss:$0 sm:$0xff] }
 0xd79   : > { %18150 = vmatprep.subr.bf16.mxu1 %v22800_v44 }
 0xd7c   : > { %18154 = vmatpush3.bf16.msra.mxu1 %v22800_v44 }
 0xd83   : > { %18144 = vmatmul.mubr.msk.bf16.vlgmr.msra.gmra.mrb[36].mxu1 %vm403_vm5, %v14606_v22 }
 0xdde   : > { %v18141_v42 = vpop.f32.mrb[40].mxu0 }
 0xddf   : > { %v14677_v29 = vpop.f32.mrb[41].mxu0 }
 0xde0   : > { %v18142_v35 = vpop.f32.mrb[42].mxu0 }
 0xde1   : > { %v14680_v18 = vpop.f32.mrb[43].mxu0 }
 0xe42   : > { %v18125_v26 = vpop.f32.mrb[32].mxu1 }
 0xe43   : > { %v18155_v11 = vadd.f32 %v18141_v42, %v18125_v26  ;;  %v14510_v58 = vpop.f32.mrb[33].mxu1 }
 0xe44   : > { %v18156_v44 = vadd.f32 %v14677_v29, %v14510_v58  ;;  %v18126_v39 = vpop.f32.mrb[34].mxu1 }
 0xe45   : > { %v14724_v46 = vadd.f32 %v18155_v11, %v16064_v5  ;;  %v18157_v55 = vadd.f32 %v18142_v35, %v18126_v39  ;;  %v14513_v24 = vpop.f32.mrb[35].mxu1 }
 0xe46   : > { %v14722_v51 = vadd.f32 %v18156_v44, %v16064_v5  ;;  %v18158_v12 = vadd.f32 %v14680_v18, %v14513_v24 }
 0xe47   : > { %14732 = vst [vmem:[%s278_s26 + $0x10] sm:$0xff] %v14724_v46  ;;  %v14725_v36 = vadd.f32 %v18157_v55, %v16064_v5 }
 0xe48   : > { %14730 = vst [vmem:[%s278_s26] sm:$0xff] %v14722_v51  ;;  %v14723_v48 = vadd.f32 %v18158_v12, %v16064_v5 }
 0xe49   : > { %14733 = vst [vmem:[%s278_s26 + $0x18] sm:$0xff] %v14725_v36 }
 0xe4a   : > { %14731 = vst [vmem:[%s278_s26 + $0x8] sm:$0xff] %v14723_v48 }
 0xe56   : > { %v18145_v60 = vpop.f32.mrb[36].mxu1 }
 0xe57   : > { %v14728_v3 = vadd.f32 %v18145_v60, %v16064_v5  ;;  %v14693_v40 = vpop.f32.mrb[37].mxu1 }
 0xe58   : > { %v14726_v20 = vadd.f32 %v16064_v5, %v14693_v40  ;;  %v18146_v1 = vpop.f32.mrb[38].mxu1 }
 0xe59   : > { %14736 = vst [vmem:[%s278_s26 + $0x30] sm:$0xff] %v14728_v3  ;;  %v14729_v31 = vadd.f32 %v18146_v1, %v16064_v5  ;;  %v14696_v45 = vpop.f32.mrb[39].mxu1 }
 0xe5a   : > { %14734 = vst [vmem:[%s278_s26 + $0x20] sm:$0xff] %v14726_v20  ;;  %v14727_v56 = vadd.f32 %v16064_v5, %v14696_v45 }
 0xe5b   : > { %14737 = vst [vmem:[%s278_s26 + $0x38] sm:$0xff] %v14729_v31 }
 0xe5c   : > { %14735 = vst [vmem:[%s278_s26 + $0x28] sm:$0xff] %v14727_v56 }
 0xe5d PF: > { %s17_s24 = sadd.s32 1, %s19161_s24  }
 0xe5e   : > { %p14_p4 = scmp.ge.s32.totalorder %s17_s24, 4  }
 0xe60   :  { %16 = sbr.rel (!%p14_p4) target bundleno = 1 (0x1), region = 92 }

</bundles_post_ra>
